<compile_context>
chip_gen: v7x
topology: tpu7x:2x2x1
jax: 0.10.0
libtpu: 0.0.40
codegen_flags: <defaults>
</compile_context>

<pallas_src>
import functools

import jax
import jax.numpy as jnp
from jax import lax
from jax.experimental import pallas as pl
from jax.experimental.pallas import tpu as pltpu


# ----------------------------------------------------------------------------
# Fused EUCB Pallas kernel
# ----------------------------------------------------------------------------
def _eucb_kernel(H, W, t, x_ref, w3_ref, sh_ref, w1_ref, b1_ref, o_ref):
    """One grid step = (batch n, input-row tile i of height t).

    x_ref : (1, t+2, W+2, Cin)  bf16  haloed, edge-padded input row tile
    w3_ref: (9*Cin, Cout)       bf16  3x3 weights, tap-major K, BN scale folded
    sh_ref: (1, Cout)           f32   BN shift (conv bias folded in)
    w1_ref: (Cout, Cout)        bf16  1x1 conv weights (in, out)
    b1_ref: (1, Cout)           f32   1x1 conv bias
    o_ref : (t, 2, W, 2*Cout)   bf16  output rows [2*i*t, 2*i*t + 2t)
    """
    Cin = x_ref.shape[-1]
    Cout = w1_ref.shape[0]
    s = pl.program_id(1) * t                      # first input row of this tile

    xw = x_ref[0]                                 # (t+2, W+2, Cin) bf16

    # ---- bilinear row-upsample, separated by output-row parity --------------
    #   E[q] -> upsampled row 2*(s+q),   O[q] -> upsampled row 2*(s+q) - 1
    x0 = xw[0:t + 1]
    x1 = xw[1:t + 2]
    E = x0 * 0.25 + x1 * 0.75                     # (t+1, W+2, Cin) bf16
    O = x0 * 0.75 + x1 * 0.25

    # Conv zero-padding happens on the *upsampled* grid: rows -1 and 2H are 0.
    q = lax.broadcasted_iota(jnp.int32, (t + 1, 1, 1), 0)
    O = jnp.where((s > 0) | (q > 0), O, jnp.zeros_like(O))       # row -1
    E = jnp.where((s + t < H) | (q < t), E, jnp.zeros_like(E))   # row 2H

    # ---- bilinear column-upsample, separated by output-col parity -----------
    zcol = jnp.zeros((t + 1, 1, Cin), E.dtype)

    def col_variants(R):
        ce = R[:, 0:W] * 0.25 + R[:, 1:W + 1] * 0.75      # even cols 2v
        co = R[:, 1:W + 1] * 0.75 + R[:, 2:W + 2] * 0.25  # odd  cols 2v+1
        co_r = jnp.concatenate([zcol, co[:, 0:W - 1]], axis=1)   # odd  col 2v-1
        ce_l = jnp.concatenate([ce[:, 1:W], zcol], axis=1)       # even col 2v+2
        return {"e": ce, "o": co, "oR": co_r, "eL": ce_l}

    cols = {"E": col_variants(E), "O": col_variants(O)}

    # (row-phase pr, row-tap du) -> (row source, row offset)
    row_tab = {(0, -1): ("O", 0), (0, 0): ("E", 0), (0, 1): ("O", 1),
               (1, -1): ("E", 0), (1, 0): ("O", 1), (1, 1): ("E", 1)}
    # (col-phase pc, col-tap dv) -> column variant
    col_tab = {(0, -1): "oR", (0, 0): "e", (0, 1): "o",
               (1, -1): "e",  (1, 0): "o", (1, 1): "eL"}

    def tap(pr, pc, du, dv):
        src, roff = row_tab[(pr, du)]
        return cols[src][col_tab[(pc, dv)]][roff:roff + t]       # (t, W, Cin)

    # ---- im2col: 9 taps packed into K (tap-major, channel-minor); the four
    #      output phases batched along M -> ONE (4tW, 9Cin) x (9Cin, Cout) dot.
    phases = []
    for pr in (0, 1):
        for pc in (0, 1):
            taps = [tap(pr, pc, du, dv)
                    for du in (-1, 0, 1) for dv in (-1, 0, 1)]
            phases.append(jnp.concatenate(taps, axis=-1))        # (t, W, 9*Cin)
    m = jnp.stack(phases, axis=0).reshape(4 * t * W, 9 * Cin)    # bf16

    acc = jnp.dot(m, w3_ref[...], preferred_element_type=jnp.float32)

    # ---- BN shift (scale already folded into w3) + ReLU + 1x1 conv ----------
    y = jnp.maximum(acc + sh_ref[...], 0.0)
    z = jnp.dot(y.astype(jnp.bfloat16), w1_ref[...],
                preferred_element_type=jnp.float32) + b1_ref[...]

    # ---- two lane-dense stores (row parities), no stack/reshape interleave --
    z = z.reshape(2, 2, t, W, Cout)               # (pr, pc, t, W, Cout)
    o_ref[:, 0] = jnp.concatenate([z[0, 0], z[0, 1]], axis=-1).astype(o_ref.dtype)
    o_ref[:, 1] = jnp.concatenate([z[1, 0], z[1, 1]], axis=-1).astype(o_ref.dtype)


# ----------------------------------------------------------------------------
# Wrapper
# ----------------------------------------------------------------------------
def _vmem_limit_bytes():
    try:
        cap = int(pltpu.get_tpu_info().vmem_capacity_bytes)
    except Exception:
        cap = 64 * 1024 * 1024                    # conservative (v7x-sized)
    # >=16 MiB headroom (matters on v7x's 64 MiB), allow more on v5e/v6e.
    return max(min(cap - 16 * 1024 * 1024, 96 * 1024 * 1024), 16 * 1024 * 1024)


def _pick_row_tile(H, W, Cin, Cout, vmem_limit):
    """Largest divisor of H whose per-step working set fits well in VMEM."""
    best = 1
    for t in range(1, H + 1):
        if H % t:
            continue
        mrows = 4 * t * W
        est = (2 * (t + 2) * (W + 2) * Cin * 2    # double-buffered input tile
               + 2 * mrows * 9 * Cin * 2          # im2col tile (+ build slack)
               + 3 * mrows * Cout * 4             # f32 matmul acc / relu / 1x1
               + 2 * 2 * t * W * 2 * Cout * 2)    # double-buffered bf16 output
        if mrows <= 8192 and est <= vmem_limit // 3:
            best = t
    return best


def eucb_forward_nhwc(x, params):
    """x: (N, H, W, Cin) f32 -> (N, 2H, 2W, Cout) bf16."""
    N, H, W, Cin = x.shape
    w3 = params["w3"]
    Cout = w3.shape[-1]

    vmem_limit = _vmem_limit_bytes()
    t = _pick_row_tile(H, W, Cin, Cout, vmem_limit)
    G = H // t

    # Edge pad once (align_corners=False clamp), then present the input as
    # pre-haloed row tiles so per-step input VMEM is O(t*W*Cin).
    xp = jnp.pad(x, ((0, 0), (1, 1), (1, 1), (0, 0)),
                 mode="edge").astype(jnp.bfloat16)
    if G == 1:
        xt = xp                                                  # (N, H+2, W+2, Cin)
    else:
        ridx = jnp.arange(G)[:, None] * t + jnp.arange(t + 2)[None, :]
        xt = xp[:, ridx].reshape(N * G, t + 2, W + 2, Cin)

    # Fold BN scale into the 3x3 weights (one-time host-side transform).
    scale = params["bn_scale"].astype(jnp.float32)
    w3f = (w3.astype(jnp.float32) * scale).reshape(9 * Cin, Cout)
    w3f = w3f.astype(jnp.bfloat16)
    shift = params["bn_bias"].reshape(1, Cout).astype(jnp.float32)
    w1 = params["w1"].astype(jnp.bfloat16)
    b1 = params["b1"].reshape(1, Cout).astype(jnp.float32)

    flops = int(2 * N * 4 * H * W * Cout * (9 * Cin + Cout))
    bytes_accessed = int(xt.size * 2 + w3f.size * 2 + w1.size * 2
                         + (shift.size + b1.size) * 4
                         + N * 4 * H * W * Cout * 2)

    out = pl.pallas_call(
        functools.partial(_eucb_kernel, H, W, t),
        grid=(N, G),
        in_specs=[
            pl.BlockSpec((1, t + 2, W + 2, Cin),
                         lambda n, i: (n * G + i, 0, 0, 0)),
            pl.BlockSpec((9 * Cin, Cout), lambda n, i: (0, 0)),
            pl.BlockSpec((1, Cout), lambda n, i: (0, 0)),
            pl.BlockSpec((Cout, Cout), lambda n, i: (0, 0)),
            pl.BlockSpec((1, Cout), lambda n, i: (0, 0)),
        ],
        out_specs=pl.BlockSpec((t, 2, W, 2 * Cout),
                               lambda n, i: (n * G + i, 0, 0, 0)),
        out_shape=jax.ShapeDtypeStruct((N * H, 2, W, 2 * Cout), jnp.bfloat16),
        compiler_params=pltpu.CompilerParams(
            dimension_semantics=("parallel", "parallel"),
            vmem_limit_bytes=vmem_limit),
        cost_estimate=pl.CostEstimate(flops=flops, transcendentals=0,
                                      bytes_accessed=bytes_accessed),
    )(xt, w3f, shift, w1, b1)

    # (N*H, 2, W, 2*Cout) -> (N, 2H, 2W, Cout) is a free row-major reshape.
    return out.reshape(N, 2 * H, 2 * W, Cout)


def eucb_forward(x_nchw, params):
    """Public NCHW interface matching the PyTorch module."""
    x = jnp.transpose(x_nchw, (0, 2, 3, 1)).astype(jnp.float32)
    y = eucb_forward_nhwc(x, params)
    return jnp.transpose(y, (0, 3, 1, 2)).astype(jnp.float32)


# ----------------------------------------------------------------------------
# Plain-JAX reference (for a loose numerical self-check)
# ----------------------------------------------------------------------------
def _bilinear_up2x_ref(x):
    N, H, W, C = x.shape

    def coords(n_in, n_out):
        o = jnp.arange(n_out, dtype=jnp.float32)
        src = jnp.clip((o + 0.5) / 2.0 - 0.5, 0.0, n_in - 1.0)
        lo = jnp.floor(src).astype(jnp.int32)
        hi = jnp.minimum(lo + 1, n_in - 1)
        fr = src - lo.astype(jnp.float32)
        return lo, hi, fr

    rlo, rhi, rf = coords(H, 2 * H)
    clo, chi, cf = coords(W, 2 * W)
    xr = (x[:, rlo] * (1.0 - rf)[None, :, None, None]
          + x[:, rhi] * rf[None, :, None, None])
    xc = (xr[:, :, clo] * (1.0 - cf)[None, None, :, None]
          + xr[:, :, chi] * cf[None, None, :, None])
    return xc


def eucb_reference(x_nchw, params):
    x = jnp.transpose(x_nchw, (0, 2, 3, 1)).astype(jnp.float32)
    u = _bilinear_up2x_ref(x)
    y = lax.conv_general_dilated(u, params["w3"].astype(jnp.float32),
                                 (1, 1), "SAME",
                                 dimension_numbers=("NHWC", "HWIO", "NHWC"))
    y = jnp.maximum(y * params["bn_scale"] + params["bn_bias"], 0.0)
    z = jnp.einsum("nhwc,cd->nhwd", y,
                   params["w1"].astype(jnp.float32)) + params["b1"]
    return jnp.transpose(z, (0, 3, 1, 2))


# ----------------------------------------------------------------------------
# Deterministic parameter construction
# ----------------------------------------------------------------------------
class PGen:
    def __init__(self, seed=0):
        self._key = jax.random.PRNGKey(seed)

    def _next(self):
        self._key, sub = jax.random.split(self._key)
        return sub

    def normal(self, shape, scale=0.1):
        return scale * jax.random.normal(self._next(), shape, jnp.float32)

    def uniform(self, shape, lo, hi):
        return jax.random.uniform(self._next(), shape, jnp.float32, lo, hi)


def make_bn(pg, C, conv_bias=None, eps=1e-5):
    gamma = pg.uniform((C,), 0.8, 1.2)
    beta = pg.normal((C,), 0.05)
    mean = pg.normal((C,), 0.05)
    var = pg.uniform((C,), 0.5, 1.5)
    scale = gamma / jnp.sqrt(var + eps)
    shift = beta - mean * scale
    if conv_bias is not None:
        shift = shift + conv_bias * scale
    return scale, shift


def make_eucb_params(pg, cin, cout):
    p = {"w3": pg.normal((3, 3, cin, cout))}      # HWIO
    b3 = pg.normal((cout,), 0.05)
    p["bn_scale"], p["bn_bias"] = make_bn(pg, cout, conv_bias=b3)
    p["w1"] = pg.normal((cout, cout))             # (in, out)
    p["b1"] = pg.normal((cout,), 0.05)
    return p


# ----------------------------------------------------------------------------
if __name__ == "__main__":
    C_IN, C_OUT = 32, 64
    N, H, W = 2, 16, 16

    pg = PGen(0)
    params = make_eucb_params(pg, C_IN, C_OUT)

    x = jax.random.normal(jax.random.PRNGKey(0), (N, C_IN, H, W), jnp.float32)

    out = jax.block_until_ready(jax.jit(eucb_forward)(x, params))
    assert out.shape == (N, C_OUT, 2 * H, 2 * W), out.shape
    assert bool(jnp.all(jnp.isfinite(out)))

    # loose check vs. a plain-JAX f32 reference (kernel runs bf16 on the MXU)
    ref = eucb_reference(x, params)
    err = float(jnp.max(jnp.abs(out - ref)))
    mag = float(jnp.max(jnp.abs(ref)))
    assert err <= 5e-2 * mag + 5e-2, (err, mag)

    print("KERNEL_OK")
</pallas_src>

<mosaic_0001>
module attributes {stable_mosaic.version = 11 : i64} {
  func.func @_eucb_kernel(%arg0: i32, %arg1: i32, %arg2: memref<1x18x18x32xbf16, #tpu.memory_space<vmem>>, %arg3: memref<288x64xbf16, #tpu.memory_space<vmem>>, %arg4: memref<1x64xf32, #tpu.memory_space<vmem>>, %arg5: memref<64x64xbf16, #tpu.memory_space<vmem>>, %arg6: memref<1x64xf32, #tpu.memory_space<vmem>>, %arg7: memref<16x2x16x128xbf16, #tpu.memory_space<vmem>>) attributes {dimension_semantics = [#tpu.dimension_semantics<parallel>, #tpu.dimension_semantics<parallel>], iteration_bounds = array<i64: 2, 1>, scalar_prefetch = 0 : i64, scratch_operands = 0 : i64, tpu.core_type = #tpu.core_type<tc>, window_params = [{transform_indices = @transform_0, window_bounds = array<i64: 1, 18, 18, 32>}, {pipeline_mode = #tpu.pipeline_mode<synchronous>, transform_indices = @transform_1, window_bounds = array<i64: 288, 64>}, {pipeline_mode = #tpu.pipeline_mode<synchronous>, transform_indices = @transform_2, window_bounds = array<i64: 1, 64>}, {pipeline_mode = #tpu.pipeline_mode<synchronous>, transform_indices = @transform_3, window_bounds = array<i64: 64, 64>}, {pipeline_mode = #tpu.pipeline_mode<synchronous>, transform_indices = @transform_4, window_bounds = array<i64: 1, 64>}, {transform_indices = @transform_5, window_bounds = array<i64: 16, 2, 16, 128>}]} {
    %c16_i32 = arith.constant 16 : i32
    %0 = arith.muli %arg1, %c16_i32 : i32
    %c0 = arith.constant 0 : index
    %c0_0 = arith.constant 0 : index
    %c0_1 = arith.constant 0 : index
    %c0_2 = arith.constant 0 : index
    %1 = vector.load %arg2[%c0, %c0_0, %c0_1, %c0_2] : memref<1x18x18x32xbf16, #tpu.memory_space<vmem>>, vector<1x18x18x32xbf16>
    %2 = vector.shape_cast %1 : vector<1x18x18x32xbf16> to vector<18x18x32xbf16>
    %3 = vector.extract_strided_slice %2 {offsets = [0, 0, 0], sizes = [17, 18, 32], strides = [1, 1, 1]} : vector<18x18x32xbf16> to vector<17x18x32xbf16>
    %4 = vector.extract_strided_slice %2 {offsets = [1, 0, 0], sizes = [17, 18, 32], strides = [1, 1, 1]} : vector<18x18x32xbf16> to vector<17x18x32xbf16>
    %cst = arith.constant 2.500000e-01 : bf16
    %5 = vector.broadcast %cst : bf16 to vector<17x18x32xbf16>
    %6 = arith.mulf %3, %5 : vector<17x18x32xbf16>
    %cst_3 = arith.constant 7.500000e-01 : bf16
    %7 = vector.broadcast %cst_3 : bf16 to vector<17x18x32xbf16>
    %8 = arith.mulf %4, %7 : vector<17x18x32xbf16>
    %9 = arith.addf %6, %8 : vector<17x18x32xbf16>
    %cst_4 = arith.constant 7.500000e-01 : bf16
    %10 = vector.broadcast %cst_4 : bf16 to vector<17x18x32xbf16>
    %11 = arith.mulf %3, %10 : vector<17x18x32xbf16>
    %cst_5 = arith.constant 2.500000e-01 : bf16
    %12 = vector.broadcast %cst_5 : bf16 to vector<17x18x32xbf16>
    %13 = arith.mulf %4, %12 : vector<17x18x32xbf16>
    %14 = arith.addf %11, %13 : vector<17x18x32xbf16>
    %15 = tpu.iota {dimensions = array<i32: 0>} : vector<17x1x1xi32>
    %c0_i32 = arith.constant 0 : i32
    %16 = arith.cmpi sgt, %0, %c0_i32 : i32
    %c0_i32_6 = arith.constant 0 : i32
    %17 = vector.broadcast %c0_i32_6 : i32 to vector<17x1x1xi32>
    %18 = arith.cmpi sgt, %15, %17 : vector<17x1x1xi32>
    %19 = vector.broadcast %16 : i1 to vector<17x1x1xi1>
    %20 = arith.ori %19, %18 : vector<17x1x1xi1>
    %cst_7 = arith.constant 0.000000e+00 : bf16
    %21 = vector.broadcast %cst_7 : bf16 to vector<17x18x32xbf16>
    %22 = vector.shape_cast %20 : vector<17x1x1xi1> to vector<17x1x1xi1>
    %23 = vector.broadcast %22 : vector<17x1x1xi1> to vector<17x18x32xi1>
    %24 = arith.select %23, %14, %21 : vector<17x18x32xi1>, vector<17x18x32xbf16>
    %c16_i32_8 = arith.constant 16 : i32
    %25 = arith.addi %0, %c16_i32_8 : i32
    %c16_i32_9 = arith.constant 16 : i32
    %26 = arith.cmpi slt, %25, %c16_i32_9 : i32
    %c16_i32_10 = arith.constant 16 : i32
    %27 = vector.broadcast %c16_i32_10 : i32 to vector<17x1x1xi32>
    %28 = arith.cmpi slt, %15, %27 : vector<17x1x1xi32>
    %29 = vector.broadcast %26 : i1 to vector<17x1x1xi1>
    %30 = arith.ori %29, %28 : vector<17x1x1xi1>
    %cst_11 = arith.constant 0.000000e+00 : bf16
    %31 = vector.broadcast %cst_11 : bf16 to vector<17x18x32xbf16>
    %32 = vector.shape_cast %30 : vector<17x1x1xi1> to vector<17x1x1xi1>
    %33 = vector.broadcast %32 : vector<17x1x1xi1> to vector<17x18x32xi1>
    %34 = arith.select %33, %9, %31 : vector<17x18x32xi1>, vector<17x18x32xbf16>
    %cst_12 = arith.constant 0.000000e+00 : bf16
    %35 = vector.broadcast %cst_12 : bf16 to vector<17x1x32xbf16>
    %36 = vector.extract_strided_slice %34 {offsets = [0, 0, 0], sizes = [17, 16, 32], strides = [1, 1, 1]} : vector<17x18x32xbf16> to vector<17x16x32xbf16>
    %cst_13 = arith.constant 2.500000e-01 : bf16
    %37 = vector.broadcast %cst_13 : bf16 to vector<17x16x32xbf16>
    %38 = arith.mulf %36, %37 : vector<17x16x32xbf16>
    %39 = vector.extract_strided_slice %34 {offsets = [0, 1, 0], sizes = [17, 16, 32], strides = [1, 1, 1]} : vector<17x18x32xbf16> to vector<17x16x32xbf16>
    %cst_14 = arith.constant 7.500000e-01 : bf16
    %40 = vector.broadcast %cst_14 : bf16 to vector<17x16x32xbf16>
    %41 = arith.mulf %39, %40 : vector<17x16x32xbf16>
    %42 = arith.addf %38, %41 : vector<17x16x32xbf16>
    %43 = vector.extract_strided_slice %34 {offsets = [0, 1, 0], sizes = [17, 16, 32], strides = [1, 1, 1]} : vector<17x18x32xbf16> to vector<17x16x32xbf16>
    %cst_15 = arith.constant 7.500000e-01 : bf16
    %44 = vector.broadcast %cst_15 : bf16 to vector<17x16x32xbf16>
    %45 = arith.mulf %43, %44 : vector<17x16x32xbf16>
    %46 = vector.extract_strided_slice %34 {offsets = [0, 2, 0], sizes = [17, 16, 32], strides = [1, 1, 1]} : vector<17x18x32xbf16> to vector<17x16x32xbf16>
    %cst_16 = arith.constant 2.500000e-01 : bf16
    %47 = vector.broadcast %cst_16 : bf16 to vector<17x16x32xbf16>
    %48 = arith.mulf %46, %47 : vector<17x16x32xbf16>
    %49 = arith.addf %45, %48 : vector<17x16x32xbf16>
    %50 = vector.extract_strided_slice %49 {offsets = [0, 0, 0], sizes = [17, 15, 32], strides = [1, 1, 1]} : vector<17x16x32xbf16> to vector<17x15x32xbf16>
    %51 = tpu.concatenate %35, %50 in 1 : vector<17x1x32xbf16>, vector<17x15x32xbf16> -> vector<17x16x32xbf16>
    %52 = vector.extract_strided_slice %42 {offsets = [0, 1, 0], sizes = [17, 15, 32], strides = [1, 1, 1]} : vector<17x16x32xbf16> to vector<17x15x32xbf16>
    %53 = tpu.concatenate %52, %35 in 1 : vector<17x15x32xbf16>, vector<17x1x32xbf16> -> vector<17x16x32xbf16>
    %54 = vector.extract_strided_slice %24 {offsets = [0, 0, 0], sizes = [17, 16, 32], strides = [1, 1, 1]} : vector<17x18x32xbf16> to vector<17x16x32xbf16>
    %cst_17 = arith.constant 2.500000e-01 : bf16
    %55 = vector.broadcast %cst_17 : bf16 to vector<17x16x32xbf16>
    %56 = arith.mulf %54, %55 : vector<17x16x32xbf16>
    %57 = vector.extract_strided_slice %24 {offsets = [0, 1, 0], sizes = [17, 16, 32], strides = [1, 1, 1]} : vector<17x18x32xbf16> to vector<17x16x32xbf16>
    %cst_18 = arith.constant 7.500000e-01 : bf16
    %58 = vector.broadcast %cst_18 : bf16 to vector<17x16x32xbf16>
    %59 = arith.mulf %57, %58 : vector<17x16x32xbf16>
    %60 = arith.addf %56, %59 : vector<17x16x32xbf16>
    %61 = vector.extract_strided_slice %24 {offsets = [0, 1, 0], sizes = [17, 16, 32], strides = [1, 1, 1]} : vector<17x18x32xbf16> to vector<17x16x32xbf16>
    %cst_19 = arith.constant 7.500000e-01 : bf16
    %62 = vector.broadcast %cst_19 : bf16 to vector<17x16x32xbf16>
    %63 = arith.mulf %61, %62 : vector<17x16x32xbf16>
    %64 = vector.extract_strided_slice %24 {offsets = [0, 2, 0], sizes = [17, 16, 32], strides = [1, 1, 1]} : vector<17x18x32xbf16> to vector<17x16x32xbf16>
    %cst_20 = arith.constant 2.500000e-01 : bf16
    %65 = vector.broadcast %cst_20 : bf16 to vector<17x16x32xbf16>
    %66 = arith.mulf %64, %65 : vector<17x16x32xbf16>
    %67 = arith.addf %63, %66 : vector<17x16x32xbf16>
    %68 = vector.extract_strided_slice %67 {offsets = [0, 0, 0], sizes = [17, 15, 32], strides = [1, 1, 1]} : vector<17x16x32xbf16> to vector<17x15x32xbf16>
    %69 = tpu.concatenate %35, %68 in 1 : vector<17x1x32xbf16>, vector<17x15x32xbf16> -> vector<17x16x32xbf16>
    %70 = vector.extract_strided_slice %60 {offsets = [0, 1, 0], sizes = [17, 15, 32], strides = [1, 1, 1]} : vector<17x16x32xbf16> to vector<17x15x32xbf16>
    %71 = tpu.concatenate %70, %35 in 1 : vector<17x15x32xbf16>, vector<17x1x32xbf16> -> vector<17x16x32xbf16>
    %72 = vector.extract_strided_slice %69 {offsets = [0, 0, 0], sizes = [16, 16, 32], strides = [1, 1, 1]} : vector<17x16x32xbf16> to vector<16x16x32xbf16>
    %73 = vector.extract_strided_slice %60 {offsets = [0, 0, 0], sizes = [16, 16, 32], strides = [1, 1, 1]} : vector<17x16x32xbf16> to vector<16x16x32xbf16>
    %74 = vector.extract_strided_slice %67 {offsets = [0, 0, 0], sizes = [16, 16, 32], strides = [1, 1, 1]} : vector<17x16x32xbf16> to vector<16x16x32xbf16>
    %75 = vector.extract_strided_slice %51 {offsets = [0, 0, 0], sizes = [16, 16, 32], strides = [1, 1, 1]} : vector<17x16x32xbf16> to vector<16x16x32xbf16>
    %76 = vector.extract_strided_slice %42 {offsets = [0, 0, 0], sizes = [16, 16, 32], strides = [1, 1, 1]} : vector<17x16x32xbf16> to vector<16x16x32xbf16>
    %77 = vector.extract_strided_slice %49 {offsets = [0, 0, 0], sizes = [16, 16, 32], strides = [1, 1, 1]} : vector<17x16x32xbf16> to vector<16x16x32xbf16>
    %78 = vector.extract_strided_slice %69 {offsets = [1, 0, 0], sizes = [16, 16, 32], strides = [1, 1, 1]} : vector<17x16x32xbf16> to vector<16x16x32xbf16>
    %79 = vector.extract_strided_slice %60 {offsets = [1, 0, 0], sizes = [16, 16, 32], strides = [1, 1, 1]} : vector<17x16x32xbf16> to vector<16x16x32xbf16>
    %80 = vector.extract_strided_slice %67 {offsets = [1, 0, 0], sizes = [16, 16, 32], strides = [1, 1, 1]} : vector<17x16x32xbf16> to vector<16x16x32xbf16>
    %81 = tpu.concatenate %72, %73, %74, %75, %76, %77, %78, %79, %80 in 2 : vector<16x16x32xbf16>, vector<16x16x32xbf16>, vector<16x16x32xbf16>, vector<16x16x32xbf16>, vector<16x16x32xbf16>, vector<16x16x32xbf16>, vector<16x16x32xbf16>, vector<16x16x32xbf16>, vector<16x16x32xbf16> -> vector<16x16x288xbf16>
    %82 = vector.extract_strided_slice %60 {offsets = [0, 0, 0], sizes = [16, 16, 32], strides = [1, 1, 1]} : vector<17x16x32xbf16> to vector<16x16x32xbf16>
    %83 = vector.extract_strided_slice %67 {offsets = [0, 0, 0], sizes = [16, 16, 32], strides = [1, 1, 1]} : vector<17x16x32xbf16> to vector<16x16x32xbf16>
    %84 = vector.extract_strided_slice %71 {offsets = [0, 0, 0], sizes = [16, 16, 32], strides = [1, 1, 1]} : vector<17x16x32xbf16> to vector<16x16x32xbf16>
    %85 = vector.extract_strided_slice %42 {offsets = [0, 0, 0], sizes = [16, 16, 32], strides = [1, 1, 1]} : vector<17x16x32xbf16> to vector<16x16x32xbf16>
    %86 = vector.extract_strided_slice %49 {offsets = [0, 0, 0], sizes = [16, 16, 32], strides = [1, 1, 1]} : vector<17x16x32xbf16> to vector<16x16x32xbf16>
    %87 = vector.extract_strided_slice %53 {offsets = [0, 0, 0], sizes = [16, 16, 32], strides = [1, 1, 1]} : vector<17x16x32xbf16> to vector<16x16x32xbf16>
    %88 = vector.extract_strided_slice %60 {offsets = [1, 0, 0], sizes = [16, 16, 32], strides = [1, 1, 1]} : vector<17x16x32xbf16> to vector<16x16x32xbf16>
    %89 = vector.extract_strided_slice %67 {offsets = [1, 0, 0], sizes = [16, 16, 32], strides = [1, 1, 1]} : vector<17x16x32xbf16> to vector<16x16x32xbf16>
    %90 = vector.extract_strided_slice %71 {offsets = [1, 0, 0], sizes = [16, 16, 32], strides = [1, 1, 1]} : vector<17x16x32xbf16> to vector<16x16x32xbf16>
    %91 = tpu.concatenate %82, %83, %84, %85, %86, %87, %88, %89, %90 in 2 : vector<16x16x32xbf16>, vector<16x16x32xbf16>, vector<16x16x32xbf16>, vector<16x16x32xbf16>, vector<16x16x32xbf16>, vector<16x16x32xbf16>, vector<16x16x32xbf16>, vector<16x16x32xbf16>, vector<16x16x32xbf16> -> vector<16x16x288xbf16>
    %92 = vector.extract_strided_slice %51 {offsets = [0, 0, 0], sizes = [16, 16, 32], strides = [1, 1, 1]} : vector<17x16x32xbf16> to vector<16x16x32xbf16>
    %93 = vector.extract_strided_slice %42 {offsets = [0, 0, 0], sizes = [16, 16, 32], strides = [1, 1, 1]} : vector<17x16x32xbf16> to vector<16x16x32xbf16>
    %94 = vector.extract_strided_slice %49 {offsets = [0, 0, 0], sizes = [16, 16, 32], strides = [1, 1, 1]} : vector<17x16x32xbf16> to vector<16x16x32xbf16>
    %95 = vector.extract_strided_slice %69 {offsets = [1, 0, 0], sizes = [16, 16, 32], strides = [1, 1, 1]} : vector<17x16x32xbf16> to vector<16x16x32xbf16>
    %96 = vector.extract_strided_slice %60 {offsets = [1, 0, 0], sizes = [16, 16, 32], strides = [1, 1, 1]} : vector<17x16x32xbf16> to vector<16x16x32xbf16>
    %97 = vector.extract_strided_slice %67 {offsets = [1, 0, 0], sizes = [16, 16, 32], strides = [1, 1, 1]} : vector<17x16x32xbf16> to vector<16x16x32xbf16>
    %98 = vector.extract_strided_slice %51 {offsets = [1, 0, 0], sizes = [16, 16, 32], strides = [1, 1, 1]} : vector<17x16x32xbf16> to vector<16x16x32xbf16>
    %99 = vector.extract_strided_slice %42 {offsets = [1, 0, 0], sizes = [16, 16, 32], strides = [1, 1, 1]} : vector<17x16x32xbf16> to vector<16x16x32xbf16>
    %100 = vector.extract_strided_slice %49 {offsets = [1, 0, 0], sizes = [16, 16, 32], strides = [1, 1, 1]} : vector<17x16x32xbf16> to vector<16x16x32xbf16>
    %101 = tpu.concatenate %92, %93, %94, %95, %96, %97, %98, %99, %100 in 2 : vector<16x16x32xbf16>, vector<16x16x32xbf16>, vector<16x16x32xbf16>, vector<16x16x32xbf16>, vector<16x16x32xbf16>, vector<16x16x32xbf16>, vector<16x16x32xbf16>, vector<16x16x32xbf16>, vector<16x16x32xbf16> -> vector<16x16x288xbf16>
    %102 = vector.extract_strided_slice %42 {offsets = [0, 0, 0], sizes = [16, 16, 32], strides = [1, 1, 1]} : vector<17x16x32xbf16> to vector<16x16x32xbf16>
    %103 = vector.extract_strided_slice %49 {offsets = [0, 0, 0], sizes = [16, 16, 32], strides = [1, 1, 1]} : vector<17x16x32xbf16> to vector<16x16x32xbf16>
    %104 = vector.extract_strided_slice %53 {offsets = [0, 0, 0], sizes = [16, 16, 32], strides = [1, 1, 1]} : vector<17x16x32xbf16> to vector<16x16x32xbf16>
    %105 = vector.extract_strided_slice %60 {offsets = [1, 0, 0], sizes = [16, 16, 32], strides = [1, 1, 1]} : vector<17x16x32xbf16> to vector<16x16x32xbf16>
    %106 = vector.extract_strided_slice %67 {offsets = [1, 0, 0], sizes = [16, 16, 32], strides = [1, 1, 1]} : vector<17x16x32xbf16> to vector<16x16x32xbf16>
    %107 = vector.extract_strided_slice %71 {offsets = [1, 0, 0], sizes = [16, 16, 32], strides = [1, 1, 1]} : vector<17x16x32xbf16> to vector<16x16x32xbf16>
    %108 = vector.extract_strided_slice %42 {offsets = [1, 0, 0], sizes = [16, 16, 32], strides = [1, 1, 1]} : vector<17x16x32xbf16> to vector<16x16x32xbf16>
    %109 = vector.extract_strided_slice %49 {offsets = [1, 0, 0], sizes = [16, 16, 32], strides = [1, 1, 1]} : vector<17x16x32xbf16> to vector<16x16x32xbf16>
    %110 = vector.extract_strided_slice %53 {offsets = [1, 0, 0], sizes = [16, 16, 32], strides = [1, 1, 1]} : vector<17x16x32xbf16> to vector<16x16x32xbf16>
    %111 = tpu.concatenate %102, %103, %104, %105, %106, %107, %108, %109, %110 in 2 : vector<16x16x32xbf16>, vector<16x16x32xbf16>, vector<16x16x32xbf16>, vector<16x16x32xbf16>, vector<16x16x32xbf16>, vector<16x16x32xbf16>, vector<16x16x32xbf16>, vector<16x16x32xbf16>, vector<16x16x32xbf16> -> vector<16x16x288xbf16>
    %112 = vector.shape_cast %81 : vector<16x16x288xbf16> to vector<1x16x16x288xbf16>
    %113 = vector.shape_cast %91 : vector<16x16x288xbf16> to vector<1x16x16x288xbf16>
    %114 = vector.shape_cast %101 : vector<16x16x288xbf16> to vector<1x16x16x288xbf16>
    %115 = vector.shape_cast %111 : vector<16x16x288xbf16> to vector<1x16x16x288xbf16>
    %116 = tpu.concatenate %112, %113, %114, %115 in 0 : vector<1x16x16x288xbf16>, vector<1x16x16x288xbf16>, vector<1x16x16x288xbf16>, vector<1x16x16x288xbf16> -> vector<4x16x16x288xbf16>
    %117 = vector.shape_cast %116 : vector<4x16x16x288xbf16> to vector<1024x288xbf16>
    %c0_21 = arith.constant 0 : index
    %c0_22 = arith.constant 0 : index
    %118 = vector.load %arg3[%c0_21, %c0_22] : memref<288x64xbf16, #tpu.memory_space<vmem>>, vector<288x64xbf16>
    %cst_23 = arith.constant dense<0.000000e+00> : vector<1024x64xf32>
    %119 = tpu.matmul %117, %118, %cst_23 {dimension_numbers = #tpu.dot_dimension_numbers<[1], [0], [0], [1], [0, 0, 1, 1], [], []>} : vector<1024x288xbf16>, vector<288x64xbf16>, vector<1024x64xf32> -> vector<1024x64xf32>
    %c0_24 = arith.constant 0 : index
    %c0_25 = arith.constant 0 : index
    %120 = vector.load %arg4[%c0_24, %c0_25] : memref<1x64xf32, #tpu.memory_space<vmem>>, vector<1x64xf32>
    %121 = vector.broadcast %120 : vector<1x64xf32> to vector<1024x64xf32>
    %122 = arith.addf %119, %121 : vector<1024x64xf32>
    %cst_26 = arith.constant 0.000000e+00 : f32
    %123 = vector.broadcast %cst_26 : f32 to vector<1024x64xf32>
    %124 = arith.maximumf %122, %123 : vector<1024x64xf32>
    %125 = arith.truncf %124 : vector<1024x64xf32> to vector<1024x64xbf16>
    %c0_27 = arith.constant 0 : index
    %c0_28 = arith.constant 0 : index
    %126 = vector.load %arg5[%c0_27, %c0_28] : memref<64x64xbf16, #tpu.memory_space<vmem>>, vector<64x64xbf16>
    %cst_29 = arith.constant dense<0.000000e+00> : vector<1024x64xf32>
    %127 = tpu.matmul %125, %126, %cst_29 {dimension_numbers = #tpu.dot_dimension_numbers<[1], [0], [0], [1], [0, 0, 1, 1], [], []>} : vector<1024x64xbf16>, vector<64x64xbf16>, vector<1024x64xf32> -> vector<1024x64xf32>
    %c0_30 = arith.constant 0 : index
    %c0_31 = arith.constant 0 : index
    %128 = vector.load %arg6[%c0_30, %c0_31] : memref<1x64xf32, #tpu.memory_space<vmem>>, vector<1x64xf32>
    %129 = vector.broadcast %128 : vector<1x64xf32> to vector<1024x64xf32>
    %130 = arith.addf %127, %129 : vector<1024x64xf32>
    %131 = vector.shape_cast %130 : vector<1024x64xf32> to vector<2x2x16x16x64xf32>
    %132 = vector.extract_strided_slice %131 {offsets = [0, 0, 0, 0, 0], sizes = [1, 1, 16, 16, 64], strides = [1, 1, 1, 1, 1]} : vector<2x2x16x16x64xf32> to vector<1x1x16x16x64xf32>
    %133 = vector.shape_cast %132 : vector<1x1x16x16x64xf32> to vector<16x16x64xf32>
    %134 = vector.extract_strided_slice %131 {offsets = [0, 1, 0, 0, 0], sizes = [1, 1, 16, 16, 64], strides = [1, 1, 1, 1, 1]} : vector<2x2x16x16x64xf32> to vector<1x1x16x16x64xf32>
    %135 = vector.shape_cast %134 : vector<1x1x16x16x64xf32> to vector<16x16x64xf32>
    %136 = tpu.concatenate %133, %135 in 2 : vector<16x16x64xf32>, vector<16x16x64xf32> -> vector<16x16x128xf32>
    %137 = arith.truncf %136 : vector<16x16x128xf32> to vector<16x16x128xbf16>
    %c0_32 = arith.constant 0 : index
    %c0_33 = arith.constant 0 : index
    %c0_34 = arith.constant 0 : index
    %c0_35 = arith.constant 0 : index
    %138 = vector.load %arg7[%c0_32, %c0_33, %c0_34, %c0_35] : memref<16x2x16x128xbf16, #tpu.memory_space<vmem>>, vector<16x1x16x128xbf16>
    %139 = vector.shape_cast %138 : vector<16x1x16x128xbf16> to vector<16x16x128xbf16>
    %140 = vector.shape_cast %137 : vector<16x16x128xbf16> to vector<16x1x16x128xbf16>
    tpu.vector_store %arg7[%c0_32, %c0_33, %c0_34, %c0_35], %140 {strides = array<i32>} : memref<16x2x16x128xbf16, #tpu.memory_space<vmem>>, vector<16x1x16x128xbf16>,
    %141 = vector.extract_strided_slice %131 {offsets = [1, 0, 0, 0, 0], sizes = [1, 1, 16, 16, 64], strides = [1, 1, 1, 1, 1]} : vector<2x2x16x16x64xf32> to vector<1x1x16x16x64xf32>
    %142 = vector.shape_cast %141 : vector<1x1x16x16x64xf32> to vector<16x16x64xf32>
    %143 = vector.extract_strided_slice %131 {offsets = [1, 1, 0, 0, 0], sizes = [1, 1, 16, 16, 64], strides = [1, 1, 1, 1, 1]} : vector<2x2x16x16x64xf32> to vector<1x1x16x16x64xf32>
    %144 = vector.shape_cast %143 : vector<1x1x16x16x64xf32> to vector<16x16x64xf32>
    %145 = tpu.concatenate %142, %144 in 2 : vector<16x16x64xf32>, vector<16x16x64xf32> -> vector<16x16x128xf32>
    %146 = arith.truncf %145 : vector<16x16x128xf32> to vector<16x16x128xbf16>
    %c0_36 = arith.constant 0 : index
    %c1 = arith.constant 1 : index
    %c0_37 = arith.constant 0 : index
    %c0_38 = arith.constant 0 : index
    %147 = vector.load %arg7[%c0_36, %c1, %c0_37, %c0_38] : memref<16x2x16x128xbf16, #tpu.memory_space<vmem>>, vector<16x1x16x128xbf16>
    %148 = vector.shape_cast %147 : vector<16x1x16x128xbf16> to vector<16x16x128xbf16>
    %149 = vector.shape_cast %146 : vector<16x16x128xbf16> to vector<16x1x16x128xbf16>
    tpu.vector_store %arg7[%c0_36, %c1, %c0_37, %c0_38], %149 {strides = array<i32>} : memref<16x2x16x128xbf16, #tpu.memory_space<vmem>>, vector<16x1x16x128xbf16>,
    return
  }
  func.func @transform_0(%arg0: i32, %arg1: i32) -> (i32, i32, i32, i32) {
    %c1_i32 = arith.constant 1 : i32
    %0 = arith.muli %arg0, %c1_i32 : i32
    %1 = arith.addi %0, %arg1 : i32
    %c0_i32 = arith.constant 0 : i32
    %c0_i32_0 = arith.constant 0 : i32
    %c0_i32_1 = arith.constant 0 : i32
    %c0_i32_2 = arith.constant 0 : i32
    return %1, %c0_i32, %c0_i32_0, %c0_i32_1 : i32, i32, i32, i32
  }
  func.func @transform_1(%arg0: i32, %arg1: i32) -> (i32, i32) {
    %c0_i32 = arith.constant 0 : i32
    %c0_i32_0 = arith.constant 0 : i32
    %c0_i32_1 = arith.constant 0 : i32
    return %c0_i32, %c0_i32_0 : i32, i32
  }
  func.func @transform_2(%arg0: i32, %arg1: i32) -> (i32, i32) {
    %c0_i32 = arith.constant 0 : i32
    %c0_i32_0 = arith.constant 0 : i32
    %c0_i32_1 = arith.constant 0 : i32
    return %c0_i32, %c0_i32_0 : i32, i32
  }
  func.func @transform_3(%arg0: i32, %arg1: i32) -> (i32, i32) {
    %c0_i32 = arith.constant 0 : i32
    %c0_i32_0 = arith.constant 0 : i32
    %c0_i32_1 = arith.constant 0 : i32
    return %c0_i32, %c0_i32_0 : i32, i32
  }
  func.func @transform_4(%arg0: i32, %arg1: i32) -> (i32, i32) {
    %c0_i32 = arith.constant 0 : i32
    %c0_i32_0 = arith.constant 0 : i32
    %c0_i32_1 = arith.constant 0 : i32
    return %c0_i32, %c0_i32_0 : i32, i32
  }
  func.func @transform_5(%arg0: i32, %arg1: i32) -> (i32, i32, i32, i32) {
    %c1_i32 = arith.constant 1 : i32
    %0 = arith.muli %arg0, %c1_i32 : i32
    %1 = arith.addi %0, %arg1 : i32
    %c0_i32 = arith.constant 0 : i32
    %c0_i32_0 = arith.constant 0 : i32
    %c0_i32_1 = arith.constant 0 : i32
    %c0_i32_2 = arith.constant 0 : i32
    return %1, %c0_i32, %c0_i32_0, %c0_i32_1 : i32, i32, i32, i32
  }
}

</mosaic_0001>

<bundles_post_ra>
// kernel: eucb_forward.1
= control target key start
LH: loop header
LB: loop body
LE: loop exit
PB: predicated region body
PF: predicated region fallthrough
CT: control target
= control target key end

     0   :  { %s10171_s18 = smov 0   ;;  %s10173_s19 = smov 0   ;;  %s15549_s0 = inlined_call_operand.vmem [shape: bf16[2,18,18,32], index: 0, kind: input, shape index: {}]   ;;  %s15550_s1 = inlined_call_operand.vmem [shape: bf16[288,64], index: 1, kind: input, shape index: {}]   ;;  %s15551_s2 = inlined_call_operand.vmem [shape: f32[1,64], index: 2, kind: input, shape index: {}]   ;;  %s15552_s3 = inlined_call_operand.vmem [shape: bf16[64,64], index: 3, kind: input, shape index: {}]   ;;  %s15553_s4 = inlined_call_operand.vmem [shape: f32[1,64], index: 4, kind: input, shape index: {}]   ;;  %s15554_s5 = inlined_call_operand.vmem [shape: bf16[32,2,16,128], index: 5, kind: output, shape index: {}]  }
   0x1   :  { %s10175_s20 = smov 0  }
   0x2 LB: > { %s27_s21 = sadd.s32 1, %s10129_s19  ;;  %p8845_p0 = scmp.ge.s32.totalorder %s10133_s20, 1  ;;  %s10133_s20 = sphi %s10175_s20, %s15_s20   ;;  %s10129_s19 = sphi %s10173_s19, %s16942_s19   ;;  %s10125_s18 = sphi %s10171_s18, %s16941_s18  }
   0x3   : > { %p29_p1 = scmp.ge.s32.totalorder %s27_s21, 2  ;;  %p205_p2 = scmp.lt.s32.totalorder %s10133_s20, 3 }
   0x5   : > { %s16944_s21 = smov (%p29_p1, %s27_s21), 0  ;;  %p206_p3 = pnand %p8845_p0, %p205_p2 }
   0x7   : > { %209 = sbr.rel (%p206_p3) target bundleno = 1686 (0x696), region = 40 }
   0xe   : > { %v10135_v0 = vmov 1048592000   ;;  %v10136_v2 = vmov 1061175104   ;;  %vm720_vm0 = vsmask.f32 3328 }
   0xf   : > { %v667_v1 = vmul.bf16 0, %v10135_v0  ;;  %v717_v3 = vmul.bf16 0, %v10136_v2  ;;  %vm721_vm1 = vsmask.f32 7440  ;;  %p237_p4 = scmp.lt.s32.totalorder %s10125_s18, 1  ;;  %s10137_s27 = smov 32  }
  0x10   : > { %vm10193_vm2 = vmor %vm720_vm0, %vm721_vm1  ;;  %vm2138_vm3 = vsmask.f32 7424  ;;  %s10138_s28 = smov 64   ;;  %vm1896_vm4 = vcmask 1040384   ;;  %s10139_s29 = smov 96   ;;  %vm4389_vm7 = vcmask 261120  }
  0x11   : > { %v1108_v4 = vshrl.u32 %v717_v3, 16  ;;  %v1111_v5 = vshll.u32 %v717_v3, 16  ;;  %v1665_v6 = vshrl.u32 %v667_v1, 16  ;;  %v1668_v7 = vshll.u32 %v667_v1, 16  ;;  %s238_s22 = scalar_select %p237_p4, %s10125_s18, 1 }
  0x12   : > { %vm1897_vm5 = vsmask.f32 256  ;;  %vm4438_vm8 = vcmask 523264   ;;  %vm4471_vm9 = vcmask 785408   ;;  %vm2137_vm10 = vcmask 1047552   ;;  %s8847_s30 = sshll.u32 %s10125_s18, 4 }
  0x13   : > { %v1110_v8 = vrot.slane %v1108_v4, 4  ;;  %v1113_v9 = vrot.slane %v1111_v5, 5  ;;  %v1667_v10 = vrot.slane %v1665_v6, 4  ;;  %v1670_v11 = vrot.slane %v1668_v7, 5  ;;  %s9894_s23 = smul.u32 216, %s238_s22  ;;  %vm10384_vm6 = vmand %vm1896_vm4, %vm1897_vm5  ;;  %p245_p5 = scmp.lt.s32.totalorder %s8847_s30, 31 }
  0x14   : > { %v1793_v13 = vadd.bf16 %v1665_v6, %v717_v3  ;;  %vm12824_vm11 = vmand %vm2137_vm10, %vm2138_vm3 }
  0x15   : > { %v1114_v14 = vor.u32 %v1113_v9, %v1110_v8  ;;  %v1671_v15 = vor.u32 %v1670_v11, %v1667_v10  ;;  %s10200_s26 = scalar_lea.vmem %s15549_s0, %s9894_s23  ;;  %s16946_s30 = smov (!%p245_p5, %s8847_s30), 31 }
  0x16   : > { %v8952_v16 = vcombine.low %v1793_v13, %v1793_v13  ;;  %v10203_v19 = vld [vmem:[%s10200_s26 + $0xc] sm:$0xf]  ;;  %v10206_v20 = vld [vmem:[%s10200_s26 + $0x10] sm:$0xf]  ;;  %v10209_v21 = vld [vmem:[%s10200_s26 + $0x14] sm:$0x1] }
  0x17   : > { %v1115_v17 = vrot.slane %v1114_v14, 4  ;;  %v1672_v18 = vrot.slane %v1671_v15, 4  ;;  %v10212_v22 = vld [vmem:[%s10200_s26 + $0x18] sm:$0xf]  ;;  %v10219_v25 = vld [vmem:[%s10200_s26 + $0x1c] sm:$0xf] }
  0x18   : > { %v10222_v26 = vld [vmem:[%s10200_s26 + $0x20] sm:$0x1]  ;;  %v316_v27 = vmul.bf16 1048592000, %v10212_v22  ;;  %v3758_v30 = vshll.u32 %v8952_v16, 16  ;;  %s9236_s18 = sshll.u32 %s16946_s30, 4 }
  0x19   : > { %v1120_v23 = vsel %vm10193_vm2, %v1115_v17, %v1113_v9  ;;  %v1677_v24 = vsel %vm10193_vm2, %v1672_v18, %v1670_v11  ;;  %v15568_v31 = vmul.bf16 1048592000, %v10219_v25  ;;  %v10227_v32 = vld [vmem:[%s10200_s26 + $0x24] sm:$0xf]  ;;  %v15566_v33 = vmul.bf16 1048592000, %v10222_v26  ;;  %s15133_s7 = scalar_lea.vmem %s15554_s5, %s9236_s18 }
  0x1a   : > { %v1197_v28 = vadd.bf16 %v1120_v23, %v667_v1  ;;  %v1791_v29 = vadd.bf16 %v1677_v24, %v717_v3  ;;  %v361_v34 = vmul.bf16 1061175104, %v10203_v19  ;;  %v362_v35 = vmul.bf16 1061175104, %v10206_v20  ;;  %v10238_v39 = vld [vmem:[%s10200_s26 + $0x28] sm:$0xf] }
  0x1b   : > { %v363_v38 = vmul.bf16 1061175104, %v10209_v21  ;;  %v10241_v40 = vld [vmem:[%s10200_s26 + $0x2c] sm:$0x1]  ;;  %v15560_v43 = vmul.bf16 1048592000, %v10227_v32 }
  0x1c   : > { %v10232_v36 = vcombine.low %v1197_v28, %v1197_v28  ;;  %v10234_v37 = vcombine.low %v1791_v29, %v1791_v29  ;;  %v472_v41 = vadd.bf16 %v361_v34, %v316_v27  ;;  %v473_v42 = vadd.bf16 %v362_v35, %v15568_v31 }
  0x1d   : > { %v15559_v44 = vmul.bf16 1048592000, %v10238_v39  ;;  %v10261_v47 = vadd.bf16 %v363_v38, %v15566_v33  ;;  %v15558_v48 = vmul.bf16 1048592000, %v10241_v40  ;;  %v3760_v53 = vrot.slane %v3758_v30, 1 }
  0x1e   : > { %16007 = vst [vmem:[#allocation2_spill] sm:$0xff] %v10232_v36  ;;  %3670 = vrot.lane.b32.xlu0 %v10232_v36, %s10137_s27  ;;  %v3751_v45 = vshrl.u32 %v10234_v37, 16  ;;  %v3753_v46 = vshll.u32 %v10234_v37, 16  ;;  %v2159_v49 = vmul.bf16 1048592000, %v472_v41 }
  0x1f   : > { %v10264_v50 = vmul.bf16 1048592000, %v473_v42  ;;  %v10266_v51 = vmul.bf16 1061175104, %v472_v41  ;;  %v10268_v54 = vmul.bf16 1061175104, %v473_v42 }
  0x20   : > { %v3755_v52 = vrot.slane %v3753_v46, 1  ;;  %v15562_v55 = vmul.bf16 1061175104, %v10261_v47  ;;  %v15571_v58 = vmul.bf16 1061175104, %v10212_v22  ;;  %v2764_v16 = vshrl.u32 %v2159_v49, 16 }
  0x21   : > { %v2267_v56 = vshrl.u32 %v10266_v51, 16  ;;  %v2270_v57 = vshll.u32 %v10266_v51, 16  ;;  %v15570_v59 = vmul.bf16 1061175104, %v10219_v25  ;;  %v2276_v61 = vshll.u32 %v10268_v54, 16 }
  0x22   : > { %v3756_v60 = vor.u32 %v3755_v52, %v3751_v45  ;;  %v2280_v62 = vshrl.u32 %v10268_v54, 16  ;;  %v2286_v63 = vshll.u32 %v15562_v55, 16  ;;  %v15569_v2 = vmul.bf16 1061175104, %v10222_v26 }
  0x23   : > { %v2269_v0 = vrot.slane %v2267_v56, 4  ;;  %v2272_v1 = vrot.slane %v2270_v57, 5  ;;  %v475_v3 = vadd.bf16 %v15571_v58, %v15560_v43  ;;  %v2278_v5 = vrot.slane %v2276_v61, 5  ;;  %v10318_v61 = vld [vmem:[%s10200_s26 + $0x30] sm:$0xf] }
  0x24   : > { %v10285_v4 = vsel %vm2138_vm3, %v3756_v60, %v3760_v53  ;;  %v2282_v6 = vrot.slane %v2280_v62, 4  ;;  %v2288_v7 = vrot.slane %v2286_v63, 5  ;;  %v476_v9 = vadd.bf16 %v15570_v59, %v15559_v44 }
  0x25   : > { %16008 = vst [vmem:[#allocation3_spill] sm:$0xff] %v10285_v4  ;;  %3942 = vrot.lane.b32.xlu1 %v10285_v4, %s10138_s28  ;;  %v2273_v8 = vor.u32 %v2272_v1, %v2269_v0  ;;  %v10297_v10 = vadd.bf16 %v15569_v2, %v15558_v48  ;;  %v10299_v11 = vmul.bf16 1048592000, %v475_v3  ;;  %v10301_v14 = vmul.bf16 1061175104, %v475_v3 }
  0x26   : > { %v2283_v13 = vor.u32 %v2282_v6, %v2278_v5  ;;  %v15563_v15 = vmul.bf16 1048592000, %v10261_v47  ;;  %v10304_v18 = vmul.bf16 1048592000, %v476_v9  ;;  %v10306_v23 = vmul.bf16 1061175104, %v476_v9 }
  0x27   : > { %v2274_v17 = vrot.slane %v2273_v8, 4  ;;  %v2767_v24 = vshll.u32 %v2159_v49, 16  ;;  %v15561_v29 = vmul.bf16 1061175104, %v10297_v10  ;;  %v2291_v30 = vshrl.u32 %v10301_v14, 16 }
  0x28   : > { %v2284_v28 = vrot.slane %v2283_v13, 4  ;;  %v2294_v41 = vshll.u32 %v10301_v14, 16  ;;  %v2300_v45 = vshll.u32 %v10306_v23, 16  ;;  %v2304_v46 = vshrl.u32 %v10306_v23, 16  ;;  %v10324_v3 = vld [vmem:[%s10200_s26 + $0x34] sm:$0xf] }
  0x29   : > { %v2279_v42 = vsel %vm10193_vm2, %v2274_v17, %v2278_v5  ;;  %v2766_v52 = vrot.slane %v2764_v16, 4  ;;  %v2293_v57 = vrot.slane %v2291_v30, 4  ;;  %v2310_v1 = vshll.u32 %v15561_v29, 16  ;;  %v258_v48 = vld [vmem:[%s10200_s26 + $0x8] sm:$0x1] }
  0x2a   : > { %v2289_v53 = vsel %vm10193_vm2, %v2284_v28, %v2288_v7  ;;  %v2686_v56 = vadd.bf16 %v2279_v42, %v2159_v49  ;;  %v2296_v60 = vrot.slane %v2294_v41, 5  ;;  %v2302_v63 = vrot.slane %v2300_v45, 5  ;;  %v10329_v7 = vld [vmem:[%s10200_s26 + $0x38] sm:$0x1] }
  0x2b   : > { %v2687_v62 = vadd.bf16 %v2289_v53, %v10264_v50  ;;  %v2306_v0 = vrot.slane %v2304_v46, 4  ;;  %v2769_v6 = vrot.slane %v2767_v24, 5  ;;  %v2773_v8 = vshll.u32 %v10264_v50, 16 }
  0x2c   : > { %v2297_v5 = vor.u32 %v2296_v60, %v2293_v57  ;;  %v2777_v49 = vshrl.u32 %v10264_v50, 16  ;;  %v2312_v16 = vrot.slane %v2310_v1, 5  ;;  %v2783_v17 = vshll.u32 %v15563_v15, 16 }
  0x2d   : > { %v10331_v9 = vcombine.low %v2686_v56, %v2687_v62  ;;  %v2307_v13 = vor.u32 %v2306_v0, %v2302_v63  ;;  %v2770_v30 = vor.u32 %v2769_v6, %v2766_v52  ;;  %v2775_v41 = vrot.slane %v2773_v8, 5 }
  0x2e   : > { %v2298_v28 = vrot.slane %v2297_v5, 4  ;;  %v2779_v42 = vrot.slane %v2777_v49, 4  ;;  %v2785_v24 = vrot.slane %v2783_v17, 5  ;;  %v15557_v45 = vmul.bf16 1048592000, %v10318_v61 }
  0x2f   : > { %16009 = vst [vmem:[#allocation4_spill] sm:$0xff] %v10331_v9  ;;  %3672 = vrot.lane.b32.xlu1 %v10331_v9, %s10137_s27  ;;  %4342 = vrot.lane.b32.xlu0 %v10331_v9, %s10139_s29  ;;  %v2308_v50 = vrot.slane %v2307_v13, 4  ;;  %v15556_v46 = vmul.bf16 1048592000, %v10324_v3  ;;  %v2771_v56 = vrot.slane %v2770_v30, 4  ;;  %v2792_v30 = vshrl.u32 %v10299_v11, 16 }
  0x30   : > { %v2303_v53 = vsel %vm10193_vm2, %v2298_v28, %v2302_v63  ;;  %v2780_v52 = vor.u32 %v2779_v42, %v2775_v41  ;;  %v15555_v57 = vmul.bf16 1048592000, %v10329_v7  ;;  %v15572_v0 = vmul.bf16 1061175104, %v10227_v32 }
  0x31   : > { %v2313_v60 = vsel %vm10193_vm2, %v2308_v50, %v2312_v16  ;;  %v2688_v62 = vadd.bf16 %v2303_v53, %v10299_v11  ;;  %v15567_v1 = vmul.bf16 1061175104, %v10238_v39  ;;  %v2776_v6 = vsel %vm10193_vm2, %v2771_v56, %v2775_v41 }
  0x32   : > { %v2689_v5 = vadd.bf16 %v2313_v60, %v10304_v18  ;;  %v2781_v8 = vrot.slane %v2780_v52, 4  ;;  %v15565_v63 = vmul.bf16 1061175104, %v10241_v40  ;;  %v3265_v49 = vadd.bf16 %v2776_v6, %v10266_v51 }
  0x33   : > { %v478_v13 = vadd.bf16 %v15572_v0, %v15557_v45  ;;  %v479_v16 = vadd.bf16 %v15567_v1, %v15556_v46  ;;  %v15574_v53 = vmul.bf16 1048592000, %v10297_v10  ;;  %v2794_v52 = vrot.slane %v2792_v30, 4  ;;  %v257_v30 = vld [vmem:[%s10200_s26 + $0x4] sm:$0xf] }
  0x34   : > { %v10362_v17 = vcombine.low %v2688_v62, %v2689_v5  ;;  %v2786_v28 = vsel %vm10193_vm2, %v2781_v8, %v2785_v24  ;;  %v10370_v51 = vadd.bf16 %v15565_v63, %v15555_v57  ;;  %v2795_v60 = vshll.u32 %v10299_v11, 16 }
  0x35   : > { %v3266_v41 = vadd.bf16 %v2786_v28, %v10268_v54  ;;  %v10374_v42 = vmul.bf16 1048592000, %v478_v13  ;;  %v10376_v50 = vmul.bf16 1061175104, %v478_v13  ;;  %v10388_v54 = vmul.bf16 1061175104, %v479_v16 }
  0x36   : > { %16010 = vst [vmem:[#allocation5_spill] sm:$0xff] %v10362_v17  ;;  %3674 = vrot.lane.b32.xlu1 %v10362_v17, %s10137_s27  ;;  %4344 = vrot.lane.b32.xlu0 %v10362_v17, %s10139_s29  ;;  %v15564_v56 = vmul.bf16 1061175104, %v10370_v51  ;;  %v2801_v8 = vshll.u32 %v10304_v18, 16  ;;  %v256_v13 = vld [vmem:[%s10200_s26] sm:$0xf] }
  0x37   : > { %v10392_v62 = vcombine.low %v3265_v49, %v3266_v41  ;;  %v2315_v5 = vshrl.u32 %v10376_v50, 16  ;;  %v2318_v6 = vshll.u32 %v10376_v50, 16  ;;  %v2324_v28 = vshll.u32 %v10388_v54, 16 }
  0x38   : > { %v2328_v57 = vshrl.u32 %v10388_v54, 16  ;;  %v2334_v46 = vshll.u32 %v15564_v56, 16  ;;  %v2797_v45 = vrot.slane %v2795_v60, 5  ;;  %v10409_v49 = vmul.bf16 1048592000, %v479_v16 }
  0x39   : > { %v10407_v11 = vsel %vm10384_vm6, 0, %v10392_v62  ;;  %v2317_v41 = vrot.slane %v2315_v5, 4  ;;  %v2320_v44 = vrot.slane %v2318_v6, 5  ;;  %v2326_v43 = vrot.slane %v2324_v28, 5 }
  0x3a   : > { %16013 = vst [vmem:[#allocation6_spill] sm:$0xff] %v10407_v11  ;;  %4310 = vrot.lane.b32.xlu1 %v10407_v11, %s10138_s28  ;;  %v2330_v29 = vrot.slane %v2328_v57, 4  ;;  %v2336_v55 = vrot.slane %v2334_v46, 5  ;;  %v2798_v15 = vor.u32 %v2797_v45, %v2794_v52  ;;  %v2803_v56 = vrot.slane %v2801_v8, 5 }
  0x3b   : > { %v2805_v60 = vshrl.u32 %v10304_v18, 16  ;;  %v2321_v63 = vor.u32 %v2320_v44, %v2317_v41  ;;  %v2811_v1 = vshll.u32 %v15574_v53, 16  ;;  %v310_v31 = vmul.bf16 1048592000, %v256_v13 }
  0x3c   : > { %v2331_v33 = vor.u32 %v2330_v29, %v2326_v43  ;;  %v2799_v16 = vrot.slane %v2798_v15, 4  ;;  %v311_v5 = vmul.bf16 1048592000, %v257_v30  ;;  %v312_v59 = vmul.bf16 1048592000, %v258_v48 }
  0x3d   : > { %v2807_v2 = vrot.slane %v2805_v60, 4  ;;  %v2322_v58 = vrot.slane %v2321_v63, 4  ;;  %v2813_v6 = vrot.slane %v2811_v1, 5  ;;  %v412_v46 = vadd.bf16 %v361_v34, %v310_v31 }
  0x3e   : > { %v2332_v0 = vrot.slane %v2331_v33, 4  ;;  %v2804_v45 = vsel %vm10193_vm2, %v2799_v16, %v2803_v56  ;;  %v413_v44 = vadd.bf16 %v362_v35, %v311_v5  ;;  %v10428_v33 = vadd.bf16 %v363_v38, %v312_v59 }
  0x3f   : > { %v2808_v18 = vor.u32 %v2807_v2, %v2803_v56  ;;  %v2327_v29 = vsel %vm10193_vm2, %v2322_v58, %v2326_v43  ;;  %v10430_v48 = vmul.bf16 1048592000, %v412_v46  ;;  %v3765_v35 = vshll.u32 %v10392_v62, 16 }
  0x40   : > { %v2337_v15 = vsel %vm10193_vm2, %v2332_v0, %v2336_v55  ;;  %v2690_v31 = vadd.bf16 %v2327_v29, %v10374_v42  ;;  %v10434_v57 = vmul.bf16 1048592000, %v413_v44  ;;  %v3268_v43 = vadd.bf16 %v2804_v45, %v10301_v14 }
  0x41   : > { %v2691_v34 = vadd.bf16 %v2337_v15, %v10409_v49  ;;  %v2809_v2 = vrot.slane %v2808_v18, 4  ;;  %v1217_v38 = vshrl.u32 %v10430_v48, 16  ;;  %v1220_v59 = vshll.u32 %v10430_v48, 16 }
  0x42   : > { %v670_v1 = vmul.bf16 1061175104, %v413_v44  ;;  %v1199_v63 = vmul.bf16 1048592000, %v10428_v33  ;;  %v1226_v14 = vshll.u32 %v10434_v57, 16  ;;  %v10453_v16 = vrot.slane %v3765_v35, 1 }
  0x43   : > { %v10438_v58 = vcombine.low %v2690_v31, %v2691_v34  ;;  %v2814_v55 = vsel %vm10193_vm2, %v2809_v2, %v2813_v6  ;;  %v1219_v56 = vrot.slane %v1217_v38, 4  ;;  %v1222_v52 = vrot.slane %v1220_v59, 5 }
  0x44   : > { %v3269_v0 = vadd.bf16 %v2814_v55, %v10306_v23  ;;  %v733_v13 = vshll.u32 %v670_v1, 16  ;;  %v737_v28 = vshrl.u32 %v670_v1, 16  ;;  %v1228_v60 = vrot.slane %v1226_v14, 5 }
  0x45   : > { %16014 = vst [vmem:[#allocation7_spill] sm:$0xff] %v10438_v58  ;;  %4346 = vrot.lane.b32.xlu0 %v10438_v58, %s10139_s29  ;;  %v1223_v41 = vor.u32 %v1222_v52, %v1219_v56  ;;  %v1230_v23 = vshrl.u32 %v10434_v57, 16  ;;  %v10460_v6 = vmul.bf16 1061175104, %v412_v46  ;;  %v1236_v44 = vshll.u32 %v1199_v63, 16 }
  0x46   : > { %v10449_v8 = vcombine.low %v3268_v43, %v3269_v0  ;;  %v16016_v29 = vmul.bf16 1061175104, %v10227_v32  ;;  %v10472_v31 = vrot.slane %v733_v13, 5  ;;  %v10474_v34 = vrot.slane %v737_v28, 4 }
  0x47   : > { %v1224_v45 = vrot.slane %v1223_v41, 4  ;;  %v1232_v18 = vrot.slane %v1230_v23, 4  ;;  %v15573_v46 = vmul.bf16 1048592000, %v10370_v51  ;;  %v2820_v2 = vshrl.u32 %v10374_v42, 16 }
  0x48   : > { %v10458_v5 = vsel %vm10384_vm6, 0, %v10449_v8  ;;  %v10470_v15 = vadd.bf16 %v16016_v29, %v316_v27  ;;  %v1238_v38 = vrot.slane %v1236_v44, 5  ;;  %v2823_v27 = vshll.u32 %v10374_v42, 16 }
  0x49   : > { %16015 = vst [vmem:[#allocation8_spill] sm:$0xff] %v10458_v5  ;;  %4312 = vrot.lane.b32.xlu0 %v10458_v5, %s10138_s28  ;;  %v1229_v43 = vsel %vm10193_vm2, %v1224_v45, %v1228_v60  ;;  %v1233_v55 = vor.u32 %v1232_v18, %v1228_v60  ;;  %v2822_v0 = vrot.slane %v2820_v2, 4  ;;  %v2829_v56 = vshll.u32 %v10409_v49, 16 }
  0x4a   : > { %v1743_v59 = vadd.bf16 %v1229_v43, %v10460_v6  ;;  %v2833_v14 = vshrl.u32 %v10409_v49, 16  ;;  %v2839_v13 = vshll.u32 %v15573_v46, 16  ;;  %v313_v28 = vmul.bf16 1048592000, %v10203_v19 }
  0x4b   : > { %v1234_v52 = vrot.slane %v1233_v55, 4  ;;  %v2825_v41 = vrot.slane %v2823_v27, 5  ;;  %v2831_v23 = vrot.slane %v2829_v56, 5  ;;  %v314_v60 = vmul.bf16 1048592000, %v10206_v20 }
  0x4c   : > { %v315_v45 = vmul.bf16 1048592000, %v10209_v21  ;;  %v3777_v18 = vshll.u32 %v10449_v8, 16  ;;  %v2835_v44 = vrot.slane %v2833_v14, 4  ;;  %v16017_v29 = vmul.bf16 1061175104, %v10212_v22 }
  0x4d   : > { %v1239_v42 = vsel %vm10193_vm2, %v1234_v52, %v1238_v38  ;;  %v2826_v43 = vor.u32 %v2825_v41, %v2822_v0  ;;  %v16018_v55 = vmul.bf16 1061175104, %v10219_v25  ;;  %v16019_v27 = vmul.bf16 1061175104, %v10222_v26 }
  0x4e   : > { %v415_v49 = vadd.bf16 %v16017_v29, %v313_v28  ;;  %v1744_v2 = vadd.bf16 %v1239_v42, %v670_v1  ;;  %v2836_v20 = vor.u32 %v2835_v44, %v2831_v23  ;;  %v2841_v21 = vrot.slane %v2839_v13, 5 }
  0x4f   : > { %v416_v19 = vadd.bf16 %v16018_v55, %v314_v60  ;;  %v10499_v56 = vadd.bf16 %v16019_v27, %v315_v45  ;;  %v2827_v38 = vrot.slane %v2826_v43, 4 }
  0x50   : > { %v637_v46 = vmul.bf16 1048592000, %v415_v49  ;;  %v672_v35 = vmul.bf16 1061175104, %v415_v49  ;;  %v10501_v30 = vcombine.low %v1743_v59, %v1744_v2  ;;  %v2837_v1 = vrot.slane %v2836_v20, 4 }
  0x51   : > { %v10503_v52 = vmul.bf16 1048592000, %v416_v19  ;;  %v10505_v22 = vmul.bf16 1061175104, %v416_v19  ;;  %v15575_v28 = vmul.bf16 1048592000, %v10499_v56  ;;  %v2832_v13 = vsel %vm10193_vm2, %v2827_v38, %v2831_v23 }
  0x52   : > { %v748_v0 = vshrl.u32 %v672_v35, 16  ;;  %v751_v14 = vshll.u32 %v672_v35, 16  ;;  %v10511_v41 = vsel %vm10384_vm6, 0, %v10501_v30  ;;  %v2842_v45 = vsel %vm10193_vm2, %v2837_v1, %v2841_v21 }
  0x53   : > { %16020 = vst [vmem:[#allocation9_spill] sm:$0xff] %v10511_v41  ;;  %v757_v59 = vshll.u32 %v10505_v22, 16  ;;  %v761_v60 = vshrl.u32 %v10505_v22, 16  ;;  %3990 = vrot.lane.b32.xlu1 %v10511_v41, %s10139_s29  ;;  %v3271_v42 = vadd.bf16 %v2832_v13, %v10376_v50  ;;  %v740_v49 = vor.u32 %v10474_v34, %v10472_v31 }
  0x54   : > { %v750_v44 = vrot.slane %v748_v0, 4  ;;  %v753_v29 = vrot.slane %v751_v14, 5  ;;  %v3272_v2 = vadd.bf16 %v2842_v45, %v10388_v54  ;;  %v1245_v43 = vshrl.u32 %v637_v46, 16 }
  0x55   : > { %v759_v23 = vrot.slane %v757_v59, 5  ;;  %v1248_v19 = vshll.u32 %v637_v46, 16  ;;  %v1254_v27 = vshll.u32 %v10503_v52, 16  ;;  %v1258_v20 = vshrl.u32 %v10503_v52, 16 }
  0x56   : > { %v754_v55 = vor.u32 %v753_v29, %v750_v44  ;;  %v10527_v38 = vcombine.low %v3271_v42, %v3272_v2  ;;  %v763_v21 = vrot.slane %v761_v60, 4  ;;  %v1247_v1 = vrot.slane %v1245_v43, 4 }
  0x57   : > { %v1264_v50 = vshll.u32 %v15575_v28, 16  ;;  %v1250_v14 = vrot.slane %v1248_v19, 5  ;;  %v1256_v34 = vrot.slane %v1254_v27, 5  ;;  %v1260_v13 = vrot.slane %v1258_v20, 4 }
  0x58   : > { %v755_v0 = vrot.slane %v754_v55, 4  ;;  %v10531_v54 = vrot.slane %v3777_v18, 1  ;;  %v741_v59 = vrot.slane %v740_v49, 4  ;;  %v10536_v45 = vsel %vm10384_vm6, 0, %v10527_v38 }
  0x59   : > { %16021 = vst [vmem:[#allocation10_spill] sm:$0xff] %v10536_v45  ;;  %v671_v42 = vmul.bf16 1061175104, %v10428_v33  ;;  %4314 = vrot.lane.b32.xlu0 %v10536_v45, %s10138_s28  ;;  %v1251_v44 = vor.u32 %v1250_v14, %v1247_v1  ;;  %v1261_v29 = vor.u32 %v1260_v13, %v1256_v34  ;;  %v1266_v2 = vrot.slane %v1264_v50, 5 }
  0x5a   : > { %v760_v60 = vsel %vm10193_vm2, %v755_v0, %v759_v23  ;;  %v764_v43 = vor.u32 %v763_v21, %v759_v23  ;;  %v1240_v55 = vshrl.u32 %v1199_v63, 16  ;;  %v4071_v20 = vshrl.u32 %v10501_v30, 16 }
  0x5b   : > { %v10543_v18 = vadd.bf16 %v760_v60, %v637_v46  ;;  %v743_v49 = vshll.u32 %v671_v42, 16  ;;  %v1252_v19 = vrot.slane %v1251_v44, 4  ;;  %v1262_v27 = vrot.slane %v1261_v29, 4 }
  0x5c   : > { %v4073_v53 = vshll.u32 %v10501_v30, 16  ;;  %v1745_v41 = vadd.bf16 %v1240_v55, %v671_v42  ;;  %v16023_v0 = vmul.bf16 1048592000, %v10219_v25  ;;  %v16024_v1 = vmul.bf16 1061175104, %v10238_v39 }
  0x5d   : > { %16022 = vst [vmem:[#allocation11_spill] sm:$0xff] %v10543_v18  ;;  %v745_v28 = vrot.slane %v743_v49, 5  ;;  %v16025_v46 = vmul.bf16 1048592000, %v10222_v26  ;;  %v16026_v23 = vmul.bf16 1061175104, %v10241_v40  ;;  %v1257_v33 = vsel %vm10193_vm2, %v1252_v19, %v1256_v34 }
  0x5e   : > { %v419_v50 = vadd.bf16 %v16024_v1, %v16023_v0  ;;  %v1267_v63 = vsel %vm10193_vm2, %v1262_v27, %v1266_v2  ;;  %v4075_v30 = vrot.slane %v4073_v53, 1  ;;  %v639_v14 = vmul.bf16 1048592000, %v10470_v15 }
  0x5f   : > { %v10557_v21 = vadd.bf16 %v16026_v23, %v16025_v46  ;;  %v1746_v13 = vadd.bf16 %v1257_v33, %v672_v35  ;;  %v1747_v25 = vadd.bf16 %v1267_v63, %v10505_v22  ;;  %v10567_v42 = vsel %vm10193_vm2, %v741_v59, %v745_v28 }
  0x60   : > { %v8968_v26 = vcombine.low %v1745_v41, %v1745_v41  ;;  %v765_v60 = vrot.slane %v764_v43, 4  ;;  %v4076_v44 = vor.u32 %v4075_v30, %v4071_v20  ;;  %v675_v29 = vmul.bf16 1061175104, %v10470_v15 }
  0x61   : > { %v10570_v49 = vmul.bf16 1061175104, %v419_v50  ;;  %v8868_v34 = vcombine.low %v1746_v13, %v1747_v25  ;;  %v10572_v2 = vmul.bf16 1048592000, %v419_v50  ;;  %v1273_v53 = vshrl.u32 %v639_v14, 16 }
  0x62   : > { %v4078_v55 = vshll.u32 %v8968_v26, 16  ;;  %v772_v19 = vshrl.u32 %v675_v29, 16  ;;  %v775_v35 = vshll.u32 %v675_v29, 16  ;;  %v1201_v15 = vmul.bf16 1048592000, %v10557_v21 }
  0x63   : > { %16027 = vst [vmem:[#allocation12_spill] sm:$0xff] %v10572_v2  ;;  %v781_v22 = vshll.u32 %v10570_v49, 16  ;;  %v785_v27 = vshrl.u32 %v10570_v49, 16  ;;  %v10578_v28 = vsel %vm10384_vm6, 0, %v8868_v34  ;;  %v4085_v41 = vshll.u32 %v8868_v34, 16 }
  0x64   : > { %16028 = vst [vmem:[#allocation13_spill] sm:$0xff] %v10578_v28  ;;  %v4080_v59 = vrot.slane %v4078_v55, 1  ;;  %3992 = vrot.lane.b32.xlu1 %v10578_v28, %s10139_s29  ;;  %v774_v43 = vrot.slane %v772_v19, 4  ;;  %v777_v20 = vrot.slane %v775_v35, 5  ;;  %v4083_v50 = vshrl.u32 %v8868_v34, 16 }
  0x65   : > { %v783_v0 = vrot.slane %v781_v22, 5  ;;  %v787_v1 = vrot.slane %v785_v27, 4  ;;  %v1275_v23 = vrot.slane %v1273_v53, 4  ;;  %v1276_v33 = vshll.u32 %v639_v14, 16 }
  0x66   : > { %v10584_v46 = vsel %vm2138_vm3, %v4076_v44, %v4080_v59  ;;  %v778_v63 = vor.u32 %v777_v20, %v774_v43  ;;  %v1282_v13 = vshll.u32 %v10572_v2, 16  ;;  %v1286_v25 = vshrl.u32 %v10572_v2, 16 }
  0x67   : > { %16029 = vst [vmem:[#allocation14_spill] sm:$0xff] %v10584_v46  ;;  %4262 = vrot.lane.b32.xlu0 %v10584_v46, %s10137_s27  ;;  %v788_v30 = vor.u32 %v787_v1, %v783_v0  ;;  %v1278_v26 = vrot.slane %v1276_v33, 5  ;;  %v1292_v55 = vshll.u32 %v1201_v15, 16  ;;  %v674_v19 = vmul.bf16 1061175104, %v10499_v56 }
  0x68   : > { %v16030_v34 = vmul.bf16 1048592000, %v10499_v56  ;;  %v4087_v44 = vrot.slane %v4085_v41, 1  ;;  %v779_v22 = vrot.slane %v778_v63, 4  ;;  %v1284_v53 = vrot.slane %v1282_v13, 5 }
  0x69   : > { %v1288_v27 = vrot.slane %v1286_v25, 4  ;;  %v789_v59 = vrot.slane %v788_v30, 4  ;;  %v1279_v28 = vor.u32 %v1278_v26, %v1275_v23  ;;  %v767_v46 = vshll.u32 %v674_v19, 16 }
  0x6a   : > { %v1268_v35 = vshrl.u32 %v16030_v34, 16  ;;  %v784_v20 = vsel %vm10193_vm2, %v779_v22, %v783_v0  ;;  %v1294_v36 = vrot.slane %v1292_v55, 5  ;;  %v16031_v33 = vmul.bf16 1048592000, %v10261_v47 }
  0x6b   : > { %v1289_v1 = vor.u32 %v1288_v27, %v1284_v53  ;;  %v10597_v17 = vadd.bf16 %v784_v20, %v639_v14  ;;  %v1280_v56 = vrot.slane %v1279_v28, 4  ;;  %v769_v34 = vrot.slane %v767_v46, 5 }
  0x6c   : > { %v1748_v43 = vadd.bf16 %v1268_v35, %v674_v19  ;;  %v2787_v4 = vshrl.u32 %v16031_v33, 16  ;;  %v4088_v13 = vor.u32 %v4087_v44, %v4083_v50  ;;  %v16033_v30 = vmul.bf16 1061175104, %v10261_v47 }
  0x6d   : > { %16032 = vst [vmem:[#allocation15_spill] sm:$0xff] %v10597_v17  ;;  %v1290_v63 = vrot.slane %v1289_v1, 4  ;;  %v677_v25 = vmul.bf16 1061175104, %v10557_v21  ;;  %v1285_v0 = vsel %vm10193_vm2, %v1280_v56, %v1284_v53  ;;  %v10606_v26 = vsel %vm10193_vm2, %v765_v60, %v769_v34 }
  0x6e   : > { %v8969_v41 = vcombine.low %v1748_v43, %v1748_v43  ;;  %v3267_v23 = vadd.bf16 %v2787_v4, %v16033_v30  ;;  %v1296_v14 = vshrl.u32 %v1201_v15, 16  ;;  %v1749_v46 = vadd.bf16 %v1285_v0, %v675_v29 }
  0x6f   : > { %v1295_v28 = vsel %vm10193_vm2, %v1290_v63, %v1294_v36  ;;  %v791_v50 = vshll.u32 %v677_v25, 16  ;;  %v16034_v21 = vmul.bf16 1048592000, %v10297_v10  ;;  %v16035_v22 = vshrl.u32 %v10392_v62, 16 }
  0x70   : > { %v4090_v55 = vshll.u32 %v8969_v41, 16  ;;  %v8953_v19 = vcombine.low %v3267_v23, %v3267_v23  ;;  %v1750_v47 = vadd.bf16 %v1295_v28, %v10570_v49  ;;  %v1751_v35 = vadd.bf16 %v1296_v14, %v677_v25 }
  0x71   : > { %v2815_v44 = vshrl.u32 %v16034_v21, 16  ;;  %v3768_v60 = vor.u32 %v10453_v16, %v16035_v22  ;;  %v793_v27 = vrot.slane %v791_v50, 5  ;;  %v370_v15 = vmul.bf16 1061175104, %v10318_v61 }
  0x72   : > { %v4092_v4 = vrot.slane %v4090_v55, 1  ;;  %v3770_v53 = vshll.u32 %v8953_v19, 16  ;;  %v8869_v43 = vcombine.low %v1749_v46, %v1750_v47  ;;  %v8970_v29 = vcombine.low %v1751_v35, %v1751_v35  ;;  %v10661_v35 = vld [vmem:[%s10200_s26 + $0x3c] sm:$0xf] }
  0x73   : > { %v16037_v49 = vmul.bf16 1061175104, %v10297_v10  ;;  %v10626_v62 = vsel %vm10193_vm2, %v789_v59, %v793_v27  ;;  %v371_v16 = vmul.bf16 1061175104, %v10324_v3  ;;  %v372_v33 = vmul.bf16 1061175104, %v10329_v7 }
  0x74   : > { %v10618_v36 = vsel %vm2138_vm3, %v4088_v13, %v4092_v4  ;;  %v3772_v1 = vrot.slane %v3770_v53, 1  ;;  %16038 = vst [vmem:[#allocation17_spill] sm:$0xff] %v10626_v62  ;;  %v10632_v56 = vsel %vm10384_vm6, 0, %v8869_v43  ;;  %v4095_v34 = vshrl.u32 %v8869_v43, 16 }
  0x75   : > { %16036 = vst [vmem:[#allocation16_spill] sm:$0xff] %v10618_v36  ;;  %v3270_v20 = vadd.bf16 %v2815_v44, %v16037_v49  ;;  %4264 = vrot.lane.b32.xlu0 %v10618_v36, %s10137_s27  ;;  %16039 = vst [vmem:[#allocation18_spill] sm:$0xff] %v10632_v56  ;;  %v4097_v41 = vshll.u32 %v8869_v43, 16  ;;  %v4102_v10 = vshll.u32 %v8970_v29, 16  ;;  %3994 = vrot.lane.b32.xlu1 %v10632_v56, %s10139_s29  ;;  %v16040_v13 = vmul.bf16 1048592000, %v10227_v32 }
  0x76   : > { %v16041_v30 = vmul.bf16 1048592000, %v10238_v39  ;;  %v10645_v0 = vsel %vm2138_vm3, %v3768_v60, %v3772_v1  ;;  %v16043_v14 = vmul.bf16 1048592000, %v10241_v40  ;;  %v16044_v32 = vshrl.u32 %v10449_v8, 16 }
  0x77   : > { %v8954_v63 = vcombine.low %v3270_v20, %v3270_v20  ;;  %v421_v59 = vadd.bf16 %v370_v15, %v16040_v13  ;;  %v4099_v25 = vrot.slane %v4097_v41, 1  ;;  %16042 = vst [vmem:[#allocation19_spill] sm:$0xff] %v10645_v0  ;;  %v4104_v55 = vrot.slane %v4102_v10, 1  ;;  %v10678_v49 = vld [vmem:[%s10200_s26 + $0x40] sm:$0xf]  ;;  %9630 = vmatprep.mubr.msk.bf16.mxu1 %vm4389_vm7, %v10645_v0 }
  0x78   : > { %v422_v23 = vadd.bf16 %v371_v16, %v16041_v30  ;;  %v423_v28 = vadd.bf16 %v372_v33, %v16043_v14  ;;  %v3780_v46 = vor.u32 %v10531_v54, %v16044_v32  ;;  %v15589_v41 = vmul.bf16 1048592000, %v10661_v35 }
  0x79   : > { %v3782_v19 = vshll.u32 %v8954_v63, 16  ;;  %v10654_v50 = vmul.bf16 1048592000, %v421_v59  ;;  %v4100_v39 = vor.u32 %v4099_v25, %v4095_v34  ;;  %3944 = vrot.lane.b32.xlu1 %v10645_v0, %s10138_s28  ;;  %v10683_v34 = vld [vmem:[%s10200_s26 + $0x44] sm:$0x1] }
  0x7a   : > { %v10656_v47 = vmul.bf16 1048592000, %v422_v23  ;;  %v10658_v4 = vmul.bf16 1061175104, %v422_v23  ;;  %v680_v21 = vmul.bf16 1061175104, %v423_v28 }
  0x7b   : > { %16045 = vst [vmem:[#allocation20_spill] sm:$0xff] %v10654_v50  ;;  %v3784_v40 = vrot.slane %v3782_v19, 1  ;;  %v1301_v8 = vshrl.u32 %v10654_v50, 16  ;;  %v1304_v54 = vshll.u32 %v10654_v50, 16  ;;  %v10668_v44 = vsel %vm2138_vm3, %v4100_v39, %v4104_v55 }
  0x7c   : > { %16046 = vst [vmem:[#allocation21_spill] sm:$0xff] %v10656_v47  ;;  %16047 = vst [vmem:[#allocation22_spill] sm:$0xff] %v10668_v44  ;;  %v805_v22 = vshll.u32 %v10658_v4, 16  ;;  %v1202_v60 = vmul.bf16 1048592000, %v423_v28  ;;  %4266 = vrot.lane.b32.xlu0 %v10668_v44, %s10137_s27  ;;  %v809_v27 = vshrl.u32 %v10658_v4, 16 }
  0x7d   : > { %v10674_v53 = vsel %vm2138_vm3, %v3780_v46, %v3784_v40  ;;  %v815_v43 = vshll.u32 %v680_v21, 16  ;;  %v1303_v29 = vrot.slane %v1301_v8, 4  ;;  %v1306_v1 = vrot.slane %v1304_v54, 5 }
  0x7e   : > { %16048 = vst [vmem:[#allocation23_spill] sm:$0xff] %v10674_v53  ;;  %v10680_v20 = vrot.slane %v805_v22, 5  ;;  %3946 = vrot.lane.b32.xlu1 %v10674_v53, %s10138_s28  ;;  %v10688_v10 = vmul.bf16 1061175104, %v421_v59  ;;  %v811_v63 = vrot.slane %v809_v27, 4  ;;  %v1310_v13 = vshll.u32 %v10656_v47, 16 }
  0x7f   : > { %v1314_v30 = vshrl.u32 %v10656_v47, 16  ;;  %v817_v23 = vrot.slane %v815_v43, 5  ;;  %v1307_v25 = vor.u32 %v1306_v1, %v1303_v29  ;;  %v1320_v55 = vshll.u32 %v1202_v60, 16 }
  0x80   : > { %16049 = vst [vmem:[#allocation24_spill] sm:$0xff] %v10680_v20  ;;  %v1324_v14 = vshrl.u32 %v1202_v60, 16  ;;  %v812_v28 = vor.u32 %v811_v63, %v10680_v20  ;;  %v1312_v32 = vrot.slane %v1310_v13, 5  ;;  %v15588_v19 = vmul.bf16 1048592000, %v10678_v49 }
  0x81   : > { %v1316_v46 = vrot.slane %v1314_v30, 4  ;;  %v1308_v39 = vrot.slane %v1307_v25, 4  ;;  %v15587_v59 = vmul.bf16 1048592000, %v10683_v34  ;;  %v15591_v8 = vmul.bf16 1061175104, %v10661_v35 }
  0x82   : > { %v1754_v40 = vadd.bf16 %v1324_v14, %v680_v21  ;;  %v813_v54 = vrot.slane %v812_v28, 4  ;;  %v1322_v27 = vrot.slane %v1320_v55, 5  ;;  %3676 = vrot.lane.b32.xlu1 %v10438_v58, %s10137_s27  ;;  %v15590_v60 = vmul.bf16 1061175104, %v10678_v49 }
  0x83   : > { %v1317_v22 = vor.u32 %v1316_v46, %v1312_v32  ;;  %v3789_v43 = vshll.u32 %v10527_v38, 16  ;;  %v1313_v29 = vsel %vm10193_vm2, %v1308_v39, %v1312_v32  ;;  %v16050_v21 = vmul.bf16 1048592000, %v10318_v61 }
  0x84   : > { %v8971_v1 = vcombine.low %v1754_v40, %v1754_v40  ;;  %v10710_v13 = vsel %vm10193_vm2, %v813_v54, %v817_v23  ;;  %v16052_v25 = vmul.bf16 1048592000, %v10324_v3  ;;  %v481_v14 = vadd.bf16 %v370_v15, %v15589_v41 }
  0x85   : > { %v10706_v63 = vadd.bf16 %v15591_v8, %v16050_v21  ;;  %16051 = vst [vmem:[#allocation25_spill] sm:$0xff] %v10710_v13  ;;  %v1318_v30 = vrot.slane %v1317_v22, 4  ;;  %v1752_v28 = vadd.bf16 %v1313_v29, %v10688_v10  ;;  %v482_v23 = vadd.bf16 %v371_v16, %v15588_v19 }
  0x86   : > { %v425_v55 = vadd.bf16 %v15590_v60, %v16052_v25  ;;  %v4114_v32 = vshll.u32 %v8971_v1, 16  ;;  %v3787_v46 = vshrl.u32 %v10527_v38, 16  ;;  %v10732_v40 = vadd.bf16 %v372_v33, %v15587_v59 }
  0x87   : > { %v1323_v39 = vsel %vm10193_vm2, %v1318_v30, %v1322_v27  ;;  %v3791_v15 = vrot.slane %v3789_v43, 1  ;;  %v10738_v22 = vmul.bf16 1048592000, %v10706_v63  ;;  %v16054_v3 = vmul.bf16 1048592000, %v10370_v51 }
  0x88   : > { %v10734_v61 = vmul.bf16 1061175104, %v425_v55  ;;  %v1753_v54 = vadd.bf16 %v1323_v39, %v10658_v4  ;;  %v4116_v16 = vrot.slane %v4114_v32, 1  ;;  %v2165_v29 = vmul.bf16 1048592000, %v481_v14 }
  0x89   : > { %16053 = vst [vmem:[#allocation26_spill] sm:$0xff] %v10738_v22  ;;  %v2843_v38 = vshrl.u32 %v16054_v3, 16  ;;  %v2203_v1 = vmul.bf16 1061175104, %v481_v14  ;;  %v10744_v30 = vmul.bf16 1048592000, %v482_v23 }
  0x8a   : > { %v829_v27 = vshll.u32 %v10734_v61, 16  ;;  %v8870_v21 = vcombine.low %v1752_v28, %v1753_v54  ;;  %v833_v33 = vshrl.u32 %v10734_v61, 16  ;;  %v10746_v25 = vmul.bf16 1061175104, %v482_v23 }
  0x8b   : > { %v15608_v4 = vmul.bf16 1061175104, %v10732_v40  ;;  %v2339_v43 = vshrl.u32 %v2203_v1, 16  ;;  %v2342_v39 = vshll.u32 %v2203_v1, 16  ;;  %v2848_v60 = vshrl.u32 %v2165_v29, 16 }
  0x8c   : > { %v4107_v19 = vshrl.u32 %v8870_v21, 16  ;;  %v4109_v3 = vshll.u32 %v8870_v21, 16  ;;  %v2348_v32 = vshll.u32 %v10746_v25, 16  ;;  %v2352_v41 = vshrl.u32 %v10746_v25, 16 }
  0x8d   : > { %v2341_v14 = vrot.slane %v2339_v43, 4  ;;  %v2344_v28 = vrot.slane %v2342_v39, 5  ;;  %v2358_v54 = vshll.u32 %v15608_v4, 16  ;;  %v2851_v44 = vshll.u32 %v2165_v29, 16 }
  0x8e   : > { %v4111_v23 = vrot.slane %v4109_v3, 1  ;;  %v2350_v8 = vrot.slane %v2348_v32, 5  ;;  %v2354_v56 = vrot.slane %v2352_v41, 4  ;;  %v2850_v9 = vrot.slane %v2848_v60, 4 }
  0x8f   : > { %v2345_v36 = vor.u32 %v2344_v28, %v2341_v14  ;;  %v2360_v58 = vrot.slane %v2358_v54, 5  ;;  %v2857_v59 = vshll.u32 %v10744_v30, 16  ;;  %v2853_v50 = vrot.slane %v2851_v44, 5 }
  0x90   : > { %v4112_v45 = vor.u32 %v4111_v23, %v4107_v19  ;;  %v2355_v5 = vor.u32 %v2354_v56, %v2350_v8  ;;  %v2861_v20 = vshrl.u32 %v10744_v30, 16  ;;  %v16055_v13 = vmul.bf16 1048592000, %v10732_v40 }
  0x91   : > { %v2346_v43 = vrot.slane %v2345_v36, 4  ;;  %v2859_v39 = vrot.slane %v2857_v59, 5  ;;  %v16056_v3 = vmul.bf16 1061175104, %v10370_v51  ;;  %v2854_v60 = vor.u32 %v2853_v50, %v2850_v9 }
  0x92   : > { %v2867_v4 = vshll.u32 %v16055_v13, 16  ;;  %v10761_v41 = vsel %vm2138_vm3, %v4112_v45, %v4116_v16  ;;  %v2356_v14 = vrot.slane %v2355_v5, 4  ;;  %v2863_v28 = vrot.slane %v2861_v20, 4 }
  0x93   : > { %v3273_v32 = vadd.bf16 %v2843_v38, %v16056_v3  ;;  %16057 = vst [vmem:[#allocation27_spill] sm:$0xff] %v10761_v41  ;;  %4268 = vrot.lane.b32.xlu0 %v10761_v41, %s10137_s27  ;;  %v10765_v56 = vmul.bf16 1048592000, %v425_v55  ;;  %v2351_v19 = vsel %vm10193_vm2, %v2346_v43, %v2350_v8  ;;  %v2855_v59 = vrot.slane %v2854_v60, 4 }
  0x94   : > { %v2869_v44 = vrot.slane %v2867_v4, 5  ;;  %v2864_v13 = vor.u32 %v2863_v28, %v2859_v39  ;;  %v3792_v51 = vor.u32 %v3791_v15, %v3787_v46  ;;  %v2361_v45 = vsel %vm10193_vm2, %v2356_v14, %v2360_v58  ;;  %v10798_v14 = vld [vmem:[%s10200_s26 + $0x48] sm:$0xf] }
  0x95   : > { %16058 = vst [vmem:[#allocation28_spill] sm:$0xff] %v10765_v56  ;;  %v8955_v36 = vcombine.low %v3273_v32, %v3273_v32  ;;  %v2692_v5 = vadd.bf16 %v2351_v19, %v2165_v29  ;;  %v2693_v9 = vadd.bf16 %v2361_v45, %v10744_v30  ;;  %v375_v50 = vmul.bf16 1061175104, %v10683_v34 }
  0x96   : > { %v2860_v20 = vsel %vm10193_vm2, %v2855_v59, %v2859_v39  ;;  %v2865_v55 = vrot.slane %v2864_v13, 4  ;;  %v10775_v16 = vrot.slane %v829_v27, 5  ;;  %v835_v4 = vrot.slane %v833_v33, 4  ;;  %v10804_v13 = vld [vmem:[%s10200_s26 + $0x4c] sm:$0xf] }
  0x97   : > { %v3794_v38 = vshll.u32 %v8955_v36, 16  ;;  %v3274_v8 = vadd.bf16 %v2860_v20, %v2203_v1  ;;  %v10779_v46 = vsel %vm10384_vm6, 0, %v8870_v21  ;;  %v16061_v58 = vmul.bf16 1048592000, %v10329_v7 }
  0x98   : > { %16059 = vst [vmem:[#allocation29_spill] sm:$0xff] %v10775_v16  ;;  %16060 = vst [vmem:[#allocation30_spill] sm:$0xff] %v10779_v46  ;;  %v2870_v29 = vsel %vm10193_vm2, %v2865_v55, %v2869_v44  ;;  %v836_v30 = vor.u32 %v835_v4, %v10775_v16  ;;  %v1329_v27 = vshrl.u32 %v10738_v22, 16  ;;  %v1332_v1 = vshll.u32 %v10738_v22, 16 }
  0x99   : > { %v3796_v54 = vrot.slane %v3794_v38, 1  ;;  %v426_v15 = vadd.bf16 %v375_v50, %v16061_v58  ;;  %v3275_v33 = vadd.bf16 %v2870_v29, %v10746_v25  ;;  %v1338_v32 = vshll.u32 %v10765_v56, 16 }
  0x9a   : > { %v837_v43 = vrot.slane %v836_v30, 4  ;;  %v1331_v39 = vrot.slane %v1329_v27, 4  ;;  %v1334_v3 = vrot.slane %v1332_v1, 5  ;;  %v1342_v28 = vshrl.u32 %v10765_v56, 16 }
  0x9b   : > { %v10792_v23 = vsel %vm2138_vm3, %v3792_v51, %v3796_v54  ;;  %v683_v21 = vmul.bf16 1061175104, %v426_v15  ;;  %v1203_v7 = vmul.bf16 1048592000, %v426_v15  ;;  %v10800_v60 = vcombine.low %v3274_v8, %v3275_v33  ;;  %v10807_v51 = vld [vmem:[%s10200_s26 + $0x50] sm:$0x1] }
  0x9c   : > { %16062 = vst [vmem:[#allocation31_spill] sm:$0xff] %v10792_v23  ;;  %3948 = vrot.lane.b32.xlu1 %v10792_v23, %s10138_s28  ;;  %v1335_v36 = vor.u32 %v1334_v3, %v1331_v39  ;;  %v1340_v19 = vrot.slane %v1338_v32, 5  ;;  %v10810_v45 = vmul.bf16 1061175104, %v10706_v63  ;;  %v15612_v55 = vmul.bf16 1048592000, %v10798_v14 }
  0x9d   : > { %v839_v25 = vshll.u32 %v683_v21, 16  ;;  %v1348_v44 = vshll.u32 %v1203_v7, 16  ;;  %v1352_v59 = vshrl.u32 %v1203_v7, 16  ;;  %v10815_v38 = vsel %vm10384_vm6, 0, %v10800_v60 }
  0x9e   : > { %16063 = vst [vmem:[#allocation32_spill] sm:$0xff] %v10815_v38  ;;  %4316 = vrot.lane.b32.xlu0 %v10815_v38, %s10138_s28  ;;  %v10820_v4 = vcombine.low %v2692_v5, %v2693_v9  ;;  %v1336_v8 = vrot.slane %v1335_v36, 4  ;;  %v1344_v54 = vrot.slane %v1342_v28, 4  ;;  %v15611_v29 = vmul.bf16 1048592000, %v10804_v13 }
  0x9f   : > { %v841_v20 = vrot.slane %v839_v25, 5  ;;  %v1757_v63 = vadd.bf16 %v1352_v59, %v683_v21  ;;  %v1350_v15 = vrot.slane %v1348_v44, 5  ;;  %v15609_v30 = vmul.bf16 1048592000, %v10807_v51 }
  0xa0   : > { %16064 = vst [vmem:[#allocation33_spill] sm:$0xff] %v10820_v4  ;;  %3996 = vrot.lane.b32.xlu1 %v10779_v46, %s10139_s29  ;;  %v1341_v27 = vsel %vm10193_vm2, %v1336_v8, %v1340_v19  ;;  %v1345_v5 = vor.u32 %v1344_v54, %v1340_v19  ;;  %v15613_v1 = vmul.bf16 1061175104, %v10798_v14  ;;  %v15610_v33 = vmul.bf16 1061175104, %v10804_v13 }
  0xa1   : > { %v10826_v58 = vsel %vm10193_vm2, %v837_v43, %v841_v20  ;;  %v8972_v9 = vcombine.low %v1757_v63, %v1757_v63  ;;  %v16066_v21 = vmul.bf16 1061175104, %v10661_v35  ;;  %v16067_v43 = vmul.bf16 1061175104, %v10678_v49 }
  0xa2   : > { %16065 = vst [vmem:[#allocation34_spill] sm:$0xff] %v10826_v58  ;;  %v3801_v3 = vshll.u32 %v10800_v60, 16  ;;  %4348 = vrot.lane.b32.xlu0 %v10820_v4, %s10139_s29  ;;  %v1346_v32 = vrot.slane %v1345_v5, 4  ;;  %v1755_v25 = vadd.bf16 %v1341_v27, %v10810_v45  ;;  %v16068_v44 = vmul.bf16 1048592000, %v10661_v35 }
  0xa3   : > { %v484_v7 = vadd.bf16 %v16066_v21, %v15612_v55  ;;  %v485_v39 = vadd.bf16 %v16067_v43, %v15611_v29  ;;  %v4126_v28 = vshll.u32 %v8972_v9, 16  ;;  %v3799_v59 = vshrl.u32 %v10800_v60, 16 }
  0xa4   : > { %3678 = vrot.lane.b32.xlu1 %v10820_v4, %s10137_s27  ;;  %v427_v36 = vadd.bf16 %v15613_v1, %v16068_v44  ;;  %v1351_v20 = vsel %vm10193_vm2, %v1346_v32, %v1350_v15  ;;  %v16069_v8 = vmul.bf16 1048592000, %v10678_v49  ;;  %v10865_v35 = vadd.bf16 %v375_v50, %v15609_v30 }
  0xa5   : > { %v10852_v19 = vmul.bf16 1061175104, %v484_v7  ;;  %v1756_v63 = vadd.bf16 %v1351_v20, %v10734_v61  ;;  %v2167_v27 = vmul.bf16 1048592000, %v484_v7  ;;  %v10868_v5 = vmul.bf16 1048592000, %v485_v39 }
  0xa6   : > { %v428_v54 = vadd.bf16 %v15610_v33, %v16069_v8  ;;  %v10870_v60 = vmul.bf16 1061175104, %v485_v39  ;;  %v3803_v9 = vrot.slane %v3801_v3, 1  ;;  %v15625_v49 = vmul.bf16 1061175104, %v10865_v35 }
  0xa7   : > { %v2363_v21 = vshrl.u32 %v10852_v19, 16  ;;  %v10876_v43 = vcombine.low %v1755_v25, %v1756_v63  ;;  %v4128_v32 = vrot.slane %v4126_v28, 1  ;;  %v10878_v44 = vmul.bf16 1048592000, %v427_v36 }
  0xa8   : > { %v10872_v15 = vmul.bf16 1061175104, %v428_v54  ;;  %v2366_v50 = vshll.u32 %v10852_v19, 16  ;;  %v10881_v61 = vmul.bf16 1061175104, %v427_v36  ;;  %v2372_v3 = vshll.u32 %v10870_v60, 16 }
  0xa9   : > { %16070 = vst [vmem:[#allocation35_spill] sm:$0xff] %v10878_v44  ;;  %v2365_v39 = vrot.slane %v2363_v21, 4  ;;  %v4119_v20 = vshrl.u32 %v10876_v43, 16  ;;  %v4121_v8 = vshll.u32 %v10876_v43, 16  ;;  %v2376_v25 = vshrl.u32 %v10870_v60, 16 }
  0xaa   : > { %v853_v7 = vshll.u32 %v10872_v15, 16  ;;  %v2368_v30 = vrot.slane %v2366_v50, 5  ;;  %v2374_v63 = vrot.slane %v2372_v3, 5  ;;  %v2382_v28 = vshll.u32 %v15625_v49, 16 }
  0xab   : > { %v15631_v33 = vmul.bf16 1048592000, %v10865_v35  ;;  %v2876_v36 = vshrl.u32 %v2167_v27, 16  ;;  %v4123_v29 = vrot.slane %v4121_v8, 1  ;;  %v2378_v1 = vrot.slane %v2376_v25, 4 }
  0xac   : > { %v2369_v55 = vor.u32 %v2368_v30, %v2365_v39  ;;  %v2879_v21 = vshll.u32 %v2167_v27, 16  ;;  %v2384_v46 = vrot.slane %v2382_v28, 5  ;;  %v2885_v4 = vshll.u32 %v10868_v5, 16 }
  0xad   : > { %v2878_v41 = vrot.slane %v2876_v36, 4  ;;  %v2889_v38 = vshrl.u32 %v10868_v5, 16  ;;  %v4124_v50 = vor.u32 %v4123_v29, %v4119_v20  ;;  %v2379_v58 = vor.u32 %v2378_v1, %v2374_v63 }
  0xae   : > { %v2370_v22 = vrot.slane %v2369_v55, 4  ;;  %v2881_v3 = vrot.slane %v2879_v21, 5  ;;  %v2887_v56 = vrot.slane %v2885_v4, 5  ;;  %v2895_v49 = vshll.u32 %v15631_v33, 16 }
  0xaf   : > { %v2891_v16 = vrot.slane %v2889_v38, 4  ;;  %v16071_v8 = vmul.bf16 1048592000, %v10732_v40  ;;  %v10898_v39 = vsel %vm2138_vm3, %v4124_v50, %v4128_v32  ;;  %v857_v25 = vshrl.u32 %v10872_v15, 16 }
  0xb0   : > { %16072 = vst [vmem:[#allocation36_spill] sm:$0xff] %v10898_v39  ;;  %v2380_v28 = vrot.slane %v2379_v58, 4  ;;  %v2882_v36 = vor.u32 %v2881_v3, %v2878_v41  ;;  %4270 = vrot.lane.b32.xlu0 %v10898_v39, %s10137_s27  ;;  %v2897_v29 = vrot.slane %v2895_v49, 5  ;;  %v16073_v38 = vmul.bf16 1061175104, %v10732_v40 }
  0xb1   : > { %v2871_v30 = vshrl.u32 %v16071_v8, 16  ;;  %v2892_v55 = vor.u32 %v2891_v16, %v2887_v56  ;;  %v2375_v1 = vsel %vm10193_vm2, %v2370_v22, %v2374_v63  ;;  %v10907_v20 = vmul.bf16 1048592000, %v428_v54 }
  0xb2   : > { %v2883_v21 = vrot.slane %v2882_v36, 4  ;;  %v3804_v32 = vor.u32 %v3803_v9, %v3799_v59  ;;  %v2385_v50 = vsel %vm10193_vm2, %v2380_v28, %v2384_v46  ;;  %v2694_v3 = vadd.bf16 %v2375_v1, %v2167_v27  ;;  %v10093_v59 = vld [vmem:[%s15550_s1 + $0x80] sm:$0xff]  }
  0xb3   : > { %v3276_v4 = vadd.bf16 %v2871_v30, %v16073_v38  ;;  %16074 = vst [vmem:[#allocation37_spill] sm:$0xff] %v10907_v20  ;;  %v2893_v58 = vrot.slane %v2892_v55, 4  ;;  %v378_v8 = vmul.bf16 1061175104, %v10807_v51  ;;  %v10914_v40 = vrot.slane %v853_v7, 5  ;;  %9626 = vmatprep.subr.bf16.mxu1 %v10093_v59 }
  0xb4   : > { %v2888_v16 = vsel %vm10193_vm2, %v2883_v21, %v2887_v56  ;;  %v859_v49 = vrot.slane %v857_v25, 4  ;;  %v1357_v22 = vshrl.u32 %v10878_v44, 16  ;;  %v2695_v9 = vadd.bf16 %v2385_v50, %v10868_v5  ;;  %v10934_v5 = vld [vmem:[%s10200_s26 + $0x54] sm:$0xf]  ;;  %9627 = vmatpush3.bf16.msra.mxu1 %v10093_v59 }
  0xb5   : > { %v8956_v41 = vcombine.low %v3276_v4, %v3276_v4  ;;  %16075 = vst [vmem:[#allocation38_spill] sm:$0xff] %v10914_v40  ;;  %v2898_v46 = vsel %vm10193_vm2, %v2893_v58, %v2897_v29  ;;  %v3277_v54 = vadd.bf16 %v2888_v16, %v10852_v19  ;;  %v16076_v7 = vmul.bf16 1048592000, %v10683_v34  ;;  %v10947_v58 = vld [vmem:[%s10200_s26 + $0x58] sm:$0xf] }
  0xb6   : > { %v3278_v56 = vadd.bf16 %v2898_v46, %v10870_v60  ;;  %v860_v30 = vor.u32 %v859_v49, %v10914_v40  ;;  %v1359_v25 = vrot.slane %v1357_v22, 4  ;;  %v1360_v36 = vshll.u32 %v10878_v44, 16 }
  0xb7   : > { %v3806_v27 = vshll.u32 %v8956_v41, 16  ;;  %v429_v63 = vadd.bf16 %v378_v8, %v16076_v7  ;;  %v1366_v19 = vshll.u32 %v10907_v20, 16  ;;  %v1370_v55 = vshrl.u32 %v10907_v20, 16 }
  0xb8   : > { %v10936_v60 = vcombine.low %v3277_v54, %v3278_v56  ;;  %v10941_v34 = vsel %vm10384_vm6, 0, %v10876_v43  ;;  %v1362_v1 = vrot.slane %v1360_v36, 5  ;;  %v10956_v43 = vcombine.low %v2694_v3, %v2695_v9  ;;  %v10961_v54 = vld [vmem:[%s10200_s26 + $0x5c] sm:$0x1] }
  0xb9   : > { %v3808_v28 = vrot.slane %v3806_v27, 1  ;;  %16077 = vst [vmem:[#allocation39_spill] sm:$0xff] %v10941_v34  ;;  %v686_v29 = vmul.bf16 1061175104, %v429_v63  ;;  %v1204_v38 = vmul.bf16 1048592000, %v429_v63 }
  0xba   : > { %v1368_v21 = vrot.slane %v1366_v19, 5  ;;  %v1372_v50 = vrot.slane %v1370_v55, 4  ;;  %v10952_v41 = vsel %vm10384_vm6, 0, %v10936_v60  ;;  %16080 = vst [vmem:[#allocation42_spill] sm:$0xff] %v10956_v43  ;;  %v861_v16 = vrot.slane %v860_v30, 4 }
  0xbb   : > { %v10944_v4 = vsel %vm2138_vm3, %v3804_v32, %v3808_v28  ;;  %16079 = vst [vmem:[#allocation41_spill] sm:$0xff] %v10952_v41  ;;  %v863_v49 = vshll.u32 %v686_v29, 16  ;;  %4318 = vrot.lane.b32.xlu0 %v10952_v41, %s10138_s28  ;;  %v1363_v32 = vor.u32 %v1362_v1, %v1359_v25  ;;  %v1376_v59 = vshll.u32 %v1204_v38, 16 }
  0xbc   : > { %16078 = vst [vmem:[#allocation40_spill] sm:$0xff] %v10944_v4  ;;  %3950 = vrot.lane.b32.xlu1 %v10944_v4, %s10138_s28  ;;  %v1373_v22 = vor.u32 %v1372_v50, %v1368_v21  ;;  %v1380_v46 = vshrl.u32 %v1204_v38, 16  ;;  %v15629_v56 = vmul.bf16 1048592000, %v10934_v5  ;;  %v15627_v7 = vmul.bf16 1048592000, %v10947_v58 }
  0xbd   : > { %v865_v27 = vrot.slane %v863_v49, 5  ;;  %v1364_v63 = vrot.slane %v1363_v32, 4  ;;  %v1378_v3 = vrot.slane %v1376_v59, 5  ;;  %v15626_v25 = vmul.bf16 1048592000, %v10961_v54 }
  0xbe   : > { %v1374_v28 = vrot.slane %v1373_v22, 4  ;;  %v1760_v9 = vadd.bf16 %v1380_v46, %v686_v29  ;;  %v15630_v36 = vmul.bf16 1061175104, %v10934_v5  ;;  %v15628_v19 = vmul.bf16 1061175104, %v10947_v58 }
  0xbf   : > { %v10969_v30 = vsel %vm10193_vm2, %v861_v16, %v865_v27  ;;  %4350 = vrot.lane.b32.xlu0 %v10956_v43, %s10139_s29  ;;  %v1369_v55 = vsel %vm10193_vm2, %v1364_v63, %v1368_v21  ;;  %v16082_v1 = vmul.bf16 1061175104, %v10798_v14  ;;  %v16083_v32 = vmul.bf16 1048592000, %v10798_v14 }
  0xc0   : > { %3998 = vrot.lane.b32.xlu1 %v10941_v34, %s10139_s29  ;;  %16081 = vst [vmem:[#allocation43_spill] sm:$0xff] %v10969_v30  ;;  %v1379_v29 = vsel %vm10193_vm2, %v1374_v28, %v1378_v3  ;;  %v8973_v38 = vcombine.low %v1760_v9, %v1760_v9  ;;  %v1758_v16 = vadd.bf16 %v1369_v55, %v10881_v61  ;;  %v3813_v21 = vshll.u32 %v10936_v60, 16 }
  0xc1   : > { %v487_v50 = vadd.bf16 %v16082_v1, %v15629_v56  ;;  %v1759_v49 = vadd.bf16 %v1379_v29, %v10872_v15  ;;  %v10990_v22 = vadd.bf16 %v15630_v36, %v16083_v32  ;;  %v16084_v63 = vmul.bf16 1048592000, %v10804_v13 }
  0xc2   : > { %v4138_v59 = vshll.u32 %v8973_v38, 16  ;;  %v16085_v14 = vmul.bf16 1061175104, %v10804_v13  ;;  %v3811_v3 = vshrl.u32 %v10936_v60, 16  ;;  %v11012_v9 = vadd.bf16 %v378_v8, %v15626_v25  ;;  %v10095_v60 = vld [vmem:[%s15550_s1 + $0x88] sm:$0xff]  }
  0xc3   : > { %v10993_v46 = vmul.bf16 1048592000, %v487_v50  ;;  %v10995_v27 = vcombine.low %v1758_v16, %v1759_v49  ;;  %v431_v15 = vadd.bf16 %v15628_v19, %v16084_v63  ;;  %v11015_v55 = vmul.bf16 1048592000, %v10990_v22  ;;  %9628 = vmatprep.subr.bf16.mxu1 %v10095_v60 }
  0xc4   : > { %3680 = vrot.lane.b32.xlu1 %v10956_v43, %s10137_s27  ;;  %v488_v28 = vadd.bf16 %v16085_v14, %v15627_v7  ;;  %v3815_v16 = vrot.slane %v3813_v21, 1  ;;  %v4140_v49 = vrot.slane %v4138_v59, 1  ;;  %v2209_v32 = vmul.bf16 1061175104, %v487_v50  ;;  %9629 = vmatpush3.bf16.msra.mxu1 %v10095_v60 }
  0xc5   : > { %16086 = vst [vmem:[#allocation44_spill] sm:$0xff] %v11015_v55  ;;  %v4131_v29 = vshrl.u32 %v10995_v27, 16  ;;  %v4133_v38 = vshll.u32 %v10995_v27, 16  ;;  %v11019_v1 = vmul.bf16 1061175104, %v431_v15  ;;  %v2904_v13 = vshrl.u32 %v10993_v46, 16 }
  0xc6   : > { %v11025_v8 = vmul.bf16 1061175104, %v488_v28  ;;  %v11028_v25 = vmul.bf16 1048592000, %v488_v28  ;;  %v15642_v7 = vmul.bf16 1061175104, %v11012_v9 }
  0xc7   : > { %v4135_v63 = vrot.slane %v4133_v38, 1  ;;  %v877_v14 = vshll.u32 %v11019_v1, 16  ;;  %v2387_v19 = vshrl.u32 %v2209_v32, 16  ;;  %v2390_v56 = vshll.u32 %v2209_v32, 16  ;;  %9631 = vmatmul.mubr.msk.bf16.vlgmr.msra.gmra.mrb[0].mxu1 %vm4389_vm7, %v10674_v53 }
  0xc8   : > { %v2396_v36 = vshll.u32 %v11025_v8, 16  ;;  %v2400_v33 = vshrl.u32 %v11025_v8, 16  ;;  %v2406_v50 = vshll.u32 %v15642_v7, 16  ;;  %v15647_v59 = vmul.bf16 1048592000, %v11012_v9  ;;  %9634 = vmatprep.mubr.msk.bf16.mxu1 %vm4389_vm7, %v10792_v23 }
  0xc9   : > { %v4136_v21 = vor.u32 %v4135_v63, %v4131_v29  ;;  %v2906_v38 = vrot.slane %v2904_v13, 4  ;;  %v2389_v34 = vrot.slane %v2387_v19, 4  ;;  %v2392_v28 = vrot.slane %v2390_v56, 5 }
  0xca   : > { %v2398_v39 = vrot.slane %v2396_v36, 5  ;;  %v2402_v43 = vrot.slane %v2400_v33, 4  ;;  %v2408_v44 = vrot.slane %v2406_v50, 5  ;;  %v2907_v40 = vshll.u32 %v10993_v46, 16 }
  0xcb   : > { %v11037_v41 = vsel %vm2138_vm3, %v4136_v21, %v4140_v49  ;;  %v2913_v30 = vshll.u32 %v11028_v25, 16  ;;  %v2393_v29 = vor.u32 %v2392_v28, %v2389_v34  ;;  %v2917_v63 = vshrl.u32 %v11028_v25, 16 }
  0xcc   : > { %16087 = vst [vmem:[#allocation45_spill] sm:$0xff] %v11037_v41  ;;  %4272 = vrot.lane.b32.xlu0 %v11037_v41, %s10137_s27  ;;  %v2403_v60 = vor.u32 %v2402_v43, %v2398_v39  ;;  %v2923_v56 = vshll.u32 %v15647_v59, 16  ;;  %v11046_v36 = vmul.bf16 1048592000, %v431_v15  ;;  %v2909_v33 = vrot.slane %v2907_v40, 5 }
  0xcd   : > { %v2915_v19 = vrot.slane %v2913_v30, 5  ;;  %v16089_v13 = vmul.bf16 1048592000, %v10865_v35  ;;  %v881_v21 = vshrl.u32 %v11019_v1, 16  ;;  %v2394_v50 = vrot.slane %v2393_v29, 4 }
  0xce   : > { %16088 = vst [vmem:[#allocation46_spill] sm:$0xff] %v11046_v36  ;;  %v2404_v7 = vrot.slane %v2403_v60, 4  ;;  %v2919_v20 = vrot.slane %v2917_v63, 4  ;;  %v2910_v41 = vor.u32 %v2909_v33, %v2906_v38  ;;  %v2925_v34 = vrot.slane %v2923_v56, 5 }
  0xcf   : > { %v2899_v49 = vshrl.u32 %v16089_v13, 16  ;;  %v16090_v43 = vmul.bf16 1061175104, %v10865_v35  ;;  %v381_v47 = vmul.bf16 1061175104, %v10961_v54  ;;  %v2399_v40 = vsel %vm10193_vm2, %v2394_v50, %v2398_v39  ;;  %9635 = vmatmul.mubr.msk.bf16.gmra.mrb[4].mxu1 %vm4389_vm7, %v10944_v4 }
  0xd0   : > { %v2920_v59 = vor.u32 %v2919_v20, %v2915_v19  ;;  %v2409_v30 = vsel %vm10193_vm2, %v2404_v7, %v2408_v44  ;;  %v11058_v15 = vrot.slane %v877_v14, 5  ;;  %v2911_v13 = vrot.slane %v2910_v41, 4 }
  0xd1   : > { %v3279_v28 = vadd.bf16 %v2899_v49, %v16090_v43  ;;  %v3816_v60 = vor.u32 %v3815_v16, %v3811_v3  ;;  %v2696_v38 = vadd.bf16 %v2399_v40, %v10993_v46  ;;  %v16092_v35 = vmul.bf16 1048592000, %v10807_v51 }
  0xd2   : > { %16091 = vst [vmem:[#allocation47_spill] sm:$0xff] %v11058_v15  ;;  %v2921_v63 = vrot.slane %v2920_v59, 4  ;;  %v883_v20 = vrot.slane %v881_v21, 4  ;;  %v1385_v33 = vshrl.u32 %v11015_v55, 16  ;;  %v2916_v39 = vsel %vm10193_vm2, %v2911_v13, %v2915_v19 }
  0xd3   : > { %v8957_v29 = vcombine.low %v3279_v28, %v3279_v28  ;;  %v432_v56 = vadd.bf16 %v381_v47, %v16092_v35  ;;  %v2697_v7 = vadd.bf16 %v2409_v30, %v11028_v25  ;;  %v1388_v41 = vshll.u32 %v11015_v55, 16  ;;  %v11082_v30 = vld [vmem:[%s10200_s26 + $0x60] sm:$0xf]  ;;  %v11087_v35 = vld [vmem:[%s10200_s26 + $0x64] sm:$0xf] }
  0xd4   : > { %v2926_v46 = vsel %vm10193_vm2, %v2921_v63, %v2925_v34  ;;  %v3280_v3 = vadd.bf16 %v2916_v39, %v2209_v32  ;;  %v884_v16 = vor.u32 %v883_v20, %v11058_v15  ;;  %v1387_v21 = vrot.slane %v1385_v33, 4 }
  0xd5   : > { %v3818_v44 = vshll.u32 %v8957_v29, 16  ;;  %v689_v51 = vmul.bf16 1061175104, %v432_v56  ;;  %v3281_v14 = vadd.bf16 %v2926_v46, %v11025_v8  ;;  %v1205_v49 = vmul.bf16 1048592000, %v432_v56 }
  0xd6   : > { %v885_v19 = vrot.slane %v884_v16, 4  ;;  %v1390_v43 = vrot.slane %v1388_v41, 5  ;;  %v1394_v25 = vshll.u32 %v11046_v36, 16  ;;  %v1398_v32 = vshrl.u32 %v11046_v36, 16  ;;  %v11111_v46 = vld [vmem:[%s10200_s26 + $0x68] sm:$0x1] }
  0xd7   : > { %v3820_v59 = vrot.slane %v3818_v44, 1  ;;  %v887_v50 = vshll.u32 %v689_v51, 16  ;;  %v11075_v28 = vcombine.low %v3280_v3, %v3281_v14  ;;  %v1404_v40 = vshll.u32 %v1205_v49, 16 }
  0xd8   : > { %v1391_v13 = vor.u32 %v1390_v43, %v1387_v21  ;;  %v1396_v29 = vrot.slane %v1394_v25, 5  ;;  %v1408_v63 = vshrl.u32 %v1205_v49, 16  ;;  %v11090_v56 = vmul.bf16 1061175104, %v10990_v22 }
  0xd9   : > { %v11078_v34 = vsel %vm2138_vm3, %v3816_v60, %v3820_v59  ;;  %v889_v8 = vrot.slane %v887_v50, 5  ;;  %v11095_v60 = vsel %vm10384_vm6, 0, %v11075_v28  ;;  %v11100_v20 = vsel %vm10384_vm6, 0, %v10995_v27 }
  0xda   : > { %16093 = vst [vmem:[#allocation48_spill] sm:$0xff] %v11078_v34  ;;  %3952 = vrot.lane.b32.xlu1 %v11078_v34, %s10138_s28  ;;  %16094 = vst [vmem:[#allocation49_spill] sm:$0xff] %v11095_v60  ;;  %v1400_v33 = vrot.slane %v1398_v32, 4  ;;  %4320 = vrot.lane.b32.xlu0 %v11095_v60, %s10138_s28  ;;  %v11104_v39 = vcombine.low %v2696_v38, %v2697_v7  ;;  %v1392_v44 = vrot.slane %v1391_v13, 4  ;;  %v1406_v16 = vrot.slane %v1404_v40, 5 }
  0xdb   : > { %16095 = vst [vmem:[#allocation50_spill] sm:$0xff] %v11100_v20  ;;  %v11108_v22 = vsel %vm10193_vm2, %v885_v19, %v889_v8  ;;  %v1763_v41 = vadd.bf16 %v1408_v63, %v689_v51  ;;  %v15650_v14 = vmul.bf16 1048592000, %v11082_v30  ;;  %v15649_v27 = vmul.bf16 1048592000, %v11087_v35  ;;  %9638 = vmatprep.mubr.msk.bf16.mxu1 %vm4389_vm7, %v11078_v34 }
  0xdc   : > { %16096 = vst [vmem:[#allocation51_spill] sm:$0xff] %v11104_v39  ;;  %16097 = vst [vmem:[#allocation52_spill] sm:$0xff] %v11108_v22  ;;  %v1401_v3 = vor.u32 %v1400_v33, %v1396_v29  ;;  %v3825_v59 = vshll.u32 %v11075_v28, 16  ;;  %v1397_v38 = vsel %vm10193_vm2, %v1392_v44, %v1396_v29  ;;  %v15652_v49 = vmul.bf16 1061175104, %v11082_v30 }
  0xdd   : > { %v8974_v7 = vcombine.low %v1763_v41, %v1763_v41  ;;  %v15648_v21 = vmul.bf16 1048592000, %v11111_v46  ;;  %v15651_v19 = vmul.bf16 1061175104, %v11087_v35  ;;  %v16098_v50 = vmul.bf16 1061175104, %v10934_v5 }
  0xde   : > { %4000 = vrot.lane.b32.xlu1 %v11100_v20, %s10139_s29  ;;  %v1402_v51 = vrot.slane %v1401_v3, 4  ;;  %4352 = vrot.lane.b32.xlu0 %v11104_v39, %s10139_s29  ;;  %v1761_v25 = vadd.bf16 %v1397_v38, %v11090_v56  ;;  %v16099_v32 = vmul.bf16 1048592000, %v10934_v5  ;;  %v16100_v29 = vmul.bf16 1061175104, %v10947_v58 }
  0xdf   : > { %v490_v43 = vadd.bf16 %v16098_v50, %v15650_v14  ;;  %v4150_v13 = vshll.u32 %v8974_v7, 16  ;;  %v16101_v3 = vmul.bf16 1048592000, %v10947_v58  ;;  %v3823_v38 = vshrl.u32 %v11075_v28, 16 }
  0xe0   : > { %v11134_v40 = vadd.bf16 %v15652_v49, %v16099_v32  ;;  %v1407_v8 = vsel %vm10193_vm2, %v1402_v51, %v1406_v16  ;;  %v491_v63 = vadd.bf16 %v16100_v29, %v15649_v27  ;;  %v3827_v7 = vrot.slane %v3825_v59, 1 }
  0xe1   : > { %v11142_v33 = vmul.bf16 1061175104, %v490_v43  ;;  %v1762_v5 = vadd.bf16 %v1407_v8, %v11019_v1  ;;  %v434_v16 = vadd.bf16 %v15651_v19, %v16101_v3  ;;  %v11158_v51 = vadd.bf16 %v381_v47, %v15648_v21 }
  0xe2   : > { %3682 = vrot.lane.b32.xlu1 %v11104_v39, %s10137_s27  ;;  %v2171_v50 = vmul.bf16 1048592000, %v490_v43  ;;  %v11163_v1 = vmul.bf16 1048592000, %v11134_v40  ;;  %v11167_v58 = vmul.bf16 1061175104, %v491_v63 }
  0xe3   : > { %v11160_v32 = vcombine.low %v1761_v25, %v1762_v5  ;;  %v11165_v8 = vmul.bf16 1061175104, %v434_v16  ;;  %v4152_v29 = vrot.slane %v4150_v13, 1  ;;  %v11169_v3 = vmul.bf16 1048592000, %v491_v63 }
  0xe4   : > { %16102 = vst [vmem:[#allocation53_spill] sm:$0xff] %v11163_v1  ;;  %v15664_v28 = vmul.bf16 1061175104, %v11158_v51  ;;  %v2411_v59 = vshrl.u32 %v11142_v33, 16  ;;  %v2414_v27 = vshll.u32 %v11142_v33, 16  ;;  %v2420_v14 = vshll.u32 %v11167_v58, 16 }
  0xe5   : > { %v4143_v47 = vshrl.u32 %v11160_v32, 16  ;;  %v4145_v43 = vshll.u32 %v11160_v32, 16  ;;  %v901_v25 = vshll.u32 %v11165_v8, 16  ;;  %v905_v5 = vshrl.u32 %v11165_v8, 16 }
  0xe6   : > { %v2413_v21 = vrot.slane %v2411_v59, 4  ;;  %v2424_v13 = vshrl.u32 %v11167_v58, 16  ;;  %v2430_v41 = vshll.u32 %v15664_v28, 16  ;;  %v15665_v44 = vmul.bf16 1048592000, %v11158_v51 }
  0xe7   : > { %v4147_v63 = vrot.slane %v4145_v43, 1  ;;  %v2932_v19 = vshrl.u32 %v2171_v50, 16  ;;  %v2416_v49 = vrot.slane %v2414_v27, 5  ;;  %v2422_v20 = vrot.slane %v2420_v14, 5 }
  0xe8   : > { %v2426_v39 = vrot.slane %v2424_v13, 4  ;;  %v2935_v60 = vshll.u32 %v2171_v50, 16  ;;  %v2432_v15 = vrot.slane %v2430_v41, 5  ;;  %v2941_v22 = vshll.u32 %v11169_v3, 16 }
  0xe9   : > { %v4148_v55 = vor.u32 %v4147_v63, %v4143_v47  ;;  %v2934_v59 = vrot.slane %v2932_v19, 4  ;;  %v2417_v36 = vor.u32 %v2416_v49, %v2413_v21  ;;  %v2945_v43 = vshrl.u32 %v11169_v3, 16  ;;  %v10085_v19 = vld [vmem:[%s15550_s1] sm:$0xff]  }
  0xea   : > { %v2427_v11 = vor.u32 %v2426_v39, %v2422_v20  ;;  %v2937_v17 = vrot.slane %v2935_v60, 5  ;;  %v2943_v28 = vrot.slane %v2941_v22, 5  ;;  %v2951_v27 = vshll.u32 %v15665_v44, 16 }
  0xeb   : > { %v11186_v62 = vsel %vm2138_vm3, %v4148_v55, %v4152_v29  ;;  %v16104_v14 = vmul.bf16 1048592000, %v11012_v9  ;;  %v2418_v60 = vrot.slane %v2417_v36, 4  ;;  %v2947_v21 = vrot.slane %v2945_v43, 4 }
  0xec   : > { %16103 = vst [vmem:[#allocation54_spill] sm:$0xff] %v11186_v62  ;;  %4274 = vrot.lane.b32.xlu0 %v11186_v62, %s10137_s27  ;;  %v2428_v39 = vrot.slane %v2427_v11, 4  ;;  %v2938_v49 = vor.u32 %v2937_v17, %v2934_v59  ;;  %v11197_v55 = vmul.bf16 1048592000, %v434_v16  ;;  %v2953_v22 = vrot.slane %v2951_v27, 5 }
  0xed   : > { %v2927_v13 = vshrl.u32 %v16104_v14, 16  ;;  %v16106_v41 = vmul.bf16 1061175104, %v11012_v9  ;;  %v2948_v63 = vor.u32 %v2947_v21, %v2943_v28  ;;  %v15682_v14 = vmov 0   ;;  %v10086_v9 = vld [vmem:[%s15550_s1 + $0x8] sm:$0xff]  }
  0xee   : > { %16105 = vst [vmem:[#allocation55_spill] sm:$0xff] %v11197_v55  ;;  %v2939_v47 = vrot.slane %v2938_v49, 4  ;;  %6072 = vmatprep.subr.bf16.mxu0 %v15682_v14  ;;  %v2423_v44 = vsel %vm10193_vm2, %v2418_v60, %v2422_v20  ;;  %v2433_v36 = vsel %vm10193_vm2, %v2428_v39, %v2432_v15  ;;  %v3828_v17 = vor.u32 %v3827_v7, %v3823_v38  ;;  %v10087_v39 = vld [vmem:[%s15550_s1 + $0x10] sm:$0xff]  }
  0xef   : > { %v3282_v29 = vadd.bf16 %v2927_v13, %v16106_v41  ;;  %6073 = vmatpush1.bf16.msra.mxu0 %v10085_v19  ;;  %v2698_v16 = vadd.bf16 %v2423_v44, %v2171_v50  ;;  %v384_v59 = vmul.bf16 1061175104, %v11111_v46  ;;  %v2949_v27 = vrot.slane %v2948_v63, 4 }
  0xf0   : > { %v2944_v43 = vsel %vm10193_vm2, %v2939_v47, %v2943_v28  ;;  %6074 = vmatprep.subr.bf16.mxu0 %v15682_v14  ;;  %v11213_v20 = vrot.slane %v901_v25, 5  ;;  %v907_v13 = vrot.slane %v905_v5, 4  ;;  %v2699_v44 = vadd.bf16 %v2433_v36, %v11169_v3  ;;  %v11239_v36 = vld [vmem:[%s10200_s26 + $0x6c] sm:$0xf] }
  0xf1   : > { %v8958_v11 = vcombine.low %v3282_v29, %v3282_v29  ;;  %v3283_v15 = vadd.bf16 %v2944_v43, %v11142_v33  ;;  %v16108_v7 = vmul.bf16 1048592000, %v10961_v54  ;;  %v2954_v19 = vsel %vm10193_vm2, %v2949_v27, %v2953_v22 }
  0xf2   : > { %16107 = vst [vmem:[#allocation56_spill] sm:$0xff] %v11213_v20  ;;  %v908_v28 = vor.u32 %v907_v13, %v11213_v20  ;;  %v1413_v60 = vshrl.u32 %v11163_v1, 16  ;;  %v1416_v25 = vshll.u32 %v11163_v1, 16  ;;  %v3284_v33 = vadd.bf16 %v2954_v19, %v11167_v58  ;;  %v10088_v19 = vld [vmem:[%s15550_s1 + $0x18] sm:$0xff]  }
  0xf3   : > { %v3830_v38 = vshll.u32 %v8958_v11, 16  ;;  %v435_v50 = vadd.bf16 %v384_v59, %v16108_v7  ;;  %6075 = vmatpush1.bf16.msra.mxu0 %v10086_v9  ;;  %v1422_v41 = vshll.u32 %v11197_v55, 16  ;;  %v1426_v63 = vshrl.u32 %v11197_v55, 16  ;;  %v11242_v11 = vld [vmem:[%s10200_s26 + $0x70] sm:$0xf] }
  0xf4   : > { %v909_v49 = vrot.slane %v908_v28, 4  ;;  %v1415_v21 = vrot.slane %v1413_v60, 4  ;;  %v1418_v22 = vrot.slane %v1416_v25, 5  ;;  %6076 = vmatprep.subr.bf16.mxu0 %v15682_v14  ;;  %v11232_v29 = vcombine.low %v3283_v15, %v3284_v33 }
  0xf5   : > { %v3832_v5 = vrot.slane %v3830_v38, 1  ;;  %v692_v3 = vmul.bf16 1061175104, %v435_v50  ;;  %v1206_v54 = vmul.bf16 1048592000, %v435_v50  ;;  %v1424_v43 = vrot.slane %v1422_v41, 5 }
  0xf6   : > { %v1419_v9 = vor.u32 %v1418_v22, %v1415_v21  ;;  %v11247_v38 = vld [vmem:[%s10200_s26 + $0x74] sm:$0x1]  ;;  %v11250_v15 = vmul.bf16 1061175104, %v11134_v40  ;;  %v11260_v7 = vsel %vm10384_vm6, 0, %v11160_v32  ;;  %v11267_v40 = vcombine.low %v2698_v16, %v2699_v44 }
  0xf7   : > { %v11235_v58 = vsel %vm2138_vm3, %v3828_v17, %v3832_v5  ;;  %v911_v47 = vshll.u32 %v692_v3, 16  ;;  %v1432_v27 = vshll.u32 %v1206_v54, 16  ;;  %v1436_v13 = vshrl.u32 %v1206_v54, 16  ;;  %16112 = vst [vmem:[#allocation60_spill] sm:$0xff] %v11260_v7  ;;  %6077 = vmatpush1.bf16.msra.mxu0 %v10087_v39 }
  0xf8   : > { %16109 = vst [vmem:[#allocation57_spill] sm:$0xff] %v11235_v58  ;;  %3954 = vrot.lane.b32.xlu1 %v11235_v58, %s10138_s28  ;;  %16110 = vst [vmem:[#allocation58_spill] sm:$0xff] %v11250_v15  ;;  %v11255_v17 = vsel %vm10384_vm6, 0, %v11232_v29  ;;  %v1420_v28 = vrot.slane %v1419_v9, 4  ;;  %v1428_v60 = vrot.slane %v1426_v63, 4  ;;  %6078 = vmatprep.subr.bf16.mxu0 %v15682_v14  ;;  %v3837_v63 = vshll.u32 %v11232_v29, 16 }
  0xf9   : > { %16111 = vst [vmem:[#allocation59_spill] sm:$0xff] %v11255_v17  ;;  %v913_v50 = vrot.slane %v911_v47, 5  ;;  %4322 = vrot.lane.b32.xlu0 %v11255_v17, %s10138_s28  ;;  %16113 = vst [vmem:[#allocation61_spill] sm:$0xff] %v11267_v40  ;;  %v1766_v25 = vadd.bf16 %v1436_v13, %v692_v3  ;;  %v1434_v33 = vrot.slane %v1432_v27, 5  ;;  %v15668_v5 = vmul.bf16 1048592000, %v11239_v36  ;;  %9639 = vmatmul.mubr.msk.bf16.gmra.mrb[8].mxu1 %vm4389_vm7, %v11235_v58 }
  0xfa   : > { %v15667_v54 = vmul.bf16 1048592000, %v11242_v11  ;;  %v1425_v16 = vsel %vm10193_vm2, %v1420_v28, %v1424_v43  ;;  %v1429_v44 = vor.u32 %v1428_v60, %v1424_v43  ;;  %v15666_v3 = vmul.bf16 1048592000, %v11247_v38  ;;  %v10089_v47 = vld [vmem:[%s15550_s1 + $0x20] sm:$0xff]  }
  0xfb   : > { %v11272_v32 = vsel %vm10193_vm2, %v909_v49, %v913_v50  ;;  %v8975_v39 = vcombine.low %v1766_v25, %v1766_v25  ;;  %v15670_v21 = vmul.bf16 1061175104, %v11239_v36  ;;  %v15669_v49 = vmul.bf16 1061175104, %v11242_v11  ;;  %6079 = vmatpush1.bf16.msra.mxu0 %v10088_v19 }
  0xfc   : > { %16114 = vst [vmem:[#allocation62_spill] sm:$0xff] %v11272_v32  ;;  %4002 = vrot.lane.b32.xlu1 %v11260_v7, %s10139_s29  ;;  %v16115_v22 = vmul.bf16 1061175104, %v11082_v30  ;;  %v1430_v9 = vrot.slane %v1429_v44, 4  ;;  %v16116_v43 = vmul.bf16 1061175104, %v11087_v35  ;;  %6080 = vmatprep.subr.bf16.mxu0 %v15682_v14  ;;  %v1764_v60 = vadd.bf16 %v1425_v16, %v11250_v15 }
  0xfd   : > { %4354 = vrot.lane.b32.xlu0 %v11267_v40, %s10139_s29  ;;  %v16117_v13 = vshrl.u32 %v10460_v6, 16  ;;  %v16118_v19 = vshll.u32 %v10460_v6, 16 }
  0xfe   : > { %v493_v41 = vadd.bf16 %v16115_v22, %v15668_v5  ;;  %v494_v27 = vadd.bf16 %v16116_v43, %v15667_v54  ;;  %v1435_v44 = vsel %vm10193_vm2, %v1430_v9, %v1434_v33  ;;  %v4162_v22 = vshll.u32 %v8975_v39, 16 }
  0xff   : > { %v11300_v50 = vrot.slane %v16117_v13, 4  ;;  %v11304_v28 = vrot.slane %v16118_v19, 5  ;;  %v11317_v43 = vadd.bf16 %v384_v59, %v15666_v3  ;;  %v3835_v13 = vshrl.u32 %v11232_v29, 16  ;;  %6081 = vmatpush1.bf16.msra.mxu0 %v10089_v47  ;;  %v10090_v59 = vld [vmem:[%s15550_s1 + $0x28] sm:$0xff]  }
 0x100   : > { %v11307_v25 = vmul.bf16 1061175104, %v493_v41  ;;  %3684 = vrot.lane.b32.xlu1 %v11267_v40, %s10137_s27  ;;  %v11319_v6 = vmul.bf16 1061175104, %v494_v27  ;;  %v1765_v16 = vadd.bf16 %v1435_v44, %v11165_v8  ;;  %v16119_v19 = vmul.bf16 1048592000, %v11082_v30  ;;  %6082 = vmatprep.subr.bf16.mxu0 %v15682_v14 }
 0x101   : > { %v16120_v39 = vmul.bf16 1048592000, %v11087_v35  ;;  %v3839_v3 = vrot.slane %v3837_v63, 1  ;;  %v11345_v54 = vmul.bf16 1048592000, %v494_v27 }
 0x102   : > { %v11327_v33 = vadd.bf16 %v15670_v21, %v16119_v19  ;;  %v2435_v8 = vshrl.u32 %v11307_v25, 16  ;;  %v2438_v30 = vshll.u32 %v11307_v25, 16  ;;  %v11340_v44 = vcombine.low %v1764_v60, %v1765_v16 }
 0x103   : > { %v437_v9 = vadd.bf16 %v15669_v49, %v16120_v39  ;;  %v2173_v19 = vmul.bf16 1048592000, %v493_v41  ;;  %v2444_v47 = vshll.u32 %v11319_v6, 16  ;;  %v4164_v39 = vrot.slane %v4162_v22, 1  ;;  %6083 = vmatpush1.bf16.msra.mxu0 %v10090_v59  ;;  %v10091_v41 = vld [vmem:[%s15550_s1 + $0x30] sm:$0xff]  }
 0x104   : > { %v2437_v5 = vrot.slane %v2435_v8, 4  ;;  %v2440_v63 = vrot.slane %v2438_v30, 5  ;;  %v4155_v49 = vshrl.u32 %v11340_v44, 16  ;;  %v4157_v21 = vshll.u32 %v11340_v44, 16  ;;  %6084 = vmatprep.subr.bf16.mxu0 %v15682_v14 }
 0x105   : > { %v11342_v35 = vmul.bf16 1061175104, %v437_v9  ;;  %v11350_v29 = vmul.bf16 1048592000, %v11327_v33  ;;  %v2446_v22 = vrot.slane %v2444_v47, 5  ;;  %v2448_v27 = vshrl.u32 %v11319_v6, 16 }
 0x106   : > { %v2441_v16 = vor.u32 %v2440_v63, %v2437_v5  ;;  %v16122_v8 = vmul.bf16 1061175104, %v11317_v43  ;;  %v4159_v7 = vrot.slane %v4157_v21, 1  ;;  %v15686_v62 = vmul.bf16 1048592000, %v11317_v43 }
 0x107   : > { %16121 = vst [vmem:[#allocation63_spill] sm:$0xff] %v11350_v29  ;;  %v925_v60 = vshll.u32 %v11342_v35, 16  ;;  %v2960_v17 = vshrl.u32 %v2173_v19, 16  ;;  %v2963_v1 = vshll.u32 %v2173_v19, 16  ;;  %v2450_v59 = vrot.slane %v2448_v27, 4  ;;  %6085 = vmatpush1.bf16.msra.mxu0 %v10091_v41 }
 0x108   : > { %v2454_v30 = vshll.u32 %v16122_v8, 16  ;;  %v2442_v20 = vrot.slane %v2441_v16, 4  ;;  %v2969_v32 = vshll.u32 %v11345_v54, 16  ;;  %v4160_v55 = vor.u32 %v4159_v7, %v4155_v49  ;;  %v10092_v8 = vld [vmem:[%s15550_s1 + $0x38] sm:$0xff]  }
 0x109   : > { %v2962_v5 = vrot.slane %v2960_v17, 4  ;;  %v2965_v47 = vrot.slane %v2963_v1, 5  ;;  %v2973_v63 = vshrl.u32 %v11345_v54, 16  ;;  %v2451_v21 = vor.u32 %v2450_v59, %v2446_v22 }
 0x10a   : > { %v2456_v40 = vrot.slane %v2454_v30, 5  ;;  %v2971_v14 = vrot.slane %v2969_v32, 5  ;;  %v2979_v15 = vshll.u32 %v15686_v62, 16  ;;  %v16123_v16 = vmul.bf16 1048592000, %v11158_v51 }
 0x10b   : > { %v16124_v30 = vmov 0   ;;  %v11372_v17 = vsel %vm2138_vm3, %v4160_v55, %v4164_v39  ;;  %v929_v1 = vshrl.u32 %v11342_v35, 16  ;;  %v2966_v7 = vor.u32 %v2965_v47, %v2962_v5  ;;  %v10094_v5 = vld [vmem:[%s15550_s1 + $0x40] sm:$0xff]  }
 0x10c   : > { %v2955_v27 = vshrl.u32 %v16123_v16, 16  ;;  %6086 = vmatprep.subr.bf16.mxu0 %v16124_v30  ;;  %16125 = vst [vmem:[#allocation64_spill] sm:$0xff] %v11372_v17  ;;  %v2975_v49 = vrot.slane %v2973_v63, 4  ;;  %4276 = vrot.lane.b32.xlu0 %v11372_v17, %s10137_s27  ;;  %v11377_v41 = vmul.bf16 1048592000, %v437_v9  ;;  %v2452_v32 = vrot.slane %v2451_v21, 4 }
 0x10d   : > { %v16127_v59 = vmul.bf16 1061175104, %v11158_v51  ;;  %v2447_v16 = vsel %vm10193_vm2, %v2442_v20, %v2446_v22  ;;  %v2967_v2 = vrot.slane %v2966_v7, 4  ;;  %v2981_v55 = vrot.slane %v2979_v15, 5  ;;  %6087 = vmatpush1.bf16.msra.mxu0 %v10092_v8 }
 0x10e   : > { %16126 = vst [vmem:[#allocation65_spill] sm:$0xff] %v11377_v41  ;;  %v2976_v18 = vor.u32 %v2975_v49, %v2971_v14  ;;  %v3840_v39 = vor.u32 %v3839_v3, %v3835_v13  ;;  %v2457_v9 = vsel %vm10193_vm2, %v2452_v32, %v2456_v40  ;;  %v387_v63 = vmul.bf16 1061175104, %v11247_v38  ;;  %6088 = vmatprep.subr.bf16.mxu0 %v16124_v30 }
 0x10f   : > { %v3285_v62 = vadd.bf16 %v2955_v27, %v16127_v59  ;;  %v11389_v51 = vrot.slane %v925_v60, 5  ;;  %v2972_v20 = vsel %vm10193_vm2, %v2967_v2, %v2971_v14  ;;  %v2700_v3 = vadd.bf16 %v2447_v16, %v2173_v19 }
 0x110   : > { %v2977_v15 = vrot.slane %v2976_v18, 4  ;;  %v931_v13 = vrot.slane %v929_v1, 4  ;;  %v3286_v22 = vadd.bf16 %v2972_v20, %v11307_v25  ;;  %v1441_v21 = vshrl.u32 %v11350_v29, 16 }
 0x111   : > { %v8959_v47 = vcombine.low %v3285_v62, %v3285_v62  ;;  %16128 = vst [vmem:[#allocation66_spill] sm:$0xff] %v11389_v51  ;;  %v16129_v62 = vmul.bf16 1048592000, %v11111_v46  ;;  %v2701_v27 = vadd.bf16 %v2457_v9, %v11345_v54  ;;  %v1444_v18 = vshll.u32 %v11350_v29, 16  ;;  %6089 = vmatpush1.bf16.msra.mxu0 %v10094_v5  ;;  %v10096_v46 = vld [vmem:[%s15550_s1 + $0x48] sm:$0xff]  }
 0x112   : > { %v2982_v60 = vsel %vm10193_vm2, %v2977_v15, %v2981_v55  ;;  %v932_v2 = vor.u32 %v931_v13, %v11389_v51  ;;  %6090 = vmatprep.subr.bf16.mxu0 %v16124_v30  ;;  %v1443_v7 = vrot.slane %v1441_v21, 4  ;;  %v1450_v32 = vshll.u32 %v11377_v41, 16 }
 0x113   : > { %v3842_v8 = vshll.u32 %v8959_v47, 16  ;;  %v438_v40 = vadd.bf16 %v387_v63, %v16129_v62  ;;  %v3287_v14 = vadd.bf16 %v2982_v60, %v11319_v6  ;;  %v1446_v49 = vrot.slane %v1444_v18, 5  ;;  %v11418_v6 = vld [vmem:[%s10200_s26 + $0x78] sm:$0xf]  ;;  %v11421_v47 = vld [vmem:[%s10200_s26 + $0x7c] sm:$0xf] }
 0x114   : > { %v933_v54 = vrot.slane %v932_v2, 4  ;;  %v1454_v5 = vshrl.u32 %v11377_v41, 16  ;;  %v1452_v20 = vrot.slane %v1450_v32, 5  ;;  %v11447_v60 = vcombine.low %v2700_v3, %v2701_v27 }
 0x115   : > { %v3844_v25 = vrot.slane %v3842_v8, 1  ;;  %v695_v19 = vmul.bf16 1061175104, %v438_v40  ;;  %v1207_v1 = vmul.bf16 1048592000, %v438_v40  ;;  %v11411_v59 = vcombine.low %v3286_v22, %v3287_v14  ;;  %6091 = vmatpush1.bf16.msra.mxu0 %v10096_v46 }
 0x116   : > { %v1447_v9 = vor.u32 %v1446_v49, %v1443_v7  ;;  %v11426_v8 = vld [vmem:[%s10200_s26 + $0x80] sm:$0x1]  ;;  %v11432_v22 = vmul.bf16 1061175104, %v11327_v33  ;;  %v11442_v40 = vsel %vm10384_vm6, 0, %v11340_v44  ;;  %6092 = vmatprep.subr.bf16.mxu0 %v16124_v30  ;;  %16134 = vst [vmem:[#allocation71_spill] sm:$0xff] %v11447_v60 }
 0x117   : > { %v11414_v16 = vsel %vm2138_vm3, %v3840_v39, %v3844_v25  ;;  %v935_v55 = vshll.u32 %v695_v19, 16  ;;  %v1460_v15 = vshll.u32 %v1207_v1, 16  ;;  %v1464_v13 = vshrl.u32 %v1207_v1, 16  ;;  %v10097_v39 = vld [vmem:[%s15550_s1 + $0x50] sm:$0xff]   ;;  %16133 = vst [vmem:[#allocation70_spill] sm:$0xff] %v11442_v40 }
 0x118   : > { %16130 = vst [vmem:[#allocation67_spill] sm:$0xff] %v11414_v16  ;;  %3956 = vrot.lane.b32.xlu1 %v11414_v16, %s10138_s28  ;;  %16131 = vst [vmem:[#allocation68_spill] sm:$0xff] %v11432_v22  ;;  %v11437_v62 = vsel %vm10384_vm6, 0, %v11411_v59  ;;  %v1448_v33 = vrot.slane %v1447_v9, 4  ;;  %v1456_v2 = vrot.slane %v1454_v5, 4  ;;  %v3849_v5 = vshll.u32 %v11411_v59, 16  ;;  %9642 = vmatprep.mubr.msk.bf16.mxu1 %vm4389_vm7, %v11414_v16 }
 0x119   : > { %16132 = vst [vmem:[#allocation69_spill] sm:$0xff] %v11437_v62  ;;  %v937_v21 = vrot.slane %v935_v55, 5  ;;  %4324 = vrot.lane.b32.xlu0 %v11437_v62, %s10138_s28  ;;  %v1769_v18 = vadd.bf16 %v1464_v13, %v695_v19  ;;  %v1462_v14 = vrot.slane %v1460_v15, 5  ;;  %v15690_v25 = vmul.bf16 1048592000, %v11418_v6  ;;  %6093 = vmatpush1.bf16.msra.mxu0 %v10097_v39  ;;  %v10098_v19 = vld [vmem:[%s15550_s1 + $0x58] sm:$0xff]  }
 0x11a   : > { %v15689_v44 = vmul.bf16 1048592000, %v11421_v47  ;;  %v1453_v1 = vsel %vm10193_vm2, %v1448_v33, %v1452_v20  ;;  %v1457_v3 = vor.u32 %v1456_v2, %v1452_v20  ;;  %v15688_v7 = vmul.bf16 1048592000, %v11426_v8  ;;  %6094 = vmatprep.subr.bf16.mxu0 %v16124_v30 }
 0x11b   : > { %v11451_v46 = vsel %vm10193_vm2, %v933_v54, %v937_v21  ;;  %v8976_v27 = vcombine.low %v1769_v18, %v1769_v18  ;;  %v15692_v54 = vmul.bf16 1061175104, %v11418_v6  ;;  %v15691_v49 = vmul.bf16 1061175104, %v11421_v47 }
 0x11c   : > { %16135 = vst [vmem:[#allocation72_spill] sm:$0xff] %v11451_v46  ;;  %4004 = vrot.lane.b32.xlu1 %v11442_v40, %s10139_s29  ;;  %v16136_v32 = vmul.bf16 1061175104, %v11239_v36  ;;  %v1458_v9 = vrot.slane %v1457_v3, 4  ;;  %v16137_v20 = vmul.bf16 1061175104, %v11242_v11  ;;  %v1767_v21 = vadd.bf16 %v1453_v1, %v11432_v22 }
 0x11d   : > { %4356 = vrot.lane.b32.xlu0 %v11447_v60, %s10139_s29  ;;  %v4174_v18 = vshll.u32 %v8976_v27, 16  ;;  %v11491_v3 = vadd.bf16 %v387_v63, %v15688_v7  ;;  %6095 = vmatpush1.bf16.msra.mxu0 %v10098_v19  ;;  %v10099_v1 = vld [vmem:[%s15550_s1 + $0x60] sm:$0xff]   ;;  %v16138_v27 = vmul.bf16 1048592000, %v11239_v36  ;;  %v16139_v63 = vmul.bf16 1048592000, %v11242_v11 }
 0x11e   : > { %v496_v55 = vadd.bf16 %v16136_v32, %v15690_v25  ;;  %v497_v15 = vadd.bf16 %v16137_v20, %v15689_v44  ;;  %v1463_v2 = vsel %vm10193_vm2, %v1458_v9, %v1462_v14  ;;  %v3847_v20 = vshrl.u32 %v11411_v59, 16  ;;  %6096 = vmatprep.subr.bf16.mxu0 %v16124_v30 }
 0x11f   : > { %v1768_v14 = vadd.bf16 %v1463_v2, %v11342_v35  ;;  %v11504_v9 = vadd.bf16 %v15692_v54, %v16138_v27  ;;  %v440_v7 = vadd.bf16 %v15691_v49, %v16139_v63  ;;  %v3851_v19 = vrot.slane %v3849_v5, 1  ;;  %v10100_v5 = vld [vmem:[%s15550_s1 + $0x68] sm:$0xff]  }
 0x120   : > { %v11481_v33 = vmul.bf16 1061175104, %v496_v55  ;;  %3686 = vrot.lane.b32.xlu1 %v11447_v60, %s10137_s27  ;;  %v11493_v32 = vmul.bf16 1061175104, %v497_v15  ;;  %v15702_v44 = vmul.bf16 1061175104, %v11491_v3 }
 0x121   : > { %v11514_v2 = vcombine.low %v1767_v21, %v1768_v14  ;;  %v11516_v36 = vmul.bf16 1061175104, %v440_v7  ;;  %v2175_v27 = vmul.bf16 1048592000, %v496_v55  ;;  %v4176_v11 = vrot.slane %v4174_v18, 1  ;;  %6097 = vmatpush1.bf16.msra.mxu0 %v10099_v1 }
 0x122   : > { %v2459_v59 = vshrl.u32 %v11481_v33, 16  ;;  %v2462_v35 = vshll.u32 %v11481_v33, 16  ;;  %v2468_v25 = vshll.u32 %v11493_v32, 16  ;;  %v11519_v39 = vmul.bf16 1048592000, %v497_v15  ;;  %6098 = vmatprep.subr.bf16.mxu0 %v16124_v30 }
 0x123   : > { %v4167_v13 = vshrl.u32 %v11514_v2, 16  ;;  %v4169_v21 = vshll.u32 %v11514_v2, 16  ;;  %v11527_v14 = vmul.bf16 1048592000, %v11504_v9  ;;  %v949_v55 = vshll.u32 %v11516_v36, 16 }
 0x124   : > { %v2461_v63 = vrot.slane %v2459_v59, 4  ;;  %v2464_v49 = vrot.slane %v2462_v35, 5  ;;  %v2470_v18 = vrot.slane %v2468_v25, 5  ;;  %v2472_v59 = vshrl.u32 %v11493_v32, 16  ;;  %v10101_v25 = vld [vmem:[%s15550_s1 + $0x70] sm:$0xff]  }
 0x125   : > { %16140 = vst [vmem:[#allocation73_spill] sm:$0xff] %v11527_v14  ;;  %v2478_v1 = vshll.u32 %v15702_v44, 16  ;;  %v4171_v35 = vrot.slane %v4169_v21, 1  ;;  %v2988_v40 = vshrl.u32 %v2175_v27, 16  ;;  %v2991_v17 = vshll.u32 %v2175_v27, 16  ;;  %6099 = vmatpush1.bf16.msra.mxu0 %v10100_v5 }
 0x126   : > { %v2465_v15 = vor.u32 %v2464_v49, %v2461_v63  ;;  %v2474_v29 = vrot.slane %v2472_v59, 4  ;;  %v2997_v46 = vshll.u32 %v11519_v39, 16  ;;  %v3001_v44 = vshrl.u32 %v11519_v39, 16  ;;  %6100 = vmatprep.subr.bf16.mxu0 %v16124_v30 }
 0x127   : > { %v2480_v51 = vrot.slane %v2478_v1, 5  ;;  %v4172_v49 = vor.u32 %v4171_v35, %v4167_v13  ;;  %v2990_v63 = vrot.slane %v2988_v40, 4  ;;  %v2993_v41 = vrot.slane %v2991_v17, 5 }
 0x128   : > { %v2466_v62 = vrot.slane %v2465_v15, 4  ;;  %v2475_v21 = vor.u32 %v2474_v29, %v2470_v18  ;;  %v2999_v54 = vrot.slane %v2997_v46, 5  ;;  %v16141_v15 = vmul.bf16 1048592000, %v11491_v3 }
 0x129   : > { %v16142_v1 = vmul.bf16 1048592000, %v11317_v43  ;;  %v11546_v5 = vsel %vm2138_vm3, %v4172_v49, %v4176_v11  ;;  %v953_v22 = vshrl.u32 %v11516_v36, 16  ;;  %v2994_v13 = vor.u32 %v2993_v41, %v2990_v63  ;;  %6101 = vmatpush1.bf16.msra.mxu0 %v10101_v25  ;;  %v10102_v11 = vld [vmem:[%s15550_s1 + $0x78] sm:$0xff]  }
 0x12a   : > { %v3007_v59 = vshll.u32 %v16141_v15, 16  ;;  %16143 = vst [vmem:[#allocation74_spill] sm:$0xff] %v11546_v5  ;;  %v3003_v40 = vrot.slane %v3001_v44, 4  ;;  %4278 = vrot.lane.b32.xlu0 %v11546_v5, %s10137_s27  ;;  %v11551_v17 = vmul.bf16 1048592000, %v440_v7  ;;  %v2476_v29 = vrot.slane %v2475_v21, 4  ;;  %6102 = vmatprep.subr.bf16.mxu0 %v16124_v30 }
 0x12b   : > { %v2983_v60 = vshrl.u32 %v16142_v1, 16  ;;  %v16145_v46 = vmul.bf16 1061175104, %v11317_v43  ;;  %v2471_v15 = vsel %vm10193_vm2, %v2466_v62, %v2470_v18  ;;  %v2995_v49 = vrot.slane %v2994_v13, 4 }
 0x12c   : > { %16144 = vst [vmem:[#allocation75_spill] sm:$0xff] %v11551_v17  ;;  %v3004_v41 = vor.u32 %v3003_v40, %v2999_v54  ;;  %v3009_v44 = vrot.slane %v3007_v59, 5  ;;  %v3852_v63 = vor.u32 %v3851_v19, %v3847_v20  ;;  %v2481_v21 = vsel %vm10193_vm2, %v2476_v29, %v2480_v51 }
 0x12d   : > { %v3288_v35 = vadd.bf16 %v2983_v60, %v16145_v46  ;;  %v390_v43 = vmul.bf16 1061175104, %v11426_v8  ;;  %v11564_v60 = vrot.slane %v949_v55, 5  ;;  %v3000_v62 = vsel %vm10193_vm2, %v2995_v49, %v2999_v54  ;;  %6103 = vmatpush1.bf16.msra.mxu0 %v10102_v11 }
 0x12e   : > { %v3005_v18 = vrot.slane %v3004_v41, 4  ;;  %v2702_v25 = vadd.bf16 %v2471_v15, %v2175_v27  ;;  %v955_v1 = vrot.slane %v953_v22, 4  ;;  %v3289_v13 = vadd.bf16 %v3000_v62, %v11481_v33 }
 0x12f   : > { %v8960_v7 = vcombine.low %v3288_v35, %v3288_v35  ;;  %16146 = vst [vmem:[#allocation76_spill] sm:$0xff] %v11564_v60  ;;  %v16147_v20 = vmul.bf16 1048592000, %v11247_v38  ;;  %v1469_v51 = vshrl.u32 %v11527_v14, 16  ;;  %v2703_v54 = vadd.bf16 %v2481_v21, %v11519_v39 }
 0x130   : > { %v3010_v19 = vsel %vm10193_vm2, %v3005_v18, %v3009_v44  ;;  %v956_v27 = vor.u32 %v955_v1, %v11564_v60  ;;  %v1472_v22 = vshll.u32 %v11527_v14, 16  ;;  %v1478_v15 = vshll.u32 %v11551_v17, 16  ;;  %v11588_v44 = vld [vmem:[%s10200_s26 + $0x84] sm:$0xf]  ;;  %v11593_v18 = vld [vmem:[%s10200_s26 + $0x88] sm:$0xf] }
 0x131   : > { %v3854_v59 = vshll.u32 %v8960_v7, 16  ;;  %v441_v30 = vadd.bf16 %v390_v43, %v16147_v20  ;;  %v3290_v33 = vadd.bf16 %v3010_v19, %v11493_v32  ;;  %v1471_v46 = vrot.slane %v1469_v51, 4  ;;  %v11607_v20 = vld [vmem:[%s10200_s26 + $0x8c] sm:$0x1] }
 0x132   : > { %v957_v29 = vrot.slane %v956_v27, 4  ;;  %v1474_v35 = vrot.slane %v1472_v22, 5  ;;  %v1482_v41 = vshrl.u32 %v11551_v17, 16  ;;  %v1480_v7 = vrot.slane %v1478_v15, 5 }
 0x133   : > { %v3856_v55 = vrot.slane %v3854_v59, 1  ;;  %v698_v38 = vmul.bf16 1061175104, %v441_v30  ;;  %v1208_v40 = vmul.bf16 1048592000, %v441_v30  ;;  %v11581_v11 = vcombine.low %v3289_v13, %v3290_v33 }
 0x134   : > { %v1475_v32 = vor.u32 %v1474_v35, %v1471_v46  ;;  %v799_v1 = vshll.u32 %v10688_v10, 16  ;;  %v11604_v13 = vsel %vm10384_vm6, 0, %v11514_v2  ;;  %v11611_v30 = vcombine.low %v2702_v25, %v2703_v54 }
 0x135   : > { %v11584_v39 = vsel %vm2138_vm3, %v3852_v63, %v3856_v55  ;;  %v959_v49 = vshll.u32 %v698_v38, 16  ;;  %v1488_v21 = vshll.u32 %v1208_v40, 16  ;;  %v1492_v62 = vshrl.u32 %v1208_v40, 16  ;;  %16150 = vst [vmem:[#allocation79_spill] sm:$0xff] %v11604_v13 }
 0x136   : > { %16148 = vst [vmem:[#allocation77_spill] sm:$0xff] %v11584_v39  ;;  %3958 = vrot.lane.b32.xlu1 %v11584_v39, %s10138_s28  ;;  %v11599_v63 = vsel %vm10384_vm6, 0, %v11581_v11  ;;  %16151 = vst [vmem:[#allocation80_spill] sm:$0xff] %v11611_v30  ;;  %v1476_v51 = vrot.slane %v1475_v32, 4  ;;  %v1484_v19 = vrot.slane %v1482_v41, 4  ;;  %v16155_v35 = vor.u32 %v11304_v28, %v11300_v50  ;;  %9643 = vmatmul.mubr.msk.bf16.gmra.mrb[12].mxu1 %vm4389_vm7, %v11584_v39 }
 0x137   : > { %16149 = vst [vmem:[#allocation78_spill] sm:$0xff] %v11599_v63  ;;  %v961_v59 = vrot.slane %v959_v49, 5  ;;  %4326 = vrot.lane.b32.xlu0 %v11599_v63, %s10138_s28  ;;  %v1772_v27 = vadd.bf16 %v1492_v62, %v698_v38  ;;  %v11614_v22 = vmul.bf16 1061175104, %v11504_v9  ;;  %v15709_v2 = vmul.bf16 1048592000, %v11588_v44 }
 0x138   : > { %v15708_v55 = vmul.bf16 1048592000, %v11593_v18  ;;  %v1481_v25 = vsel %vm10193_vm2, %v1476_v51, %v1480_v7  ;;  %v1485_v54 = vor.u32 %v1484_v19, %v1480_v7  ;;  %v1490_v40 = vrot.slane %v1488_v21, 5 }
 0x139   : > { %16152 = vst [vmem:[#allocation81_spill] sm:$0xff] %v11614_v22  ;;  %v11618_v33 = vsel %vm10193_vm2, %v957_v29, %v961_v59  ;;  %v15707_v38 = vmul.bf16 1048592000, %v11607_v20  ;;  %v8977_v9 = vcombine.low %v1772_v27, %v1772_v27  ;;  %v16154_v29 = vmul.bf16 1061175104, %v11418_v6 }
 0x13a   : > { %16153 = vst [vmem:[#allocation82_spill] sm:$0xff] %v11618_v33  ;;  %4006 = vrot.lane.b32.xlu1 %v11604_v13, %s10139_s29  ;;  %v11634_v15 = vrot.slane %v16155_v35, 4  ;;  %v16156_v49 = vshrl.u32 %v10688_v10, 16  ;;  %v1486_v32 = vrot.slane %v1485_v54, 4  ;;  %v16157_v7 = vmul.bf16 1061175104, %v11421_v47 }
 0x13b   : > { %v499_v46 = vadd.bf16 %v16154_v29, %v15709_v2  ;;  %4358 = vrot.lane.b32.xlu0 %v11611_v30, %s10139_s29  ;;  %v11646_v62 = vrot.slane %v799_v1, 5  ;;  %v1770_v50 = vadd.bf16 %v1481_v25, %v11614_v22  ;;  %v15712_v51 = vmul.bf16 1061175104, %v11588_v44 }
 0x13c   : > { %v11638_v41 = vrot.slane %v16156_v49, 4  ;;  %v500_v21 = vadd.bf16 %v16157_v7, %v15708_v55  ;;  %v1491_v10 = vsel %vm10193_vm2, %v1486_v32, %v1490_v40  ;;  %v11661_v1 = vadd.bf16 %v390_v43, %v15707_v38 }
 0x13d   : > { %v11650_v28 = vmul.bf16 1061175104, %v499_v46  ;;  %v1771_v25 = vadd.bf16 %v1491_v10, %v11516_v36  ;;  %v4186_v54 = vshll.u32 %v8977_v9, 16  ;;  %v15719_v40 = vmul.bf16 1061175104, %v11593_v18 }
 0x13e   : > { %3688 = vrot.lane.b32.xlu1 %v11611_v30, %s10137_s27  ;;  %v11663_v19 = vmul.bf16 1061175104, %v500_v21  ;;  %v3859_v29 = vshrl.u32 %v11581_v11, 16  ;;  %v3861_v43 = vshll.u32 %v11581_v11, 16  ;;  %v2177_v38 = vmul.bf16 1048592000, %v499_v46 }
 0x13f   : > { %v2483_v49 = vshrl.u32 %v11650_v28, 16  ;;  %v2486_v32 = vshll.u32 %v11650_v28, 16  ;;  %v11673_v7 = vcombine.low %v1770_v50, %v1771_v25  ;;  %v16158_v36 = vmul.bf16 1048592000, %v11418_v6 }
 0x140   : > { %v2492_v55 = vshll.u32 %v11663_v19, 16  ;;  %v11682_v10 = vmul.bf16 1048592000, %v500_v21  ;;  %v4188_v11 = vrot.slane %v4186_v54, 1  ;;  %v16159_v50 = vmul.bf16 1048592000, %v11421_v47 }
 0x141   : > { %v11680_v9 = vadd.bf16 %v15712_v51, %v16158_v36  ;;  %v2485_v2 = vrot.slane %v2483_v49, 4  ;;  %v2488_v27 = vrot.slane %v2486_v32, 5  ;;  %v4179_v59 = vshrl.u32 %v11673_v7, 16 }
 0x142   : > { %v4181_v35 = vshll.u32 %v11673_v7, 16  ;;  %v443_v46 = vadd.bf16 %v15719_v40, %v16159_v50  ;;  %v2494_v6 = vrot.slane %v2492_v55, 5  ;;  %v2496_v13 = vshrl.u32 %v11663_v19, 16 }
 0x143   : > { %v2489_v25 = vor.u32 %v2488_v27, %v2485_v2  ;;  %v16160_v36 = vmul.bf16 1061175104, %v11661_v1  ;;  %v15725_v49 = vmul.bf16 1048592000, %v11661_v1  ;;  %v3016_v32 = vshrl.u32 %v2177_v38, 16 }
 0x144   : > { %v4183_v51 = vrot.slane %v4181_v35, 1  ;;  %v3019_v5 = vshll.u32 %v2177_v38, 16  ;;  %v11694_v63 = vmul.bf16 1061175104, %v443_v46  ;;  %v2498_v14 = vrot.slane %v2496_v13, 4 }
 0x145   : > { %v2502_v21 = vshll.u32 %v16160_v36, 16  ;;  %v2490_v54 = vrot.slane %v2489_v25, 4  ;;  %v3025_v47 = vshll.u32 %v11682_v10, 16  ;;  %v3018_v50 = vrot.slane %v3016_v32, 4 }
 0x146   : > { %v4184_v60 = vor.u32 %v4183_v51, %v4179_v59  ;;  %v3021_v2 = vrot.slane %v3019_v5, 5  ;;  %v3029_v55 = vshrl.u32 %v11682_v10, 16  ;;  %v2499_v27 = vor.u32 %v2498_v14, %v2494_v6 }
 0x147   : > { %v3027_v40 = vrot.slane %v3025_v47, 5  ;;  %v3035_v35 = vshll.u32 %v15725_v49, 16  ;;  %v16161_v36 = vmul.bf16 1048592000, %v11491_v3  ;;  %v2504_v25 = vrot.slane %v2502_v21, 5 }
 0x148   : > { %v11703_v17 = vsel %vm2138_vm3, %v4184_v60, %v4188_v11  ;;  %v3022_v13 = vor.u32 %v3021_v2, %v3018_v50  ;;  %v3031_v30 = vrot.slane %v3029_v55, 4  ;;  %v3863_v22 = vrot.slane %v3861_v43, 1 }
 0x149   : > { %v3011_v33 = vshrl.u32 %v16161_v36, 16  ;;  %16162 = vst [vmem:[#allocation83_spill] sm:$0xff] %v11703_v17  ;;  %4280 = vrot.lane.b32.xlu0 %v11703_v17, %s10137_s27  ;;  %v973_v5 = vshll.u32 %v11694_v63, 16  ;;  %v2500_v14 = vrot.slane %v2499_v27, 4  ;;  %v16163_v59 = vmul.bf16 1061175104, %v11491_v3 }
 0x14a   : > { %v3023_v32 = vrot.slane %v3022_v13, 4  ;;  %v3032_v47 = vor.u32 %v3031_v30, %v3027_v40  ;;  %v3037_v49 = vrot.slane %v3035_v35, 5  ;;  %v11711_v60 = vmul.bf16 1048592000, %v11680_v9 }
 0x14b   : > { %v3291_v51 = vadd.bf16 %v3011_v33, %v16163_v59  ;;  %v977_v11 = vshrl.u32 %v11694_v63, 16  ;;  %v2495_v43 = vsel %vm10193_vm2, %v2490_v54, %v2494_v6  ;;  %v11718_v50 = vmul.bf16 1048592000, %v443_v46 }
 0x14c   : > { %16164 = vst [vmem:[#allocation84_spill] sm:$0xff] %v11711_v60  ;;  %v3028_v3 = vsel %vm10193_vm2, %v3023_v32, %v3027_v40  ;;  %v3033_v30 = vrot.slane %v3032_v47, 4  ;;  %v2505_v33 = vsel %vm10193_vm2, %v2500_v14, %v2504_v25  ;;  %v16166_v2 = vshrl.u32 %v10810_v45, 16 }
 0x14d   : > { %v8961_v21 = vcombine.low %v3291_v51, %v3291_v51  ;;  %16165 = vst [vmem:[#allocation85_spill] sm:$0xff] %v11718_v50  ;;  %v3292_v27 = vadd.bf16 %v3028_v3, %v11650_v28  ;;  %v3864_v35 = vor.u32 %v3863_v22, %v3859_v29  ;;  %v2704_v46 = vadd.bf16 %v2495_v43, %v2177_v38 }
 0x14e   : > { %v11728_v55 = vrot.slane %v16166_v2, 4  ;;  %v3038_v40 = vsel %vm10193_vm2, %v3033_v30, %v3037_v49  ;;  %v15727_v54 = vmul.bf16 1061175104, %v11607_v20  ;;  %v11736_v36 = vrot.slane %v973_v5, 5 }
 0x14f   : > { %v3866_v6 = vshll.u32 %v8961_v21, 16  ;;  %v3293_v25 = vadd.bf16 %v3038_v40, %v11663_v19  ;;  %v2705_v14 = vadd.bf16 %v2505_v33, %v11682_v10  ;;  %v979_v59 = vrot.slane %v977_v11, 4  ;;  %v11769_v33 = vld [vmem:[%s10200_s26 + $0x90] sm:$0xf]  ;;  %v11776_v40 = vld [vmem:[%s10200_s26 + $0x94] sm:$0xf] }
 0x150   : > { %16167 = vst [vmem:[#allocation86_spill] sm:$0xff] %v11728_v55  ;;  %16168 = vst [vmem:[#allocation87_spill] sm:$0xff] %v11736_v36  ;;  %v16169_v22 = vmul.bf16 1048592000, %v11426_v8  ;;  %v1497_v29 = vshrl.u32 %v11711_v60, 16  ;;  %v1500_v38 = vshll.u32 %v11711_v60, 16 }
 0x151   : > { %v3868_v13 = vrot.slane %v3866_v6, 1  ;;  %v1506_v49 = vshll.u32 %v11718_v50, 16  ;;  %v11747_v5 = vcombine.low %v3292_v27, %v3293_v25  ;;  %v980_v10 = vor.u32 %v979_v59, %v11736_v36 }
 0x152   : > { %v444_v28 = vadd.bf16 %v15727_v54, %v16169_v22  ;;  %v1510_v51 = vshrl.u32 %v11718_v50, 16  ;;  %v1499_v47 = vrot.slane %v1497_v29, 4  ;;  %v1502_v11 = vrot.slane %v1500_v38, 5 }
 0x153   : > { %v11750_v19 = vsel %vm2138_vm3, %v3864_v35, %v3868_v13  ;;  %v11759_v21 = vsel %vm10384_vm6, 0, %v11747_v5  ;;  %v11761_v43 = vcombine.low %v2704_v46, %v2705_v14  ;;  %v11766_v3 = vsel %vm10384_vm6, 0, %v11673_v7 }
 0x154   : > { %16170 = vst [vmem:[#allocation88_spill] sm:$0xff] %v11750_v19  ;;  %3960 = vrot.lane.b32.xlu1 %v11750_v19, %s10138_s28  ;;  %v701_v8 = vmul.bf16 1061175104, %v444_v28  ;;  %v1209_v32 = vmul.bf16 1048592000, %v444_v28  ;;  %16171 = vst [vmem:[#allocation89_spill] sm:$0xff] %v11759_v21  ;;  %4328 = vrot.lane.b32.xlu0 %v11759_v21, %s10138_s28  ;;  %v1503_v27 = vor.u32 %v1502_v11, %v1499_v47 }
 0x155   : > { %16172 = vst [vmem:[#allocation90_spill] sm:$0xff] %v11761_v43  ;;  %16173 = vst [vmem:[#allocation91_spill] sm:$0xff] %v11766_v3  ;;  %v981_v30 = vrot.slane %v980_v10, 4  ;;  %v1508_v35 = vrot.slane %v1506_v49, 5  ;;  %v1512_v6 = vrot.slane %v1510_v51, 4  ;;  %v844_v46 = vshrl.u32 %v10881_v61, 16  ;;  %9646 = vmatprep.mubr.msk.bf16.mxu1 %vm4389_vm7, %v11750_v19 }
 0x156   : > { %v983_v2 = vshll.u32 %v701_v8, 16  ;;  %v11780_v7 = vmul.bf16 1061175104, %v11680_v9  ;;  %v1516_v25 = vshll.u32 %v1209_v32, 16  ;;  %v1520_v13 = vshrl.u32 %v1209_v32, 16 }
 0x157   : > { %v1504_v59 = vrot.slane %v1503_v27, 4  ;;  %v1513_v22 = vor.u32 %v1512_v6, %v1508_v35  ;;  %v15726_v28 = vmul.bf16 1048592000, %v11769_v33  ;;  %v3873_v29 = vshll.u32 %v11747_v5, 16  ;;  %v11789_v10 = vld [vmem:[%s10200_s26 + $0x98] sm:$0x1] }
 0x158   : > { %16174 = vst [vmem:[#allocation92_spill] sm:$0xff] %v11780_v7  ;;  %4008 = vrot.lane.b32.xlu1 %v11766_v3, %s10139_s29  ;;  %v985_v14 = vrot.slane %v983_v2, 5  ;;  %v1518_v38 = vrot.slane %v1516_v25, 5  ;;  %v1775_v49 = vadd.bf16 %v1520_v13, %v701_v8  ;;  %v15729_v9 = vmul.bf16 1048592000, %v11776_v40  ;;  %4360 = vrot.lane.b32.xlu0 %v11761_v43, %s10139_s29  ;;  %v11801_v2 = vpop.permute.xlu1 %3942 }
 0x159   : > { %v1509_v32 = vsel %vm10193_vm2, %v1504_v59, %v1508_v35  ;;  %v1514_v47 = vrot.slane %v1513_v22, 4  ;;  %v15730_v11 = vmul.bf16 1061175104, %v11769_v33  ;;  %v15728_v6 = vmul.bf16 1061175104, %v11776_v40 }
 0x15a   : > { %v11796_v51 = vsel %vm10193_vm2, %v981_v30, %v985_v14  ;;  %v1773_v8 = vadd.bf16 %v1509_v32, %v11780_v7  ;;  %v8978_v27 = vcombine.low %v1775_v49, %v1775_v49  ;;  %v16176_v25 = vmul.bf16 1061175104, %v11588_v44 }
 0x15b   : > { %16175 = vst [vmem:[#allocation93_spill] sm:$0xff] %v11796_v51  ;;  %v16177_v30 = vshll.u32 %v10810_v45, 16  ;;  %v1519_v35 = vsel %vm10193_vm2, %v1514_v47, %v1518_v38  ;;  %v15731_v59 = vmul.bf16 1048592000, %v11789_v10  ;;  %v16179_v22 = vmul.bf16 1048592000, %v11588_v44 }
 0x15c   : > { %v502_v13 = vadd.bf16 %v16176_v25, %v15726_v28  ;;  %3690 = vrot.lane.b32.xlu1 %v11761_v43, %s10137_s27  ;;  %v3871_v32 = vshrl.u32 %v11747_v5, 16  ;;  %v3875_v25 = vrot.slane %v3873_v29, 1  ;;  %v1774_v45 = vadd.bf16 %v1519_v35, %v11694_v63  ;;  %v11846_v5 = vpop.permute.xlu0 %3670 }
 0x15d   : > { %v11811_v14 = vrot.slane %v16177_v30, 5  ;;  %v11822_v49 = vadd.bf16 %v15730_v11, %v16179_v22  ;;  %v16180_v38 = vmul.bf16 1061175104, %v11593_v18  ;;  %v11830_v30 = vrot.slane %v844_v46, 4 }
 0x15e   : > { %v4198_v54 = vshll.u32 %v8978_v27, 16  ;;  %v16182_v44 = vmul.bf16 1048592000, %v11593_v18  ;;  %v11844_v63 = vsel %vm10384_vm6, 0, %v10234_v37  ;;  %v11848_v46 = vcombine.low %v1773_v8, %v1774_v45  ;;  %v11868_v45 = vpop.permute.xlu1 %3672 }
 0x15f   : > { %16178 = vst [vmem:[#allocation94_spill] sm:$0xff] %v11811_v14  ;;  %v503_v47 = vadd.bf16 %v16180_v38, %v15729_v9  ;;  %16181 = vst [vmem:[#allocation95_spill] sm:$0xff] %v11830_v30  ;;  %v11851_v29 = vmul.bf16 1048592000, %v11822_v49  ;;  %v2179_v18 = vmul.bf16 1048592000, %v502_v13  ;;  %v11874_v9 = vor.u32 %v3875_v25, %v3871_v32 }
 0x160   : > { %v11837_v22 = vadd.bf16 %v15728_v6, %v16182_v44  ;;  %16183 = vst [vmem:[#allocation96_spill] sm:$0xff] %v11844_v63  ;;  %v16185_v27 = vmul.bf16 1061175104, %v11607_v20  ;;  %v11864_v38 = vmul.bf16 1061175104, %v502_v13  ;;  %v4191_v44 = vshrl.u32 %v11848_v46, 16  ;;  %v11885_v25 = vpop.permute.xlu0 %4342 }
 0x161   : > { %16184 = vst [vmem:[#allocation97_spill] sm:$0xff] %v11851_v29  ;;  %v11866_v8 = vmul.bf16 1061175104, %v503_v47  ;;  %v4193_v6 = vshll.u32 %v11848_v46, 16  ;;  %v11872_v28 = vmul.bf16 1048592000, %v503_v47 }
 0x162   : > { %v11859_v35 = vadd.bf16 %v16185_v27, %v15731_v59  ;;  %v11862_v37 = vmul.bf16 1061175104, %v11837_v22  ;;  %v4200_v11 = vrot.slane %v4198_v54, 1  ;;  %v2507_v13 = vshrl.u32 %v11864_v38, 16  ;;  %16186 = vst [vmem:[#allocation98_spill] sm:$0xff] %v11885_v25 }
 0x163   : > { %v4195_v3 = vrot.slane %v4193_v6, 1  ;;  %v2510_v16 = vshll.u32 %v11864_v38, 16  ;;  %v2516_v17 = vshll.u32 %v11866_v8, 16  ;;  %v2520_v58 = vshrl.u32 %v11866_v8, 16 }
 0x164   : > { %v997_v27 = vshll.u32 %v11862_v37, 16  ;;  %v15752_v59 = vmul.bf16 1061175104, %v11859_v35  ;;  %v2509_v34 = vrot.slane %v2507_v13, 4  ;;  %v3044_v54 = vshrl.u32 %v2179_v18, 16 }
 0x165   : > { %v4196_v4 = vor.u32 %v4195_v3, %v4191_v44  ;;  %v2512_v23 = vrot.slane %v2510_v16, 5  ;;  %v2518_v21 = vrot.slane %v2516_v17, 5  ;;  %v2522_v60 = vrot.slane %v2520_v58, 4 }
 0x166   : > { %v2526_v47 = vshll.u32 %v15752_v59, 16  ;;  %v3046_v36 = vrot.slane %v3044_v54, 4  ;;  %v3047_v53 = vshll.u32 %v2179_v18, 16  ;;  %v3053_v51 = vshll.u32 %v11872_v28, 16  ;;  %v11893_v59 = vpop.permute.xlu1 %3674 }
 0x167   : > { %v11891_v13 = vsel %vm2138_vm3, %v4196_v4, %v4200_v11  ;;  %v2513_v32 = vor.u32 %v2512_v23, %v2509_v34  ;;  %v2523_v50 = vor.u32 %v2522_v60, %v2518_v21  ;;  %v3057_v3 = vshrl.u32 %v11872_v28, 16 }
 0x168   : > { %v2528_v6 = vrot.slane %v2526_v47, 5  ;;  %16187 = vst [vmem:[#allocation99_spill] sm:$0xff] %v11891_v13  ;;  %4282 = vrot.lane.b32.xlu0 %v11891_v13, %s10137_s27  ;;  %v3049_v58 = vrot.slane %v3047_v53, 5  ;;  %v3055_v16 = vrot.slane %v3053_v51, 5  ;;  %v16188_v17 = vmul.bf16 1048592000, %v11859_v35  ;;  %v11908_v53 = vpop.permute.xlu0 %4344 }
 0x169   : > { %v16189_v4 = vmul.bf16 1048592000, %v11661_v1  ;;  %v1001_v47 = vshrl.u32 %v11862_v37, 16  ;;  %v2514_v23 = vrot.slane %v2513_v32, 4  ;;  %v2524_v34 = vrot.slane %v2523_v50, 4  ;;  %16191 = vst [vmem:[#allocation100_spill] sm:$0xff] %v11908_v53 }
 0x16a   : > { %v3063_v44 = vshll.u32 %v16188_v17, 16  ;;  %v3059_v60 = vrot.slane %v3057_v3, 4  ;;  %v3050_v54 = vor.u32 %v3049_v58, %v3046_v36  ;;  %v16190_v19 = vmul.bf16 1061175104, %v11661_v1  ;;  %v11919_v3 = vpop.permute.xlu1 %4310 }
 0x16b   : > { %v3039_v11 = vshrl.u32 %v16189_v4, 16  ;;  %v15765_v13 = vmul.bf16 1061175104, %v11789_v10  ;;  %v2519_v17 = vsel %vm10193_vm2, %v2514_v23, %v2518_v21  ;;  %v2529_v4 = vsel %vm10193_vm2, %v2524_v34, %v2528_v6 }
 0x16c   : > { %v3065_v39 = vrot.slane %v3063_v44, 5  ;;  %v3060_v51 = vor.u32 %v3059_v60, %v3055_v16  ;;  %v11914_v43 = vrot.slane %v997_v27, 5  ;;  %v11917_v50 = vmul.bf16 1048592000, %v11837_v22 }
 0x16d   : > { %v3294_v0 = vadd.bf16 %v3039_v11, %v16190_v19  ;;  %v3051_v36 = vrot.slane %v3050_v54, 4  ;;  %v2706_v1 = vadd.bf16 %v2519_v17, %v2179_v18  ;;  %v16194_v58 = vmul.bf16 1048592000, %v11607_v20 }
 0x16e   : > { %16192 = vst [vmem:[#allocation101_spill] sm:$0xff] %v11914_v43  ;;  %16193 = vst [vmem:[#allocation102_spill] sm:$0xff] %v11917_v50  ;;  %v3061_v19 = vrot.slane %v3060_v51, 4  ;;  %v1003_v21 = vrot.slane %v1001_v47, 4  ;;  %v1525_v11 = vshrl.u32 %v11851_v29, 16  ;;  %v2707_v22 = vadd.bf16 %v2529_v4, %v11872_v28 }
 0x16f   : > { %v8962_v32 = vcombine.low %v3294_v0, %v3294_v0  ;;  %v447_v44 = vadd.bf16 %v15765_v13, %v16194_v58  ;;  %v3056_v27 = vsel %vm10193_vm2, %v3051_v36, %v3055_v16  ;;  %v1528_v0 = vshll.u32 %v11851_v29, 16  ;;  %v11935_v16 = vpop.permute.xlu0 %4346  ;;  %v11950_v58 = vpop.permute.xlu1 %3990 }
 0x170   : > { %v3066_v18 = vsel %vm10193_vm2, %v3061_v19, %v3065_v39  ;;  %v3295_v23 = vadd.bf16 %v3056_v27, %v11864_v38  ;;  %v1004_v34 = vor.u32 %v1003_v21, %v11914_v43  ;;  %v1527_v51 = vrot.slane %v1525_v11, 4  ;;  %16195 = vst [vmem:[#allocation103_spill] sm:$0xff] %v11935_v16  ;;  %v11946_v19 = vld [vmem:[%s10200_s26 + $0x9c] sm:$0xf] }
 0x171   : > { %v3878_v6 = vshll.u32 %v8962_v32, 16  ;;  %v704_v20 = vmul.bf16 1061175104, %v447_v44  ;;  %v3296_v47 = vadd.bf16 %v3066_v18, %v11866_v8  ;;  %v1210_v54 = vmul.bf16 1048592000, %v447_v44 }
 0x172   : > { %v1005_v28 = vrot.slane %v1004_v34, 4  ;;  %v1530_v4 = vrot.slane %v1528_v0, 5  ;;  %v1534_v36 = vshll.u32 %v11917_v50, 16  ;;  %v1538_v32 = vshrl.u32 %v11917_v50, 16 }
 0x173   : > { %v3880_v60 = vrot.slane %v3878_v6, 1  ;;  %v1007_v17 = vshll.u32 %v704_v20, 16  ;;  %v11938_v39 = vcombine.low %v3295_v23, %v3296_v47  ;;  %v1544_v8 = vshll.u32 %v1210_v54, 16  ;;  %v11953_v6 = vld [vmem:[%s10200_s26 + $0xa0] sm:$0xf] }
 0x174   : > { %v1531_v21 = vor.u32 %v1530_v4, %v1527_v51  ;;  %v1536_v11 = vrot.slane %v1534_v36, 5  ;;  %v1548_v27 = vshrl.u32 %v1210_v54, 16  ;;  %v11968_v18 = vsel %vm10384_vm6, 0, %v11848_v46  ;;  %v11979_v54 = vld [vmem:[%s10200_s26 + $0xa4] sm:$0x1]  ;;  %v11985_v36 = vpop.permute.xlu0 %4312 }
 0x175   : > { %v11942_v38 = vsel %vm2138_vm3, %v11874_v9, %v3880_v60  ;;  %v1009_v44 = vrot.slane %v1007_v17, 5  ;;  %v11958_v9 = vmul.bf16 1061175104, %v11822_v49  ;;  %v11963_v0 = vsel %vm10384_vm6, 0, %v11938_v39  ;;  %16199 = vst [vmem:[#allocation107_spill] sm:$0xff] %v11968_v18 }
 0x176   : > { %16196 = vst [vmem:[#allocation104_spill] sm:$0xff] %v11942_v38  ;;  %3962 = vrot.lane.b32.xlu1 %v11942_v38, %s10138_s28  ;;  %9647 = vmatmul.mubr.msk.bf16.gmra.mrb[16].mxu1 %vm4389_vm7, %v11942_v38  ;;  %16198 = vst [vmem:[#allocation106_spill] sm:$0xff] %v11963_v0  ;;  %v1540_v23 = vrot.slane %v1538_v32, 4  ;;  %v11972_v34 = vcombine.low %v2706_v1, %v2707_v22  ;;  %v1532_v47 = vrot.slane %v1531_v21, 4  ;;  %v3885_v51 = vshll.u32 %v11938_v39, 16 }
 0x177   : > { %16197 = vst [vmem:[#allocation105_spill] sm:$0xff] %v11958_v9  ;;  %4330 = vrot.lane.b32.xlu0 %v11963_v0, %s10138_s28  ;;  %v11976_v49 = vsel %vm10193_vm2, %v1005_v28, %v1009_v44  ;;  %v1778_v60 = vadd.bf16 %v1548_v27, %v704_v20  ;;  %v1546_v4 = vrot.slane %v1544_v8, 5  ;;  %v15764_v46 = vmul.bf16 1048592000, %v11946_v19 }
 0x178   : > { %16200 = vst [vmem:[#allocation108_spill] sm:$0xff] %v11972_v34  ;;  %16201 = vst [vmem:[#allocation109_spill] sm:$0xff] %v11976_v49  ;;  %v1541_v17 = vor.u32 %v1540_v23, %v1536_v11  ;;  %v1537_v1 = vsel %vm10193_vm2, %v1532_v47, %v1536_v11  ;;  %v15767_v20 = vmul.bf16 1061175104, %v11946_v19  ;;  %v15766_v8 = vmul.bf16 1061175104, %v11953_v6  ;;  %v12003_v47 = vpop.permute.xlu1 %3992 }
 0x179   : > { %v8979_v22 = vcombine.low %v1778_v60, %v1778_v60  ;;  %v16202_v21 = vmul.bf16 1061175104, %v11769_v33  ;;  %v4392_v23 = vsel %vm4389_vm7, %v11844_v63, %v11846_v5  ;;  %v1776_v11 = vadd.bf16 %v1537_v1, %v11958_v9 }
 0x17a   : > { %4010 = vrot.lane.b32.xlu1 %v11968_v18, %s10139_s29  ;;  %v1542_v32 = vrot.slane %v1541_v17, 4  ;;  %v16203_v60 = vmul.bf16 1048592000, %v11769_v33  ;;  %v16204_v5 = vmul.bf16 1048592000, %v11776_v40  ;;  %v16205_v1 = vshll.u32 %v10881_v61, 16  ;;  %v12044_v33 = vpop.permute.xlu0 %4314 }
 0x17b   : > { %v505_v27 = vadd.bf16 %v16202_v21, %v15764_v46  ;;  %4362 = vrot.lane.b32.xlu0 %v11972_v34, %s10139_s29  ;;  %v4210_v46 = vshll.u32 %v8979_v22, 16  ;;  %v16208_v22 = vmul.bf16 1061175104, %v11776_v40  ;;  %v3883_v61 = vshrl.u32 %v11938_v39, 16 }
 0x17c   : > { %v12009_v17 = vadd.bf16 %v15767_v20, %v16203_v60  ;;  %v1547_v21 = vsel %vm10193_vm2, %v1542_v32, %v1546_v4  ;;  %v449_v13 = vadd.bf16 %v15766_v8, %v16204_v5  ;;  %v12021_v28 = vrot.slane %v16205_v1, 5  ;;  %v12061_v63 = vpop.permute.xlu1 %3994 }
 0x17d   : > { %v12017_v44 = vmul.bf16 1061175104, %v505_v27  ;;  %v1777_v60 = vadd.bf16 %v1547_v21, %v11862_v37  ;;  %v16207_v4 = vmul.bf16 1048592000, %v11953_v6  ;;  %v12033_v5 = vsel %vm4438_vm8, %v4392_v23, %v11801_v2  ;;  %16213 = vst [vmem:[#allocation113_spill] sm:$0xff] %v12061_v63 }
 0x17e   : > { %16206 = vst [vmem:[#allocation110_spill] sm:$0xff] %v12021_v28  ;;  %3692 = vrot.lane.b32.xlu1 %v11972_v34, %s10137_s27  ;;  %v3887_v1 = vrot.slane %v3885_v51, 1  ;;  %v16209_v8 = vmul.bf16 1048592000, %v11979_v54  ;;  %v16210_v20 = vmul.bf16 1061175104, %v11789_v10  ;;  %v4263_v14 = vpop.permute.xlu0 %4262 }
 0x17f   : > { %v506_v32 = vadd.bf16 %v16208_v22, %v16207_v4  ;;  %v12042_v21 = vcombine.low %v1776_v11, %v1777_v60  ;;  %v12047_v40 = vmul.bf16 1048592000, %v12009_v17  ;;  %v2181_v4 = vmul.bf16 1048592000, %v505_v27 }
 0x180   : > { %v12040_v37 = vadd.bf16 %v16210_v20, %v16209_v8  ;;  %v4212_v2 = vrot.slane %v4210_v46, 1  ;;  %v12051_v23 = vmul.bf16 1048592000, %v449_v13  ;;  %v2531_v51 = vshrl.u32 %v12017_v44, 16 }
 0x181   : > { %16211 = vst [vmem:[#allocation111_spill] sm:$0xff] %v12047_v40  ;;  %v12049_v22 = vmul.bf16 1061175104, %v506_v32  ;;  %v4203_v20 = vshrl.u32 %v12042_v21, 16  ;;  %v4205_v8 = vshll.u32 %v12042_v21, 16  ;;  %v2534_v18 = vshll.u32 %v12017_v44, 16 }
 0x182   : > { %16212 = vst [vmem:[#allocation112_spill] sm:$0xff] %v12051_v23  ;;  %v12057_v11 = vmul.bf16 1061175104, %v449_v13  ;;  %v12059_v60 = vmul.bf16 1048592000, %v506_v32  ;;  %v2533_v27 = vrot.slane %v2531_v51, 4 }
 0x183   : > { %v2540_v46 = vshll.u32 %v12049_v22, 16  ;;  %v2544_v38 = vshrl.u32 %v12049_v22, 16  ;;  %v4207_v39 = vrot.slane %v4205_v8, 1  ;;  %v16214_v0 = vmul.bf16 1061175104, %v12040_v37 }
 0x184   : > { %v3072_v49 = vshrl.u32 %v2181_v4, 16  ;;  %v2536_v13 = vrot.slane %v2534_v18, 5  ;;  %v3075_v34 = vshll.u32 %v2181_v4, 16  ;;  %v3081_v30 = vshll.u32 %v12059_v60, 16 }
 0x185   : > { %v2550_v29 = vshll.u32 %v16214_v0, 16  ;;  %v2542_v50 = vrot.slane %v2540_v46, 5  ;;  %v2546_v32 = vrot.slane %v2544_v38, 4  ;;  %v4208_v9 = vor.u32 %v4207_v39, %v4203_v20 }
 0x186   : > { %v3074_v51 = vrot.slane %v3072_v49, 4  ;;  %v2537_v55 = vor.u32 %v2536_v13, %v2533_v27  ;;  %v3077_v63 = vrot.slane %v3075_v34, 5  ;;  %v3085_v8 = vshrl.u32 %v12059_v60, 16 }
 0x187   : > { %v2552_v28 = vrot.slane %v2550_v29, 5  ;;  %v2547_v7 = vor.u32 %v2546_v32, %v2542_v50  ;;  %v12072_v0 = vsel %vm2138_vm3, %v4208_v9, %v4212_v2  ;;  %v3083_v43 = vrot.slane %v3081_v30, 5  ;;  %v12078_v29 = vpop.permute.xlu1 %3944 }
 0x188   : > { %16215 = vst [vmem:[#allocation114_spill] sm:$0xff] %v12072_v0  ;;  %v16216_v18 = vmul.bf16 1048592000, %v12040_v37  ;;  %v16217_v38 = vmul.bf16 1048592000, %v11859_v35  ;;  %4284 = vrot.lane.b32.xlu0 %v12072_v0, %s10137_s27  ;;  %v2538_v49 = vrot.slane %v2537_v55, 4  ;;  %v3078_v34 = vor.u32 %v3077_v63, %v3074_v51 }
 0x189   : > { %v2548_v20 = vrot.slane %v2547_v7, 4  ;;  %v3087_v27 = vrot.slane %v3085_v8, 4  ;;  %v16218_v9 = vmul.bf16 1061175104, %v11859_v35  ;;  %v736_v30 = vsel %vm10193_vm2, %v11634_v15, %v10472_v31  ;;  %v4265_v8 = vpop.permute.xlu0 %4264 }
 0x18a   : > { %v3091_v46 = vshll.u32 %v16216_v18, 16  ;;  %v3067_v39 = vshrl.u32 %v16217_v38, 16  ;;  %v1166_v32 = vadd.bf16 %v10567_v42, %v10434_v57  ;;  %v3079_v18 = vrot.slane %v3078_v34, 4 }
 0x18b   : > { %v3088_v38 = vor.u32 %v3087_v27, %v3083_v43  ;;  %v1165_v0 = vadd.bf16 %v736_v30, %v10430_v48  ;;  %v2543_v55 = vsel %vm10193_vm2, %v2538_v49, %v2542_v50  ;;  %v1021_v7 = vshll.u32 %v12057_v11, 16  ;;  %v16221_v49 = vld [vmem:[#allocation11_spill] sm:$0xff] }
 0x18c   : > { %v3093_v13 = vrot.slane %v3091_v46, 5  ;;  %v3297_v2 = vadd.bf16 %v3067_v39, %v16218_v9  ;;  %v3888_v35 = vor.u32 %v3887_v1, %v3883_v61  ;;  %v2553_v51 = vsel %vm10193_vm2, %v2548_v20, %v2552_v28  ;;  %v12104_v61 = vpop.permute.xlu1 %3946 }
 0x18d   : > { %v1025_v31 = vshrl.u32 %v12057_v11, 16  ;;  %v3084_v57 = vsel %vm10193_vm2, %v3079_v18, %v3083_v43  ;;  %v3089_v42 = vrot.slane %v3088_v38, 4  ;;  %v12099_v15 = vcombine.low %v1165_v0, %v1166_v32 }
 0x18e   : > { %v8963_v63 = vcombine.low %v3297_v2, %v3297_v2  ;;  %v3298_v48 = vadd.bf16 %v3084_v57, %v12017_v44  ;;  %v2708_v50 = vadd.bf16 %v2543_v55, %v2181_v4  ;;  %v1168_v39 = vadd.bf16 %v10606_v26, %v10503_v52 }
 0x18f   : > { %16219 = vst [vmem:[#allocation115_spill] sm:$0xff] %v12099_v15  ;;  %v3094_v28 = vsel %vm10193_vm2, %v3089_v42, %v3093_v13  ;;  %v12110_v1 = vsel %vm4389_vm7, %v12099_v15, %v4263_v14  ;;  %v2709_v43 = vadd.bf16 %v2553_v51, %v12059_v60  ;;  %v12123_v26 = vsel %vm10384_vm6, 0, %v12042_v21  ;;  %v12138_v21 = vpop.permute.xlu0 %4266 }
 0x190   : > { %v3890_v46 = vshll.u32 %v8963_v63, 16  ;;  %16220 = vst [vmem:[#allocation116_spill] sm:$0xff] %v12110_v1  ;;  %v3299_v0 = vadd.bf16 %v3094_v28, %v12049_v22  ;;  %v12115_v4 = vcombine.low %v16221_v49, %v1168_v39  ;;  %v4553_v52 = vsel %vm4438_vm8, %v12110_v1, %v11919_v3  ;;  %16223 = vst [vmem:[#allocation117_spill] sm:$0xff] %v12123_v26  ;;  %v12161_v38 = vpop.permute.xlu1 %3676  ;;  %v12172_v39 = vld [vmem:[%s10200_s26 + $0xa8] sm:$0xf] }
 0x191   : > { %v4585_v14 = vsel %vm4471_vm9, %v4553_v52, %v11885_v25  ;;  %v399_v60 = vmul.bf16 1061175104, %v11979_v54  ;;  %v12128_v20 = vrot.slane %v1021_v7, 5  ;;  %v4473_v3 = vsel %vm4471_vm9, %v12033_v5, %v11950_v58 }
 0x192   : > { %v3892_v44 = vrot.slane %v3890_v46, 1  ;;  %16222 = vst [vmem:[#allocation11_spill] sm:$0xff] %v12115_v4  ;;  %v12130_v22 = vcombine.low %v3298_v48, %v3299_v0  ;;  %6104 = vmatprep.mubr.bf16.mxu0 %v4585_v14  ;;  %v1027_v27 = vrot.slane %v1025_v31, 4  ;;  %v16226_v13 = vmul.bf16 1048592000, %v11789_v10  ;;  %v16231_v0 = vld [vmem:[#allocation12_spill] sm:$0xff] }
 0x193   : > { %16224 = vst [vmem:[#allocation118_spill] sm:$0xff] %v12128_v20  ;;  %6105 = vmatmul.mubr.bf16.vlgmr.msra.gmra.mrb[0].mxu0 %v4473_v3  ;;  %v1553_v2 = vshrl.u32 %v12047_v40, 16  ;;  %v1556_v30 = vshll.u32 %v12047_v40, 16  ;;  %v1562_v32 = vshll.u32 %v12051_v23, 16  ;;  %v12154_v5 = vcombine.low %v2708_v50, %v2709_v43  ;;  %v12183_v14 = vld [vmem:[%s10200_s26 + $0xac] sm:$0xf]  ;;  %v12185_v3 = vpop.permute.xlu0 %4268 }
 0x194   : > { %v12133_v34 = vsel %vm2138_vm3, %v3888_v35, %v3892_v44  ;;  %v450_v9 = vadd.bf16 %v399_v60, %v16226_v13  ;;  %v12152_v58 = vsel %vm10384_vm6, 0, %v12130_v22  ;;  %v12158_v18 = vsel %vm4389_vm7, %v12115_v4, %v4265_v8  ;;  %v16232_v44 = vld [vmem:[#allocation17_spill] sm:$0xff] }
 0x195   : > { %16225 = vst [vmem:[#allocation119_spill] sm:$0xff] %v12133_v34  ;;  %3964 = vrot.lane.b32.xlu1 %v12133_v34, %s10138_s28  ;;  %16227 = vst [vmem:[#allocation120_spill] sm:$0xff] %v12152_v58  ;;  %v1028_v10 = vor.u32 %v1027_v27, %v12128_v20  ;;  %9650 = vmatprep.mubr.msk.bf16.mxu1 %vm4389_vm7, %v12133_v34  ;;  %v1555_v63 = vrot.slane %v1553_v2, 4  ;;  %v1558_v35 = vrot.slane %v1556_v30, 5  ;;  %v871_v51 = vshll.u32 %v11090_v56, 16 }
 0x196   : > { %16228 = vst [vmem:[#allocation121_spill] sm:$0xff] %v12154_v5  ;;  %16229 = vst [vmem:[#allocation122_spill] sm:$0xff] %v12158_v18  ;;  %4332 = vrot.lane.b32.xlu0 %v12152_v58, %s10138_s28  ;;  %v707_v55 = vmul.bf16 1061175104, %v450_v9  ;;  %v1211_v7 = vmul.bf16 1048592000, %v450_v9  ;;  %v1170_v49 = vadd.bf16 %v16232_v44, %v16231_v0  ;;  %v4555_v52 = vsel %vm4438_vm8, %v12158_v18, %v11985_v36 }
 0x197   : > { %v1029_v8 = vrot.slane %v1028_v10, 4  ;;  %v1564_v31 = vrot.slane %v1562_v32, 5  ;;  %v1566_v57 = vshrl.u32 %v12051_v23, 16  ;;  %v1559_v48 = vor.u32 %v1558_v35, %v1555_v63  ;;  %v12190_v2 = vld [vmem:[%s10200_s26 + $0xb0] sm:$0x1]  ;;  %v16233_v32 = vld [vmem:[#allocation15_spill] sm:$0xff]  ;;  %v12198_v63 = vpop.permute.xlu1 %3948 }
 0x198   : > { %v1031_v42 = vshll.u32 %v707_v55, 16  ;;  %v1572_v46 = vshll.u32 %v1211_v7, 16  ;;  %v1576_v50 = vshrl.u32 %v1211_v7, 16  ;;  %v12175_v28 = vmul.bf16 1061175104, %v12009_v17  ;;  %v16239_v0 = vld [vmem:[#allocation6_spill] sm:$0xff] }
 0x199   : > { %4012 = vrot.lane.b32.xlu1 %v12123_v26, %s10139_s29  ;;  %v1568_v43 = vrot.slane %v1566_v57, 4  ;;  %v1560_v13 = vrot.slane %v1559_v48, 4  ;;  %v12193_v10 = vcombine.low %v16233_v32, %v1170_v49  ;;  %v4588_v36 = vsel %vm4471_vm9, %v4555_v52, %v11908_v53  ;;  %v12230_v32 = vpop.permute.xlu0 %4316 }
 0x19a   : > { %16230 = vst [vmem:[#allocation123_spill] sm:$0xff] %v12175_v28  ;;  %4364 = vrot.lane.b32.xlu0 %v12154_v5, %s10139_s29  ;;  %v1033_v27 = vrot.slane %v1031_v42, 5  ;;  %v1574_v9 = vrot.slane %v1572_v46, 5  ;;  %v1781_v17 = vadd.bf16 %v1576_v50, %v707_v55  ;;  %v15787_v7 = vmul.bf16 1048592000, %v12172_v39  ;;  %6112 = vmatprep.mubr.bf16.mxu0 %v4588_v36 }
 0x19b   : > { %v1569_v30 = vor.u32 %v1568_v43, %v1564_v31  ;;  %16234 = vst [vmem:[#allocation12_spill] sm:$0xff] %v12193_v10  ;;  %v16235_v35 = vshrl.u32 %v11090_v56, 16  ;;  %v1565_v42 = vsel %vm10193_vm2, %v1560_v13, %v1564_v31  ;;  %v12212_v46 = vrot.slane %v871_v51, 5 }
 0x19c   : > { %v12206_v55 = vsel %vm10193_vm2, %v1029_v8, %v1033_v27  ;;  %v8980_v48 = vcombine.low %v1781_v17, %v1781_v17  ;;  %v15789_v43 = vmul.bf16 1048592000, %v12183_v14  ;;  %v15788_v56 = vmul.bf16 1048592000, %v12190_v2 }
 0x19d   : > { %v12202_v57 = vrot.slane %v16235_v35, 4  ;;  %16237 = vst [vmem:[#allocation15_spill] sm:$0xff] %v12206_v55  ;;  %3694 = vrot.lane.b32.xlu1 %v12154_v5, %s10137_s27  ;;  %16238 = vst [vmem:[#allocation124_spill] sm:$0xff] %v12212_v46  ;;  %v1570_v50 = vrot.slane %v1569_v30, 4  ;;  %v4395_v8 = vsel %vm4389_vm7, %v16239_v0, %v11868_v45  ;;  %v3897_v44 = vshll.u32 %v12130_v22, 16  ;;  %v16242_v45 = vld [vmem:[#allocation58_spill] sm:$0xff] }
 0x19e   : > { %v1779_v31 = vadd.bf16 %v1565_v42, %v12175_v28  ;;  %v15786_v49 = vmul.bf16 1061175104, %v12172_v39  ;;  %v4222_v51 = vshll.u32 %v8980_v48, 16  ;;  %v16240_v27 = vmul.bf16 1061175104, %v11946_v19 }
 0x19f   : > { %16236 = vst [vmem:[#allocation17_spill] sm:$0xff] %v12202_v57  ;;  %v1575_v52 = vsel %vm10193_vm2, %v1570_v50, %v1574_v9  ;;  %v16241_v17 = vmul.bf16 1048592000, %v12040_v37  ;;  %v12235_v35 = vsel %vm4438_vm8, %v4395_v8, %v12078_v29  ;;  %v15792_v9 = vmul.bf16 1061175104, %v12183_v14  ;;  %v12257_v8 = vpop.permute.xlu1 %3996 }
 0x1a0   : > { %v508_v13 = vadd.bf16 %v16240_v27, %v15787_v7  ;;  %v1780_v42 = vadd.bf16 %v1575_v52, %v12057_v11  ;;  %v16243_v48 = vmul.bf16 1048592000, %v11946_v19  ;;  %v16244_v27 = vmul.bf16 1061175104, %v11953_v6 }
 0x1a1   : > { %v3095_v30 = vshrl.u32 %v16241_v17, 16  ;;  %v12253_v29 = vadd.bf16 %v399_v60, %v15788_v56  ;;  %v3895_v19 = vshrl.u32 %v12130_v22, 16  ;;  %v3899_v52 = vrot.slane %v3897_v44, 1 }
 0x1a2   : > { %v12243_v50 = vadd.bf16 %v15786_v49, %v16243_v48  ;;  %v509_v17 = vadd.bf16 %v16244_v27, %v15789_v43  ;;  %v12255_v11 = vmul.bf16 1061175104, %v508_v13  ;;  %v12260_v48 = vcombine.low %v1779_v31, %v1780_v42  ;;  %v12287_v42 = vpop.permute.xlu0 %4348 }
 0x1a3   : > { %v16245_v49 = vmul.bf16 1061175104, %v12040_v37  ;;  %v4224_v36 = vrot.slane %v4222_v51, 1  ;;  %v12267_v27 = vsel %vm4389_vm7, %v12193_v10, %v12138_v21  ;;  %v16247_v44 = vmul.bf16 1048592000, %v11953_v6  ;;  %16249 = vst [vmem:[#allocation126_spill] sm:$0xff] %v12287_v42  ;;  %v12295_v1 = vpop.permute.xlu1 %3678 }
 0x1a4   : > { %16246 = vst [vmem:[#allocation58_spill] sm:$0xff] %v12267_v27  ;;  %v12269_v60 = vmul.bf16 1061175104, %v509_v17  ;;  %v4215_v43 = vshrl.u32 %v12260_v48, 16  ;;  %v4217_v22 = vshll.u32 %v12260_v48, 16  ;;  %v2555_v51 = vshrl.u32 %v12255_v11, 16 }
 0x1a5   : > { %v3300_v7 = vadd.bf16 %v3095_v30, %v16245_v49  ;;  %v452_v37 = vadd.bf16 %v15792_v9, %v16247_v44  ;;  %v12278_v31 = vmul.bf16 1048592000, %v508_v13  ;;  %v12281_v49 = vmul.bf16 1048592000, %v12243_v50 }
 0x1a6   : > { %v12283_v21 = vmul.bf16 1048592000, %v509_v17  ;;  %v2558_v30 = vshll.u32 %v12255_v11, 16  ;;  %v4219_v56 = vrot.slane %v4217_v22, 1  ;;  %v2564_v6 = vshll.u32 %v12269_v60, 16 }
 0x1a7   : > { %16248 = vst [vmem:[#allocation125_spill] sm:$0xff] %v12281_v49  ;;  %v12289_v53 = vmul.bf16 1061175104, %v452_v37  ;;  %v8964_v18 = vcombine.low %v3300_v7, %v3300_v7  ;;  %v2557_v44 = vrot.slane %v2555_v51, 4  ;;  %v2568_v9 = vshrl.u32 %v12269_v60, 16 }
 0x1a8   : > { %v2560_v13 = vrot.slane %v2558_v30, 5  ;;  %v16250_v25 = vmul.bf16 1061175104, %v12253_v29  ;;  %v4220_v26 = vor.u32 %v4219_v56, %v4215_v43  ;;  %v2566_v0 = vrot.slane %v2564_v6, 5 }
 0x1a9   : > { %v15810_v34 = vmul.bf16 1048592000, %v12253_v29  ;;  %v3100_v22 = vshrl.u32 %v12278_v31, 16  ;;  %v2570_v40 = vrot.slane %v2568_v9, 4  ;;  %v3103_v7 = vshll.u32 %v12278_v31, 16 }
 0x1aa   : > { %v2574_v17 = vshll.u32 %v16250_v25, 16  ;;  %v2561_v58 = vor.u32 %v2560_v13, %v2557_v44  ;;  %v12301_v51 = vsel %vm2138_vm3, %v4220_v26, %v4224_v36  ;;  %v3109_v55 = vshll.u32 %v12283_v21, 16  ;;  %v12309_v44 = vpop.permute.xlu0 %4270 }
 0x1ab   : > { %16251 = vst [vmem:[#allocation127_spill] sm:$0xff] %v12301_v51  ;;  %v3102_v30 = vrot.slane %v3100_v22, 4  ;;  %v3113_v25 = vshrl.u32 %v12283_v21, 16  ;;  %4286 = vrot.lane.b32.xlu0 %v12301_v51, %s10137_s27  ;;  %v2571_v56 = vor.u32 %v2570_v40, %v2566_v0  ;;  %v3105_v6 = vrot.slane %v3103_v7, 5  ;;  %v12314_v51 = vpop.permute.xlu1 %3950 }
 0x1ac   : > { %v2576_v20 = vrot.slane %v2574_v17, 5  ;;  %v2562_v43 = vrot.slane %v2561_v58, 4  ;;  %v3119_v9 = vshll.u32 %v15810_v34, 16  ;;  %v3111_v13 = vrot.slane %v3109_v55, 5  ;;  %v16252_v55 = vld [vmem:[#allocation21_spill] sm:$0xff] }
 0x1ad   : > { %v3115_v17 = vrot.slane %v3113_v25, 4  ;;  %v3900_v26 = vor.u32 %v3899_v52, %v3895_v19  ;;  %v3902_v36 = vshll.u32 %v8964_v18, 16  ;;  %v1045_v22 = vshll.u32 %v12289_v53, 16  ;;  %v16253_v25 = vld [vmem:[#allocation25_spill] sm:$0xff] }
 0x1ae   : > { %v2572_v23 = vrot.slane %v2571_v56, 4  ;;  %v3106_v10 = vor.u32 %v3105_v6, %v3102_v30  ;;  %v802_v28 = vor.u32 %v11646_v62, %v11638_v41  ;;  %v1049_v40 = vshrl.u32 %v12289_v53, 16 }
 0x1af   : > { %v3116_v58 = vor.u32 %v3115_v17, %v3111_v13  ;;  %v3121_v7 = vrot.slane %v3119_v9, 5  ;;  %v3904_v34 = vrot.slane %v3902_v36, 1  ;;  %v1172_v19 = vadd.bf16 %v16253_v25, %v16252_v55  ;;  %v12359_v9 = vpop.permute.xlu1 %3998  ;;  %v16261_v36 = vld [vmem:[#allocation8_spill] sm:$0xff] }
 0x1b0   : > { %v3107_v5 = vrot.slane %v3106_v10, 4  ;;  %v803_v4 = vrot.slane %v802_v28, 4  ;;  %v4476_v18 = vsel %vm4471_vm9, %v12235_v35, %v12003_v47  ;;  %v2567_v41 = vsel %vm10193_vm2, %v2562_v43, %v2566_v0  ;;  %v16256_v47 = vld [vmem:[#allocation24_spill] sm:$0xff] }
 0x1b1   : > { %v3117_v52 = vrot.slane %v3116_v58, 4  ;;  %v12323_v30 = vsel %vm2138_vm3, %v3900_v26, %v3904_v34  ;;  %6113 = vmatmul.mubr.bf16.gmra.mrb[4].mxu0 %v4476_v18  ;;  %v2577_v62 = vsel %vm10193_vm2, %v2572_v23, %v2576_v20  ;;  %v12329_v10 = vmul.bf16 1048592000, %v452_v37  ;;  %v12345_v23 = vpop.permute.xlu0 %4318  ;;  %v16258_v0 = vld [vmem:[#allocation20_spill] sm:$0xff] }
 0x1b2   : > { %16254 = vst [vmem:[#allocation21_spill] sm:$0xff] %v12323_v30  ;;  %v3112_v28 = vsel %vm10193_vm2, %v3107_v5, %v3111_v13  ;;  %3966 = vrot.lane.b32.xlu1 %v12323_v30, %s10138_s28  ;;  %v808_v34 = vsel %vm10193_vm2, %v803_v4, %v16256_v47  ;;  %v12341_v35 = vsel %vm10384_vm6, 0, %v12260_v48  ;;  %9651 = vmatmul.mubr.msk.bf16.gmra.mrb[20].mxu1 %vm4389_vm7, %v12323_v30  ;;  %v12364_v17 = vrot.slane %v1045_v22, 5 }
 0x1b3   : > { %16255 = vst [vmem:[#allocation25_spill] sm:$0xff] %v12329_v10  ;;  %16257 = vst [vmem:[#allocation24_spill] sm:$0xff] %v12341_v35  ;;  %v3122_v20 = vsel %vm10193_vm2, %v3117_v52, %v3121_v7  ;;  %v3301_v5 = vadd.bf16 %v3112_v28, %v12255_v11  ;;  %v1171_v37 = vadd.bf16 %v808_v34, %v16258_v0  ;;  %v15815_v11 = vmul.bf16 1061175104, %v12190_v2  ;;  %v16266_v52 = vld [vmem:[#allocation68_spill] sm:$0xff]  ;;  %v12399_v0 = vpop.permute.xlu1 %3680 }
 0x1b4   : > { %v4557_v4 = vsel %vm4438_vm8, %v12267_v27, %v12044_v33  ;;  %v3302_v43 = vadd.bf16 %v3122_v20, %v12269_v60  ;;  %v2710_v48 = vadd.bf16 %v2567_v41, %v12278_v31  ;;  %v2711_v56 = vadd.bf16 %v2577_v62, %v12283_v21  ;;  %16260 = vst [vmem:[#allocation128_spill] sm:$0xff] %v12364_v17 }
 0x1b5   : > { %v4591_v6 = vsel %vm4471_vm9, %v4557_v4, %v11935_v16  ;;  %v12361_v13 = vcombine.low %v1171_v37, %v1172_v19  ;;  %v1051_v26 = vrot.slane %v1049_v40, 4  ;;  %v1581_v60 = vshrl.u32 %v12281_v49, 16  ;;  %16267 = vst [vmem:[#allocation68_spill] sm:$0xff] %v12399_v0  ;;  %v16306_v0 = vld [vmem:[#allocation29_spill] sm:$0xff] }
 0x1b6   : > { %6120 = vmatprep.mubr.bf16.mxu0 %v4591_v6  ;;  %v12366_v33 = vcombine.low %v3301_v5, %v3302_v43  ;;  %4014 = vrot.lane.b32.xlu1 %v12341_v35, %s10139_s29  ;;  %v1584_v31 = vshll.u32 %v12281_v49, 16  ;;  %v1590_v21 = vshll.u32 %v12329_v10, 16  ;;  %v4398_v58 = vsel %vm4389_vm7, %v16261_v36, %v11893_v59 }
 0x1b7   : > { %16259 = vst [vmem:[#allocation20_spill] sm:$0xff] %v12361_v13  ;;  %v16262_v7 = vmul.bf16 1048592000, %v11979_v54  ;;  %v1052_v40 = vor.u32 %v1051_v26, %v12364_v17  ;;  %v1594_v55 = vshrl.u32 %v12329_v10, 16  ;;  %v895_v25 = vshll.u32 %v16242_v45, 16  ;;  %v12392_v54 = vpop.permute.xlu0 %4350  ;;  %v16269_v26 = vld [vmem:[#allocation81_spill] sm:$0xff] }
 0x1b8   : > { %v4444_v19 = vsel %vm4438_vm8, %v4398_v58, %v12104_v61  ;;  %v12388_v18 = vsel %vm10384_vm6, 0, %v12366_v33  ;;  %v12390_v59 = vcombine.low %v2710_v48, %v2711_v56  ;;  %16265 = vst [vmem:[#allocation131_spill] sm:$0xff] %v12392_v54  ;;  %v916_v41 = vshrl.u32 %v16266_v52, 16  ;;  %v16268_v48 = vld [vmem:[#allocation113_spill] sm:$0xff] }
 0x1b9   : > { %v453_v22 = vadd.bf16 %v15815_v11, %v16262_v7  ;;  %16263 = vst [vmem:[#allocation129_spill] sm:$0xff] %v12388_v18  ;;  %4334 = vrot.lane.b32.xlu0 %v12388_v18, %s10138_s28  ;;  %v1583_v47 = vrot.slane %v1581_v60, 4  ;;  %v1053_v34 = vrot.slane %v1052_v40, 4  ;;  %v1586_v20 = vrot.slane %v1584_v31, 5  ;;  %v12459_v11 = vld [vmem:[%s10200_s26 + $0xbc] sm:$0x1] }
 0x1ba   : > { %16264 = vst [vmem:[#allocation130_spill] sm:$0xff] %v12390_v59  ;;  %v1592_v61 = vrot.slane %v1590_v21, 5  ;;  %v1596_v5 = vrot.slane %v1594_v55, 4  ;;  %3696 = vrot.lane.b32.xlu1 %v12390_v59, %s10137_s27  ;;  %v4479_v56 = vsel %vm4471_vm9, %v4444_v19, %v16268_v48  ;;  %v919_v6 = vshll.u32 %v16266_v52, 16  ;;  %v12411_v55 = vld [vmem:[%s10200_s26 + $0xb4] sm:$0xf] }
 0x1bb   : > { %v710_v62 = vmul.bf16 1061175104, %v453_v22  ;;  %v1212_v28 = vmul.bf16 1048592000, %v453_v22  ;;  %v940_v60 = vshrl.u32 %v16269_v26, 16  ;;  %v1587_v31 = vor.u32 %v1586_v20, %v1583_v47  ;;  %6121 = vmatmul.mubr.bf16.gmra.mrb[8].mxu0 %v4479_v56 }
 0x1bc   : > { %v1597_v21 = vor.u32 %v1596_v5, %v1592_v61  ;;  %v12406_v58 = vmul.bf16 1061175104, %v12243_v50  ;;  %v943_v19 = vshll.u32 %v16269_v26, 16  ;;  %v12416_v20 = vld [vmem:[%s10200_s26 + $0xc0] sm:$0xf]  ;;  %v12418_v5 = vpop.permute.xlu0 %4272  ;;  %v16272_v50 = vshrl.u32 %v16242_v45, 16 }
 0x1bd   : > { %v1055_v37 = vshll.u32 %v710_v62, 16  ;;  %v1600_v4 = vshll.u32 %v1212_v28, 16  ;;  %v1604_v43 = vshrl.u32 %v1212_v28, 16  ;;  %4366 = vrot.lane.b32.xlu0 %v12390_v59, %s10139_s29  ;;  %v16271_v28 = vld [vmem:[#allocation92_spill] sm:$0xff]  ;;  %v1588_v48 = vrot.slane %v1587_v31, 4 }
 0x1be   : > { %16270 = vst [vmem:[#allocation113_spill] sm:$0xff] %v12406_v58  ;;  %v964_v52 = vshrl.u32 %v16271_v28, 16  ;;  %v1598_v47 = vrot.slane %v1597_v21, 4  ;;  %v12422_v56 = vrot.slane %v16272_v50, 4  ;;  %v12432_v26 = vrot.slane %v919_v6, 5  ;;  %v12438_v21 = vpop.permute.xlu1 %3952 }
 0x1bf   : > { %v1057_v7 = vrot.slane %v1055_v37, 5  ;;  %v1602_v22 = vrot.slane %v1600_v4, 5  ;;  %v1784_v40 = vadd.bf16 %v1604_v43, %v710_v62  ;;  %v12424_v37 = vrot.slane %v895_v25, 5  ;;  %16278 = vst [vmem:[#allocation136_spill] sm:$0xff] %v12438_v21 }
 0x1c0   : > { %16273 = vst [vmem:[#allocation81_spill] sm:$0xff] %v12422_v56  ;;  %v12430_v43 = vrot.slane %v916_v41, 4  ;;  %16277 = vst [vmem:[#allocation135_spill] sm:$0xff] %v12432_v26  ;;  %v1593_v31 = vsel %vm10193_vm2, %v1588_v48, %v1592_v61  ;;  %v355_v41 = vmul.bf16 1048592000, %v12411_v55  ;;  %v12447_v50 = vrot.slane %v943_v19, 5 }
 0x1c1   : > { %16274 = vst [vmem:[#allocation132_spill] sm:$0xff] %v12424_v37  ;;  %v12428_v62 = vsel %vm10193_vm2, %v1053_v34, %v1057_v7  ;;  %v8981_v4 = vcombine.low %v1784_v40, %v1784_v40  ;;  %v1603_v45 = vsel %vm10193_vm2, %v1598_v47, %v1602_v22  ;;  %v1782_v25 = vadd.bf16 %v1593_v31, %v12406_v58  ;;  %v302_v7 = vld [vmem:[%s10200_s26 + $0xb8] sm:$0xf]  ;;  %v305_v48 = vld [vmem:[%s10200_s26 + $0xc4] sm:$0xf] }
 0x1c2   : > { %16275 = vst [vmem:[#allocation133_spill] sm:$0xff] %v12428_v62  ;;  %16276 = vst [vmem:[#allocation134_spill] sm:$0xff] %v12430_v43  ;;  %v1783_v34 = vadd.bf16 %v1603_v45, %v12289_v53  ;;  %v406_v6 = vmul.bf16 1061175104, %v12416_v20  ;;  %v12445_v40 = vrot.slane %v940_v60, 4  ;;  %v12449_v61 = vrot.slane %v964_v52, 4 }
 0x1c3   : > { %16280 = vst [vmem:[#allocation138_spill] sm:$0xff] %v12447_v50  ;;  %v16282_v47 = vld [vmem:[#allocation10_spill] sm:$0xff]  ;;  %v4234_v45 = vshll.u32 %v8981_v4, 16  ;;  %v12466_v60 = vsel %vm4389_vm7, %v12361_v13, %v12185_v3  ;;  %v307_v52 = vld [vmem:[%s10200_s26 + $0xcc] sm:$0xf]  ;;  %v3909_v3 = vshll.u32 %v12366_v33, 16 }
 0x1c4   : > { %16279 = vst [vmem:[#allocation137_spill] sm:$0xff] %v12445_v40  ;;  %16281 = vst [vmem:[#allocation139_spill] sm:$0xff] %v12449_v61  ;;  %v4401_v31 = vsel %vm4389_vm7, %v16282_v47, %v12161_v38  ;;  %v12456_v53 = vcombine.low %v1782_v25, %v1783_v34  ;;  %v12461_v16 = vadd.bf16 %v406_v6, %v355_v41  ;;  %v356_v22 = vmul.bf16 1048592000, %v302_v7  ;;  %v12474_v25 = vpop.permute.xlu0 %4320 }
 0x1c5   : > { %16283 = vst [vmem:[#allocation140_spill] sm:$0xff] %v12466_v60  ;;  %v12470_v19 = vsel %vm4438_vm8, %v4401_v31, %v12198_v63  ;;  %v403_v38 = vmul.bf16 1061175104, %v12411_v55  ;;  %16284 = vst [vmem:[#allocation141_spill] sm:$0xff] %v12474_v25  ;;  %v404_v27 = vmul.bf16 1061175104, %v302_v7  ;;  %v4559_v63 = vsel %vm4438_vm8, %v12466_v60, %v12230_v32  ;;  %v12485_v55 = vpop.permute.xlu1 %4000 }
 0x1c6   : > { %v4227_v4 = vshrl.u32 %v12456_v53, 16  ;;  %v4229_v34 = vshll.u32 %v12456_v53, 16  ;;  %v407_v35 = vmul.bf16 1061175104, %v305_v48  ;;  %v3907_v47 = vshrl.u32 %v12366_v33, 16  ;;  %16285 = vst [vmem:[#allocation142_spill] sm:$0xff] %v12485_v55 }
 0x1c7   : > { %v308_v31 = vld [vmem:[%s10200_s26 + $0xd0] sm:$0xf]  ;;  %v4236_v18 = vrot.slane %v4234_v45, 1  ;;  %v12490_v7 = vmul.bf16 1048592000, %v12461_v16  ;;  %v4594_v10 = vsel %vm4471_vm9, %v4559_v63, %v12287_v42  ;;  %v3911_v61 = vrot.slane %v3909_v3, 1 }
 0x1c8   : > { %v4231_v30 = vrot.slane %v4229_v34, 1  ;;  %v12487_v49 = vadd.bf16 %v407_v35, %v356_v22  ;;  %v358_v17 = vmul.bf16 1048592000, %v12416_v20  ;;  %v359_v62 = vmul.bf16 1048592000, %v305_v48  ;;  %6128 = vmatprep.mubr.bf16.mxu0 %v4594_v10  ;;  %v12505_v63 = vpop.permute.xlu0 %4352 }
 0x1c9   : > { %16287 = vst [vmem:[#allocation144_spill] sm:$0xff] %v12490_v7  ;;  %v466_v33 = vmul.bf16 1048592000, %v307_v52  ;;  %v16288_v60 = vmul.bf16 1048592000, %v12172_v39  ;;  %16293 = vst [vmem:[#allocation145_spill] sm:$0xff] %v12505_v63 }
 0x1ca   : > { %16286 = vst [vmem:[#allocation143_spill] sm:$0xff] %v12487_v49  ;;  %v4232_v32 = vor.u32 %v4231_v30, %v4227_v4  ;;  %v16289_v13 = vmul.bf16 1048592000, %v12183_v14  ;;  %v467_v45 = vmul.bf16 1048592000, %v308_v31  ;;  %v12526_v4 = vpop.permute.xlu1 %3682 }
 0x1cb   : > { %v454_v36 = vadd.bf16 %v403_v38, %v16288_v60  ;;  %v16290_v58 = vmul.bf16 1061175104, %v12172_v39  ;;  %v16291_v20 = vmul.bf16 1061175104, %v12183_v14  ;;  %v16292_v52 = vmul.bf16 1048592000, %v12253_v29 }
 0x1cc   : > { %v455_v34 = vadd.bf16 %v404_v27, %v16289_v13  ;;  %v12508_v30 = vsel %vm2138_vm3, %v4232_v32, %v4236_v18  ;;  %v16295_v60 = vmul.bf16 1048592000, %v12459_v11  ;;  %v16296_v13 = vmul.bf16 1061175104, %v12190_v2  ;;  %16298 = vst [vmem:[#allocation148_spill] sm:$0xff] %v12526_v4 }
 0x1cd   : > { %v511_v59 = vadd.bf16 %v16290_v58, %v355_v41  ;;  %v512_v48 = vadd.bf16 %v16291_v20, %v356_v22  ;;  %v3123_v50 = vshrl.u32 %v16292_v52, 16  ;;  %16294 = vst [vmem:[#allocation146_spill] sm:$0xff] %v12508_v30  ;;  %v12517_v39 = vmul.bf16 1048592000, %v12487_v49  ;;  %4288 = vrot.lane.b32.xlu0 %v12508_v30, %s10137_s27 }
 0x1ce   : > { %v12514_v10 = vadd.bf16 %v16296_v13, %v16295_v60  ;;  %v1637_v14 = vshrl.u32 %v12490_v7, 16  ;;  %v514_v58 = vadd.bf16 %v403_v38, %v358_v17  ;;  %v515_v41 = vadd.bf16 %v404_v27, %v359_v62  ;;  %v12554_v60 = vpop.permute.xlu0 %4274 }
 0x1cf   : > { %16297 = vst [vmem:[#allocation147_spill] sm:$0xff] %v12517_v39  ;;  %v12522_v22 = vadd.bf16 %v466_v33, %v406_v6  ;;  %v12524_v18 = vmul.bf16 1061175104, %v455_v34  ;;  %v12528_v3 = vadd.bf16 %v467_v45, %v407_v35  ;;  %v12530_v31 = vmul.bf16 1048592000, %v454_v36  ;;  %16302 = vst [vmem:[#allocation151_spill] sm:$0xff] %v12554_v60 }
 0x1d0   : > { %v12532_v32 = vmul.bf16 1048592000, %v455_v34  ;;  %v1640_v20 = vshll.u32 %v12490_v7, 16  ;;  %v12535_v52 = vmul.bf16 1061175104, %v454_v36  ;;  %v12541_v6 = vrot.slane %v1637_v14, 4 }
 0x1d1   : > { %16299 = vst [vmem:[#allocation149_spill] sm:$0xff] %v12530_v31  ;;  %v16301_v17 = vmul.bf16 1061175104, %v12253_v29  ;;  %v12544_v38 = vmul.bf16 1048592000, %v511_v59  ;;  %v3912_v13 = vor.u32 %v3911_v61, %v3907_v47  ;;  %v16304_v7 = vld [vmem:[#allocation86_spill] sm:$0xff] }
 0x1d2   : > { %16300 = vst [vmem:[#allocation150_spill] sm:$0xff] %v12532_v32  ;;  %v12546_v33 = vmul.bf16 1048592000, %v512_v48  ;;  %v12548_v34 = vmul.bf16 1048592000, %v514_v58  ;;  %v12556_v27 = vrot.slane %v1640_v20, 5  ;;  %v12579_v55 = vpop.permute.xlu0 %4322 }
 0x1d3   : > { %v3303_v62 = vadd.bf16 %v3123_v50, %v16301_v17  ;;  %v12550_v45 = vmul.bf16 1061175104, %v511_v59  ;;  %v12552_v36 = vmul.bf16 1061175104, %v512_v48  ;;  %v12558_v29 = vmul.bf16 1048592000, %v515_v41  ;;  %v12565_v48 = vpop.permute.xlu1 %3954 }
 0x1d4   : > { %v2732_v50 = vmul.bf16 1048592000, %v12514_v10  ;;  %16303 = vst [vmem:[#allocation152_spill] sm:$0xff] %v12565_v48  ;;  %v12568_v61 = vmul.bf16 1048592000, %v12522_v22  ;;  %v3128_v20 = vshrl.u32 %v12544_v38, 16 }
 0x1d5   : > { %v8965_v14 = vcombine.low %v3303_v62, %v3303_v62  ;;  %v2579_v17 = vshrl.u32 %v12550_v45, 16  ;;  %v2582_v35 = vshll.u32 %v12550_v45, 16  ;;  %v2588_v42 = vshll.u32 %v12552_v36, 16  ;;  %v16305_v62 = vld [vmem:[#allocation94_spill] sm:$0xff] }
 0x1d6   : > { %v2592_v59 = vshrl.u32 %v12552_v36, 16  ;;  %v12571_v47 = vmul.bf16 1048592000, %v12528_v3  ;;  %v826_v30 = vor.u32 %v16305_v62, %v16304_v7  ;;  %v3130_v56 = vrot.slane %v3128_v20, 4 }
 0x1d7   : > { %v2581_v40 = vrot.slane %v2579_v17, 4  ;;  %v2584_v26 = vrot.slane %v2582_v35, 5  ;;  %v2590_v43 = vrot.slane %v2588_v42, 5  ;;  %v3131_v28 = vshll.u32 %v12544_v38, 16  ;;  %v12583_v62 = vpop.permute.xlu1 %4002 }
 0x1d8   : > { %v2594_v37 = vrot.slane %v2592_v59, 4  ;;  %v3137_v15 = vshll.u32 %v12546_v33, 16  ;;  %v3141_v48 = vshrl.u32 %v12546_v33, 16  ;;  %v3147_v46 = vshll.u32 %v2732_v50, 16 }
 0x1d9   : > { %v2585_v60 = vor.u32 %v2584_v26, %v2581_v40  ;;  %v3914_v57 = vshll.u32 %v8965_v14, 16  ;;  %v3133_v49 = vrot.slane %v3131_v28, 5  ;;  %v827_v17 = vrot.slane %v826_v30, 4  ;;  %v16307_v26 = vld [vmem:[#allocation28_spill] sm:$0xff]  ;;  %v16308_v40 = vld [vmem:[#allocation34_spill] sm:$0xff] }
 0x1da   : > { %v2595_v4 = vor.u32 %v2594_v37, %v2590_v43  ;;  %v3139_v63 = vrot.slane %v3137_v15, 5  ;;  %v3143_v7 = vrot.slane %v3141_v48, 4  ;;  %v12581_v35 = vmul.bf16 1061175104, %v514_v58  ;;  %v16310_v30 = vld [vmem:[#allocation26_spill] sm:$0xff] }
 0x1db   : > { %v2586_v42 = vrot.slane %v2585_v60, 4  ;;  %v3149_v59 = vrot.slane %v3147_v46, 5  ;;  %v3916_v20 = vrot.slane %v3914_v57, 1  ;;  %v3134_v21 = vor.u32 %v3133_v49, %v3130_v56 }
 0x1dc   : > { %v3144_v25 = vor.u32 %v3143_v7, %v3139_v63  ;;  %v832_v37 = vsel %vm10193_vm2, %v827_v17, %v16306_v0  ;;  %v1174_v14 = vadd.bf16 %v16308_v40, %v16307_v26  ;;  %v12590_v28 = vmul.bf16 1061175104, %v515_v41 }
 0x1dd   : > { %v12593_v15 = vsel %vm2138_vm3, %v3912_v13, %v3916_v20  ;;  %v1173_v58 = vadd.bf16 %v832_v37, %v16310_v30  ;;  %v2235_v57 = vmul.bf16 1061175104, %v12514_v10  ;;  %v2596_v46 = vrot.slane %v2595_v4, 4 }
 0x1de   : > { %16309 = vst [vmem:[#allocation86_spill] sm:$0xff] %v12593_v15  ;;  %v3135_v60 = vrot.slane %v3134_v21, 4  ;;  %v3145_v49 = vrot.slane %v3144_v25, 4  ;;  %3968 = vrot.lane.b32.xlu1 %v12593_v15, %s10138_s28  ;;  %9654 = vmatprep.mubr.msk.bf16.mxu1 %vm4389_vm7, %v12593_v15  ;;  %v3151_v0 = vshrl.u32 %v2732_v50, 16  ;;  %v2591_v13 = vsel %vm10193_vm2, %v2586_v42, %v2590_v43  ;;  %v12610_v21 = vpop.permute.xlu0 %4354 }
 0x1df   : > { %v12601_v56 = vcombine.low %v1173_v58, %v1174_v14  ;;  %v2598_v41 = vshll.u32 %v2235_v57, 16  ;;  %v12608_v10 = vsel %vm10384_vm6, 0, %v12456_v53  ;;  %16313 = vst [vmem:[#allocation28_spill] sm:$0xff] %v12610_v21  ;;  %v12620_v53 = vpop.permute.xlu1 %3684  ;;  %v2712_v37 = vadd.bf16 %v2591_v13, %v12544_v38 }
 0x1e0   : > { %16312 = vst [vmem:[#allocation29_spill] sm:$0xff] %v12608_v10  ;;  %v3140_v4 = vsel %vm10193_vm2, %v3135_v60, %v3139_v63  ;;  %v3150_v50 = vsel %vm10193_vm2, %v3145_v49, %v3149_v59  ;;  %v3306_v48 = vadd.bf16 %v3151_v0, %v2235_v57  ;;  %v4482_v63 = vsel %vm4471_vm9, %v12470_v19, %v12257_v8 }
 0x1e1   : > { %16311 = vst [vmem:[#allocation94_spill] sm:$0xff] %v12601_v56  ;;  %v3304_v43 = vadd.bf16 %v3140_v4, %v12550_v45  ;;  %v3305_v17 = vadd.bf16 %v3150_v50, %v12552_v36  ;;  %v2600_v42 = vrot.slane %v2598_v41, 5  ;;  %v405_v59 = vmul.bf16 1061175104, %v12459_v11  ;;  %6129 = vmatmul.mubr.bf16.gmra.mrb[12].mxu0 %v4482_v63  ;;  %v12647_v41 = vld [vmem:[%s10200_s26 + $0xc8] sm:$0x1] }
 0x1e2   : > { %v8966_v20 = vcombine.low %v3306_v48, %v3306_v48  ;;  %4016 = vrot.lane.b32.xlu1 %v12608_v10, %s10139_s29  ;;  %v16314_v36 = vshll.u32 %v12524_v18, 16  ;;  %v16316_v38 = vshrl.u32 %v12524_v18, 16  ;;  %v16317_v57 = vmul.bf16 1048592000, %v12190_v2  ;;  %v12649_v13 = vpop.permute.xlu0 %4276 }
 0x1e3   : > { %v8932_v26 = vcombine.low %v3304_v43, %v3305_v17  ;;  %v2601_v45 = vsel %vm10193_vm2, %v2596_v46, %v2600_v42  ;;  %v1609_v19 = vshrl.u32 %v12530_v31, 16  ;;  %v1612_v42 = vshll.u32 %v12530_v31, 16 }
 0x1e4   : > { %v12633_v40 = vrot.slane %v16314_v36, 5  ;;  %v1075_v14 = vrot.slane %v16316_v38, 4  ;;  %v3926_v30 = vshll.u32 %v8966_v20, 16  ;;  %v2713_v58 = vadd.bf16 %v2601_v45, %v12546_v33  ;;  %v12656_v20 = vpop.permute.xlu1 %3956 }
 0x1e5   : > { %v456_v8 = vadd.bf16 %v405_v59, %v16317_v57  ;;  %v12643_v60 = vsel %vm10384_vm6, 0, %v8932_v26  ;;  %v3919_v46 = vshrl.u32 %v8932_v26, 16  ;;  %v3921_v49 = vshll.u32 %v8932_v26, 16 }
 0x1e6   : > { %16315 = vst [vmem:[#allocation34_spill] sm:$0xff] %v12633_v40  ;;  %16318 = vst [vmem:[#allocation26_spill] sm:$0xff] %v12643_v60  ;;  %v1076_v0 = vor.u32 %v1075_v14, %v12633_v40  ;;  %4336 = vrot.lane.b32.xlu0 %v12643_v60, %s10138_s28  ;;  %v3928_v33 = vrot.slane %v3926_v30, 1  ;;  %v12653_v2 = vcombine.low %v2712_v37, %v2713_v58  ;;  %v1611_v17 = vrot.slane %v1609_v19, 4  ;;  %v12670_v10 = vpop.permute.xlu0 %4324 }
 0x1e7   : > { %v713_v4 = vmul.bf16 1061175104, %v456_v8  ;;  %v1213_v50 = vmul.bf16 1048592000, %v456_v8  ;;  %v3923_v48 = vrot.slane %v3921_v49, 1  ;;  %v1618_v26 = vshll.u32 %v12532_v32, 16 }
 0x1e8   : > { %16319 = vst [vmem:[#allocation153_spill] sm:$0xff] %v12653_v2  ;;  %v1077_v43 = vrot.slane %v1076_v0, 4  ;;  %v1622_v45 = vshrl.u32 %v12532_v32, 16  ;;  %3698 = vrot.lane.b32.xlu1 %v12653_v2, %s10137_s27  ;;  %v1614_v38 = vrot.slane %v1612_v42, 5  ;;  %v360_v30 = vmul.bf16 1048592000, %v12647_v41 }
 0x1e9   : > { %v1079_v63 = vshll.u32 %v713_v4, 16  ;;  %v1628_v36 = vshll.u32 %v1213_v50, 16  ;;  %v3924_v37 = vor.u32 %v3923_v48, %v3919_v46  ;;  %v1632_v14 = vshrl.u32 %v1213_v50, 16 }
 0x1ea   : > { %4368 = vrot.lane.b32.xlu0 %v12653_v2, %s10139_s29  ;;  %v1620_v57 = vrot.slane %v1618_v26, 5  ;;  %v1624_v8 = vrot.slane %v1622_v45, 4  ;;  %v1615_v0 = vor.u32 %v1614_v38, %v1611_v17  ;;  %v12668_v25 = vadd.bf16 %v405_v59, %v360_v30  ;;  %v12704_v59 = vpop.permute.xlu0 %4356 }
 0x1eb   : > { %v1081_v58 = vrot.slane %v1079_v63, 5  ;;  %v1630_v19 = vrot.slane %v1628_v36, 5  ;;  %v12666_v49 = vsel %vm2138_vm3, %v3924_v37, %v3928_v33  ;;  %v1787_v7 = vadd.bf16 %v1632_v14, %v713_v4  ;;  %v12684_v63 = vpop.permute.xlu1 %4004  ;;  %16324 = vst [vmem:[#allocation157_spill] sm:$0xff] %v12704_v59 }
 0x1ec   : > { %16320 = vst [vmem:[#allocation154_spill] sm:$0xff] %v12666_v49  ;;  %9655 = vmatmul.mubr.msk.bf16.gmra.mrb[24].mxu1 %vm4389_vm7, %v12666_v49  ;;  %v1625_v50 = vor.u32 %v1624_v8, %v1620_v57  ;;  %v3156_v48 = vshrl.u32 %v12548_v34, 16  ;;  %v3159_v42 = vshll.u32 %v12548_v34, 16  ;;  %3970 = vrot.lane.b32.xlu1 %v12666_v49, %s10138_s28  ;;  %v1616_v33 = vrot.slane %v1615_v0, 4 }
 0x1ed   : > { %v12676_v46 = vsel %vm10193_vm2, %v1077_v43, %v1081_v58  ;;  %v8982_v4 = vcombine.low %v1787_v7, %v1787_v7  ;;  %v2733_v17 = vmul.bf16 1048592000, %v12668_v25  ;;  %v3165_v36 = vshll.u32 %v12558_v29, 16 }
 0x1ee   : > { %16321 = vst [vmem:[#allocation155_spill] sm:$0xff] %v12676_v46  ;;  %v1626_v26 = vrot.slane %v1625_v50, 4  ;;  %v3158_v43 = vrot.slane %v3156_v48, 4  ;;  %v3161_v45 = vrot.slane %v3159_v42, 5  ;;  %v1621_v37 = vsel %vm10193_vm2, %v1616_v33, %v1620_v57  ;;  %v309_v50 = vld [vmem:[%s10200_s26 + $0xd4] sm:$0x1] }
 0x1ef   : > { %v4246_v38 = vshll.u32 %v8982_v4, 16  ;;  %v3169_v30 = vshrl.u32 %v12558_v29, 16  ;;  %v1785_v58 = vadd.bf16 %v1621_v37, %v12535_v52  ;;  %v3167_v0 = vrot.slane %v3165_v36, 5  ;;  %v16323_v57 = vld [vmem:[#allocation32_spill] sm:$0xff]  ;;  %v12712_v49 = vpop.permute.xlu1 %3686 }
 0x1f0   : > { %v1631_v7 = vsel %vm10193_vm2, %v1626_v26, %v1630_v19  ;;  %v3162_v8 = vor.u32 %v3161_v45, %v3158_v43  ;;  %v12698_v48 = vsel %vm4389_vm7, %v12601_v56, %v12309_v44  ;;  %v4404_v42 = vsel %vm4389_vm7, %v16323_v57, %v12295_v1 }
 0x1f1   : > { %16322 = vst [vmem:[#allocation156_spill] sm:$0xff] %v12698_v48  ;;  %v1786_v33 = vadd.bf16 %v1631_v7, %v12524_v18  ;;  %v3171_v4 = vrot.slane %v3169_v30, 4  ;;  %v3175_v26 = vshll.u32 %v2733_v17, 16  ;;  %v3179_v37 = vshrl.u32 %v2733_v17, 16 }
 0x1f2   : > { %v3163_v19 = vrot.slane %v3162_v8, 4  ;;  %v4561_v45 = vsel %vm4438_vm8, %v12698_v48, %v12345_v23  ;;  %v468_v14 = vmul.bf16 1048592000, %v309_v50  ;;  %v4248_v1 = vrot.slane %v4246_v38, 1 }
 0x1f3   : > { %v12710_v44 = vcombine.low %v1785_v58, %v1786_v33  ;;  %v3172_v36 = vor.u32 %v3171_v4, %v3167_v0  ;;  %v3177_v30 = vrot.slane %v3175_v26, 5  ;;  %v16325_v7 = vmul.bf16 1061175104, %v12668_v25  ;;  %v12736_v60 = vpop.permute.xlu1 %3958 }
 0x1f4   : > { %v3168_v18 = vsel %vm10193_vm2, %v3163_v19, %v3167_v0  ;;  %v16326_v50 = vmul.bf16 1061175104, %v12647_v41  ;;  %v3184_v38 = vshrl.u32 %v12568_v61, 16  ;;  %v3187_v0 = vshll.u32 %v12568_v61, 16 }
 0x1f5   : > { %v3309_v17 = vadd.bf16 %v3179_v37, %v16325_v7  ;;  %v4239_v8 = vshrl.u32 %v12710_v44, 16  ;;  %v4241_v43 = vshll.u32 %v12710_v44, 16  ;;  %v3173_v57 = vrot.slane %v3172_v36, 4  ;;  %v12731_v36 = vpop.permute.xlu0 %4278 }
 0x1f6   : > { %v3307_v23 = vadd.bf16 %v3168_v18, %v12581_v35  ;;  %v12723_v33 = vadd.bf16 %v468_v14, %v16326_v50  ;;  %v3193_v26 = vshll.u32 %v12571_v47, 16  ;;  %v3197_v37 = vshrl.u32 %v12571_v47, 16 }
 0x1f7   : > { %v8967_v58 = vcombine.low %v3309_v17, %v3309_v17  ;;  %v4243_v4 = vrot.slane %v4241_v43, 1  ;;  %v3178_v19 = vsel %vm10193_vm2, %v3173_v57, %v3177_v30  ;;  %v3186_v48 = vrot.slane %v3184_v38, 4 }
 0x1f8   : > { %v3308_v18 = vadd.bf16 %v3178_v19, %v12590_v28  ;;  %v2734_v17 = vmul.bf16 1048592000, %v12723_v33  ;;  %v3189_v15 = vrot.slane %v3187_v0, 5  ;;  %v3195_v43 = vrot.slane %v3193_v26, 5 }
 0x1f9   : > { %v3938_v7 = vshll.u32 %v8967_v58, 16  ;;  %v4244_v50 = vor.u32 %v4243_v4, %v4239_v8  ;;  %v12739_v30 = vmul.bf16 1061175104, %v12522_v22  ;;  %v12742_v31 = vmul.bf16 1061175104, %v12528_v3 }
 0x1fa   : > { %v8933_v57 = vcombine.low %v3307_v23, %v3308_v18  ;;  %v3199_v40 = vrot.slane %v3197_v37, 4  ;;  %v3190_v19 = vor.u32 %v3189_v15, %v3186_v48  ;;  %v3203_v14 = vshll.u32 %v2734_v17, 16 }
 0x1fb   : > { %v12745_v58 = vsel %vm2138_vm3, %v4244_v50, %v4248_v1  ;;  %v3207_v56 = vshrl.u32 %v2734_v17, 16  ;;  %v3940_v0 = vrot.slane %v3938_v7, 1  ;;  %v16328_v26 = vmul.bf16 1061175104, %v12723_v33  ;;  %v12755_v1 = vpop.permute.xlu0 %4326  ;;  %v16330_v17 = vld [vmem:[#allocation95_spill] sm:$0xff]  ;;  %v16331_v50 = vld [vmem:[#allocation110_spill] sm:$0xff] }
 0x1fc   : > { %16327 = vst [vmem:[#allocation158_spill] sm:$0xff] %v12745_v58  ;;  %4290 = vrot.lane.b32.xlu0 %v12745_v58, %s10137_s27  ;;  %v3931_v8 = vshrl.u32 %v8933_v57, 16  ;;  %v3933_v38 = vshll.u32 %v8933_v57, 16  ;;  %v3200_v23 = vor.u32 %v3199_v40, %v3195_v43  ;;  %v3191_v4 = vrot.slane %v3190_v19, 4 }
 0x1fd   : > { %v3205_v22 = vrot.slane %v3203_v14, 5  ;;  %v3312_v3 = vadd.bf16 %v3207_v56, %v16328_v26  ;;  %v12753_v37 = vsel %vm10384_vm6, 0, %v8933_v57  ;;  %v4597_v18 = vsel %vm4471_vm9, %v4561_v45, %v12392_v54  ;;  %v12767_v26 = vpop.permute.xlu1 %4006 }
 0x1fe   : > { %16329 = vst [vmem:[#allocation159_spill] sm:$0xff] %v12753_v37  ;;  %v3935_v15 = vrot.slane %v3933_v38, 1  ;;  %v3201_v48 = vrot.slane %v3200_v23, 4  ;;  %v850_v7 = vor.u32 %v16331_v50, %v16330_v17  ;;  %v4448_v40 = vsel %vm4438_vm8, %v4404_v42, %v12314_v51  ;;  %6136 = vmatprep.mubr.bf16.mxu0 %v4597_v18  ;;  %v16333_v42 = vld [vmem:[#allocation37_spill] sm:$0xff]  ;;  %v16334_v17 = vld [vmem:[#allocation43_spill] sm:$0xff] }
 0x1ff   : > { %v16332_v14 = vmul.bf16 1061175104, %v12668_v25  ;;  %v3196_v57 = vsel %vm10193_vm2, %v3191_v4, %v3195_v43  ;;  %v8984_v19 = vcombine.low %v3312_v3, %v3312_v3  ;;  %v1176_v50 = vadd.bf16 %v16334_v17, %v16333_v42 }
 0x200   : > { %v3936_v38 = vor.u32 %v3935_v15, %v3931_v8  ;;  %v3206_v45 = vsel %vm10193_vm2, %v3201_v48, %v3205_v22  ;;  %v3310_v23 = vadd.bf16 %v3196_v57, %v12739_v30  ;;  %4338 = vrot.lane.b32.xlu0 %v12753_v37, %s10138_s28  ;;  %v851_v51 = vrot.slane %v850_v7, 4  ;;  %v16337_v22 = vld [vmem:[#allocation38_spill] sm:$0xff] }
 0x201   : > { %v2622_v56 = vshll.u32 %v16332_v14, 16  ;;  %v3311_v25 = vadd.bf16 %v3206_v45, %v12742_v31  ;;  %v4485_v43 = vsel %vm4471_vm9, %v4448_v40, %v12359_v9  ;;  %v16335_v4 = vshrl.u32 %v12581_v35, 16  ;;  %v16339_v14 = vld [vmem:[#allocation35_spill] sm:$0xff]  ;;  %v12797_v45 = vpop.permute.xlu0 %4358 }
 0x202   : > { %v12782_v3 = vsel %vm2138_vm3, %v3936_v38, %v3940_v0  ;;  %v856_v15 = vsel %vm10193_vm2, %v851_v51, %v16337_v22  ;;  %6137 = vmatmul.mubr.bf16.gmra.mrb[16].mxu0 %v4485_v43  ;;  %v16338_v48 = vshll.u32 %v12581_v35, 16  ;;  %v2612_v7 = vshll.u32 %v12590_v28, 16  ;;  %16341 = vst [vmem:[#allocation110_spill] sm:$0xff] %v12797_v45 }
 0x203   : > { %v2605_v8 = vrot.slane %v16335_v4, 4  ;;  %16336 = vst [vmem:[#allocation95_spill] sm:$0xff] %v12782_v3  ;;  %9658 = vmatprep.mubr.msk.bf16.mxu1 %vm4389_vm7, %v12782_v3  ;;  %v12792_v9 = vcombine.low %v3310_v23, %v3311_v25  ;;  %v4385_v40 = vshll.u32 %v8984_v19, 16  ;;  %v1175_v57 = vadd.bf16 %v856_v15, %v16339_v14  ;;  %v16344_v4 = vld [vmem:[#allocation4_spill] sm:$0xff] }
 0x204   : > { %v2608_v18 = vrot.slane %v16338_v48, 5  ;;  %v16340_v0 = vshrl.u32 %v12590_v28, 16  ;;  %v2624_v51 = vrot.slane %v2622_v56, 5  ;;  %v2614_v17 = vrot.slane %v2612_v7, 5  ;;  %v12810_v28 = vpop.permute.xlu1 %3688 }
 0x205   : > { %v12802_v35 = vsel %vm10384_vm6, 0, %v12710_v44  ;;  %v4378_v43 = vshrl.u32 %v12792_v9, 16  ;;  %v4380_v23 = vshll.u32 %v12792_v9, 16  ;;  %v12806_v19 = vcombine.low %v1175_v57, %v1176_v50 }
 0x206   : > { %v2618_v38 = vrot.slane %v16340_v0, 4  ;;  %v2609_v42 = vor.u32 %v2608_v18, %v2605_v8  ;;  %16342 = vst [vmem:[#allocation37_spill] sm:$0xff] %v12802_v35  ;;  %4018 = vrot.lane.b32.xlu1 %v12802_v35, %s10139_s29  ;;  %v3525_v8 = vshrl.u32 %v16344_v4, 16  ;;  %v3527_v22 = vshll.u32 %v16344_v4, 16  ;;  %v16346_v18 = vld [vmem:[#allocation5_spill] sm:$0xff] }
 0x207   : > { %16343 = vst [vmem:[#allocation43_spill] sm:$0xff] %v12806_v19  ;;  %v12815_v44 = vmul.bf16 1061175104, %v12461_v16  ;;  %v4382_v15 = vrot.slane %v4380_v23, 1  ;;  %v4387_v48 = vrot.slane %v4385_v40, 1  ;;  %v3534_v50 = vshll.u32 %v16346_v18, 16 }
 0x208   : > { %v2610_v56 = vrot.slane %v2609_v42, 4  ;;  %v2619_v25 = vor.u32 %v2618_v38, %v2614_v17  ;;  %v3529_v57 = vrot.slane %v3527_v22, 1  ;;  %v3532_v0 = vshrl.u32 %v16346_v18, 16 }
 0x209   : > { %16345 = vst [vmem:[#allocation38_spill] sm:$0xff] %v12815_v44  ;;  %v4383_v42 = vor.u32 %v4382_v15, %v4378_v43  ;;  %v3536_v16 = vrot.slane %v3534_v50, 1  ;;  %v16349_v40 = vmul.bf16 1048592000, %v12459_v11  ;;  %v16350_v23 = vmul.bf16 1061175104, %v12647_v41 }
 0x20a   : > { %v2615_v7 = vsel %vm10193_vm2, %v2610_v56, %v2614_v17  ;;  %v2620_v14 = vrot.slane %v2619_v25, 4  ;;  %v12834_v17 = vpop.permute.xlu0 %4280  ;;  %v16352_v56 = vshrl.u32 %v12517_v39, 16  ;;  %v3530_v25 = vor.u32 %v3529_v57, %v3525_v8  ;;  %v16355_v41 = vld [vmem:[#allocation68_spill] sm:$0xff]  ;;  %v16356_v50 = vld [vmem:[#allocation41_spill] sm:$0xff] }
 0x20b   : > { %v2714_v38 = vadd.bf16 %v2615_v7, %v12548_v34  ;;  %v12832_v35 = vadd.bf16 %v16350_v23, %v16349_v40  ;;  %v1643_v22 = vor.u32 %v12556_v27, %v12541_v6  ;;  %v12843_v15 = vsel %vm2138_vm3, %v4383_v42, %v4387_v48  ;;  %v12854_v23 = vpop.permute.xlu1 %3960  ;;  %v16358_v48 = vld [vmem:[#allocation141_spill] sm:$0xff]  ;;  %v16359_v42 = vld [vmem:[#allocation136_spill] sm:$0xff] }
 0x20c   : > { %v1652_v43 = vrot.slane %v16352_v56, 4  ;;  %v2625_v34 = vsel %vm10193_vm2, %v2620_v14, %v2624_v51  ;;  %16353 = vst [vmem:[#allocation5_spill] sm:$0xff] %v12843_v15  ;;  %v12848_v11 = vsel %vm4389_vm7, %v12806_v19, %v12418_v5  ;;  %v4407_v7 = vsel %vm4389_vm7, %v16356_v50, %v16355_v41  ;;  %9659 = vmatmul.mubr.msk.bf16.gmra.mrb[28].mxu1 %vm4389_vm7, %v12843_v15  ;;  %v16364_v51 = vld [vmem:[#allocation17_spill] sm:$0xff]  ;;  %v16370_v15 = vld [vmem:[#allocation52_spill] sm:$0xff] }
 0x20d   : > { %16351 = vst [vmem:[#allocation35_spill] sm:$0xff] %v12832_v35  ;;  %16354 = vst [vmem:[#allocation160_spill] sm:$0xff] %v12848_v11  ;;  %v2715_v40 = vadd.bf16 %v2625_v34, %v12558_v29  ;;  %v12860_v27 = vsel %vm12824_vm11, %v3530_v25, 0  ;;  %v3537_v6 = vor.u32 %v3536_v16, %v3532_v0  ;;  %v1214_v5 = vmul.bf16 1048592000, %v12832_v35  ;;  %v16360_v34 = vld [vmem:[#allocation145_spill] sm:$0xff] }
 0x20e   : > { %16357 = vst [vmem:[#allocation68_spill] sm:$0xff] %v12860_v27  ;;  %v4563_v29 = vsel %vm4438_vm8, %v12848_v11, %v16358_v48  ;;  %9662 = vmatprep.mubr.msk.bf16.mxu1 %vm4389_vm7, %v12860_v27  ;;  %v1644_v14 = vrot.slane %v1643_v22, 4  ;;  %v1646_v57 = vshll.u32 %v12517_v39, 16  ;;  %v4450_v56 = vsel %vm4438_vm8, %v4407_v7, %v16359_v42  ;;  %v16363_v22 = vld [vmem:[#allocation142_spill] sm:$0xff]  ;;  %v16365_v7 = vld [vmem:[#allocation124_spill] sm:$0xff]  ;;  %v16371_v39 = vld [vmem:[#allocation7_spill] sm:$0xff] }
 0x20f   : > { %v12864_v8 = vcombine.low %v2714_v38, %v2715_v40  ;;  %v1656_v0 = vshll.u32 %v1214_v5, 16  ;;  %v1660_v16 = vshrl.u32 %v1214_v5, 16  ;;  %v4600_v25 = vsel %vm4471_vm9, %v4563_v29, %v16360_v34  ;;  %v16361_v38 = vld [vmem:[#allocation143_spill] sm:$0xff]  ;;  %v12887_v5 = vpop.permute.xlu0 %4328 }
 0x210   : > { %v12877_v41 = vmul.bf16 1061175104, %v16361_v38  ;;  %v1648_v40 = vrot.slane %v1646_v57, 5  ;;  %v4488_v48 = vsel %vm4471_vm9, %v4450_v56, %v16363_v22  ;;  %v874_v42 = vor.u32 %v16365_v7, %v16364_v51  ;;  %6144 = vmatprep.mubr.bf16.mxu0 %v4600_v25  ;;  %v16369_v7 = vld [vmem:[#allocation46_spill] sm:$0xff] }
 0x211   : > { %4370 = vrot.lane.b32.xlu0 %v12864_v8, %s10139_s29  ;;  %3700 = vrot.lane.b32.xlu1 %v12864_v8, %s10137_s27  ;;  %v16366_v29 = vmul.bf16 1061175104, %v12723_v33  ;;  %v12895_v38 = vsel %vm12824_vm11, %v3537_v6, 0  ;;  %v1658_v57 = vrot.slane %v1656_v0, 5  ;;  %v16368_v11 = vmul.bf16 1061175104, %v12832_v35 }
 0x212   : > { %16362 = vst [vmem:[#allocation141_spill] sm:$0xff] %v12877_v41  ;;  %16367 = vst [vmem:[#allocation136_spill] sm:$0xff] %v12895_v38  ;;  %v1649_v56 = vsel %vm10193_vm2, %v1644_v14, %v1648_v40  ;;  %v1653_v22 = vor.u32 %v1652_v43, %v1648_v40  ;;  %6145 = vmatmul.mubr.bf16.gmra.mrb[20].mxu0 %v4488_v48  ;;  %v875_v51 = vrot.slane %v874_v42, 4  ;;  %v3539_v0 = vshrl.u32 %v16371_v39, 16  ;;  %v16372_v14 = vld [vmem:[#allocation47_spill] sm:$0xff]  ;;  %v16374_v40 = vld [vmem:[#allocation44_spill] sm:$0xff] }
 0x213   : > { %v12891_v34 = vshll.u32 %v16366_v29, 16  ;;  %v1790_v50 = vadd.bf16 %v1660_v16, %v16368_v11  ;;  %v1178_v33 = vadd.bf16 %v16370_v15, %v16369_v7  ;;  %v12903_v29 = vpop.permute.xlu1 %4008  ;;  %v1788_v37 = vadd.bf16 %v1649_v56, %v12815_v44  ;;  %v16373_v16 = vld [vmem:[#allocation33_spill] sm:$0xff] }
 0x214   : > { %v3541_v35 = vshll.u32 %v16371_v39, 16  ;;  %v1654_v11 = vrot.slane %v1653_v22, 4  ;;  %v880_v43 = vsel %vm10193_vm2, %v875_v51, %v16372_v14  ;;  %v3546_v25 = vshrl.u32 %v16373_v16, 16  ;;  %9663 = vmatmul.mubr.msk.bf16.gmra.mrb[32].mxu1 %vm4389_vm7, %v12895_v38  ;;  %v12923_v14 = vpop.permute.xlu0 %4360 }
 0x215   : > { %v8983_v6 = vcombine.low %v1790_v50, %v1790_v50  ;;  %3972 = vrot.lane.b32.xlu1 %v12782_v3, %s10138_s28  ;;  %v3548_v15 = vshll.u32 %v16373_v16, 16  ;;  %v1177_v48 = vadd.bf16 %v880_v43, %v16374_v40  ;;  %v2627_v56 = vshrl.u32 %v12739_v30, 16  ;;  %16375 = vst [vmem:[#allocation143_spill] sm:$0xff] %v12923_v14  ;;  %v16378_v40 = vld [vmem:[#allocation49_spill] sm:$0xff] }
 0x216   : > { %v3543_v42 = vrot.slane %v3541_v35, 1  ;;  %v1659_v22 = vsel %vm10193_vm2, %v1654_v11, %v1658_v57  ;;  %v2630_v3 = vshll.u32 %v12739_v30, 16  ;;  %v2636_v51 = vshll.u32 %v12742_v31, 16  ;;  %v16377_v35 = vld [vmem:[#allocation148_spill] sm:$0xff] }
 0x217   : > { %v4258_v50 = vshll.u32 %v8983_v6, 16  ;;  %v3550_v7 = vrot.slane %v3548_v15, 1  ;;  %v2648_v58 = vrot.slane %v12891_v34, 5  ;;  %v1789_v44 = vadd.bf16 %v1659_v22, %v12877_v41  ;;  %v12932_v15 = vpop.permute.xlu1 %3690 }
 0x218   : > { %v12927_v6 = vcombine.low %v1177_v48, %v1178_v33  ;;  %v3544_v43 = vor.u32 %v3543_v42, %v3539_v0  ;;  %v4410_v19 = vsel %vm4389_vm7, %v16378_v40, %v16377_v35  ;;  %v2629_v57 = vrot.slane %v2627_v56, 4  ;;  %v16380_v48 = vld [vmem:[#allocation151_spill] sm:$0xff]  ;;  %v12962_v35 = vpop.permute.xlu0 %4282 }
 0x219   : > { %v3551_v16 = vor.u32 %v3550_v7, %v3546_v25  ;;  %v2632_v11 = vrot.slane %v2630_v3, 5  ;;  %v8882_v30 = vcombine.low %v1788_v37, %v1789_v44  ;;  %v2638_v34 = vrot.slane %v2636_v51, 5  ;;  %v16384_v7 = vld [vmem:[#allocation152_spill] sm:$0xff]  ;;  %v16385_v51 = vld [vmem:[#allocation115_spill] sm:$0xff] }
 0x21a   : > { %16376 = vst [vmem:[#allocation142_spill] sm:$0xff] %v12927_v6  ;;  %v12936_v46 = vsel %vm12824_vm11, %v3544_v43, 0  ;;  %v2640_v22 = vshrl.u32 %v12742_v31, 16  ;;  %v4260_v33 = vrot.slane %v4258_v50, 1  ;;  %v12942_v0 = vsel %vm4389_vm7, %v12927_v6, %v16380_v48 }
 0x21b   : > { %16379 = vst [vmem:[#allocation17_spill] sm:$0xff] %v12936_v46  ;;  %16381 = vst [vmem:[#allocation124_spill] sm:$0xff] %v12942_v0  ;;  %9666 = vmatprep.mubr.msk.bf16.mxu1 %vm4389_vm7, %v12936_v46  ;;  %v12948_v3 = vsel %vm12824_vm11, %v3551_v16, 0  ;;  %v2633_v37 = vor.u32 %v2632_v11, %v2629_v57  ;;  %v4251_v44 = vshrl.u32 %v8882_v30, 16  ;;  %v4253_v25 = vshll.u32 %v8882_v30, 16 }
 0x21c   : > { %16382 = vst [vmem:[#allocation46_spill] sm:$0xff] %v12948_v3  ;;  %v2642_v42 = vrot.slane %v2640_v22, 4  ;;  %v12952_v31 = vsel %vm10384_vm6, 0, %v8882_v30  ;;  %v4565_v56 = vsel %vm4438_vm8, %v12942_v0, %v12579_v55  ;;  %v4452_v16 = vsel %vm4438_vm8, %v4410_v19, %v16384_v7  ;;  %9667 = vmatmul.mubr.msk.bf16.gmra.mrb[36].mxu1 %vm4389_vm7, %v12948_v3  ;;  %v16386_v30 = vld [vmem:[#allocation42_spill] sm:$0xff]  ;;  %v16387_v0 = vld [vmem:[#allocation51_spill] sm:$0xff] }
 0x21d   : > { %16383 = vst [vmem:[#allocation52_spill] sm:$0xff] %v12952_v31  ;;  %v2634_v50 = vrot.slane %v2633_v37, 4  ;;  %4020 = vrot.lane.b32.xlu1 %v12952_v31, %s10139_s29  ;;  %v2004_v43 = vshll.u32 %v16385_v51, 16  ;;  %v4255_v57 = vrot.slane %v4253_v25, 1  ;;  %v3553_v22 = vshrl.u32 %v16386_v30, 16  ;;  %v12973_v31 = vpop.permute.xlu1 %3962 }
 0x21e   : > { %v2643_v11 = vor.u32 %v2642_v42, %v2638_v34  ;;  %v3555_v48 = vshll.u32 %v16386_v30, 16  ;;  %v2002_v55 = vshrl.u32 %v16385_v51, 16  ;;  %v3560_v19 = vshrl.u32 %v16387_v0, 16  ;;  %v16388_v42 = vld [vmem:[#allocation3_spill] sm:$0xff]  ;;  %v16389_v30 = vld [vmem:[#allocation2_spill] sm:$0xff] }
 0x21f   : > { %v2639_v37 = vsel %vm10193_vm2, %v2634_v50, %v2638_v34  ;;  %v3562_v7 = vshll.u32 %v16387_v0, 16  ;;  %v4256_v25 = vor.u32 %v4255_v57, %v4251_v44  ;;  %v2006_v41 = vrot.slane %v2004_v43, 1 }
 0x220   : > { %v2644_v40 = vrot.slane %v2643_v11, 4  ;;  %v3557_v6 = vrot.slane %v3555_v48, 1  ;;  %v2114_v32 = vshrl.u32 %v16389_v30, 16  ;;  %v2116_v34 = vshll.u32 %v16389_v30, 16  ;;  %v16410_v30 = vld [vmem:[#allocation59_spill] sm:$0xff] }
 0x221   : > { %4632 = vrot.lane.b32.xlu1 %v16388_v42, %s10137_s27  ;;  %v3564_v3 = vrot.slane %v3562_v7, 1  ;;  %v4603_v50 = vsel %vm4471_vm9, %v4565_v56, %v12610_v21  ;;  %v12982_v46 = vsel %vm2138_vm3, %v4256_v25, %v4260_v33  ;;  %v4491_v43 = vsel %vm4471_vm9, %v4452_v16, %v12583_v62  ;;  %v12992_v33 = vpop.permute.xlu0 %4330  ;;  %v16391_v25 = vld [vmem:[#allocation92_spill] sm:$0xff] }
 0x222   : > { %16390 = vst [vmem:[#allocation7_spill] sm:$0xff] %v12982_v46  ;;  %v2649_v44 = vsel %vm10193_vm2, %v2644_v40, %v2648_v58  ;;  %v3558_v57 = vor.u32 %v3557_v6, %v3553_v22  ;;  %6152 = vmatprep.mubr.bf16.mxu0 %v4603_v50  ;;  %4292 = vrot.lane.b32.xlu0 %v12982_v46, %s10137_s27  ;;  %v2118_v56 = vrot.slane %v2116_v34, 1  ;;  %v16392_v21 = vshll.u32 %v16391_v25, 16  ;;  %v16400_v34 = vld [vmem:[#allocation62_spill] sm:$0xff] }
 0x223   : > { %v2716_v11 = vadd.bf16 %v2639_v37, %v12568_v61  ;;  %v2717_v48 = vadd.bf16 %v2649_v44, %v12571_v47  ;;  %v3565_v7 = vor.u32 %v3564_v3, %v3560_v19  ;;  %6153 = vmatmul.mubr.bf16.gmra.mrb[24].mxu0 %v4491_v43  ;;  %v13001_v62 = vsel %vm10384_vm6, 0, %v12792_v9  ;;  %v16395_v61 = vld [vmem:[#allocation81_spill] sm:$0xff]  ;;  %v16396_v47 = vld [vmem:[#allocation132_spill] sm:$0xff]  ;;  %v13016_v9 = vpop.permute.xlu1 %4010  ;;  %v16399_v19 = vld [vmem:[#allocation55_spill] sm:$0xff] }
 0x224   : > { %v12996_v58 = vrot.slane %v16392_v21, 5  ;;  %16393 = vst [vmem:[#allocation47_spill] sm:$0xff] %v13001_v62  ;;  %v13005_v6 = vsel %vm12824_vm11, %v3558_v57, 0  ;;  %v898_v40 = vor.u32 %v16396_v47, %v16395_v61  ;;  %v16397_v3 = vld [vmem:[#allocation105_spill] sm:$0xff]  ;;  %v2007_v22 = vor.u32 %v2006_v41, %v2002_v55  ;;  %v16404_v43 = vld [vmem:[#allocation71_spill] sm:$0xff]  ;;  %v16405_v61 = vld [vmem:[#allocation56_spill] sm:$0xff] }
 0x225   : > { %16394 = vst [vmem:[#allocation44_spill] sm:$0xff] %v13005_v6  ;;  %v988_v16 = vshrl.u32 %v16397_v3, 16  ;;  %9670 = vmatprep.mubr.msk.bf16.mxu1 %vm4389_vm7, %v13005_v6  ;;  %v13014_v21 = vsel %vm12824_vm11, %v3565_v7, 0  ;;  %v2119_v24 = vor.u32 %v2118_v56, %v2114_v32  ;;  %v1180_v50 = vadd.bf16 %v16400_v34, %v16399_v19  ;;  %v16401_v44 = vld [vmem:[#allocation61_spill] sm:$0xff] }
 0x226   : > { %16398 = vst [vmem:[#allocation148_spill] sm:$0xff] %v13014_v21  ;;  %9671 = vmatmul.mubr.msk.bf16.gmra.mrb[40].mxu1 %vm4389_vm7, %v13014_v21  ;;  %v899_v37 = vrot.slane %v898_v40, 4  ;;  %v3567_v57 = vshrl.u32 %v16401_v44, 16  ;;  %v3569_v41 = vshll.u32 %v16401_v44, 16  ;;  %4340 = vrot.lane.b32.xlu0 %v13001_v62, %s10138_s28  ;;  %v13026_v55 = vcombine.low %v2716_v11, %v2717_v48  ;;  %v16406_v11 = vld [vmem:[#allocation134_spill] sm:$0xff]  ;;  %v16407_v48 = vld [vmem:[#allocation135_spill] sm:$0xff] }
 0x227   : > { %v13030_v32 = vsel %vm12824_vm11, %v2119_v24, 0  ;;  %v3574_v7 = vshrl.u32 %v16404_v43, 16  ;;  %v3576_v56 = vshll.u32 %v16404_v43, 16  ;;  %v991_v25 = vshll.u32 %v16397_v3, 16  ;;  %v16409_v34 = vld [vmem:[#allocation53_spill] sm:$0xff]  ;;  %v16412_v43 = vld [vmem:[#allocation11_spill] sm:$0xff] }
 0x228   : > { %16402 = vst [vmem:[#allocation151_spill] sm:$0xff] %v13026_v55  ;;  %16403 = vst [vmem:[#allocation152_spill] sm:$0xff] %v13030_v32  ;;  %4680 = vrot.lane.b32.xlu1 %v13030_v32, %s10138_s28  ;;  %v904_v47 = vsel %vm10193_vm2, %v899_v37, %v16405_v61  ;;  %v3571_v40 = vrot.slane %v3569_v41, 1  ;;  %v922_v19 = vor.u32 %v16407_v48, %v16406_v11  ;;  %v13044_v24 = vsel %vm12824_vm11, %v2007_v22, 0  ;;  %v13050_v32 = vpop.permute.xlu0 %4362  ;;  %v16413_v61 = vld [vmem:[#allocation65_spill] sm:$0xff]  ;;  %v16414_v44 = vld [vmem:[#allocation72_spill] sm:$0xff] }
 0x229   : > { %16408 = vst [vmem:[#allocation92_spill] sm:$0xff] %v13044_v24  ;;  %v1179_v62 = vadd.bf16 %v904_v47, %v16409_v34  ;;  %v4413_v3 = vsel %vm4389_vm7, %v16410_v30, %v12620_v53  ;;  %v3578_v42 = vrot.slane %v3576_v56, 1  ;;  %16411 = vst [vmem:[#allocation81_spill] sm:$0xff] %v13050_v32  ;;  %v2011_v37 = vshll.u32 %v16412_v43, 16  ;;  %v16416_v48 = vld [vmem:[#allocation80_spill] sm:$0xff]  ;;  %v13061_v56 = vpop.permute.xlu1 %3692 }
 0x22a   : > { %v3572_v46 = vor.u32 %v3571_v40, %v3567_v57  ;;  %v923_v41 = vrot.slane %v922_v19, 4  ;;  %v1182_v11 = vadd.bf16 %v16414_v44, %v16413_v61  ;;  %4372 = vrot.lane.b32.xlu0 %v13026_v55, %s10139_s29  ;;  %v3581_v34 = vshrl.u32 %v16416_v48, 16  ;;  %v16418_v44 = vld [vmem:[#allocation66_spill] sm:$0xff] }
 0x22b   : > { %v13057_v22 = vcombine.low %v1179_v62, %v1180_v50  ;;  %v3579_v47 = vor.u32 %v3578_v42, %v3574_v7  ;;  %v3583_v53 = vshll.u32 %v16416_v48, 16  ;;  %v16419_v62 = vld [vmem:[#allocation90_spill] sm:$0xff]  ;;  %v4454_v19 = vsel %vm4438_vm8, %v4413_v3, %v12656_v20 }
 0x22c   : > { %4712 = vrot.lane.b32.xlu1 %v16385_v51, %s10139_s29  ;;  %v13067_v57 = vsel %vm12824_vm11, %v3572_v46, 0  ;;  %v928_v40 = vsel %vm10193_vm2, %v923_v41, %v16418_v44  ;;  %v3588_v50 = vshrl.u32 %v16419_v62, 16  ;;  %v3590_v42 = vshll.u32 %v16419_v62, 16  ;;  %v16422_v41 = vld [vmem:[#allocation63_spill] sm:$0xff] }
 0x22d   : > { %16415 = vst [vmem:[#allocation132_spill] sm:$0xff] %v13057_v22  ;;  %16417 = vst [vmem:[#allocation105_spill] sm:$0xff] %v13067_v57  ;;  %v13077_v7 = vsel %vm4389_vm7, %v13057_v22, %v12649_v13  ;;  %9674 = vmatprep.mubr.msk.bf16.mxu1 %vm4389_vm7, %v13067_v57  ;;  %v13085_v46 = vsel %vm12824_vm11, %v3579_v47, 0  ;;  %v1181_v61 = vadd.bf16 %v928_v40, %v16422_v41  ;;  %v3585_v20 = vrot.slane %v3583_v53, 1 }
 0x22e   : > { %16420 = vst [vmem:[#allocation55_spill] sm:$0xff] %v13077_v7  ;;  %16421 = vst [vmem:[#allocation62_spill] sm:$0xff] %v13085_v46  ;;  %v4567_v44 = vsel %vm4438_vm8, %v13077_v7, %v12670_v10  ;;  %9675 = vmatmul.mubr.msk.bf16.gmra.mrb[44].mxu1 %vm4389_vm7, %v13085_v46  ;;  %v4494_v13 = vsel %vm4471_vm9, %v4454_v19, %v12684_v63  ;;  %v3592_v3 = vrot.slane %v3590_v42, 1  ;;  %4760 = vrot.lane.b32.xlu0 %v13044_v24, %s10137_s27  ;;  %v13102_v10 = vpop.permute.xlu0 %4284  ;;  %v16424_v7 = vld [vmem:[#allocation19_spill] sm:$0xff]  ;;  %v16425_v42 = vld [vmem:[#allocation108_spill] sm:$0xff] }
 0x22f   : > { %v2009_v47 = vshrl.u32 %v16412_v43, 16  ;;  %v2013_v30 = vrot.slane %v2011_v37, 1  ;;  %v4606_v40 = vsel %vm4471_vm9, %v4567_v44, %v12704_v59  ;;  %v13100_v41 = vcombine.low %v1181_v61, %v1182_v11  ;;  %v16427_v61 = vld [vmem:[#allocation121_spill] sm:$0xff]  ;;  %v13118_v59 = vpop.permute.xlu1 %3964 }
 0x230   : > { %4634 = vrot.lane.b32.xlu1 %v16424_v7, %s10137_s27  ;;  %6160 = vmatprep.mubr.bf16.mxu0 %v4606_v40  ;;  %v3586_v63 = vor.u32 %v3585_v20, %v3581_v34  ;;  %v3593_v53 = vor.u32 %v3592_v3, %v3588_v50  ;;  %v3595_v19 = vshrl.u32 %v16425_v42, 16  ;;  %v3597_v24 = vshll.u32 %v16425_v42, 16 }
 0x231   : > { %16423 = vst [vmem:[#allocation56_spill] sm:$0xff] %v13100_v41  ;;  %v13108_v51 = vrot.slane %v988_v16, 4  ;;  %v13110_v37 = vrot.slane %v991_v25, 5  ;;  %6161 = vmatmul.mubr.bf16.gmra.mrb[28].mxu0 %v4494_v13  ;;  %v13115_v11 = vsel %vm4389_vm7, %v13100_v41, %v12731_v36  ;;  %v3604_v44 = vshll.u32 %v16427_v61, 16  ;;  %v16429_v36 = vld [vmem:[#allocation69_spill] sm:$0xff] }
 0x232   : > { %16426 = vst [vmem:[#allocation134_spill] sm:$0xff] %v13115_v11  ;;  %v13122_v34 = vsel %vm12824_vm11, %v3586_v63, 0  ;;  %v4569_v16 = vsel %vm4438_vm8, %v13115_v11, %v12755_v1  ;;  %v3599_v25 = vrot.slane %v3597_v24, 1  ;;  %v3602_v50 = vshrl.u32 %v16427_v61, 16  ;;  %4792 = vrot.lane.b32.xlu0 %v16344_v4, %s10138_s28  ;;  %v16431_v24 = vld [vmem:[#allocation123_spill] sm:$0xff] }
 0x233   : > { %16428 = vst [vmem:[#allocation135_spill] sm:$0xff] %v13122_v34  ;;  %v4416_v13 = vsel %vm4389_vm7, %v16429_v36, %v12712_v49  ;;  %9678 = vmatprep.mubr.msk.bf16.mxu1 %vm4389_vm7, %v13122_v34  ;;  %v13137_v20 = vsel %vm12824_vm11, %v3593_v53, 0  ;;  %v3606_v3 = vrot.slane %v3604_v44, 1  ;;  %v4609_v1 = vsel %vm4471_vm9, %v4569_v16, %v12797_v45  ;;  %v16432_v49 = vld [vmem:[#allocation137_spill] sm:$0xff]  ;;  %v16433_v36 = vld [vmem:[#allocation138_spill] sm:$0xff]  ;;  %v16434_v53 = vld [vmem:[#allocation12_spill] sm:$0xff]  ;;  %v13151_v45 = vpop.permute.xlu0 %4332 }
 0x234   : > { %16430 = vst [vmem:[#allocation53_spill] sm:$0xff] %v13137_v20  ;;  %v1012_v40 = vshrl.u32 %v16431_v24, 16  ;;  %v2014_v63 = vor.u32 %v2013_v30, %v2009_v47  ;;  %4682 = vrot.lane.b32.xlu1 %v12860_v27, %s10138_s28  ;;  %v3600_v11 = vor.u32 %v3599_v25, %v3595_v19  ;;  %6168 = vmatprep.mubr.bf16.mxu0 %v4609_v1  ;;  %v2018_v42 = vshll.u32 %v16434_v53, 16  ;;  %v16435_v44 = vld [vmem:[#allocation130_spill] sm:$0xff]  ;;  %v13169_v27 = vpop.permute.xlu1 %4012 }
 0x235   : > { %v946_v61 = vor.u32 %v16433_v36, %v16432_v49  ;;  %v4456_v4 = vsel %vm4438_vm8, %v4416_v13, %v12736_v60  ;;  %v3609_v62 = vshrl.u32 %v16435_v44, 16  ;;  %v3611_v16 = vshll.u32 %v16435_v44, 16  ;;  %v16437_v36 = vld [vmem:[#allocation75_spill] sm:$0xff]  ;;  %v16438_v13 = vld [vmem:[#allocation82_spill] sm:$0xff] }
 0x236   : > { %9679 = vmatmul.mubr.msk.bf16.gmra.mrb[48].mxu1 %vm4389_vm7, %v13137_v20  ;;  %v13157_v30 = vsel %vm12824_vm11, %v3600_v11, 0  ;;  %v3607_v47 = vor.u32 %v3606_v3, %v3602_v50  ;;  %v4497_v19 = vsel %vm4471_vm9, %v4456_v4, %v12767_v26  ;;  %v1015_v25 = vshll.u32 %v16431_v24, 16  ;;  %4824 = vrot.lane.b32.xlu0 %v16424_v7, %s10139_s29  ;;  %v16439_v50 = vld [vmem:[#allocation113_spill] sm:$0xff]  ;;  %v16441_v4 = vld [vmem:[#allocation76_spill] sm:$0xff]  ;;  %v16442_v24 = vld [vmem:[#allocation139_spill] sm:$0xff] }
 0x237   : > { %16436 = vst [vmem:[#allocation65_spill] sm:$0xff] %v13157_v30  ;;  %v947_v60 = vrot.slane %v946_v61, 4  ;;  %9682 = vmatprep.mubr.msk.bf16.mxu1 %vm4389_vm7, %v13157_v30  ;;  %v1184_v1 = vadd.bf16 %v16438_v13, %v16437_v36  ;;  %v3613_v49 = vrot.slane %v3611_v16, 1  ;;  %v3618_v11 = vshll.u32 %v12653_v2, 16  ;;  %v16443_v7 = vld [vmem:[#allocation73_spill] sm:$0xff] }
 0x238   : > { %v1036_v3 = vshrl.u32 %v16439_v50, 16  ;;  %v13174_v26 = vsel %vm12824_vm11, %v2014_v63, 0  ;;  %4714 = vrot.lane.b32.xlu1 %v16412_v43, %s10139_s29  ;;  %v970_v16 = vor.u32 %v12996_v58, %v16442_v24  ;;  %v1039_v36 = vshll.u32 %v16439_v50, 16  ;;  %v16445_v50 = vld [vmem:[#allocation85_spill] sm:$0xff] }
 0x239   : > { %16440 = vst [vmem:[#allocation72_spill] sm:$0xff] %v13174_v26  ;;  %v952_v61 = vsel %vm10193_vm2, %v947_v60, %v16441_v4  ;;  %v2016_v13 = vshrl.u32 %v16434_v53, 16  ;;  %6169 = vmatmul.mubr.bf16.gmra.mrb[32].mxu0 %v4497_v19  ;;  %v3614_v30 = vor.u32 %v3613_v49, %v3609_v62  ;;  %v2020_v63 = vrot.slane %v2018_v42, 1  ;;  %v16446_v4 = vld [vmem:[#allocation93_spill] sm:$0xff]  ;;  %v13198_v62 = vpop.permute.xlu0 %4364  ;;  %v16448_v42 = vld [vmem:[#allocation23_spill] sm:$0xff] }
 0x23a   : > { %v1183_v44 = vadd.bf16 %v952_v61, %v16443_v7  ;;  %v13188_v20 = vsel %vm12824_vm11, %v3607_v47, 0  ;;  %v3616_v43 = vshrl.u32 %v12653_v2, 16  ;;  %v971_v34 = vrot.slane %v970_v16, 4  ;;  %4762 = vrot.lane.b32.xlu0 %v13174_v26, %s10137_s27  ;;  %16447 = vst [vmem:[#allocation66_spill] sm:$0xff] %v13198_v62  ;;  %v16449_v47 = vld [vmem:[#allocation78_spill] sm:$0xff] }
 0x23b   : > { %16444 = vst [vmem:[#allocation80_spill] sm:$0xff] %v13188_v20  ;;  %v3620_v60 = vrot.slane %v3618_v11, 1  ;;  %v1186_v19 = vadd.bf16 %v16446_v4, %v16445_v50  ;;  %v3625_v7 = vshll.u32 %v12864_v8, 16  ;;  %v4419_v49 = vsel %vm4389_vm7, %v16449_v47, %v12810_v28  ;;  %v16453_v50 = vld [vmem:[#allocation84_spill] sm:$0xff]  ;;  %v13221_v47 = vpop.permute.xlu1 %3694 }
 0x23c   : > { %v13193_v58 = vcombine.low %v1183_v44, %v1184_v1  ;;  %4636 = vrot.lane.b32.xlu1 %v16448_v42, %s10137_s27  ;;  %v13207_v61 = vsel %vm12824_vm11, %v3614_v30, 0  ;;  %v16451_v44 = vld [vmem:[#allocation87_spill] sm:$0xff]  ;;  %v3623_v11 = vshrl.u32 %v12864_v8, 16  ;;  %v4458_v16 = vsel %vm4438_vm8, %v4419_v49, %v12854_v23 }
 0x23d   : > { %16450 = vst [vmem:[#allocation63_spill] sm:$0xff] %v13207_v61  ;;  %v976_v1 = vsel %vm10193_vm2, %v971_v34, %v16451_v44  ;;  %v3627_v4 = vrot.slane %v3625_v7, 1  ;;  %v1014_v30 = vrot.slane %v1012_v40, 4  ;;  %v1017_v2 = vrot.slane %v1015_v25, 5 }
 0x23e   : > { %v13216_v24 = vsel %vm4389_vm7, %v13193_v58, %v12834_v17  ;;  %v1185_v28 = vadd.bf16 %v976_v1, %v16453_v50  ;;  %9683 = vmatmul.mubr.msk.bf16.gmra.mrb[52].mxu1 %vm4389_vm7, %v13188_v20  ;;  %v4500_v17 = vsel %vm4471_vm9, %v4458_v16, %v12903_v29  ;;  %4794 = vrot.lane.b32.xlu0 %v16346_v18, %s10138_s28  ;;  %v3632_v7 = vshll.u32 %v13026_v55, 16  ;;  %v16458_v50 = vld [vmem:[#allocation109_spill] sm:$0xff] }
 0x23f   : > { %16452 = vst [vmem:[#allocation123_spill] sm:$0xff] %v13216_v24  ;;  %v4571_v34 = vsel %vm4438_vm8, %v13216_v24, %v12887_v5  ;;  %9686 = vmatprep.mubr.msk.bf16.mxu1 %vm4389_vm7, %v13207_v61  ;;  %v3621_v23 = vor.u32 %v3620_v60, %v3616_v43  ;;  %v1038_v49 = vrot.slane %v1036_v3, 4  ;;  %v2021_v44 = vor.u32 %v2020_v63, %v2016_v13  ;;  %v4287_v3 = vpop.permute.xlu0 %4286  ;;  %v16455_v13 = vld [vmem:[#allocation20_spill] sm:$0xff] }
 0x240   : > { %v4612_v40 = vsel %vm4471_vm9, %v4571_v34, %v12923_v14  ;;  %v13236_v25 = vcombine.low %v1185_v28, %v1186_v19  ;;  %4684 = vrot.lane.b32.xlu1 %v12895_v38, %s10138_s28  ;;  %v3628_v5 = vor.u32 %v3627_v4, %v3623_v11  ;;  %v994_v29 = vor.u32 %v13110_v37, %v13108_v51  ;;  %v16457_v11 = vld [vmem:[#allocation102_spill] sm:$0xff]  ;;  %v13265_v4 = vpop.permute.xlu1 %3966  ;;  %v16460_v34 = vld [vmem:[#allocation89_spill] sm:$0xff]  ;;  %v16499_v14 = vld [vmem:[#allocation36_spill] sm:$0xff] }
 0x241   : > { %6176 = vmatprep.mubr.bf16.mxu0 %v4612_v40  ;;  %v1041_v1 = vrot.slane %v1039_v36, 5  ;;  %v1060_v43 = vshrl.u32 %v12535_v52, 16  ;;  %v1063_v60 = vshll.u32 %v12535_v52, 16  ;;  %v2025_v63 = vshll.u32 %v16455_v13, 16  ;;  %v16462_v40 = vld [vmem:[#allocation101_spill] sm:$0xff]  ;;  %v16510_v38 = vld [vmem:[#allocation83_spill] sm:$0xff] }
 0x242   : > { %6177 = vmatmul.mubr.bf16.gmra.mrb[36].mxu0 %v4500_v17  ;;  %v13248_v19 = vsel %vm4389_vm7, %v13236_v25, %v12962_v35  ;;  %v3630_v16 = vshrl.u32 %v13026_v55, 16  ;;  %v995_v37 = vrot.slane %v994_v29, 4  ;;  %4826 = vrot.lane.b32.xlu0 %v16448_v42, %s10139_s29  ;;  %v13259_v52 = vsel %vm12824_vm11, %v3621_v23, 0  ;;  %v16463_v29 = vld [vmem:[#allocation97_spill] sm:$0xff] }
 0x243   : > { %16454 = vst [vmem:[#allocation137_spill] sm:$0xff] %v13248_v19  ;;  %v4573_v51 = vsel %vm4438_vm8, %v13248_v19, %v12992_v33  ;;  %16456 = vst [vmem:[#allocation138_spill] sm:$0xff] %v13259_v52  ;;  %v3634_v36 = vrot.slane %v3632_v7, 1  ;;  %v1188_v28 = vadd.bf16 %v16458_v50, %v16457_v11  ;;  %v13269_v33 = vsel %vm12824_vm11, %v2021_v44, 0 }
 0x244   : > { %v4615_v35 = vsel %vm4471_vm9, %v4573_v51, %v13050_v32  ;;  %16459 = vst [vmem:[#allocation75_spill] sm:$0xff] %v13269_v33  ;;  %4716 = vrot.lane.b32.xlu1 %v16434_v53, %s10139_s29  ;;  %v4422_v17 = vsel %vm4389_vm7, %v16460_v34, %v12932_v15  ;;  %v13278_v23 = vsel %vm12824_vm11, %v3628_v5, 0  ;;  %v1000_v7 = vsel %vm10193_vm2, %v995_v37, %v16462_v40 }
 0x245   : > { %16461 = vst [vmem:[#allocation82_spill] sm:$0xff] %v13278_v23  ;;  %6184 = vmatprep.mubr.bf16.mxu0 %v4615_v35  ;;  %v4460_v44 = vsel %vm4438_vm8, %v4422_v17, %v12973_v31  ;;  %v1187_v51 = vadd.bf16 %v1000_v7, %v16463_v29  ;;  %v1018_v11 = vor.u32 %v1017_v2, %v1014_v30  ;;  %v2023_v15 = vshrl.u32 %v16455_v13, 16  ;;  %v4335_v30 = vpop.permute.xlu0 %4334  ;;  %v16465_v7 = vld [vmem:[#allocation31_spill] sm:$0xff]  ;;  %v16466_v29 = vld [vmem:[#allocation112_spill] sm:$0xff] }
 0x246   : > { %9687 = vmatmul.mubr.msk.bf16.gmra.mrb[56].mxu1 %vm4389_vm7, %v13259_v52  ;;  %v4503_v5 = vsel %vm4471_vm9, %v4460_v44, %v13016_v9  ;;  %v1042_v50 = vor.u32 %v1041_v1, %v1038_v49  ;;  %4764 = vrot.lane.b32.xlu0 %v13269_v33, %s10137_s27  ;;  %v2027_v35 = vrot.slane %v2025_v63, 1  ;;  %v3635_v31 = vor.u32 %v3634_v36, %v3630_v16  ;;  %v16467_v9 = vld [vmem:[#allocation15_spill] sm:$0xff]  ;;  %v16469_v16 = vld [vmem:[#allocation118_spill] sm:$0xff] }
 0x247   : > { %9690 = vmatprep.mubr.msk.bf16.mxu1 %vm4389_vm7, %v13278_v23  ;;  %v13295_v37 = vcombine.low %v1187_v51, %v1188_v28  ;;  %v1019_v2 = vrot.slane %v1018_v11, 4  ;;  %v1062_v17 = vrot.slane %v1060_v43, 4  ;;  %v1065_v40 = vrot.slane %v1063_v60, 5  ;;  %v4015_v28 = vpop.permute.xlu1 %4014  ;;  %v16470_v43 = vld [vmem:[#allocation25_spill] sm:$0xff]  ;;  %v16472_v11 = vld [vmem:[#allocation111_spill] sm:$0xff] }
 0x248   : > { %4638 = vrot.lane.b32.xlu1 %v16465_v7, %s10137_s27  ;;  %v1190_v49 = vadd.bf16 %v16467_v9, %v16466_v29  ;;  %v1043_v1 = vrot.slane %v1042_v50, 4  ;;  %v16471_v60 = vld [vmem:[#allocation133_spill] sm:$0xff] }
 0x249   : > { %16464 = vst [vmem:[#allocation113_spill] sm:$0xff] %v13295_v37  ;;  %v13304_v63 = vsel %vm4389_vm7, %v13295_v37, %v13102_v10  ;;  %v1024_v36 = vsel %vm10193_vm2, %v1019_v2, %v16469_v16  ;;  %v1192_v44 = vadd.bf16 %v16471_v60, %v16470_v43  ;;  %v2028_v10 = vor.u32 %v2027_v35, %v2023_v15  ;;  %v16475_v16 = vld [vmem:[#allocation125_spill] sm:$0xff] }
 0x24a   : > { %6185 = vmatmul.mubr.bf16.gmra.mrb[40].mxu0 %v4503_v5  ;;  %16468 = vst [vmem:[#allocation76_spill] sm:$0xff] %v13304_v63  ;;  %v4575_v51 = vsel %vm4438_vm8, %v13304_v63, %v13151_v45  ;;  %v1189_v50 = vadd.bf16 %v1024_v36, %v16472_v11  ;;  %v16473_v5 = vld [vmem:[#allocation128_spill] sm:$0xff]  ;;  %4796 = vrot.lane.b32.xlu0 %v16371_v39, %s10138_s28  ;;  %v13322_v2 = vsel %vm12824_vm11, %v3635_v31, 0  ;;  %v16476_v45 = vld [vmem:[#allocation17_spill] sm:$0xff]  ;;  %v16477_v36 = vld [vmem:[#allocation106_spill] sm:$0xff]  ;;  %v13336_v31 = vpop.permute.xlu0 %4366 }
 0x24b   : > { %v1048_v29 = vsel %vm10193_vm2, %v1043_v1, %v16473_v5  ;;  %16474 = vst [vmem:[#allocation139_spill] sm:$0xff] %v13322_v2  ;;  %v4618_v9 = vsel %vm4471_vm9, %v4575_v51, %v13198_v62  ;;  %v4425_v1 = vsel %vm4389_vm7, %v16477_v36, %v13061_v56  ;;  %v1066_v15 = vor.u32 %v1065_v40, %v1062_v17  ;;  %v16482_v17 = vld [vmem:[#allocation16_spill] sm:$0xff]  ;;  %v3697_v40 = vpop.permute.xlu1 %3696  ;;  %v16493_v62 = vld [vmem:[#allocation27_spill] sm:$0xff] }
 0x24c   : > { %v1191_v43 = vadd.bf16 %v1048_v29, %v16475_v16  ;;  %4686 = vrot.lane.b32.xlu1 %v16476_v45, %s10138_s28  ;;  %6192 = vmatprep.mubr.bf16.mxu0 %v4618_v9  ;;  %v13332_v60 = vcombine.low %v1189_v50, %v1190_v49  ;;  %v4462_v35 = vsel %vm4438_vm8, %v4425_v1, %v13118_v59  ;;  %v16484_v50 = vld [vmem:[#allocation155_spill] sm:$0xff]  ;;  %v16487_v16 = vld [vmem:[#allocation34_spill] sm:$0xff] }
 0x24d   : > { %16479 = vst [vmem:[#allocation85_spill] sm:$0xff] %v13336_v31  ;;  %v4506_v51 = vsel %vm4471_vm9, %v4462_v35, %v13169_v27  ;;  %v1067_v49 = vrot.slane %v1066_v15, 4  ;;  %v13358_v27 = vsel %vm12824_vm11, %v2028_v10, 0  ;;  %v13369_v15 = vpop.f32.mrb[0].mxu1  ;;  %v10103_v10 = vld [vmem:[%s15552_s3] sm:$0xff]  }
 0x24e   : > { %16478 = vst [vmem:[#allocation73_spill] sm:$0xff] %v13332_v60  ;;  %v13338_v11 = vcombine.low %v1191_v43, %v1192_v44  ;;  %9691 = vmatmul.mubr.msk.bf16.gmra.mrb[60].mxu1 %vm4389_vm7, %v13322_v2  ;;  %v13346_v56 = vsel %vm4389_vm7, %v13332_v60, %v4287_v3  ;;  %4828 = vrot.lane.b32.xlu0 %v16465_v7, %s10139_s29  ;;  %v16483_v44 = vld [vmem:[#allocation150_spill] sm:$0xff]  ;;  %16485 = vst [vmem:[#allocation84_spill] sm:$0xff] %v13358_v27  ;;  %v16488_v43 = vld [vmem:[#allocation149_spill] sm:$0xff] }
 0x24f   : > { %16481 = vst [vmem:[#allocation87_spill] sm:$0xff] %v13346_v56  ;;  %9694 = vmatprep.mubr.msk.bf16.mxu1 %vm4389_vm7, %v16482_v17  ;;  %v4577_v59 = vsel %vm4438_vm8, %v13346_v56, %v4335_v30  ;;  %v1194_v5 = vadd.bf16 %v16484_v50, %v16483_v44  ;;  %v16486_v3 = vld [vmem:[#allocation94_spill] sm:$0xff]  ;;  %v1072_v30 = vsel %vm10193_vm2, %v1067_v49, %v16487_v16  ;;  %v16489_v44 = vld [vmem:[#allocation40_spill] sm:$0xff]  ;;  %v4289_v16 = vpop.permute.xlu0 %4288  ;;  %v16492_v56 = vld [vmem:[#allocation33_spill] sm:$0xff] }
 0x250   : > { %16480 = vst [vmem:[#allocation93_spill] sm:$0xff] %v13338_v11  ;;  %4718 = vrot.lane.b32.xlu1 %v16455_v13, %s10139_s29  ;;  %v2032_v29 = vshll.u32 %v16486_v3, 16  ;;  %v4621_v9 = vsel %vm4471_vm9, %v4577_v59, %v13336_v31  ;;  %v1193_v1 = vadd.bf16 %v1072_v30, %v16488_v43  ;;  %v13378_v59 = vpop.f32.mrb[1].mxu1  ;;  %v16490_v50 = vld [vmem:[#allocation120_spill] sm:$0xff]  ;;  %9758 = vmatprep.subr.bf16.mxu1 %v10103_v10  ;;  %v3969_v43 = vpop.permute.xlu1 %3968  ;;  %v16491_v31 = vld [vmem:[#allocation22_spill] sm:$0xff] }
 0x251   : > { %v13386_v30 = vpop.f32.mrb[2].mxu1  ;;  %9759 = vmatpush3.bf16.msra.mxu1 %v10103_v10  ;;  %v13420_v32 = vsel %vm4389_vm7, %v13338_v11, %v4289_v16  ;;  %v16501_v16 = vld [vmem:[#allocation45_spill] sm:$0xff]  ;;  %v16520_v13 = vld [vmem:[#allocation38_spill] sm:$0xff] }
 0x252   : > { %6193 = vmatmul.mubr.bf16.gmra.mrb[44].mxu0 %v4506_v51  ;;  %4766 = vrot.lane.b32.xlu0 %v13358_v27, %s10137_s27  ;;  %v13376_v35 = vcombine.low %v1193_v1, %v1194_v5  ;;  %v2030_v51 = vshrl.u32 %v16486_v3, 16  ;;  %v2034_v49 = vrot.slane %v2032_v29, 1  ;;  %v13390_v1 = vpop.f32.mrb[3].mxu1  ;;  %16498 = vst [vmem:[#allocation109_spill] sm:$0xff] %v13420_v32 }
 0x253   : > { %6200 = vmatprep.mubr.bf16.mxu0 %v4621_v9  ;;  %v4428_v9 = vsel %vm4389_vm7, %v16490_v50, %v13221_v47  ;;  %v10104_v47 = vld [vmem:[%s15552_s3 + $0x8] sm:$0xff]  }
 0x254   : > { %4640 = vrot.lane.b32.xlu1 %v16489_v44, %s10137_s27  ;;  %v4464_v5 = vsel %vm4438_vm8, %v4428_v9, %v13265_v4  ;;  %v2035_v4 = vor.u32 %v2034_v49, %v2030_v51  ;;  %v16494_v9 = vld [vmem:[#allocation46_spill] sm:$0xff]  ;;  %9760 = vmatprep.subr.bf16.mxu1 %v10104_v47  ;;  %v16496_v51 = vld [vmem:[#allocation43_spill] sm:$0xff] }
 0x255   : > { %v4509_v29 = vsel %vm4471_vm9, %v4464_v5, %v4015_v28  ;;  %9761 = vmatpush3.bf16.msra.mxu1 %v10104_v47  ;;  %v10105_v28 = vld [vmem:[%s15552_s3 + $0x10] sm:$0xff]   ;;  %v4017_v5 = vpop.permute.xlu1 %4016  ;;  %v2039_v49 = vshll.u32 %v16496_v51, 16 }
 0x256   : > { %9695 = vmatmul.mubr.msk.bf16.gmra.mrb[64].mxu1 %vm4389_vm7, %v16491_v31  ;;  %4798 = vrot.lane.b32.xlu0 %v16492_v56, %s10138_s28  ;;  %v13411_v63 = vsel %vm12824_vm11, %v2035_v4, 0 }
 0x257   : > { %9698 = vmatprep.mubr.msk.bf16.mxu1 %vm4389_vm7, %v16493_v62  ;;  %16495 = vst [vmem:[#allocation102_spill] sm:$0xff] %v13411_v63  ;;  %9762 = vmatprep.subr.bf16.mxu1 %v10105_v28 }
 0x258   : > { %4688 = vrot.lane.b32.xlu1 %v16494_v9, %s10138_s28  ;;  %v4337_v10 = vpop.permute.xlu0 %4336 }
 0x259   : > { %9763 = vmatpush3.bf16.msra.mxu1 %v10105_v28  ;;  %v4579_v4 = vsel %vm4438_vm8, %v13420_v32, %v4337_v10  ;;  %v16502_v28 = vld [vmem:[#allocation48_spill] sm:$0xff]  ;;  %v2037_v10 = vshrl.u32 %v16496_v51, 16 }
 0x25a   : > { %6201 = vmatmul.mubr.bf16.gmra.mrb[48].mxu0 %v4509_v29  ;;  %4830 = vrot.lane.b32.xlu0 %v16489_v44, %s10139_s29  ;;  %v16497_v29 = vld [vmem:[#allocation129_spill] sm:$0xff] }
 0x25b   : > { %v4431_v47 = vsel %vm4389_vm7, %v16497_v29, %v3697_v40  ;;  %v10106_v40 = vld [vmem:[%s15552_s3 + $0x18] sm:$0xff]  }
 0x25c   : > { %4720 = vrot.lane.b32.xlu1 %v16486_v3, %s10139_s29  ;;  %v4466_v19 = vsel %vm4438_vm8, %v4431_v47, %v3969_v43  ;;  %v13427_v24 = vpop.permute.xlu0 %4368  ;;  %v2041_v47 = vrot.slane %v2039_v49, 1  ;;  %9764 = vmatprep.subr.bf16.mxu1 %v10106_v40  ;;  %v16504_v49 = vld [vmem:[#allocation54_spill] sm:$0xff] }
 0x25d   : > { %16500 = vst [vmem:[#allocation101_spill] sm:$0xff] %v13427_v24  ;;  %v4512_v44 = vsel %vm4471_vm9, %v4466_v19, %v4017_v5  ;;  %v4624_v43 = vsel %vm4471_vm9, %v4579_v4, %v13427_v24  ;;  %9765 = vmatpush3.bf16.msra.mxu1 %v10106_v40  ;;  %v13442_v19 = vpop.f32.mrb[4].mxu1  ;;  %v16503_v5 = vld [vmem:[#allocation42_spill] sm:$0xff] }
 0x25e   : > { %9699 = vmatmul.mubr.msk.bf16.gmra.mrb[68].mxu1 %vm4389_vm7, %v16499_v14  ;;  %4768 = vrot.lane.b32.xlu0 %v13411_v63, %s10137_s27  ;;  %v13446_v32 = vpop.f32.mrb[5].mxu1  ;;  %v2042_v7 = vor.u32 %v2041_v47, %v2037_v10  ;;  %v13472_v47 = vld [vmem:[%s15551_s2] ss:$0 sm:$0xff] }
 0x25f   : > { %9702 = vmatprep.mubr.msk.bf16.mxu1 %vm4389_vm7, %v16501_v16  ;;  %6208 = vmatprep.mubr.bf16.mxu0 %v4624_v43  ;;  %v13450_v4 = vpop.f32.mrb[6].mxu1  ;;  %v16507_v43 = vld [vmem:[#allocation142_spill] sm:$0xff] }
 0x260   : > { %4642 = vrot.lane.b32.xlu1 %v16502_v28, %s10137_s27  ;;  %v13452_v24 = vpop.f32.mrb[7].mxu1  ;;  %v13462_v40 = vsel %vm12824_vm11, %v2042_v7, 0  ;;  %v2046_v10 = vshll.u32 %v16507_v43, 16  ;;  %v2044_v42 = vshrl.u32 %v16507_v43, 16 }
 0x261   : > { %16506 = vst [vmem:[#allocation97_spill] sm:$0xff] %v13462_v40  ;;  %v13488_v3 = vpop.f32.mrb[8].mxu1 }
 0x262   : > { %6209 = vmatmul.mubr.bf16.gmra.mrb[52].mxu0 %v4512_v44  ;;  %4800 = vrot.lane.b32.xlu0 %v16503_v5, %s10138_s28  ;;  %v16505_v44 = vld [vmem:[#allocation64_spill] sm:$0xff]  ;;  %v2048_v7 = vrot.slane %v2046_v10, 1  ;;  %16511 = vst [vmem:[#allocation112_spill] sm:$0xff] %v13488_v3 }
 0x264   : > { %4690 = vrot.lane.b32.xlu1 %v13005_v6, %s10138_s28  ;;  %v16509_v6 = vld [vmem:[#allocation74_spill] sm:$0xff]  ;;  %v2049_v50 = vor.u32 %v2048_v7, %v2044_v42 }
 0x266   : > { %9703 = vmatmul.mubr.msk.bf16.gmra.mrb[72].mxu1 %vm4389_vm7, %v16504_v49  ;;  %4832 = vrot.lane.b32.xlu0 %v16502_v28, %s10139_s29  ;;  %v16508_v28 = vld [vmem:[#allocation57_spill] sm:$0xff]  ;;  %v6106_v2 = vpop.f32.mrb[0].mxu0  ;;  %v13497_v42 = vsel %vm12824_vm11, %v2049_v50, 0 }
 0x267   : > { %9706 = vmatprep.mubr.msk.bf16.mxu1 %vm4389_vm7, %v16505_v44  ;;  %v6107_v9 = vadd.f32 %v13472_v47, %v6106_v2  ;;  %v6108_v45 = vpop.f32.mrb[1].mxu0  ;;  %16512 = vst [vmem:[#allocation15_spill] sm:$0xff] %v13497_v42  ;;  %v16523_v44 = vld [vmem:[#allocation26_spill] sm:$0xff] }
 0x268   : > { %4722 = vrot.lane.b32.xlu1 %v16496_v51, %s10139_s29  ;;  %v6109_v29 = vpop.f32.mrb[2].mxu0  ;;  %v3699_v51 = vpop.permute.xlu1 %3698 }
 0x269   : > { %v6652_v10 = vadd.f32 %v13378_v59, %v6107_v9  ;;  %v6110_v36 = vadd.f32 %v13472_v47, %v6109_v29  ;;  %v6111_v34 = vpop.f32.mrb[3].mxu0  ;;  %v13491_v45 = vpop.f32.mrb[9].mxu1  ;;  %v2053_v59 = vshll.u32 %v13057_v22, 16 }
 0x26a   : > { %4770 = vrot.lane.b32.xlu0 %v13462_v40, %s10137_s27  ;;  %v13502_v29 = vpop.f32.mrb[10].mxu1 }
 0x26b   : > { %v6655_v2 = vadd.f32 %v13390_v1, %v6110_v36  ;;  %v7162_v34 = vmax.f32 %v6652_v10, 0.0  ;;  %16513 = vst [vmem:[#allocation118_spill] sm:$0xff] %v13502_v29  ;;  %v13504_v7 = vpop.f32.mrb[11].mxu1  ;;  %v16514_v36 = vld [vmem:[#allocation99_spill] sm:$0xff] }
 0x26c   : > { %4644 = vrot.lane.b32.xlu1 %v16508_v28, %s10137_s27  ;;  %v16516_v10 = vld [vmem:[#allocation67_spill] sm:$0xff] }
 0x26d   : > { %v7163_v9 = vmax.f32 %v6655_v2, 0.0  ;;  %v2051_v2 = vshrl.u32 %v13057_v22, 16 }
 0x26e   : > { %9707 = vmatmul.mubr.msk.bf16.gmra.mrb[76].mxu1 %vm4389_vm7, %v16509_v6  ;;  %4802 = vrot.lane.b32.xlu0 %v16387_v0, %s10138_s28  ;;  %v4291_v50 = vpop.permute.xlu0 %4290  ;;  %v16518_v6 = vld [vmem:[#allocation127_spill] sm:$0xff] }
 0x26f   : > { %9710 = vmatprep.mubr.msk.bf16.mxu1 %vm4389_vm7, %v16510_v38  ;;  %v13508_v1 = vpack.c.bf16 %v7163_v9, %v7162_v34  ;;  %v16517_v38 = vld [vmem:[#allocation61_spill] sm:$0xff] }
 0x270   : > { %4692 = vrot.lane.b32.xlu1 %v13014_v21, %s10138_s28  ;;  %v3971_v21 = vpop.permute.xlu1 %3970 }
 0x272   : > { %4834 = vrot.lane.b32.xlu0 %v16508_v28, %s10139_s29  ;;  %v16515_v28 = vld [vmem:[#allocation114_spill] sm:$0xff]  ;;  %v4339_v34 = vpop.permute.xlu0 %4338 }
 0x274   : > { %4724 = vrot.lane.b32.xlu1 %v16507_v43, %s10139_s29  ;;  %v2055_v43 = vrot.slane %v2053_v59, 1  ;;  %v1084_v59 = vshrl.u32 %v16520_v13, 16 }
 0x276   : > { %9711 = vmatmul.mubr.msk.bf16.gmra.mrb[80].mxu1 %vm4389_vm7, %v16514_v36  ;;  %4772 = vrot.lane.b32.xlu0 %v13497_v42, %s10137_s27  ;;  %v2056_v36 = vor.u32 %v2055_v43, %v2051_v2  ;;  %v2060_v43 = vshll.u32 %v13100_v41, 16  ;;  %v1087_v2 = vshll.u32 %v16520_v13, 16 }
 0x277   : > { %9714 = vmatprep.mubr.msk.bf16.mxu1 %vm4389_vm7, %v16515_v28  ;;  %v16519_v28 = vld [vmem:[#allocation146_spill] sm:$0xff] }
 0x278   : > { %4646 = vrot.lane.b32.xlu1 %v16516_v10, %s10137_s27  ;;  %v4019_v9 = vpop.permute.xlu1 %4018  ;;  %v13530_v53 = vsel %vm12824_vm11, %v2056_v36, 0  ;;  %v1089_v0 = vrot.slane %v1087_v2, 5 }
 0x279   : > { %16521 = vst [vmem:[#allocation25_spill] sm:$0xff] %v13530_v53 }
 0x27a   : > { %4804 = vrot.lane.b32.xlu0 %v16517_v38, %s10138_s28  ;;  %v13542_v38 = vsel %vm4389_vm7, %v13376_v35, %v4291_v50  ;;  %v2058_v50 = vshrl.u32 %v13100_v41, 16 }
 0x27b   : > { %16524 = vst [vmem:[#allocation133_spill] sm:$0xff] %v13542_v38 }
 0x27c   : > { %4694 = vrot.lane.b32.xlu1 %v13067_v57, %s10138_s28  ;;  %v16522_v57 = vld [vmem:[#allocation141_spill] sm:$0xff] }
 0x27e   : > { %9715 = vmatmul.mubr.msk.bf16.gmra.mrb[84].mxu1 %vm4389_vm7, %v16518_v6  ;;  %4836 = vrot.lane.b32.xlu0 %v16516_v10, %s10139_s29  ;;  %v1093_v6 = vshll.u32 %v16522_v57, 16  ;;  %v1097_v10 = vshrl.u32 %v16522_v57, 16 }
 0x27f   : > { %9718 = vmatprep.mubr.msk.bf16.mxu1 %vm4389_vm7, %v16519_v28  ;;  %v4434_v28 = vsel %vm4389_vm7, %v16523_v44, %v3699_v51  ;;  %v16526_v51 = vld [vmem:[#allocation77_spill] sm:$0xff]  ;;  %v2062_v44 = vrot.slane %v2060_v43, 1 }
 0x280   : > { %4726 = vrot.lane.b32.xlu1 %v13057_v22, %s10139_s29  ;;  %v4468_v36 = vsel %vm4438_vm8, %v4434_v28, %v3971_v21  ;;  %v4581_v22 = vsel %vm4438_vm8, %v13542_v38, %v4339_v34  ;;  %v1086_v28 = vrot.slane %v1084_v59, 4  ;;  %v1095_v29 = vrot.slane %v1093_v6, 5  ;;  %v16527_v34 = vld [vmem:[#allocation158_spill] sm:$0xff]  ;;  %v13565_v38 = vpop.f32.mrb[12].mxu1  ;;  %v16531_v59 = vld [vmem:[#allocation35_spill] sm:$0xff] }
 0x281   : > { %v4515_v49 = vsel %vm4471_vm9, %v4468_v36, %v4019_v9  ;;  %v1099_v3 = vrot.slane %v1097_v10, 4  ;;  %v16528_v9 = vld [vmem:[#allocation71_spill] sm:$0xff]  ;;  %16530 = vst [vmem:[#allocation128_spill] sm:$0xff] %v13565_v38  ;;  %v2063_v43 = vor.u32 %v2062_v44, %v2058_v50  ;;  %v13571_v6 = vpop.f32.mrb[13].mxu1  ;;  %v16532_v2 = vmul.bf16 1061175104, %v16531_v59 }
 0x282   : > { %4774 = vrot.lane.b32.xlu0 %v13530_v53, %s10137_s27  ;;  %v16529_v36 = vld [vmem:[#allocation7_spill] sm:$0xff] }
 0x283   : > { %v13549_v13 = vpop.permute.xlu0 %4370  ;;  %v13552_v57 = vpop.permute.xlu1 %3700  ;;  %v1100_v10 = vor.u32 %v1099_v3, %v1095_v29  ;;  %v13584_v50 = vsel %vm12824_vm11, %v2063_v43, 0 }
 0x284   : > { %16525 = vst [vmem:[#allocation111_spill] sm:$0xff] %v13549_v13  ;;  %4648 = vrot.lane.b32.xlu1 %v16526_v51, %s10137_s27  ;;  %v4627_v21 = vsel %vm4471_vm9, %v4581_v22, %v13549_v13  ;;  %v6114_v13 = vpop.f32.mrb[4].mxu0  ;;  %16535 = vst [vmem:[#allocation150_spill] sm:$0xff] %v13584_v50 }
 0x285   : > { %6216 = vmatprep.mubr.bf16.mxu0 %v4627_v21  ;;  %v1090_v21 = vor.u32 %v1089_v0, %v1086_v28  ;;  %v2067_v0 = vshll.u32 %v13193_v58, 16 }
 0x286   : > { %9719 = vmatmul.mubr.msk.bf16.gmra.mrb[88].mxu1 %vm4389_vm7, %v16527_v34  ;;  %6217 = vmatmul.mubr.bf16.gmra.mrb[56].mxu0 %v4515_v49  ;;  %v1103_v49 = vshll.u32 %v16532_v2, 16  ;;  %v13575_v34 = vpop.f32.mrb[14].mxu1 }
 0x287   : > { %4806 = vrot.lane.b32.xlu0 %v16528_v9, %s10138_s28  ;;  %9722 = vmatprep.mubr.msk.bf16.mxu1 %vm4389_vm7, %v16529_v36  ;;  %v13569_v22 = vpop.permute.xlu1 %3972  ;;  %16533 = vst [vmem:[#allocation125_spill] sm:$0xff] %v13575_v34  ;;  %v6115_v36 = vadd.f32 %v13472_v47, %v6114_v13  ;;  %v6116_v9 = vpop.f32.mrb[5].mxu0  ;;  %v1091_v2 = vrot.slane %v1090_v21, 4 }
 0x288   : > { %4696 = vrot.lane.b32.xlu1 %v13085_v46, %s10138_s28  ;;  %v13578_v38 = vpop.f32.mrb[15].mxu1  ;;  %v6117_v44 = vpop.f32.mrb[6].mxu0  ;;  %v1101_v9 = vrot.slane %v1100_v10, 4  ;;  %v1105_v59 = vrot.slane %v1103_v49, 5  ;;  %v16536_v46 = vld [vmem:[#allocation3_spill] sm:$0xff]  ;;  %v2069_v10 = vrot.slane %v2067_v0, 1 }
 0x289   : > { %16534 = vst [vmem:[#allocation16_spill] sm:$0xff] %v13578_v38  ;;  %v6660_v3 = vadd.f32 %v13369_v15, %v6115_v36  ;;  %v6118_v13 = vadd.f32 %v13472_v47, %v6117_v44  ;;  %v6119_v28 = vpop.f32.mrb[7].mxu0  ;;  %v16537_v15 = vld [vmem:[#allocation88_spill] sm:$0xff]  ;;  %v2065_v36 = vshrl.u32 %v13193_v58, 16  ;;  %v16540_v0 = vld [vmem:[#allocation135_spill] sm:$0xff] }
 0x28a   : > { %v1106_v44 = vsel %vm10193_vm2, %v1101_v9, %v1105_v59  ;;  %v16538_v28 = vld [vmem:[#allocation144_spill] sm:$0xff] }
 0x28b   : > { %4838 = vrot.lane.b32.xlu0 %v16526_v51, %s10139_s29  ;;  %v6663_v51 = vadd.f32 %v13386_v30, %v6118_v13  ;;  %v7164_v49 = vmax.f32 %v6660_v3, 0.0  ;;  %v1096_v30 = vsel %vm10193_vm2, %v1091_v2, %v1095_v29  ;;  %v2070_v34 = vor.u32 %v2069_v10, %v2065_v36 }
 0x28c   : > { %4728 = vrot.lane.b32.xlu1 %v13100_v41, %s10139_s29 }
 0x28d   : > { %v7165_v21 = vmax.f32 %v6663_v51, 0.0  ;;  %v13626_v10 = vsel %vm12824_vm11, %v2070_v34, 0 }
 0x28e   : > { %9723 = vmatmul.mubr.msk.bf16.gmra.mrb[92].mxu1 %vm4389_vm7, %v16536_v46  ;;  %v1195_v46 = vadd.bf16 %v1096_v30, %v16538_v28  ;;  %v6122_v3 = vpop.f32.mrb[8].mxu0  ;;  %16542 = vst [vmem:[#allocation34_spill] sm:$0xff] %v13626_v10 }
 0x28f   : > { %4776 = vrot.lane.b32.xlu0 %v13584_v50, %s10137_s27  ;;  %v4021_v43 = vpop.permute.xlu1 %4020  ;;  %9726 = vmatprep.mubr.msk.bf16.mxu1 %vm4389_vm7, %v13174_v26  ;;  %v13605_v13 = vpack.c.bf16 %v7165_v21, %v7164_v49  ;;  %v16539_v26 = vld [vmem:[#allocation147_spill] sm:$0xff]  ;;  %v6123_v9 = vadd.f32 %v13472_v47, %v6122_v3  ;;  %v6124_v12 = vpop.f32.mrb[9].mxu0  ;;  %v2074_v49 = vshll.u32 %v13236_v25, 16 }
 0x290   : > { %4650 = vrot.lane.b32.xlu1 %v16537_v15, %s10137_s27  ;;  %v1196_v41 = vadd.bf16 %v1106_v44, %v16539_v26  ;;  %v6125_v29 = vpop.f32.mrb[10].mxu0 }
 0x291   : > { %v6668_v26 = vadd.f32 %v13446_v32, %v6123_v9  ;;  %v6126_v59 = vadd.f32 %v13472_v47, %v6125_v29  ;;  %v6127_v2 = vpop.f32.mrb[11].mxu0  ;;  %v16543_v32 = vld [vmem:[#allocation159_spill] sm:$0xff]  ;;  %v16545_v9 = vld [vmem:[#allocation104_spill] sm:$0xff]  ;;  %v2076_v12 = vrot.slane %v2074_v49, 1  ;;  %v13659_v49 = vpop.f32.mrb[16].mxu1 }
 0x292   : > { %v13622_v36 = vcombine.low %v1195_v46, %v1196_v41  ;;  %v4437_v28 = vsel %vm4389_vm7, %v16543_v32, %v13552_v57 }
 0x293   : > { %4808 = vrot.lane.b32.xlu0 %v16416_v48, %s10138_s28  ;;  %v4633_v51 = vpop.permute.xlu1 %4632  ;;  %v6671_v44 = vadd.f32 %v13452_v24, %v6126_v59  ;;  %v7166_v46 = vmax.f32 %v6668_v26, 0.0  ;;  %v4470_v3 = vsel %vm4438_vm8, %v4437_v28, %v13569_v22  ;;  %v2072_v24 = vshrl.u32 %v13236_v25, 16  ;;  %v16547_v22 = vld [vmem:[#allocation90_spill] sm:$0xff] }
 0x294   : > { %4698 = vrot.lane.b32.xlu1 %v16540_v0, %s10138_s28  ;;  %v4293_v38 = vpop.permute.xlu0 %4292  ;;  %16541 = vst [vmem:[#allocation155_spill] sm:$0xff] %v13622_v36  ;;  %v4518_v26 = vsel %vm4471_vm9, %v4470_v3, %v4021_v43  ;;  %v13663_v43 = vpop.f32.mrb[17].mxu1 }
 0x295   : > { %v7167_v41 = vmax.f32 %v6671_v44, 0.0  ;;  %v13639_v34 = vsel %vm4389_vm7, %v13622_v36, %v4293_v38  ;;  %v16548_v44 = vld [vmem:[#allocation53_spill] sm:$0xff] }
 0x296   : > { %9727 = vmatmul.mubr.msk.bf16.gmra.mrb[96].mxu1 %vm4389_vm7, %v13269_v33  ;;  %16544 = vst [vmem:[#allocation149_spill] sm:$0xff] %v13639_v34  ;;  %v16560_v33 = vld [vmem:[#allocation121_spill] sm:$0xff] }
 0x297   : > { %4840 = vrot.lane.b32.xlu0 %v16537_v15, %s10139_s29  ;;  %9730 = vmatprep.mubr.msk.bf16.mxu1 %vm4389_vm7, %v13358_v27  ;;  %v13651_v59 = vpack.c.bf16 %v7167_v41, %v7166_v46  ;;  %v13667_v46 = vpop.f32.mrb[18].mxu1  ;;  %v16552_v15 = vld [vmem:[#allocation119_spill] sm:$0xff] }
 0x298   : > { %4730 = vrot.lane.b32.xlu1 %v13193_v58, %s10139_s29  ;;  %v4341_v21 = vpop.permute.xlu0 %4340  ;;  %v13669_v3 = vpop.f32.mrb[19].mxu1 }
 0x299   : > { %v4583_v57 = vsel %vm4438_vm8, %v13639_v34, %v4341_v21  ;;  %v2077_v21 = vor.u32 %v2076_v12, %v2072_v24  ;;  %v2081_v12 = vshll.u32 %v13295_v37, 16 }
 0x29a   : > { %v4681_v30 = vpop.permute.xlu1 %4680 }
 0x29b   : > { %4778 = vrot.lane.b32.xlu0 %v13626_v10, %s10137_s27  ;;  %v13675_v24 = vsel %vm12824_vm11, %v2077_v21, 0  ;;  %v16551_v21 = vld [vmem:[#allocation14_spill] sm:$0xff]  ;;  %v2083_v0 = vrot.slane %v2081_v12, 1 }
 0x29c   : > { %4652 = vrot.lane.b32.xlu1 %v16545_v9, %s10137_s27  ;;  %v13648_v29 = vpop.permute.xlu0 %4372  ;;  %16549 = vst [vmem:[#allocation33_spill] sm:$0xff] %v13675_v24 }
 0x29d   : > { %16546 = vst [vmem:[#allocation22_spill] sm:$0xff] %v13648_v29  ;;  %v4630_v38 = vsel %vm4471_vm9, %v4583_v57, %v13648_v29 }
 0x29e   : > { %v4713_v2 = vpop.permute.xlu1 %4712  ;;  %9731 = vmatmul.mubr.msk.bf16.gmra.mrb[100].mxu1 %vm4389_vm7, %v13411_v63  ;;  %6224 = vmatprep.mubr.bf16.mxu0 %v4630_v38  ;;  %v16550_v38 = vld [vmem:[#allocation2_spill] sm:$0xff] }
 0x29f   : > { %4810 = vrot.lane.b32.xlu0 %v16547_v22, %s10138_s28  ;;  %6225 = vmatmul.mubr.bf16.gmra.mrb[60].mxu0 %v4518_v26  ;;  %v4857_v29 = vsel %vm4389_vm7, %v16550_v38, %v4633_v51 }
 0x2a0   : > { %4700 = vrot.lane.b32.xlu1 %v16548_v44, %s10138_s28  ;;  %v4761_v28 = vpop.permute.xlu0 %4760  ;;  %9734 = vmatprep.mubr.msk.bf16.mxu1 %vm4389_vm7, %v13462_v40  ;;  %v2079_v44 = vshrl.u32 %v13295_v37, 16 }
 0x2a1   : > { %v4970_v34 = vsel %vm4389_vm7, %v16551_v21, %v4761_v28 }
 0x2a2   : > { %v4635_v41 = vpop.permute.xlu1 %4634 }
 0x2a3   : > { %4842 = vrot.lane.b32.xlu0 %v16545_v9, %s10139_s29  ;;  %v4889_v9 = vsel %vm4438_vm8, %v4857_v29, %v4681_v30  ;;  %v2084_v30 = vor.u32 %v2083_v0, %v2079_v44  ;;  %v16555_v29 = vld [vmem:[#allocation65_spill] sm:$0xff] }
 0x2a4   : > { %4732 = vrot.lane.b32.xlu1 %v13236_v25, %s10139_s29  ;;  %v4793_v57 = vpop.permute.xlu0 %4792  ;;  %v4921_v40 = vsel %vm4471_vm9, %v4889_v9, %v4713_v2  ;;  %v16557_v9 = vld [vmem:[#allocation4_spill] sm:$0xff] }
 0x2a5   : > { %v13719_v2 = vsel %vm4389_vm7, %v16557_v9, %v4635_v41 }
 0x2a6   : > { %v4683_v26 = vpop.permute.xlu1 %4682  ;;  %9735 = vmatmul.mubr.msk.bf16.gmra.mrb[104].mxu1 %vm4389_vm7, %v13497_v42  ;;  %v5017_v42 = vsel %vm4438_vm8, %v4970_v34, %v4793_v57  ;;  %v2095_v34 = vshll.u32 %v13338_v11, 16  ;;  %16558 = vst [vmem:[#allocation45_spill] sm:$0xff] %v13719_v2 }
 0x2a7   : > { %4780 = vrot.lane.b32.xlu0 %v13675_v24, %s10137_s27  ;;  %9738 = vmatprep.mubr.msk.bf16.mxu1 %vm4389_vm7, %v13530_v53  ;;  %v16554_v53 = vld [vmem:[#allocation108_spill] sm:$0xff]  ;;  %v4891_v57 = vsel %vm4438_vm8, %v13719_v2, %v4683_v26  ;;  %v2093_v26 = vshrl.u32 %v13338_v11, 16 }
 0x2a8   : > { %4654 = vrot.lane.b32.xlu1 %v16552_v15, %s10137_s27  ;;  %v4825_v51 = vpop.permute.xlu0 %4824 }
 0x2a9   : > { %v5049_v63 = vsel %vm4471_vm9, %v5017_v42, %v4825_v51  ;;  %v13711_v42 = vsel %vm12824_vm11, %v2084_v30, 0  ;;  %v16559_v51 = vld [vmem:[#allocation21_spill] sm:$0xff]  ;;  %v2086_v30 = vshrl.u32 %v13332_v60, 16 }
 0x2aa   : > { %v13697_v27 = vpop.permute.xlu1 %4714  ;;  %6232 = vmatprep.mubr.bf16.mxu0 %v5049_v63  ;;  %16556 = vst [vmem:[#allocation36_spill] sm:$0xff] %v13711_v42  ;;  %v2088_v63 = vshll.u32 %v13332_v60, 16 }
 0x2ab   : > { %16553 = vst [vmem:[#allocation27_spill] sm:$0xff] %v13697_v27  ;;  %4812 = vrot.lane.b32.xlu0 %v16554_v53, %s10138_s28  ;;  %6233 = vmatmul.mubr.bf16.gmra.mrb[64].mxu0 %v4921_v40  ;;  %v4924_v41 = vsel %vm4471_vm9, %v4891_v57, %v13697_v27 }
 0x2ac   : > { %4702 = vrot.lane.b32.xlu1 %v16555_v29, %s10138_s28  ;;  %v4763_v28 = vpop.permute.xlu0 %4762 }
 0x2ad   : > { %v4973_v44 = vsel %vm4389_vm7, %v16482_v17, %v4763_v28  ;;  %v2097_v28 = vrot.slane %v2095_v34, 1 }
 0x2ae   : > { %v4637_v12 = vpop.permute.xlu1 %4636  ;;  %9739 = vmatmul.mubr.msk.bf16.gmra.mrb[108].mxu1 %vm4389_vm7, %v13584_v50 }
 0x2af   : > { %4844 = vrot.lane.b32.xlu0 %v16552_v15, %s10139_s29  ;;  %9742 = vmatprep.mubr.msk.bf16.mxu1 %vm4389_vm7, %v13626_v10  ;;  %v2090_v15 = vrot.slane %v2088_v63, 1  ;;  %v2102_v63 = vshll.u32 %v13376_v35, 16  ;;  %v2098_v27 = vor.u32 %v2097_v28, %v2093_v26  ;;  %v2107_v26 = vshrl.u32 %v13622_v36, 16 }
 0x2b0   : > { %4734 = vrot.lane.b32.xlu1 %v13295_v37, %s10139_s29  ;;  %v4795_v40 = vpop.permute.xlu0 %4794 }
 0x2b1   : > { %v5019_v29 = vsel %vm4438_vm8, %v4973_v44, %v4795_v40  ;;  %v13742_v40 = vpop.f32.mrb[20].mxu1  ;;  %v2091_v44 = vor.u32 %v2090_v15, %v2086_v30  ;;  %v2100_v15 = vshrl.u32 %v13376_v35, 16  ;;  %v2104_v30 = vrot.slane %v2102_v63, 1 }
 0x2b2   : > { %v4685_v0 = vpop.permute.xlu1 %4684  ;;  %v13747_v57 = vpop.f32.mrb[21].mxu1 }
 0x2b3   : > { %4782 = vrot.lane.b32.xlu0 %v13711_v42, %s10137_s27  ;;  %v13757_v37 = vpop.f32.mrb[22].mxu1 }
 0x2b4   : > { %4656 = vrot.lane.b32.xlu1 %v16559_v51, %s10137_s27  ;;  %v4827_v10 = vpop.permute.xlu0 %4826 }
 0x2b5   : > { %v5052_v9 = vsel %vm4471_vm9, %v5019_v29, %v4827_v10  ;;  %v2109_v10 = vshll.u32 %v13622_v36, 16  ;;  %v6130_v29 = vpop.f32.mrb[12].mxu0 }
 0x2b6   : > { %v13734_v50 = vpop.permute.xlu1 %4716  ;;  %9743 = vmatmul.mubr.msk.bf16.gmra.mrb[112].mxu1 %vm4389_vm7, %v13675_v24  ;;  %6240 = vmatprep.mubr.bf16.mxu0 %v5052_v9  ;;  %v6131_v34 = vadd.f32 %v13472_v47, %v6130_v29  ;;  %v6132_v9 = vpop.f32.mrb[13].mxu0  ;;  %v13761_v29 = vsel %vm12824_vm11, %v2091_v44, 0  ;;  %v2105_v44 = vor.u32 %v2104_v30, %v2100_v15 }
 0x2b7   : > { %4814 = vrot.lane.b32.xlu0 %v16560_v33, %s10138_s28  ;;  %6241 = vmatmul.mubr.bf16.gmra.mrb[68].mxu0 %v4924_v41  ;;  %v6133_v2 = vpop.f32.mrb[14].mxu0  ;;  %16561 = vst [vmem:[#allocation42_spill] sm:$0xff] %v13761_v29  ;;  %v2111_v28 = vrot.slane %v2109_v10, 1  ;;  %v13766_v9 = vpop.f32.mrb[23].mxu1 }
 0x2b8   : > { %4704 = vrot.lane.b32.xlu1 %v13188_v20, %s10138_s28  ;;  %v4765_v24 = vpop.permute.xlu0 %4764  ;;  %9746 = vmatprep.mubr.msk.bf16.mxu1 %vm4389_vm7, %v13711_v42  ;;  %v6676_v41 = vadd.f32 %v13442_v19, %v6131_v34  ;;  %v6134_v20 = vadd.f32 %v13472_v47, %v6133_v2  ;;  %v6135_v32 = vpop.f32.mrb[15].mxu0  ;;  %v13777_v2 = vsel %vm4389_vm7, %v16346_v18, %v4637_v12 }
 0x2b9   : > { %v13773_v32 = vsel %vm12824_vm11, %v2098_v27, 0  ;;  %v4976_v10 = vsel %vm4389_vm7, %v16491_v31, %v4765_v24  ;;  %v4893_v27 = vsel %vm4438_vm8, %v13777_v2, %v4685_v0  ;;  %v2112_v18 = vor.u32 %v2111_v28, %v2107_v26  ;;  %v16564_v24 = vld [vmem:[#allocation130_spill] sm:$0xff] }
 0x2ba   : > { %v4639_v38 = vpop.permute.xlu1 %4638  ;;  %v6679_v19 = vadd.f32 %v13450_v4, %v6134_v20  ;;  %16562 = vst [vmem:[#allocation38_spill] sm:$0xff] %v13773_v32  ;;  %v7168_v20 = vmax.f32 %v6676_v41, 0.0  ;;  %v13801_v0 = vsel %vm12824_vm11, %v2105_v44, 0  ;;  %v16567_v44 = vld [vmem:[#allocation154_spill] sm:$0xff] }
 0x2bb   : > { %4846 = vrot.lane.b32.xlu0 %v16559_v51, %s10139_s29  ;;  %v16563_v51 = vld [vmem:[#allocation86_spill] sm:$0xff]  ;;  %16565 = vst [vmem:[#allocation141_spill] sm:$0xff] %v13801_v0  ;;  %v13807_v41 = vsel %vm12824_vm11, %v2112_v18, 0  ;;  %v13819_v54 = vsel %vm4389_vm7, %v16371_v39, %v4639_v38 }
 0x2bc   : > { %4736 = vrot.lane.b32.xlu1 %v13332_v60, %s10139_s29  ;;  %v4797_v63 = vpop.permute.xlu0 %4796  ;;  %v7169_v4 = vmax.f32 %v6679_v19, 0.0  ;;  %16566 = vst [vmem:[#allocation35_spill] sm:$0xff] %v13807_v41 }
 0x2bd   : > { %v5021_v12 = vsel %vm4438_vm8, %v4976_v10, %v4797_v63 }
 0x2be   : > { %v4687_v34 = vpop.permute.xlu1 %4686  ;;  %9747 = vmatmul.mubr.msk.bf16.gmra.mrb[116].mxu1 %vm4389_vm7, %v13761_v29  ;;  %v13792_v60 = vpack.c.bf16 %v7169_v4, %v7168_v20 }
 0x2bf   : > { %4784 = vrot.lane.b32.xlu0 %v13761_v29, %s10137_s27  ;;  %9750 = vmatprep.mubr.msk.bf16.mxu1 %vm4389_vm7, %v13773_v32  ;;  %v4927_v29 = vsel %vm4471_vm9, %v4893_v27, %v13734_v50  ;;  %v4895_v19 = vsel %vm4438_vm8, %v13819_v54, %v4687_v34  ;;  %v16569_v27 = vld [vmem:[#allocation152_spill] sm:$0xff]  ;;  %v13837_v18 = vpop.f32.mrb[24].mxu1  ;;  %v16570_v34 = vld [vmem:[#allocation153_spill] sm:$0xff] }
 0x2c0   : > { %4658 = vrot.lane.b32.xlu1 %v16563_v51, %s10137_s27  ;;  %v4829_v42 = vpop.permute.xlu0 %4828 }
 0x2c1   : > { %v5055_v15 = vsel %vm4471_vm9, %v5021_v12, %v4829_v42  ;;  %v13841_v12 = vpop.f32.mrb[25].mxu1 }
 0x2c2   : > { %v13795_v30 = vpop.permute.xlu1 %4718  ;;  %6248 = vmatprep.mubr.bf16.mxu0 %v5055_v15  ;;  %v13845_v15 = vpop.f32.mrb[26].mxu1 }
 0x2c3   : > { %4816 = vrot.lane.b32.xlu0 %v16564_v24, %s10138_s28  ;;  %6249 = vmatmul.mubr.bf16.gmra.mrb[72].mxu0 %v4927_v29  ;;  %v4930_v10 = vsel %vm4471_vm9, %v4895_v19, %v13795_v30 }
 0x2c4   : > { %4706 = vrot.lane.b32.xlu1 %v13207_v61, %s10138_s28  ;;  %v4767_v26 = vpop.permute.xlu0 %4766 }
 0x2c5   : > { %v4979_v63 = vsel %vm4389_vm7, %v16493_v62, %v4767_v26 }
 0x2c6   : > { %v4641_v42 = vpop.permute.xlu1 %4640  ;;  %9751 = vmatmul.mubr.msk.bf16.gmra.mrb[120].mxu1 %vm4389_vm7, %v13801_v0 }
 0x2c7   : > { %4848 = vrot.lane.b32.xlu0 %v16563_v51, %s10139_s29  ;;  %9754 = vmatprep.mubr.msk.bf16.mxu1 %vm4389_vm7, %v13807_v41 }
 0x2c8   : > { %4738 = vrot.lane.b32.xlu1 %v13338_v11, %s10139_s29  ;;  %v4799_v29 = vpop.permute.xlu0 %4798 }
 0x2c9   : > { %v5023_v20 = vsel %vm4438_vm8, %v4979_v63, %v4799_v29  ;;  %v13849_v29 = vpop.f32.mrb[27].mxu1 }
 0x2ca   : > { %v4689_v28 = vpop.permute.xlu1 %4688 }
 0x2cb   : > { %4786 = vrot.lane.b32.xlu0 %v13773_v32, %s10137_s27 }
 0x2cc   : > { %4660 = vrot.lane.b32.xlu1 %v16567_v44, %s10137_s27  ;;  %v4831_v4 = vpop.permute.xlu0 %4830 }
 0x2cd   : > { %v5058_v39 = vsel %vm4471_vm9, %v5023_v20, %v4831_v4  ;;  %v13859_v4 = vsel %vm4389_vm7, %v16492_v56, %v4641_v42 }
 0x2ce   : > { %v13833_v38 = vpop.permute.xlu1 %4720  ;;  %9755 = vmatmul.mubr.msk.bf16.gmra.mrb[124].mxu1 %vm4389_vm7, %v16569_v27  ;;  %6256 = vmatprep.mubr.bf16.mxu0 %v5058_v39  ;;  %v4897_v39 = vsel %vm4438_vm8, %v13859_v4, %v4689_v28  ;;  %v16571_v27 = vld [vmem:[#allocation95_spill] sm:$0xff] }
 0x2cf   : > { %16568 = vst [vmem:[#allocation144_spill] sm:$0xff] %v13833_v38  ;;  %4818 = vrot.lane.b32.xlu0 %v16570_v34, %s10138_s28  ;;  %6257 = vmatmul.mubr.bf16.gmra.mrb[76].mxu0 %v4930_v10  ;;  %v4933_v51 = vsel %vm4471_vm9, %v4897_v39, %v13833_v38 }
 0x2d0   : > { %4708 = vrot.lane.b32.xlu1 %v13259_v52, %s10138_s28  ;;  %v4769_v26 = vpop.permute.xlu0 %4768  ;;  %9766 = vmatprep.mubr.msk.bf16.mxu1 %vm4438_vm8, %v13508_v1 }
 0x2d1   : > { %v4982_v10 = vsel %vm4389_vm7, %v16499_v14, %v4769_v26 }
 0x2d2   : > { %v4643_v63 = vpop.permute.xlu1 %4642 }
 0x2d3   : > { %4850 = vrot.lane.b32.xlu0 %v16567_v44, %s10139_s29 }
 0x2d4   : > { %4740 = vrot.lane.b32.xlu1 %v13376_v35, %s10139_s29  ;;  %v4801_v19 = vpop.permute.xlu0 %4800 }
 0x2d5   : > { %v6138_v1 = vpop.f32.mrb[16].mxu0  ;;  %v5025_v42 = vsel %vm4438_vm8, %v4982_v10, %v4801_v19 }
 0x2d6   : > { %v4691_v20 = vpop.permute.xlu1 %4690  ;;  %9767 = vmatmul.mubr.msk.bf16.vlgmr.msra.gmra.mrb[128].mxu1 %vm4438_vm8, %v13605_v13  ;;  %v6139_v13 = vadd.f32 %v13472_v47, %v6138_v1  ;;  %v6140_v56 = vpop.f32.mrb[17].mxu0 }
 0x2d7   : > { %4788 = vrot.lane.b32.xlu0 %v13801_v0, %s10137_s27  ;;  %9770 = vmatprep.mubr.msk.bf16.mxu1 %vm4438_vm8, %v13651_v59  ;;  %v6141_v59 = vpop.f32.mrb[18].mxu0 }
 0x2d8   : > { %4662 = vrot.lane.b32.xlu1 %v16571_v27, %s10137_s27  ;;  %v4833_v44 = vpop.permute.xlu0 %4832  ;;  %v6684_v26 = vadd.f32 %v13491_v45, %v6139_v13  ;;  %v6142_v28 = vadd.f32 %v13472_v47, %v6141_v59  ;;  %v6143_v52 = vpop.f32.mrb[19].mxu0  ;;  %v13898_v13 = vsel %vm4389_vm7, %v16503_v5, %v4643_v63  ;;  %v16576_v59 = vld [vmem:[#allocation13_spill] sm:$0xff] }
 0x2d9   : > { %v5061_v0 = vsel %vm4471_vm9, %v5025_v42, %v4833_v44  ;;  %16574 = vst [vmem:[#allocation14_spill] sm:$0xff] %v13898_v13  ;;  %v4899_v42 = vsel %vm4438_vm8, %v13898_v13, %v4691_v20  ;;  %v16589_v13 = vld [vmem:[#allocation115_spill] sm:$0xff] }
 0x2da   : > { %v13876_v32 = vpop.permute.xlu1 %4722  ;;  %6264 = vmatprep.mubr.bf16.mxu0 %v5061_v0  ;;  %v6687_v19 = vadd.f32 %v13504_v7, %v6142_v28  ;;  %v7170_v44 = vmax.f32 %v6684_v26, 0.0 }
 0x2db   : > { %16572 = vst [vmem:[#allocation147_spill] sm:$0xff] %v13876_v32  ;;  %4820 = vrot.lane.b32.xlu0 %v12864_v8, %s10138_s28  ;;  %6265 = vmatmul.mubr.bf16.gmra.mrb[80].mxu0 %v4933_v51  ;;  %v4936_v63 = vsel %vm4471_vm9, %v4899_v42, %v13876_v32  ;;  %v16587_v32 = vld [vmem:[#allocation51_spill] sm:$0xff] }
 0x2dc   : > { %4710 = vrot.lane.b32.xlu1 %v13278_v23, %s10138_s28  ;;  %v4771_v1 = vpop.permute.xlu0 %4770  ;;  %v7171_v45 = vmax.f32 %v6687_v19, 0.0 }
 0x2dd   : > { %v4985_v56 = vsel %vm4389_vm7, %v16501_v16, %v4771_v1 }
 0x2de   : > { %v4645_v10 = vpop.permute.xlu1 %4644  ;;  %9771 = vmatmul.mubr.msk.bf16.gmra.mrb[132].mxu1 %vm4438_vm8, %v13792_v60  ;;  %v7294_v52 = vpack.c.bf16 %v7171_v45, %v7170_v44 }
 0x2df   : > { %4852 = vrot.lane.b32.xlu0 %v16571_v27, %s10139_s29  ;;  %v13891_v0 = vpop.f32.mrb[28].mxu1  ;;  %v16579_v27 = vld [vmem:[#allocation112_spill] sm:$0xff] }
 0x2e0   : > { %4742 = vrot.lane.b32.xlu1 %v13622_v36, %s10139_s29  ;;  %v4803_v51 = vpop.permute.xlu0 %4802  ;;  %16573 = vst [vmem:[#allocation90_spill] sm:$0xff] %v13891_v0  ;;  %9774 = vmatprep.mubr.msk.bf16.mxu1 %vm4438_vm8, %v7294_v52  ;;  %v13894_v7 = vpop.f32.mrb[29].mxu1  ;;  %v16578_v52 = vld [vmem:[#allocation6_spill] sm:$0xff] }
 0x2e1   : > { %v13902_v60 = vpop.f32.mrb[30].mxu1  ;;  %v5027_v28 = vsel %vm4438_vm8, %v4985_v56, %v4803_v51  ;;  %v16621_v0 = vld [vmem:[#allocation74_spill] sm:$0xff] }
 0x2e2   : > { %v4693_v39 = vpop.permute.xlu1 %4692  ;;  %16575 = vst [vmem:[#allocation108_spill] sm:$0xff] %v13902_v60  ;;  %v13910_v26 = vpop.f32.mrb[31].mxu1  ;;  %v16605_v60 = vld [vmem:[#allocation64_spill] sm:$0xff] }
 0x2e3   : > { %4790 = vrot.lane.b32.xlu0 %v13807_v41, %s10137_s27 }
 0x2e4   : > { %5195 = vrot.lane.b32.xlu1 %v16576_v59, %s10138_s28  ;;  %v4835_v5 = vpop.permute.xlu0 %4834 }
 0x2e5   : > { %v5064_v19 = vsel %vm4471_vm9, %v5027_v28, %v4835_v5  ;;  %v6146_v45 = vpop.f32.mrb[20].mxu0 }
 0x2e6   : > { %v13916_v44 = vpop.permute.xlu1 %4724  ;;  %6272 = vmatprep.mubr.bf16.mxu0 %v5064_v19  ;;  %v6147_v20 = vadd.f32 %v13472_v47, %v6146_v45  ;;  %v6148_v1 = vpop.f32.mrb[21].mxu0  ;;  %v16582_v19 = vld [vmem:[#allocation118_spill] sm:$0xff] }
 0x2e7   : > { %16577 = vst [vmem:[#allocation4_spill] sm:$0xff] %v13916_v44  ;;  %4822 = vrot.lane.b32.xlu0 %v13026_v55, %s10138_s28  ;;  %6273 = vmatmul.mubr.bf16.gmra.mrb[84].mxu0 %v4936_v63  ;;  %v6149_v51 = vpop.f32.mrb[22].mxu0  ;;  %v13925_v23 = vpop.f32.mrb[32].mxu1  ;;  %v16581_v55 = vld [vmem:[#allocation5_spill] sm:$0xff]  ;;  %v16584_v63 = vld [vmem:[#allocation18_spill] sm:$0xff] }
 0x2e8   : > { %5160 = vrot.lane.b32.xlu1 %v16578_v52, %s10139_s29  ;;  %v4773_v56 = vpop.permute.xlu0 %4772  ;;  %v6692_v42 = vadd.f32 %v16579_v27, %v6147_v20  ;;  %v6150_v28 = vadd.f32 %v13472_v47, %v6149_v51  ;;  %v6151_v5 = vpop.f32.mrb[23].mxu0  ;;  %16580 = vst [vmem:[#allocation121_spill] sm:$0xff] %v13925_v23  ;;  %v13940_v23 = vsel %vm4389_vm7, %v16587_v32, %v4645_v10 }
 0x2e9   : > { %v13930_v1 = vpop.f32.mrb[33].mxu1  ;;  %16588 = vst [vmem:[#allocation13_spill] sm:$0xff] %v13940_v23 }
 0x2ea   : > { %v4647_v41 = vpop.permute.xlu1 %4646  ;;  %v6695_v45 = vadd.f32 %v16582_v19, %v6150_v28  ;;  %16583 = vst [vmem:[#allocation130_spill] sm:$0xff] %v13930_v1  ;;  %v13934_v52 = vpop.f32.mrb[34].mxu1  ;;  %v7172_v27 = vmax.f32 %v6692_v42, 0.0  ;;  %v16590_v19 = vld [vmem:[#allocation54_spill] sm:$0xff]  ;;  %v16591_v42 = vld [vmem:[#allocation8_spill] sm:$0xff] }
 0x2eb   : > { %4854 = vrot.lane.b32.xlu0 %v16581_v55, %s10139_s29  ;;  %16585 = vst [vmem:[#allocation152_spill] sm:$0xff] %v13934_v52  ;;  %v13936_v51 = vpop.f32.mrb[35].mxu1  ;;  %v4988_v1 = vsel %vm4389_vm7, %v16590_v19, %v4773_v56  ;;  %v4901_v52 = vsel %vm4438_vm8, %v13940_v23, %v4693_v39  ;;  %v16601_v23 = vld [vmem:[#allocation61_spill] sm:$0xff] }
 0x2ec   : > { %5197 = vrot.lane.b32.xlu1 %v16584_v63, %s10138_s28  ;;  %v4805_v61 = vpop.permute.xlu0 %4804  ;;  %v7173_v20 = vmax.f32 %v6695_v45, 0.0  ;;  %16586 = vst [vmem:[#allocation153_spill] sm:$0xff] %v13936_v51  ;;  %v4939_v32 = vsel %vm4471_vm9, %v4901_v52, %v13916_v44  ;;  %v16623_v63 = vld [vmem:[#allocation125_spill] sm:$0xff] }
 0x2ed   : > { %v5029_v45 = vsel %vm4438_vm8, %v4988_v1, %v4805_v61  ;;  %v16596_v61 = vld [vmem:[#allocation30_spill] sm:$0xff] }
 0x2ee   : > { %v4695_v5 = vpop.permute.xlu1 %4694  ;;  %v7295_v28 = vpack.c.bf16 %v7173_v20, %v7172_v27 }
 0x2ef   : > { %5096 = vrot.lane.b32.xlu0 %v16589_v13, %s10137_s27  ;;  %v13954_v10 = vpop.f32.mrb[36].mxu1 }
 0x2f0   : > { %5162 = vrot.lane.b32.xlu1 %v16591_v42, %s10139_s29  ;;  %v4837_v51 = vpop.permute.xlu0 %4836  ;;  %9775 = vmatmul.mubr.msk.bf16.gmra.mrb[136].mxu1 %vm4438_vm8, %v7295_v28  ;;  %16592 = vst [vmem:[#allocation6_spill] sm:$0xff] %v13954_v10  ;;  %v13959_v56 = vpop.f32.mrb[37].mxu1 }
 0x2f1   : > { %v5067_v13 = vsel %vm4471_vm9, %v5029_v45, %v4837_v51  ;;  %16594 = vst [vmem:[#allocation5_spill] sm:$0xff] %v13959_v56  ;;  %v13963_v39 = vpop.f32.mrb[38].mxu1  ;;  %v16598_v51 = vld [vmem:[#allocation11_spill] sm:$0xff] }
 0x2f2   : > { %v13957_v27 = vpop.permute.xlu1 %4726  ;;  %6280 = vmatprep.mubr.bf16.mxu0 %v5067_v13  ;;  %16595 = vst [vmem:[#allocation118_spill] sm:$0xff] %v13963_v39  ;;  %v13967_v1 = vpop.f32.mrb[39].mxu1 }
 0x2f3   : > { %16593 = vst [vmem:[#allocation112_spill] sm:$0xff] %v13957_v27  ;;  %5128 = vrot.lane.b32.xlu0 %v16551_v21, %s10138_s28  ;;  %6281 = vmatmul.mubr.bf16.gmra.mrb[88].mxu0 %v4939_v32  ;;  %16597 = vst [vmem:[#allocation51_spill] sm:$0xff] %v13967_v1  ;;  %v16599_v21 = vld [vmem:[#allocation10_spill] sm:$0xff] }
 0x2f4   : > { %5199 = vrot.lane.b32.xlu1 %v16596_v61, %s10138_s28  ;;  %v4775_v52 = vpop.permute.xlu0 %4774  ;;  %v13980_v61 = vsel %vm4389_vm7, %v16601_v23, %v4647_v41 }
 0x2f5   : > { %16602 = vst [vmem:[#allocation54_spill] sm:$0xff] %v13980_v61 }
 0x2f6   : > { %v4649_v20 = vpop.permute.xlu1 %4648  ;;  %v6154_v28 = vpop.f32.mrb[24].mxu0 }
 0x2f7   : > { %5098 = vrot.lane.b32.xlu0 %v16598_v51, %s10137_s27  ;;  %v6155_v42 = vadd.f32 %v13472_v47, %v6154_v28  ;;  %v6156_v45 = vpop.f32.mrb[25].mxu0  ;;  %v16603_v28 = vld [vmem:[#allocation16_spill] sm:$0xff] }
 0x2f8   : > { %5164 = vrot.lane.b32.xlu1 %v16599_v21, %s10139_s29  ;;  %v6157_v13 = vpop.f32.mrb[26].mxu0 }
 0x2f9   : > { %v4807_v39 = vpop.permute.xlu0 %4806  ;;  %v6700_v32 = vadd.f32 %v13571_v6, %v6155_v42  ;;  %v6158_v10 = vadd.f32 %v13472_v47, %v6157_v13  ;;  %v6159_v56 = vpop.f32.mrb[27].mxu0  ;;  %v4991_v6 = vsel %vm4389_vm7, %v16605_v60, %v4775_v52  ;;  %v16606_v42 = vld [vmem:[#allocation39_spill] sm:$0xff] }
 0x2fa   : > { %v4697_v1 = vpop.permute.xlu1 %4696  ;;  %v13976_v44 = vpop.f32.mrb[40].mxu1  ;;  %v4903_v56 = vsel %vm4438_vm8, %v13980_v61, %v4695_v5  ;;  %v5031_v23 = vsel %vm4438_vm8, %v4991_v6, %v4807_v39  ;;  %v16610_v5 = vld [vmem:[#allocation12_spill] sm:$0xff] }
 0x2fb   : > { %16600 = vst [vmem:[#allocation115_spill] sm:$0xff] %v13976_v44  ;;  %5130 = vrot.lane.b32.xlu0 %v16482_v17, %s10138_s28  ;;  %v6703_v45 = vadd.f32 %v16603_v28, %v6158_v10  ;;  %v13985_v21 = vpop.f32.mrb[41].mxu1  ;;  %v4942_v44 = vsel %vm4471_vm9, %v4903_v56, %v13957_v27  ;;  %v7174_v10 = vmax.f32 %v6700_v32, 0.0  ;;  %v16611_v39 = vld [vmem:[#allocation32_spill] sm:$0xff] }
 0x2fc   : > { %16604 = vst [vmem:[#allocation8_spill] sm:$0xff] %v13985_v21  ;;  %5201 = vrot.lane.b32.xlu1 %v16606_v42, %s10138_s28  ;;  %v13993_v13 = vpop.f32.mrb[42].mxu1 }
 0x2fd   : > { %16607 = vst [vmem:[#allocation11_spill] sm:$0xff] %v13993_v13  ;;  %v4839_v41 = vpop.permute.xlu0 %4838  ;;  %v7175_v28 = vmax.f32 %v6703_v45, 0.0  ;;  %v13998_v21 = vpop.f32.mrb[43].mxu1  ;;  %v16617_v13 = vld [vmem:[#allocation71_spill] sm:$0xff] }
 0x2fe   : > { %16608 = vst [vmem:[#allocation10_spill] sm:$0xff] %v13998_v21  ;;  %v5070_v52 = vsel %vm4471_vm9, %v5031_v23, %v4839_v41  ;;  %v14001_v38 = vpop.permute.xlu1 %4728  ;;  %v16615_v41 = vld [vmem:[#allocation50_spill] sm:$0xff]  ;;  %v16619_v21 = vld [vmem:[#allocation20_spill] sm:$0xff] }
 0x2ff   : > { %16609 = vst [vmem:[#allocation61_spill] sm:$0xff] %v14001_v38  ;;  %5100 = vrot.lane.b32.xlu0 %v16610_v5, %s10137_s27  ;;  %6288 = vmatprep.mubr.bf16.mxu0 %v5070_v52  ;;  %v7296_v61 = vpack.c.bf16 %v7175_v28, %v7174_v10 }
 0x300   : > { %6289 = vmatmul.mubr.bf16.gmra.mrb[92].mxu0 %v4942_v44  ;;  %5166 = vrot.lane.b32.xlu1 %v16611_v39, %s10139_s29 }
 0x301   : > { %v4777_v6 = vpop.permute.xlu0 %4776  ;;  %9778 = vmatprep.mubr.msk.bf16.mxu1 %vm4438_vm8, %v7296_v61  ;;  %v14008_v32 = vpop.f32.mrb[44].mxu1 }
 0x302   : > { %16612 = vst [vmem:[#allocation16_spill] sm:$0xff] %v14008_v32  ;;  %v4651_v45 = vpop.permute.xlu1 %4650  ;;  %v14010_v56 = vpop.f32.mrb[45].mxu1 }
 0x303   : > { %16613 = vst [vmem:[#allocation64_spill] sm:$0xff] %v14010_v56  ;;  %5132 = vrot.lane.b32.xlu0 %v16491_v31, %s10138_s28  ;;  %v14014_v23 = vpop.f32.mrb[46].mxu1  ;;  %v14023_v56 = vsel %vm4389_vm7, %v16617_v13, %v4649_v20 }
 0x304   : > { %16614 = vst [vmem:[#allocation12_spill] sm:$0xff] %v14014_v23  ;;  %5203 = vrot.lane.b32.xlu1 %v16615_v41, %s10138_s28  ;;  %v6162_v44 = vpop.f32.mrb[28].mxu0  ;;  %v14018_v10 = vpop.f32.mrb[47].mxu1  ;;  %16618 = vst [vmem:[#allocation71_spill] sm:$0xff] %v14023_v56  ;;  %v16620_v23 = vld [vmem:[#allocation128_spill] sm:$0xff] }
 0x305   : > { %16616 = vst [vmem:[#allocation32_spill] sm:$0xff] %v14018_v10  ;;  %v4809_v28 = vpop.permute.xlu0 %4808  ;;  %v6163_v52 = vadd.f32 %v13472_v47, %v6162_v44  ;;  %v6164_v61 = vpop.f32.mrb[29].mxu0  ;;  %v4994_v10 = vsel %vm4389_vm7, %v16621_v0, %v4777_v6  ;;  %v4905_v44 = vsel %vm4438_vm8, %v14023_v56, %v4697_v1 }
 0x306   : > { %v4699_v39 = vpop.permute.xlu1 %4698  ;;  %v6165_v32 = vpop.f32.mrb[30].mxu0  ;;  %v16622_v61 = vld [vmem:[#allocation41_spill] sm:$0xff]  ;;  %v5033_v20 = vsel %vm4438_vm8, %v4994_v10, %v4809_v28 }
 0x307   : > { %5102 = vrot.lane.b32.xlu0 %v16619_v21, %s10137_s27  ;;  %v6708_v27 = vadd.f32 %v16620_v23, %v6163_v52  ;;  %v6166_v41 = vadd.f32 %v13472_v47, %v6165_v32  ;;  %v6167_v42 = vpop.f32.mrb[31].mxu0  ;;  %v4945_v21 = vsel %vm4471_vm9, %v4905_v44, %v14001_v38  ;;  %v16627_v44 = vld [vmem:[#allocation60_spill] sm:$0xff] }
 0x308   : > { %5168 = vrot.lane.b32.xlu1 %v16622_v61, %s10139_s29 }
 0x309   : > { %v4841_v13 = vpop.permute.xlu0 %4840  ;;  %v6711_v23 = vadd.f32 %v16623_v63, %v6166_v41  ;;  %v14039_v52 = vpop.f32.mrb[48].mxu1  ;;  %v7176_v1 = vmax.f32 %v6708_v27, 0.0 }
 0x30a   : > { %16624 = vst [vmem:[#allocation128_spill] sm:$0xff] %v14039_v52  ;;  %v5073_v42 = vsel %vm4471_vm9, %v5033_v20, %v4841_v13  ;;  %v14042_v32 = vpop.permute.xlu1 %4730  ;;  %v14044_v6 = vpop.f32.mrb[49].mxu1 }
 0x30b   : > { %16625 = vst [vmem:[#allocation74_spill] sm:$0xff] %v14044_v6  ;;  %5134 = vrot.lane.b32.xlu0 %v16493_v62, %s10138_s28  ;;  %6296 = vmatprep.mubr.bf16.mxu0 %v5073_v42  ;;  %v7177_v10 = vmax.f32 %v6711_v23, 0.0  ;;  %v14048_v28 = vpop.f32.mrb[50].mxu1  ;;  %v16629_v42 = vld [vmem:[#allocation94_spill] sm:$0xff] }
 0x30c   : > { %16626 = vst [vmem:[#allocation41_spill] sm:$0xff] %v14048_v28  ;;  %6297 = vmatmul.mubr.bf16.gmra.mrb[96].mxu0 %v4945_v21  ;;  %5205 = vrot.lane.b32.xlu1 %v16627_v44, %s10138_s28  ;;  %v6170_v63 = vpop.f32.mrb[32].mxu0  ;;  %v14052_v41 = vpop.f32.mrb[51].mxu1  ;;  %v16630_v28 = vld [vmem:[#allocation49_spill] sm:$0xff]  ;;  %v14069_v44 = vsel %vm4389_vm7, %v16416_v48, %v4651_v45 }
 0x30d   : > { %16628 = vst [vmem:[#allocation125_spill] sm:$0xff] %v14052_v41  ;;  %v4779_v61 = vpop.permute.xlu0 %4778  ;;  %v7297_v20 = vpack.c.bf16 %v7177_v10, %v7176_v1  ;;  %v6171_v13 = vadd.f32 %v13472_v47, %v6170_v63  ;;  %v6172_v52 = vpop.f32.mrb[33].mxu0 }
 0x30e   : > { %v4653_v6 = vpop.permute.xlu1 %4652  ;;  %v6173_v38 = vpop.f32.mrb[34].mxu0 }
 0x30f   : > { %5104 = vrot.lane.b32.xlu0 %v16629_v42, %s10137_s27  ;;  %9779 = vmatmul.mubr.msk.bf16.gmra.mrb[140].mxu1 %vm4438_vm8, %v7297_v20  ;;  %v6716_v27 = vadd.f32 %v13663_v43, %v6171_v13  ;;  %v6174_v21 = vadd.f32 %v13472_v47, %v6173_v38  ;;  %v6175_v23 = vpop.f32.mrb[35].mxu0 }
 0x310   : > { %5170 = vrot.lane.b32.xlu1 %v16630_v28, %s10139_s29  ;;  %v16634_v28 = vld [vmem:[#allocation83_spill] sm:$0xff] }
 0x311   : > { %v4811_v41 = vpop.permute.xlu0 %4810  ;;  %v6719_v1 = vadd.f32 %v13669_v3, %v6174_v21  ;;  %v14063_v10 = vpop.f32.mrb[52].mxu1  ;;  %v7178_v43 = vmax.f32 %v6716_v27, 0.0  ;;  %v4997_v13 = vsel %vm4389_vm7, %v16634_v28, %v4779_v61  ;;  %v4907_v3 = vsel %vm4438_vm8, %v14069_v44, %v4699_v39  ;;  %v16635_v21 = vld [vmem:[#allocation70_spill] sm:$0xff] }
 0x312   : > { %16631 = vst [vmem:[#allocation94_spill] sm:$0xff] %v14063_v10  ;;  %v4701_v52 = vpop.permute.xlu1 %4700  ;;  %v14065_v63 = vpop.f32.mrb[53].mxu1  ;;  %v5035_v48 = vsel %vm4438_vm8, %v4997_v13, %v4811_v41  ;;  %v4948_v27 = vsel %vm4471_vm9, %v4907_v3, %v14042_v32 }
 0x313   : > { %16632 = vst [vmem:[#allocation49_spill] sm:$0xff] %v14065_v63  ;;  %5136 = vrot.lane.b32.xlu0 %v16499_v14, %s10138_s28  ;;  %v7179_v38 = vmax.f32 %v6719_v1, 0.0  ;;  %v14073_v20 = vpop.f32.mrb[54].mxu1 }
 0x314   : > { %16633 = vst [vmem:[#allocation161_spill] sm:$0xff] %v14073_v20  ;;  %5207 = vrot.lane.b32.xlu1 %v16635_v21, %s10138_s28  ;;  %v14081_v10 = vpop.f32.mrb[55].mxu1  ;;  %v16638_v21 = vld [vmem:[#allocation43_spill] sm:$0xff] }
 0x315   : > { %v6178_v23 = vpop.f32.mrb[36].mxu0  ;;  %16636 = vst [vmem:[#allocation83_spill] sm:$0xff] %v14081_v10  ;;  %v4843_v45 = vpop.permute.xlu0 %4842  ;;  %v7298_v1 = vpack.c.bf16 %v7179_v38, %v7178_v43  ;;  %v16639_v43 = vld [vmem:[#allocation59_spill] sm:$0xff] }
 0x316   : > { %v6179_v20 = vadd.f32 %v13472_v47, %v6178_v23  ;;  %v6180_v63 = vpop.f32.mrb[37].mxu0  ;;  %v5076_v61 = vsel %vm4471_vm9, %v5035_v48, %v4843_v45  ;;  %v14088_v56 = vpop.permute.xlu1 %4732  ;;  %v16643_v45 = vld [vmem:[#allocation79_spill] sm:$0xff] }
 0x317   : > { %16637 = vst [vmem:[#allocation162_spill] sm:$0xff] %v14088_v56  ;;  %v6181_v39 = vpop.f32.mrb[38].mxu0  ;;  %5106 = vrot.lane.b32.xlu0 %v16638_v21, %s10137_s27  ;;  %6304 = vmatprep.mubr.bf16.mxu0 %v5076_v61 }
 0x318   : > { %v6724_v10 = vadd.f32 %v13659_v49, %v6179_v20  ;;  %v6182_v41 = vadd.f32 %v13472_v47, %v6181_v39  ;;  %v6183_v13 = vpop.f32.mrb[39].mxu0  ;;  %6305 = vmatmul.mubr.bf16.gmra.mrb[100].mxu0 %v4948_v27  ;;  %5172 = vrot.lane.b32.xlu1 %v16639_v43, %s10139_s29  ;;  %v14113_v39 = vld [vmem:[%s15551_s2] ss:$0 sm:$0xff] }
 0x319   : > { %v4781_v38 = vpop.permute.xlu0 %4780  ;;  %9782 = vmatprep.mubr.msk.bf16.mxu1 %vm4438_vm8, %v7298_v1  ;;  %v14098_v3 = vpop.f32.mrb[56].mxu1 }
 0x31a   : > { %v6727_v63 = vadd.f32 %v13667_v46, %v6182_v41  ;;  %16640 = vst [vmem:[#allocation43_spill] sm:$0xff] %v14098_v3  ;;  %v4655_v23 = vpop.permute.xlu1 %4654  ;;  %v14100_v48 = vpop.f32.mrb[57].mxu1  ;;  %v7180_v49 = vmax.f32 %v6724_v10, 0.0 }
 0x31b   : > { %16641 = vst [vmem:[#allocation59_spill] sm:$0xff] %v14100_v48  ;;  %5138 = vrot.lane.b32.xlu0 %v16501_v16, %s10138_s28  ;;  %v14104_v20 = vpop.f32.mrb[58].mxu1  ;;  %v16647_v48 = vld [vmem:[#allocation69_spill] sm:$0xff] }
 0x31c   : > { %v7181_v47 = vmax.f32 %v6727_v63, 0.0  ;;  %16642 = vst [vmem:[#allocation163_spill] sm:$0xff] %v14104_v20  ;;  %5209 = vrot.lane.b32.xlu1 %v16643_v45, %s10138_s28  ;;  %v14108_v61 = vpop.f32.mrb[59].mxu1  ;;  %v14118_v63 = vsel %vm4389_vm7, %v16547_v22, %v4653_v6  ;;  %v16645_v20 = vld [vmem:[#allocation142_spill] sm:$0xff] }
 0x31d   : > { %v6186_v27 = vpop.f32.mrb[40].mxu0  ;;  %16644 = vst [vmem:[#allocation164_spill] sm:$0xff] %v14108_v61  ;;  %v4813_v1 = vpop.permute.xlu0 %4812  ;;  %v16646_v61 = vld [vmem:[#allocation99_spill] sm:$0xff] }
 0x31e   : > { %v7299_v46 = vpack.c.bf16 %v7181_v47, %v7180_v49  ;;  %v6187_v41 = vadd.f32 %v14113_v39, %v6186_v27  ;;  %v6188_v13 = vpop.f32.mrb[41].mxu0  ;;  %v4703_v10 = vpop.permute.xlu1 %4702  ;;  %v5000_v27 = vsel %vm4389_vm7, %v16646_v61, %v4781_v38 }
 0x31f   : > { %v6189_v43 = vpop.f32.mrb[42].mxu0  ;;  %5108 = vrot.lane.b32.xlu0 %v16645_v20, %s10137_s27  ;;  %v4909_v13 = vsel %vm4438_vm8, %v14118_v63, %v4701_v52  ;;  %v5037_v22 = vsel %vm4438_vm8, %v5000_v27, %v4813_v1  ;;  %v16651_v27 = vld [vmem:[#allocation91_spill] sm:$0xff] }
 0x320   : > { %9783 = vmatmul.mubr.msk.bf16.gmra.mrb[144].mxu1 %vm4438_vm8, %v7299_v46  ;;  %v6732_v49 = vadd.f32 %v13747_v57, %v6187_v41  ;;  %v6190_v47 = vadd.f32 %v14113_v39, %v6189_v43  ;;  %v6191_v3 = vpop.f32.mrb[43].mxu0  ;;  %5174 = vrot.lane.b32.xlu1 %v16647_v48, %s10139_s29  ;;  %v4951_v46 = vsel %vm4471_vm9, %v4909_v13, %v14088_v56 }
 0x321   : > { %v4845_v6 = vpop.permute.xlu0 %4844  ;;  %v14135_v41 = vpop.f32.mrb[60].mxu1 }
 0x322   : > { %v6735_v57 = vadd.f32 %v13766_v9, %v6190_v47  ;;  %16648 = vst [vmem:[#allocation142_spill] sm:$0xff] %v14135_v41  ;;  %v5079_v3 = vsel %vm4471_vm9, %v5037_v22, %v4845_v6  ;;  %v14138_v43 = vpop.permute.xlu1 %4734  ;;  %v14140_v38 = vpop.f32.mrb[61].mxu1  ;;  %v7182_v52 = vmax.f32 %v6732_v49, 0.0 }
 0x323   : > { %16649 = vst [vmem:[#allocation99_spill] sm:$0xff] %v14140_v38  ;;  %5140 = vrot.lane.b32.xlu0 %v16590_v19, %s10138_s28  ;;  %6312 = vmatprep.mubr.bf16.mxu0 %v5079_v3  ;;  %v14144_v1 = vpop.f32.mrb[62].mxu1  ;;  %v16653_v3 = vld [vmem:[#allocation132_spill] sm:$0xff] }
 0x324   : > { %v7183_v48 = vmax.f32 %v6735_v57, 0.0  ;;  %16650 = vst [vmem:[#allocation69_spill] sm:$0xff] %v14144_v1  ;;  %6313 = vmatmul.mubr.bf16.gmra.mrb[104].mxu0 %v4951_v46  ;;  %5211 = vrot.lane.b32.xlu1 %v16651_v27, %s10138_s28  ;;  %v14148_v47 = vpop.f32.mrb[63].mxu1  ;;  %v16654_v1 = vld [vmem:[#allocation78_spill] sm:$0xff]  ;;  %v14165_v27 = vsel %vm4389_vm7, %v16554_v53, %v4655_v23 }
 0x325   : > { %v6194_v9 = vpop.f32.mrb[44].mxu0  ;;  %16652 = vst [vmem:[#allocation165_spill] sm:$0xff] %v14148_v47  ;;  %v4783_v13 = vpop.permute.xlu0 %4782 }
 0x326   : > { %v7300_v22 = vpack.c.bf16 %v7183_v48, %v7182_v52  ;;  %v6195_v6 = vadd.f32 %v14113_v39, %v6194_v9  ;;  %v6196_v41 = vpop.f32.mrb[45].mxu0  ;;  %v4657_v38 = vpop.permute.xlu1 %4656 }
 0x327   : > { %v6197_v56 = vpop.f32.mrb[46].mxu0  ;;  %5110 = vrot.lane.b32.xlu0 %v16653_v3, %s10137_s27 }
 0x328   : > { %9786 = vmatprep.mubr.msk.bf16.mxu1 %vm4438_vm8, %v7300_v22  ;;  %v6740_v49 = vadd.f32 %v13742_v40, %v6195_v6  ;;  %v6198_v46 = vadd.f32 %v14113_v39, %v6197_v56  ;;  %v6199_v57 = vpop.f32.mrb[47].mxu0  ;;  %5176 = vrot.lane.b32.xlu1 %v16654_v1, %s10139_s29  ;;  %v16658_v1 = vld [vmem:[#allocation114_spill] sm:$0xff] }
 0x329   : > { %v4815_v47 = vpop.permute.xlu0 %4814  ;;  %v14159_v48 = vpop.f32.mrb[64].mxu1  ;;  %v5003_v6 = vsel %vm4389_vm7, %v16658_v1, %v4783_v13 }
 0x32a   : > { %v6743_v52 = vadd.f32 %v13757_v37, %v6198_v46  ;;  %16655 = vst [vmem:[#allocation132_spill] sm:$0xff] %v14159_v48  ;;  %v4705_v41 = vpop.permute.xlu1 %4704  ;;  %v14161_v9 = vpop.f32.mrb[65].mxu1  ;;  %v7184_v40 = vmax.f32 %v6740_v49, 0.0  ;;  %v4911_v37 = vsel %vm4438_vm8, %v14165_v27, %v4703_v10  ;;  %v16659_v46 = vld [vmem:[#allocation107_spill] sm:$0xff]  ;;  %v5039_v53 = vsel %vm4438_vm8, %v5003_v6, %v4815_v47 }
 0x32b   : > { %16656 = vst [vmem:[#allocation78_spill] sm:$0xff] %v14161_v9  ;;  %5142 = vrot.lane.b32.xlu0 %v16605_v60, %s10138_s28  ;;  %v14169_v22 = vpop.f32.mrb[66].mxu1  ;;  %v4954_v49 = vsel %vm4471_vm9, %v4911_v37, %v14138_v43 }
 0x32c   : > { %v7185_v56 = vmax.f32 %v6743_v52, 0.0  ;;  %16657 = vst [vmem:[#allocation166_spill] sm:$0xff] %v14169_v22  ;;  %5213 = vrot.lane.b32.xlu1 %v16659_v46, %s10138_s28  ;;  %v14177_v48 = vpop.f32.mrb[67].mxu1  ;;  %v16661_v46 = vld [vmem:[#allocation56_spill] sm:$0xff] }
 0x32d   : > { %v6202_v57 = vpop.f32.mrb[48].mxu0  ;;  %16660 = vst [vmem:[#allocation114_spill] sm:$0xff] %v14177_v48  ;;  %v4847_v23 = vpop.permute.xlu0 %4846 }
 0x32e   : > { %v7301_v52 = vpack.c.bf16 %v7185_v56, %v7184_v40  ;;  %v6203_v22 = vadd.f32 %v14113_v39, %v6202_v57  ;;  %v6204_v9 = vpop.f32.mrb[49].mxu0  ;;  %v5082_v13 = vsel %vm4471_vm9, %v5039_v53, %v4847_v23  ;;  %v14184_v45 = vpop.permute.xlu1 %4736  ;;  %v16662_v40 = vld [vmem:[#allocation89_spill] sm:$0xff] }
 0x32f   : > { %v6205_v10 = vpop.f32.mrb[50].mxu0  ;;  %5112 = vrot.lane.b32.xlu0 %v16661_v46, %s10137_s27  ;;  %6320 = vmatprep.mubr.bf16.mxu0 %v5082_v13 }
 0x330   : > { %v6748_v48 = vadd.f32 %v13841_v12, %v6203_v22  ;;  %v6206_v47 = vadd.f32 %v14113_v39, %v6205_v10  ;;  %v6207_v6 = vpop.f32.mrb[51].mxu0  ;;  %6321 = vmatmul.mubr.bf16.gmra.mrb[108].mxu0 %v4954_v49  ;;  %5178 = vrot.lane.b32.xlu1 %v16662_v40, %s10139_s29  ;;  %v16666_v49 = vld [vmem:[#allocation117_spill] sm:$0xff] }
 0x331   : > { %v4785_v56 = vpop.permute.xlu0 %4784  ;;  %9787 = vmatmul.mubr.msk.bf16.gmra.mrb[148].mxu1 %vm4438_vm8, %v7301_v52  ;;  %v14194_v37 = vpop.f32.mrb[68].mxu1 }
 0x332   : > { %v6751_v9 = vadd.f32 %v13849_v29, %v6206_v47  ;;  %16663 = vst [vmem:[#allocation56_spill] sm:$0xff] %v14194_v37  ;;  %v4659_v57 = vpop.permute.xlu1 %4658  ;;  %v14196_v53 = vpop.f32.mrb[69].mxu1  ;;  %v7186_v12 = vmax.f32 %v6748_v48, 0.0 }
 0x333   : > { %16664 = vst [vmem:[#allocation89_spill] sm:$0xff] %v14196_v53  ;;  %5144 = vrot.lane.b32.xlu0 %v16621_v0, %s10138_s28  ;;  %v14200_v23 = vpop.f32.mrb[70].mxu1  ;;  %v14209_v53 = vsel %vm4389_vm7, %v16560_v33, %v4657_v38 }
 0x334   : > { %v7187_v22 = vmax.f32 %v6751_v9, 0.0  ;;  %16665 = vst [vmem:[#allocation167_spill] sm:$0xff] %v14200_v23  ;;  %5215 = vrot.lane.b32.xlu1 %v16666_v49, %s10138_s28  ;;  %v14204_v10 = vpop.f32.mrb[71].mxu1 }
 0x335   : > { %v6210_v13 = vpop.f32.mrb[52].mxu0  ;;  %16667 = vst [vmem:[#allocation117_spill] sm:$0xff] %v14204_v10  ;;  %v4817_v52 = vpop.permute.xlu0 %4816 }
 0x336   : > { %v7302_v29 = vpack.c.bf16 %v7187_v22, %v7186_v12  ;;  %v6211_v47 = vadd.f32 %v14113_v39, %v6210_v13  ;;  %v6212_v6 = vpop.f32.mrb[53].mxu0  ;;  %v4707_v40 = vpop.permute.xlu1 %4706  ;;  %v16668_v12 = vld [vmem:[#allocation127_spill] sm:$0xff]  ;;  %v4913_v13 = vsel %vm4438_vm8, %v14209_v53, %v4705_v41 }
 0x337   : > { %v6213_v37 = vpop.f32.mrb[54].mxu0  ;;  %5114 = vrot.lane.b32.xlu0 %v13193_v58, %s10137_s27  ;;  %v5006_v22 = vsel %vm4389_vm7, %v16668_v12, %v4785_v56  ;;  %v16669_v6 = vld [vmem:[#allocation106_spill] sm:$0xff] }
 0x338   : > { %9790 = vmatprep.mubr.msk.bf16.mxu1 %vm4438_vm8, %v7302_v29  ;;  %v6756_v48 = vadd.f32 %v13837_v18, %v6211_v47  ;;  %v6214_v9 = vadd.f32 %v14113_v39, %v6213_v37  ;;  %v6215_v23 = vpop.f32.mrb[55].mxu0  ;;  %5180 = vrot.lane.b32.xlu1 %v16669_v6, %s10139_s29  ;;  %v5041_v33 = vsel %vm4438_vm8, %v5006_v22, %v4817_v52 }
 0x339   : > { %v4849_v38 = vpop.permute.xlu0 %4848  ;;  %v4957_v29 = vsel %vm4471_vm9, %v4913_v13, %v14184_v45  ;;  %v14226_v47 = vpop.f32.mrb[72].mxu1  ;;  %v16674_v13 = vld [vmem:[#allocation24_spill] sm:$0xff] }
 0x33a   : > { %v6759_v18 = vadd.f32 %v13845_v15, %v6214_v9  ;;  %16670 = vst [vmem:[#allocation106_spill] sm:$0xff] %v14226_v47  ;;  %v5085_v37 = vsel %vm4471_vm9, %v5041_v33, %v4849_v38  ;;  %v14229_v23 = vpop.permute.xlu1 %4738  ;;  %v14231_v56 = vpop.f32.mrb[73].mxu1  ;;  %v7188_v41 = vmax.f32 %v6756_v48, 0.0  ;;  %v16676_v38 = vld [vmem:[#allocation120_spill] sm:$0xff] }
 0x33b   : > { %16671 = vst [vmem:[#allocation168_spill] sm:$0xff] %v14229_v23  ;;  %16672 = vst [vmem:[#allocation169_spill] sm:$0xff] %v14231_v56  ;;  %5146 = vrot.lane.b32.xlu0 %v16634_v28, %s10138_s28  ;;  %6328 = vmatprep.mubr.bf16.mxu0 %v5085_v37  ;;  %v14235_v22 = vpop.f32.mrb[74].mxu1 }
 0x33c   : > { %v7189_v52 = vmax.f32 %v6759_v18, 0.0  ;;  %16673 = vst [vmem:[#allocation170_spill] sm:$0xff] %v14235_v22  ;;  %6329 = vmatmul.mubr.bf16.gmra.mrb[112].mxu0 %v4957_v29  ;;  %5217 = vrot.lane.b32.xlu1 %v16674_v13, %s10138_s28  ;;  %v14239_v15 = vpop.f32.mrb[75].mxu1  ;;  %v14252_v22 = vsel %vm4389_vm7, %v16564_v24, %v4659_v57 }
 0x33d   : > { %16675 = vst [vmem:[#allocation171_spill] sm:$0xff] %v14239_v15  ;;  %v4787_v9 = vpop.permute.xlu0 %4786 }
 0x33e   : > { %v7303_v6 = vpack.c.bf16 %v7189_v52, %v7188_v41  ;;  %v4661_v33 = vpop.permute.xlu1 %4660  ;;  %v16680_v52 = vld [vmem:[#allocation146_spill] sm:$0xff] }
 0x33f   : > { %5116 = vrot.lane.b32.xlu0 %v13236_v25, %s10137_s27 }
 0x340   : > { %9791 = vmatmul.mubr.msk.bf16.gmra.mrb[152].mxu1 %vm4438_vm8, %v7303_v6  ;;  %5182 = vrot.lane.b32.xlu1 %v16676_v38, %s10139_s29  ;;  %v5009_v6 = vsel %vm4389_vm7, %v16680_v52, %v4787_v9  ;;  %v4915_v38 = vsel %vm4438_vm8, %v14252_v22, %v4707_v40  ;;  %v16684_v9 = vld [vmem:[#allocation113_spill] sm:$0xff] }
 0x341   : > { %v4819_v48 = vpop.permute.xlu0 %4818  ;;  %v14246_v18 = vpop.f32.mrb[76].mxu1  ;;  %v4960_v57 = vsel %vm4471_vm9, %v4915_v38, %v14229_v23  ;;  %v16685_v40 = vld [vmem:[#allocation129_spill] sm:$0xff] }
 0x342   : > { %16677 = vst [vmem:[#allocation120_spill] sm:$0xff] %v14246_v18  ;;  %v4709_v29 = vpop.permute.xlu1 %4708  ;;  %v14248_v37 = vpop.f32.mrb[77].mxu1  ;;  %v16681_v18 = vld [vmem:[#allocation29_spill] sm:$0xff] }
 0x343   : > { %16678 = vst [vmem:[#allocation172_spill] sm:$0xff] %v14248_v37  ;;  %5148 = vrot.lane.b32.xlu0 %v16646_v61, %s10138_s28  ;;  %v14256_v41 = vpop.f32.mrb[78].mxu1  ;;  %v5043_v37 = vsel %vm4438_vm8, %v5009_v6, %v4819_v48  ;;  %v16689_v38 = vld [vmem:[#allocation37_spill] sm:$0xff] }
 0x344   : > { %16679 = vst [vmem:[#allocation173_spill] sm:$0xff] %v14256_v41  ;;  %5219 = vrot.lane.b32.xlu1 %v16681_v18, %s10138_s28  ;;  %v14264_v47 = vpop.f32.mrb[79].mxu1  ;;  %v16693_v18 = vld [vmem:[#allocation26_spill] sm:$0xff] }
 0x345   : > { %16682 = vst [vmem:[#allocation174_spill] sm:$0xff] %v14264_v47  ;;  %v4851_v24 = vpop.permute.xlu0 %4850 }
 0x346   : > { %v5088_v15 = vsel %vm4471_vm9, %v5043_v37, %v4851_v24  ;;  %v14270_v41 = vpop.permute.xlu1 %4740 }
 0x347   : > { %16683 = vst [vmem:[#allocation175_spill] sm:$0xff] %v14270_v41  ;;  %5118 = vrot.lane.b32.xlu0 %v16684_v9, %s10137_s27  ;;  %6336 = vmatprep.mubr.bf16.mxu0 %v5088_v15 }
 0x348   : > { %6337 = vmatmul.mubr.bf16.gmra.mrb[116].mxu0 %v4960_v57  ;;  %5184 = vrot.lane.b32.xlu1 %v16685_v40, %s10139_s29  ;;  %v14290_v40 = vsel %vm4389_vm7, %v16570_v34, %v4661_v33 }
 0x349   : > { %v4789_v56 = vpop.permute.xlu0 %4788  ;;  %v14276_v47 = vpop.f32.mrb[80].mxu1 }
 0x34a   : > { %16686 = vst [vmem:[#allocation113_spill] sm:$0xff] %v14276_v47  ;;  %v4663_v48 = vpop.permute.xlu1 %4662  ;;  %v14278_v6 = vpop.f32.mrb[81].mxu1  ;;  %v16691_v47 = vld [vmem:[#allocation73_spill] sm:$0xff] }
 0x34b   : > { %16687 = vst [vmem:[#allocation129_spill] sm:$0xff] %v14278_v6  ;;  %5150 = vrot.lane.b32.xlu0 %v16658_v1, %s10138_s28  ;;  %v14282_v37 = vpop.f32.mrb[82].mxu1  ;;  %v16692_v6 = vld [vmem:[#allocation158_spill] sm:$0xff] }
 0x34c   : > { %16688 = vst [vmem:[#allocation176_spill] sm:$0xff] %v14282_v37  ;;  %5221 = vrot.lane.b32.xlu1 %v16689_v38, %s10138_s28  ;;  %v14286_v24 = vpop.f32.mrb[83].mxu1  ;;  %v5012_v10 = vsel %vm4389_vm7, %v16692_v6, %v4789_v56  ;;  %v4917_v37 = vsel %vm4438_vm8, %v14290_v40, %v4709_v29 }
 0x34d   : > { %16690 = vst [vmem:[#allocation177_spill] sm:$0xff] %v14286_v24  ;;  %v4821_v15 = vpop.permute.xlu0 %4820  ;;  %v4963_v13 = vsel %vm4471_vm9, %v4917_v37, %v14270_v41 }
 0x34e   : > { %v4711_v57 = vpop.permute.xlu1 %4710  ;;  %v5045_v24 = vsel %vm4438_vm8, %v5012_v10, %v4821_v15  ;;  %v16697_v10 = vld [vmem:[#allocation52_spill] sm:$0xff] }
 0x34f   : > { %5120 = vrot.lane.b32.xlu0 %v16691_v47, %s10137_s27 }
 0x350   : > { %5186 = vrot.lane.b32.xlu1 %v16693_v18, %s10139_s29 }
 0x351   : > { %v4853_v38 = vpop.permute.xlu0 %4852  ;;  %v14303_v34 = vpop.f32.mrb[84].mxu1 }
 0x352   : > { %16694 = vst [vmem:[#allocation158_spill] sm:$0xff] %v14303_v34  ;;  %v5091_v33 = vsel %vm4471_vm9, %v5045_v24, %v4853_v38  ;;  %v14306_v47 = vpop.permute.xlu1 %4742  ;;  %v14308_v23 = vpop.f32.mrb[85].mxu1  ;;  %v16699_v38 = vld [vmem:[#allocation159_spill] sm:$0xff] }
 0x353   : > { %16695 = vst [vmem:[#allocation26_spill] sm:$0xff] %v14308_v23  ;;  %5152 = vrot.lane.b32.xlu0 %v16668_v12, %s10138_s28  ;;  %6344 = vmatprep.mubr.bf16.mxu0 %v5091_v33  ;;  %v14312_v56 = vpop.f32.mrb[86].mxu1 }
 0x354   : > { %16696 = vst [vmem:[#allocation178_spill] sm:$0xff] %v14312_v56  ;;  %6345 = vmatmul.mubr.bf16.gmra.mrb[120].mxu0 %v4963_v13  ;;  %5223 = vrot.lane.b32.xlu1 %v16697_v10, %s10138_s28  ;;  %v14316_v18 = vpop.f32.mrb[87].mxu1  ;;  %v14325_v13 = vsel %vm4389_vm7, %v12864_v8, %v4663_v48 }
 0x355   : > { %16698 = vst [vmem:[#allocation179_spill] sm:$0xff] %v14316_v18  ;;  %v4791_v29 = vpop.permute.xlu0 %4790  ;;  %16700 = vst [vmem:[#allocation159_spill] sm:$0xff] %v14325_v13  ;;  %v16701_v18 = vld [vmem:[#allocation45_spill] sm:$0xff] }
 0x356   : > { %v5196_v37 = vpop.permute.xlu1 %5195 }
 0x357   : > { %5122 = vrot.lane.b32.xlu0 %v13338_v11, %s10137_s27  ;;  %v5375_v23 = vsel %vm4438_vm8, %v16701_v18, %v5196_v37 }
 0x358   : > { %5188 = vrot.lane.b32.xlu1 %v16699_v38, %s10139_s29  ;;  %v16703_v38 = vld [vmem:[#allocation7_spill] sm:$0xff] }
 0x359   : > { %v4823_v24 = vpop.permute.xlu0 %4822  ;;  %v6218_v15 = vpop.f32.mrb[56].mxu0  ;;  %v5015_v41 = vsel %vm4389_vm7, %v16703_v38, %v4791_v29 }
 0x35a   : > { %v5161_v34 = vpop.permute.xlu1 %5160  ;;  %v6219_v33 = vadd.f32 %v14113_v39, %v6218_v15  ;;  %v6220_v56 = vpop.f32.mrb[57].mxu0  ;;  %v4919_v15 = vsel %vm4438_vm8, %v14325_v13, %v4711_v57  ;;  %v5047_v18 = vsel %vm4438_vm8, %v5015_v41, %v4823_v24  ;;  %v16704_v13 = vld [vmem:[#allocation27_spill] sm:$0xff] }
 0x35b   : > { %5154 = vrot.lane.b32.xlu0 %v16680_v52, %s10138_s28  ;;  %v6221_v10 = vpop.f32.mrb[58].mxu0  ;;  %v14331_v11 = vpop.f32.mrb[88].mxu1 }
 0x35c   : > { %16702 = vst [vmem:[#allocation45_spill] sm:$0xff] %v14331_v11  ;;  %5126 = vrot.lane.b32.xlu1 %v13622_v36, %s10137_s27  ;;  %v6764_v8 = vadd.f32 %v13894_v7, %v6219_v33  ;;  %v6222_v48 = vadd.f32 %v14113_v39, %v6221_v10  ;;  %v6223_v56 = vpop.f32.mrb[59].mxu0  ;;  %v14341_v52 = vpop.f32.mrb[89].mxu1  ;;  %v4966_v11 = vsel %vm4471_vm9, %v4919_v15, %v14306_v47 }
 0x35d   : > { %v4855_v37 = vpop.permute.xlu0 %4854  ;;  %v14346_v29 = vpop.f32.mrb[90].mxu1  ;;  %v5406_v36 = vsel %vm4471_vm9, %v5375_v23, %v16704_v13 }
 0x35e   : > { %v5094_v57 = vsel %vm4471_vm9, %v5047_v18, %v4855_v37  ;;  %v5198_v12 = vpop.permute.xlu1 %5197  ;;  %v6767_v7 = vadd.f32 %v13910_v26, %v6222_v48  ;;  %v14352_v10 = vpop.f32.mrb[91].mxu1  ;;  %v7190_v41 = vmax.f32 %v6764_v8, 0.0  ;;  %v16705_v8 = vld [vmem:[#allocation47_spill] sm:$0xff]  ;;  %v16706_v48 = vld [vmem:[#allocation9_spill] sm:$0xff] }
 0x35f   : > { %5124 = vrot.lane.b32.xlu0 %v13376_v35, %s10137_s27  ;;  %6352 = vmatprep.mubr.bf16.mxu0 %v5094_v57  ;;  %v5377_v26 = vsel %vm4438_vm8, %v13777_v2, %v5198_v12 }
 0x360   : > { %6353 = vmatmul.mubr.bf16.gmra.mrb[124].mxu0 %v4966_v11  ;;  %v7191_v24 = vmax.f32 %v6767_v7, 0.0  ;;  %5158 = vrot.lane.b32.xlu1 %v16703_v38, %s10138_s28  ;;  %v5408_v7 = vsel %vm4471_vm9, %v5377_v26, %v13734_v50 }
 0x361   : > { %v5097_v33 = vpop.permute.xlu0 %5096  ;;  %6360 = vmatprep.mubr.bf16.mxu0 %v5406_v36  ;;  %v14358_v15 = vpop.f32.mrb[92].mxu1 }
 0x362   : > { %v7304_v23 = vpack.c.bf16 %v7191_v24, %v7190_v41  ;;  %v5163_v13 = vpop.permute.xlu1 %5162  ;;  %v14360_v56 = vpop.f32.mrb[93].mxu1  ;;  %v5246_v18 = vsel %vm4389_vm7, %v16706_v48, %v5097_v33 }
 0x363   : > { %5156 = vrot.lane.b32.xlu0 %v16692_v6, %s10138_s28  ;;  %v14366_v11 = vpop.f32.mrb[94].mxu1 }
 0x364   : > { %5190 = vrot.lane.b32.xlu1 %v16705_v8, %s10139_s29  ;;  %9794 = vmatprep.mubr.msk.bf16.mxu1 %vm4438_vm8, %v7304_v23  ;;  %v14371_v36 = vpop.f32.mrb[95].mxu1  ;;  %v16707_v8 = vld [vmem:[#allocation96_spill] sm:$0xff] }
 0x365   : > { %v5129_v37 = vpop.permute.xlu0 %5128 }
 0x366   : > { %v5293_v57 = vsel %vm4438_vm8, %v5246_v18, %v5129_v37  ;;  %v5200_v41 = vpop.permute.xlu1 %5199 }
 0x367   : > { %5192 = vrot.lane.b32.xlu0 %v16581_v55, %s10137_s27  ;;  %v5325_v2 = vsel %vm4471_vm9, %v5293_v57, %v5161_v34  ;;  %v5379_v50 = vsel %vm4438_vm8, %v13819_v54, %v5200_v41 }
 0x368   : > { %6361 = vmatmul.mubr.bf16.gmra.mrb[128].mxu0 %v5325_v2  ;;  %5504 = vrot.lane.b32.xlu1 %v16598_v51, %s10138_s28  ;;  %v5410_v37 = vsel %vm4471_vm9, %v5379_v50, %v13795_v30  ;;  %v16712_v30 = vld [vmem:[#allocation68_spill] sm:$0xff] }
 0x369   : > { %v5099_v12 = vpop.permute.xlu0 %5098  ;;  %6368 = vmatprep.mubr.bf16.mxu0 %v5408_v7  ;;  %v14383_v24 = vpop.f32.mrb[96].mxu1  ;;  %v16709_v7 = vld [vmem:[#allocation2_spill] sm:$0xff] }
 0x36a   : > { %v5165_v33 = vpop.permute.xlu1 %5164  ;;  %v14385_v23 = vpop.f32.mrb[97].mxu1  ;;  %v5249_v51 = vsel %vm4389_vm7, %v16576_v59, %v5099_v12 }
 0x36b   : > { %5225 = vrot.lane.b32.xlu0 %v16707_v8, %s10138_s28  ;;  %v14391_v26 = vpop.f32.mrb[98].mxu1 }
 0x36c   : > { %16708 = vst [vmem:[#allocation7_spill] sm:$0xff] %v14391_v26  ;;  %5536 = vrot.lane.b32.xlu1 %v16482_v17, %s10139_s29  ;;  %v14395_v34 = vpop.f32.mrb[99].mxu1  ;;  %v16719_v26 = vld [vmem:[#allocation108_spill] sm:$0xff] }
 0x36d   : > { %v5131_v48 = vpop.permute.xlu0 %5130 }
 0x36e   : > { %v5295_v18 = vsel %vm4438_vm8, %v5249_v51, %v5131_v48  ;;  %v5202_v57 = vpop.permute.xlu1 %5201  ;;  %v16715_v48 = vld [vmem:[#allocation18_spill] sm:$0xff] }
 0x36f   : > { %5227 = vrot.lane.b32.xlu0 %v16709_v7, %s10139_s29  ;;  %v5328_v54 = vsel %vm4471_vm9, %v5295_v18, %v5163_v13  ;;  %v5381_v8 = vsel %vm4438_vm8, %v13859_v4, %v5202_v57 }
 0x370   : > { %6369 = vmatmul.mubr.bf16.gmra.mrb[132].mxu0 %v5328_v54  ;;  %5506 = vrot.lane.b32.xlu1 %v16610_v5, %s10138_s28 }
 0x371   : > { %v5101_v17 = vpop.permute.xlu0 %5100  ;;  %6376 = vmatprep.mubr.bf16.mxu0 %v5410_v37  ;;  %v14407_v41 = vpop.f32.mrb[100].mxu1 }
 0x372   : > { %16710 = vst [vmem:[#allocation27_spill] sm:$0xff] %v14407_v41  ;;  %v5167_v59 = vpop.permute.xlu1 %5166  ;;  %v14409_v2 = vpop.f32.mrb[101].mxu1  ;;  %v5252_v18 = vsel %vm4389_vm7, %v16715_v48, %v5101_v17  ;;  %v16716_v41 = vld [vmem:[#allocation90_spill] sm:$0xff]  ;;  %v16720_v48 = vld [vmem:[#allocation20_spill] sm:$0xff] }
 0x373   : > { %16711 = vst [vmem:[#allocation47_spill] sm:$0xff] %v14409_v2  ;;  %v6226_v12 = vpop.f32.mrb[60].mxu0  ;;  %5472 = vrot.lane.b32.xlu0 %v16712_v30, %s10137_s27  ;;  %v14415_v50 = vpop.f32.mrb[102].mxu1 }
 0x374   : > { %16713 = vst [vmem:[#allocation9_spill] sm:$0xff] %v14415_v50  ;;  %v6227_v13 = vadd.f32 %v14113_v39, %v6226_v12  ;;  %v6228_v51 = vpop.f32.mrb[61].mxu0  ;;  %5538 = vrot.lane.b32.xlu1 %v16491_v31, %s10139_s29  ;;  %v14420_v5 = vpop.f32.mrb[103].mxu1  ;;  %v16717_v50 = vld [vmem:[#allocation144_spill] sm:$0xff] }
 0x375   : > { %16714 = vst [vmem:[#allocation96_spill] sm:$0xff] %v14420_v5  ;;  %v6229_v37 = vpop.f32.mrb[62].mxu0  ;;  %v5133_v54 = vpop.permute.xlu0 %5132  ;;  %v5412_v12 = vsel %vm4471_vm9, %v5381_v8, %v16717_v50  ;;  %v16718_v31 = vld [vmem:[#allocation92_spill] sm:$0xff] }
 0x376   : > { %v6772_v30 = vadd.f32 %v16716_v41, %v6227_v13  ;;  %v6230_v2 = vadd.f32 %v14113_v39, %v6229_v37  ;;  %v5297_v4 = vsel %vm4438_vm8, %v5252_v18, %v5133_v54  ;;  %v6231_v57 = vpop.f32.mrb[63].mxu0  ;;  %v5204_v51 = vpop.permute.xlu1 %5203  ;;  %v16721_v50 = vld [vmem:[#allocation136_spill] sm:$0xff] }
 0x377   : > { %5439 = vrot.lane.b32.xlu0 %v16718_v31, %s10138_s28  ;;  %v5331_v5 = vsel %vm4471_vm9, %v5297_v4, %v5165_v33  ;;  %v16722_v57 = vld [vmem:[#allocation14_spill] sm:$0xff] }
 0x378   : > { %v6775_v17 = vadd.f32 %v16719_v26, %v6230_v2  ;;  %6377 = vmatmul.mubr.bf16.gmra.mrb[136].mxu0 %v5331_v5  ;;  %5508 = vrot.lane.b32.xlu1 %v16720_v48, %s10138_s28  ;;  %v7192_v18 = vmax.f32 %v6772_v30, 0.0  ;;  %v5383_v33 = vsel %vm4438_vm8, %v16722_v57, %v5204_v51  ;;  %v16724_v4 = vld [vmem:[#allocation30_spill] sm:$0xff] }
 0x379   : > { %v5103_v41 = vpop.permute.xlu0 %5102  ;;  %6384 = vmatprep.mubr.bf16.mxu0 %v5412_v12  ;;  %v14435_v13 = vpop.f32.mrb[104].mxu1 }
 0x37a   : > { %v7193_v37 = vmax.f32 %v6775_v17, 0.0  ;;  %v5169_v54 = vpop.permute.xlu1 %5168  ;;  %v14437_v8 = vpop.f32.mrb[105].mxu1  ;;  %v5255_v30 = vsel %vm4389_vm7, %v16724_v4, %v5103_v41  ;;  %v16725_v17 = vld [vmem:[#allocation147_spill] sm:$0xff] }
 0x37b   : > { %5474 = vrot.lane.b32.xlu0 %v16721_v50, %s10137_s27  ;;  %v14443_v26 = vpop.f32.mrb[106].mxu1  ;;  %v5414_v48 = vsel %vm4471_vm9, %v5383_v33, %v16725_v17 }
 0x37c   : > { %16723 = vst [vmem:[#allocation2_spill] sm:$0xff] %v14443_v26  ;;  %v7305_v2 = vpack.c.bf16 %v7193_v37, %v7192_v18  ;;  %5540 = vrot.lane.b32.xlu1 %v16493_v62, %s10139_s29  ;;  %v14447_v5 = vpop.f32.mrb[107].mxu1  ;;  %v16726_v18 = vld [vmem:[#allocation72_spill] sm:$0xff] }
 0x37d   : > { %v5135_v12 = vpop.permute.xlu0 %5134 }
 0x37e   : > { %v5299_v31 = vsel %vm4438_vm8, %v5255_v30, %v5135_v12  ;;  %9795 = vmatmul.mubr.msk.bf16.gmra.mrb[156].mxu1 %vm4438_vm8, %v7305_v2  ;;  %v5206_v51 = vpop.permute.xlu1 %5205  ;;  %v6234_v50 = vpop.f32.mrb[64].mxu0  ;;  %v16727_v2 = vld [vmem:[#allocation130_spill] sm:$0xff] }
 0x37f   : > { %5441 = vrot.lane.b32.xlu0 %v16726_v18, %s10138_s28  ;;  %v5334_v62 = vsel %vm4471_vm9, %v5299_v31, %v5167_v59  ;;  %v6235_v37 = vadd.f32 %v14113_v39, %v6234_v50  ;;  %v6236_v57 = vpop.f32.mrb[65].mxu0  ;;  %v16728_v18 = vld [vmem:[#allocation17_spill] sm:$0xff] }
 0x380   : > { %6385 = vmatmul.mubr.bf16.gmra.mrb[140].mxu0 %v5334_v62  ;;  %5510 = vrot.lane.b32.xlu1 %v16629_v42, %s10138_s28  ;;  %v6237_v41 = vpop.f32.mrb[66].mxu0  ;;  %v16729_v59 = vld [vmem:[#allocation13_spill] sm:$0xff] }
 0x381   : > { %v5105_v4 = vpop.permute.xlu0 %5104  ;;  %6392 = vmatprep.mubr.bf16.mxu0 %v5414_v48  ;;  %v6780_v30 = vadd.f32 %v16727_v2, %v6235_v37  ;;  %v6238_v33 = vadd.f32 %v14113_v39, %v6237_v41  ;;  %v6239_v12 = vpop.f32.mrb[67].mxu0  ;;  %v5385_v31 = vsel %vm4438_vm8, %v16729_v59, %v5206_v51  ;;  %v16731_v62 = vld [vmem:[#allocation153_spill] sm:$0xff]  ;;  %v16733_v48 = vld [vmem:[#allocation39_spill] sm:$0xff]  ;;  %v16734_v51 = vld [vmem:[#allocation4_spill] sm:$0xff] }
 0x382   : > { %v5171_v17 = vpop.permute.xlu1 %5170  ;;  %v14467_v50 = vpop.f32.mrb[108].mxu1  ;;  %v5258_v37 = vsel %vm4389_vm7, %v16733_v48, %v5105_v4  ;;  %v5416_v59 = vsel %vm4471_vm9, %v5385_v31, %v16734_v51 }
 0x383   : > { %5476 = vrot.lane.b32.xlu0 %v16728_v18, %s10137_s27  ;;  %16730 = vst [vmem:[#allocation68_spill] sm:$0xff] %v14467_v50  ;;  %v6783_v57 = vadd.f32 %v16731_v62, %v6238_v33  ;;  %v14472_v42 = vpop.f32.mrb[109].mxu1  ;;  %v7194_v12 = vmax.f32 %v6780_v30, 0.0 }
 0x384   : > { %5542 = vrot.lane.b32.xlu1 %v16499_v14, %s10139_s29  ;;  %16732 = vst [vmem:[#allocation18_spill] sm:$0xff] %v14472_v42  ;;  %v14476_v2 = vpop.f32.mrb[110].mxu1  ;;  %v16735_v14 = vld [vmem:[#allocation75_spill] sm:$0xff] }
 0x385   : > { %v5137_v41 = vpop.permute.xlu0 %5136  ;;  %v7195_v18 = vmax.f32 %v6783_v57, 0.0  ;;  %v14481_v33 = vpop.f32.mrb[111].mxu1 }
 0x386   : > { %v5301_v26 = vsel %vm4438_vm8, %v5258_v37, %v5137_v41  ;;  %v5208_v50 = vpop.permute.xlu1 %5207  ;;  %v16738_v37 = vld [vmem:[#allocation46_spill] sm:$0xff] }
 0x387   : > { %5443 = vrot.lane.b32.xlu0 %v16735_v14, %s10138_s28  ;;  %v5337_v62 = vsel %vm4471_vm9, %v5301_v26, %v5169_v54  ;;  %v7306_v42 = vpack.c.bf16 %v7195_v18, %v7194_v12  ;;  %v16739_v41 = vld [vmem:[#allocation54_spill] sm:$0xff] }
 0x388   : > { %6393 = vmatmul.mubr.bf16.gmra.mrb[144].mxu0 %v5337_v62  ;;  %5512 = vrot.lane.b32.xlu1 %v16638_v21, %s10138_s28  ;;  %v5387_v54 = vsel %vm4438_vm8, %v16739_v41, %v5208_v50  ;;  %v16743_v62 = vld [vmem:[#allocation121_spill] sm:$0xff] }
 0x389   : > { %v5107_v4 = vpop.permute.xlu0 %5106  ;;  %6400 = vmatprep.mubr.bf16.mxu0 %v5416_v59  ;;  %v14488_v30 = vpop.f32.mrb[112].mxu1  ;;  %9798 = vmatprep.mubr.msk.bf16.mxu1 %vm4438_vm8, %v7306_v42  ;;  %v16742_v42 = vld [vmem:[#allocation50_spill] sm:$0xff] }
 0x38a   : > { %16736 = vst [vmem:[#allocation90_spill] sm:$0xff] %v14488_v30  ;;  %v5173_v31 = vpop.permute.xlu1 %5172  ;;  %v14491_v57 = vpop.f32.mrb[113].mxu1  ;;  %v5261_v51 = vsel %vm4389_vm7, %v16742_v42, %v5107_v4 }
 0x38b   : > { %16737 = vst [vmem:[#allocation144_spill] sm:$0xff] %v14491_v57  ;;  %v6242_v48 = vpop.f32.mrb[68].mxu0  ;;  %5478 = vrot.lane.b32.xlu0 %v16738_v37, %s10137_s27  ;;  %v14497_v26 = vpop.f32.mrb[114].mxu1  ;;  %v16746_v57 = vld [vmem:[#allocation152_spill] sm:$0xff] }
 0x38c   : > { %16740 = vst [vmem:[#allocation92_spill] sm:$0xff] %v14497_v26  ;;  %v6243_v21 = vadd.f32 %v14113_v39, %v6242_v48  ;;  %v6244_v12 = vpop.f32.mrb[69].mxu0  ;;  %5544 = vrot.lane.b32.xlu1 %v16501_v16, %s10139_s29  ;;  %v14502_v18 = vpop.f32.mrb[115].mxu1  ;;  %v16744_v26 = vld [vmem:[#allocation112_spill] sm:$0xff] }
 0x38d   : > { %16741 = vst [vmem:[#allocation108_spill] sm:$0xff] %v14502_v18  ;;  %v6245_v59 = vpop.f32.mrb[70].mxu0  ;;  %v5139_v14 = vpop.permute.xlu0 %5138  ;;  %v5418_v48 = vsel %vm4471_vm9, %v5387_v54, %v16744_v26  ;;  %v16745_v16 = vld [vmem:[#allocation84_spill] sm:$0xff] }
 0x38e   : > { %v6788_v37 = vadd.f32 %v16743_v62, %v6243_v21  ;;  %v6246_v30 = vadd.f32 %v14113_v39, %v6245_v59  ;;  %v5303_v50 = vsel %vm4438_vm8, %v5261_v51, %v5139_v14  ;;  %v6247_v41 = vpop.f32.mrb[71].mxu0  ;;  %v5210_v12 = vpop.permute.xlu1 %5209  ;;  %v16747_v26 = vld [vmem:[#allocation44_spill] sm:$0xff]  ;;  %v16748_v62 = vld [vmem:[#allocation71_spill] sm:$0xff] }
 0x38f   : > { %5445 = vrot.lane.b32.xlu0 %v16745_v16, %s10138_s28  ;;  %v5340_v18 = vsel %vm4471_vm9, %v5303_v50, %v5171_v17  ;;  %v5389_v17 = vsel %vm4438_vm8, %v16748_v62, %v5210_v12 }
 0x390   : > { %v6791_v4 = vadd.f32 %v16746_v57, %v6246_v30  ;;  %6401 = vmatmul.mubr.bf16.gmra.mrb[148].mxu0 %v5340_v18  ;;  %5514 = vrot.lane.b32.xlu1 %v16645_v20, %s10138_s28  ;;  %v7196_v51 = vmax.f32 %v6788_v37, 0.0  ;;  %v16749_v18 = vld [vmem:[#allocation60_spill] sm:$0xff] }
 0x391   : > { %v5109_v21 = vpop.permute.xlu0 %5108  ;;  %6408 = vmatprep.mubr.bf16.mxu0 %v5418_v48  ;;  %v14517_v42 = vpop.f32.mrb[116].mxu1  ;;  %v16750_v48 = vld [vmem:[#allocation61_spill] sm:$0xff] }
 0x392   : > { %v7197_v59 = vmax.f32 %v6791_v4, 0.0  ;;  %v5175_v14 = vpop.permute.xlu1 %5174  ;;  %v14519_v54 = vpop.f32.mrb[117].mxu1  ;;  %v5264_v37 = vsel %vm4389_vm7, %v16749_v18, %v5109_v21  ;;  %v5420_v16 = vsel %vm4471_vm9, %v5389_v17, %v16750_v48  ;;  %v16753_v48 = vld [vmem:[#allocation148_spill] sm:$0xff] }
 0x393   : > { %5480 = vrot.lane.b32.xlu0 %v16747_v26, %s10137_s27  ;;  %v14525_v30 = vpop.f32.mrb[118].mxu1 }
 0x394   : > { %v7307_v57 = vpack.c.bf16 %v7197_v59, %v7196_v51  ;;  %5546 = vrot.lane.b32.xlu1 %v16590_v19, %s10139_s29  ;;  %v14529_v20 = vpop.f32.mrb[119].mxu1  ;;  %v16751_v51 = vld [vmem:[#allocation102_spill] sm:$0xff] }
 0x395   : > { %v5141_v50 = vpop.permute.xlu0 %5140 }
 0x396   : > { %v5305_v41 = vsel %vm4438_vm8, %v5264_v37, %v5141_v50  ;;  %9799 = vmatmul.mubr.msk.bf16.gmra.mrb[160].mxu1 %vm4438_vm8, %v7307_v57  ;;  %v5212_v12 = vpop.permute.xlu1 %5211  ;;  %v6250_v4 = vpop.f32.mrb[72].mxu0  ;;  %v16752_v57 = vld [vmem:[#allocation5_spill] sm:$0xff] }
 0x397   : > { %5447 = vrot.lane.b32.xlu0 %v16751_v51, %s10138_s28  ;;  %v5343_v19 = vsel %vm4471_vm9, %v5305_v41, %v5173_v31  ;;  %v6251_v59 = vadd.f32 %v14113_v39, %v6250_v4  ;;  %v6252_v26 = vpop.f32.mrb[73].mxu0  ;;  %v5391_v31 = vsel %vm4438_vm8, %v14069_v44, %v5212_v12  ;;  %v16754_v4 = vld [vmem:[#allocation51_spill] sm:$0xff] }
 0x398   : > { %6409 = vmatmul.mubr.bf16.gmra.mrb[152].mxu0 %v5343_v19  ;;  %5516 = vrot.lane.b32.xlu1 %v16653_v3, %s10138_s28  ;;  %v6253_v21 = vpop.f32.mrb[74].mxu0  ;;  %v5422_v44 = vsel %vm4471_vm9, %v5391_v31, %v14042_v32 }
 0x399   : > { %v5111_v62 = vpop.permute.xlu0 %5110  ;;  %6416 = vmatprep.mubr.bf16.mxu0 %v5420_v16  ;;  %v6796_v18 = vadd.f32 %v16752_v57, %v6251_v59  ;;  %v6254_v17 = vadd.f32 %v14113_v39, %v6253_v21  ;;  %v6255_v37 = vpop.f32.mrb[75].mxu0  ;;  %v16755_v16 = vld [vmem:[#allocation70_spill] sm:$0xff] }
 0x39a   : > { %v5177_v50 = vpop.permute.xlu1 %5176  ;;  %v14549_v41 = vpop.f32.mrb[120].mxu1  ;;  %v5267_v19 = vsel %vm4389_vm7, %v16755_v16, %v5111_v62  ;;  %v16758_v16 = vld [vmem:[#allocation105_spill] sm:$0xff] }
 0x39b   : > { %5482 = vrot.lane.b32.xlu0 %v16753_v48, %s10137_s27  ;;  %v6799_v51 = vadd.f32 %v16754_v4, %v6254_v17  ;;  %v14554_v3 = vpop.f32.mrb[121].mxu1  ;;  %v7198_v21 = vmax.f32 %v6796_v18, 0.0 }
 0x39c   : > { %5548 = vrot.lane.b32.xlu1 %v16605_v60, %s10139_s29  ;;  %v14558_v26 = vpop.f32.mrb[122].mxu1  ;;  %v16756_v60 = vld [vmem:[#allocation97_spill] sm:$0xff] }
 0x39d   : > { %v5143_v59 = vpop.permute.xlu0 %5142  ;;  %v7199_v57 = vmax.f32 %v6799_v51, 0.0  ;;  %v14563_v17 = vpop.f32.mrb[123].mxu1 }
 0x39e   : > { %v5307_v37 = vsel %vm4438_vm8, %v5267_v19, %v5143_v59  ;;  %v5214_v12 = vpop.permute.xlu1 %5213 }
 0x39f   : > { %5449 = vrot.lane.b32.xlu0 %v16756_v60, %s10138_s28  ;;  %v5346_v48 = vsel %vm4471_vm9, %v5307_v37, %v5175_v14  ;;  %v7308_v4 = vpack.c.bf16 %v7199_v57, %v7198_v21  ;;  %v5393_v14 = vsel %vm4438_vm8, %v14118_v63, %v5214_v12  ;;  %v16761_v57 = vld [vmem:[#allocation79_spill] sm:$0xff] }
 0x3a0   : > { %6417 = vmatmul.mubr.bf16.gmra.mrb[156].mxu0 %v5346_v48  ;;  %5518 = vrot.lane.b32.xlu1 %v16661_v46, %s10138_s28  ;;  %v16762_v48 = vld [vmem:[#allocation6_spill] sm:$0xff] }
 0x3a1   : > { %v5113_v62 = vpop.permute.xlu0 %5112  ;;  %6424 = vmatprep.mubr.bf16.mxu0 %v5422_v44  ;;  %v14570_v18 = vpop.f32.mrb[124].mxu1  ;;  %9802 = vmatprep.mubr.msk.bf16.mxu1 %vm4438_vm8, %v7308_v4 }
 0x3a2   : > { %16757 = vst [vmem:[#allocation20_spill] sm:$0xff] %v14570_v18  ;;  %v5179_v32 = vpop.permute.xlu1 %5178  ;;  %v14573_v31 = vpop.f32.mrb[125].mxu1  ;;  %v5270_v37 = vsel %vm4389_vm7, %v16761_v57, %v5113_v62 }
 0x3a3   : > { %v6258_v51 = vpop.f32.mrb[76].mxu0  ;;  %5484 = vrot.lane.b32.xlu0 %v16758_v16, %s10137_s27  ;;  %v14579_v19 = vpop.f32.mrb[126].mxu1 }
 0x3a4   : > { %16759 = vst [vmem:[#allocation136_spill] sm:$0xff] %v14579_v19  ;;  %v6259_v46 = vadd.f32 %v14113_v39, %v6258_v51  ;;  %v6260_v59 = vpop.f32.mrb[77].mxu0  ;;  %5550 = vrot.lane.b32.xlu1 %v16621_v0, %s10139_s29  ;;  %v14584_v21 = vpop.f32.mrb[127].mxu1  ;;  %v16763_v19 = vld [vmem:[#allocation162_spill] sm:$0xff]  ;;  %v16764_v0 = vld [vmem:[#allocation15_spill] sm:$0xff] }
 0x3a5   : > { %16760 = vst [vmem:[#allocation14_spill] sm:$0xff] %v14584_v21  ;;  %v6261_v44 = vpop.f32.mrb[78].mxu0  ;;  %v5145_v60 = vpop.permute.xlu0 %5144  ;;  %v5424_v51 = vsel %vm4471_vm9, %v5393_v14, %v16763_v19  ;;  %v16765_v21 = vld [vmem:[#allocation118_spill] sm:$0xff] }
 0x3a6   : > { %v6804_v4 = vadd.f32 %v16762_v48, %v6259_v46  ;;  %v6262_v16 = vadd.f32 %v14113_v39, %v6261_v44  ;;  %v5309_v63 = vsel %vm4438_vm8, %v5270_v37, %v5145_v60  ;;  %v6263_v12 = vpop.f32.mrb[79].mxu0  ;;  %v5216_v59 = vpop.permute.xlu1 %5215  ;;  %v16766_v19 = vld [vmem:[#allocation62_spill] sm:$0xff]  ;;  %v16767_v48 = vld [vmem:[#allocation91_spill] sm:$0xff] }
 0x3a7   : > { %5451 = vrot.lane.b32.xlu0 %v16764_v0, %s10138_s28  ;;  %v5349_v18 = vsel %vm4471_vm9, %v5309_v63, %v5177_v50  ;;  %v5395_v50 = vsel %vm4438_vm8, %v14165_v27, %v5216_v59  ;;  %v16768_v59 = vld [vmem:[#allocation25_spill] sm:$0xff] }
 0x3a8   : > { %v6807_v62 = vadd.f32 %v16765_v21, %v6262_v16  ;;  %6425 = vmatmul.mubr.bf16.gmra.mrb[160].mxu0 %v5349_v18  ;;  %5520 = vrot.lane.b32.xlu1 %v13193_v58, %s10138_s28  ;;  %v7200_v37 = vmax.f32 %v6804_v4, 0.0  ;;  %v5426_v12 = vsel %vm4471_vm9, %v5395_v50, %v14138_v43 }
 0x3a9   : > { %v5115_v46 = vpop.permute.xlu0 %5114  ;;  %6432 = vmatprep.mubr.bf16.mxu0 %v5424_v51  ;;  %v14599_v57 = vpop.f32.mrb[128].mxu1 }
 0x3aa   : > { %v7201_v44 = vmax.f32 %v6807_v62, 0.0  ;;  %v5181_v60 = vpop.permute.xlu1 %5180  ;;  %v14601_v14 = vpop.f32.mrb[129].mxu1  ;;  %v5273_v4 = vsel %vm4389_vm7, %v16767_v48, %v5115_v46  ;;  %v16770_v48 = vld [vmem:[#allocation135_spill] sm:$0xff] }
 0x3ab   : > { %5486 = vrot.lane.b32.xlu0 %v16766_v19, %s10137_s27  ;;  %v14607_v21 = vpop.f32.mrb[130].mxu1 }
 0x3ac   : > { %v7309_v18 = vpack.c.bf16 %v7201_v44, %v7200_v37  ;;  %5552 = vrot.lane.b32.xlu1 %v16634_v28, %s10139_s29  ;;  %v14611_v58 = vpop.f32.mrb[131].mxu1  ;;  %v16769_v44 = vld [vmem:[#allocation8_spill] sm:$0xff] }
 0x3ad   : > { %v5147_v16 = vpop.permute.xlu0 %5146 }
 0x3ae   : > { %v5311_v63 = vsel %vm4438_vm8, %v5273_v4, %v5147_v16  ;;  %9803 = vmatmul.mubr.msk.bf16.gmra.mrb[164].mxu1 %vm4438_vm8, %v7309_v18  ;;  %v5218_v27 = vpop.permute.xlu1 %5217  ;;  %v6266_v51 = vpop.f32.mrb[80].mxu0  ;;  %v16771_v16 = vld [vmem:[#allocation10_spill] sm:$0xff] }
 0x3af   : > { %5453 = vrot.lane.b32.xlu0 %v16768_v59, %s10138_s28  ;;  %v5352_v28 = vsel %vm4471_vm9, %v5311_v63, %v5179_v32  ;;  %v6267_v0 = vadd.f32 %v14113_v39, %v6266_v51  ;;  %v6268_v62 = vpop.f32.mrb[81].mxu0  ;;  %v5397_v32 = vsel %vm4438_vm8, %v14209_v53, %v5218_v27 }
 0x3b0   : > { %6433 = vmatmul.mubr.bf16.gmra.mrb[164].mxu0 %v5352_v28  ;;  %5522 = vrot.lane.b32.xlu1 %v13236_v25, %s10138_s28  ;;  %v6269_v46 = vpop.f32.mrb[82].mxu0  ;;  %v5428_v53 = vsel %vm4471_vm9, %v5397_v32, %v14184_v45  ;;  %v16774_v45 = vld [vmem:[#allocation53_spill] sm:$0xff] }
 0x3b1   : > { %v5117_v37 = vpop.permute.xlu0 %5116  ;;  %6440 = vmatprep.mubr.bf16.mxu0 %v5426_v12  ;;  %v6812_v19 = vadd.f32 %v16769_v44, %v6267_v0  ;;  %v6270_v43 = vadd.f32 %v14113_v39, %v6269_v46  ;;  %v6271_v50 = vpop.f32.mrb[83].mxu0  ;;  %v16772_v12 = vld [vmem:[#allocation107_spill] sm:$0xff] }
 0x3b2   : > { %v5183_v18 = vpop.permute.xlu1 %5182  ;;  %v14631_v4 = vpop.f32.mrb[132].mxu1  ;;  %v5276_v51 = vsel %vm4389_vm7, %v16772_v12, %v5117_v37 }
 0x3b3   : > { %5488 = vrot.lane.b32.xlu0 %v16770_v48, %s10137_s27  ;;  %v6815_v63 = vadd.f32 %v16771_v16, %v6270_v43  ;;  %v14636_v25 = vpop.f32.mrb[133].mxu1  ;;  %v7202_v0 = vmax.f32 %v6812_v19, 0.0 }
 0x3b4   : > { %5554 = vrot.lane.b32.xlu1 %v16646_v61, %s10139_s29  ;;  %v14640_v28 = vpop.f32.mrb[134].mxu1  ;;  %v16773_v61 = vld [vmem:[#allocation150_spill] sm:$0xff] }
 0x3b5   : > { %v5149_v59 = vpop.permute.xlu0 %5148  ;;  %v7203_v62 = vmax.f32 %v6815_v63, 0.0  ;;  %v14645_v44 = vpop.f32.mrb[135].mxu1 }
 0x3b6   : > { %v5313_v46 = vsel %vm4438_vm8, %v5276_v51, %v5149_v59  ;;  %v5220_v27 = vpop.permute.xlu1 %5219  ;;  %v16775_v51 = vld [vmem:[#allocation115_spill] sm:$0xff] }
 0x3b7   : > { %5455 = vrot.lane.b32.xlu0 %v16773_v61, %s10138_s28  ;;  %v5355_v43 = vsel %vm4471_vm9, %v5313_v46, %v5181_v60  ;;  %v7310_v50 = vpack.c.bf16 %v7203_v62, %v7202_v0  ;;  %v5399_v32 = vsel %vm4438_vm8, %v14252_v22, %v5220_v27  ;;  %v16777_v61 = vld [vmem:[#allocation34_spill] sm:$0xff] }
 0x3b8   : > { %6441 = vmatmul.mubr.bf16.gmra.mrb[168].mxu0 %v5355_v43  ;;  %5524 = vrot.lane.b32.xlu1 %v16684_v9, %s10138_s28  ;;  %v16778_v43 = vld [vmem:[#allocation11_spill] sm:$0xff] }
 0x3b9   : > { %v5119_v37 = vpop.permute.xlu0 %5118  ;;  %6448 = vmatprep.mubr.bf16.mxu0 %v5428_v53  ;;  %9806 = vmatprep.mubr.msk.bf16.mxu1 %vm4438_vm8, %v7310_v50  ;;  %v16776_v53 = vld [vmem:[#allocation168_spill] sm:$0xff]  ;;  %v16779_v50 = vld [vmem:[#allocation73_spill] sm:$0xff] }
 0x3ba   : > { %v5185_v19 = vpop.permute.xlu1 %5184  ;;  %v6274_v48 = vpop.f32.mrb[84].mxu0  ;;  %v5279_v9 = vsel %vm4389_vm7, %v16666_v49, %v5119_v37  ;;  %v5430_v22 = vsel %vm4471_vm9, %v5399_v32, %v16776_v53 }
 0x3bb   : > { %5490 = vrot.lane.b32.xlu0 %v16774_v45, %s10137_s27  ;;  %v6275_v16 = vadd.f32 %v14113_v39, %v6274_v48  ;;  %v6276_v60 = vpop.f32.mrb[85].mxu0 }
 0x3bc   : > { %5556 = vrot.lane.b32.xlu1 %v16658_v1, %s10139_s29  ;;  %v6277_v63 = vpop.f32.mrb[86].mxu0 }
 0x3bd   : > { %v5151_v12 = vpop.permute.xlu0 %5150  ;;  %v6820_v59 = vadd.f32 %v16775_v51, %v6275_v16  ;;  %v6278_v0 = vadd.f32 %v14113_v39, %v6277_v63  ;;  %v6279_v46 = vpop.f32.mrb[87].mxu0  ;;  %v16780_v16 = vld [vmem:[#allocation65_spill] sm:$0xff]  ;;  %v16782_v63 = vld [vmem:[#allocation24_spill] sm:$0xff] }
 0x3be   : > { %v5315_v62 = vsel %vm4438_vm8, %v5279_v9, %v5151_v12  ;;  %v5222_v27 = vpop.permute.xlu1 %5221 }
 0x3bf   : > { %5457 = vrot.lane.b32.xlu0 %v16777_v61, %s10138_s28  ;;  %v5358_v1 = vsel %vm4471_vm9, %v5315_v62, %v5183_v18  ;;  %v6823_v49 = vadd.f32 %v16778_v43, %v6278_v0  ;;  %v7204_v39 = vmax.f32 %v6820_v59, 0.0  ;;  %v5401_v32 = vsel %vm4438_vm8, %v14290_v40, %v5222_v27  ;;  %v16781_v18 = vld [vmem:[#allocation127_spill] sm:$0xff]  ;;  %v16784_v27 = vld [vmem:[#allocation33_spill] sm:$0xff]  ;;  %v14699_v43 = vld [vmem:[%s15551_s2] ss:$0 sm:$0xff] }
 0x3c0   : > { %6449 = vmatmul.mubr.bf16.gmra.mrb[172].mxu0 %v5358_v1  ;;  %5526 = vrot.lane.b32.xlu1 %v16779_v50, %s10138_s28  ;;  %v16783_v62 = vld [vmem:[#allocation175_spill] sm:$0xff] }
 0x3c1   : > { %v5121_v37 = vpop.permute.xlu0 %5120  ;;  %6456 = vmatprep.mubr.bf16.mxu0 %v5430_v22  ;;  %v7205_v48 = vmax.f32 %v6823_v49, 0.0  ;;  %v5432_v46 = vsel %vm4471_vm9, %v5401_v32, %v16783_v62 }
 0x3c2   : > { %v5187_v45 = vpop.permute.xlu1 %5186  ;;  %v5282_v12 = vsel %vm4389_vm7, %v16782_v63, %v5121_v37  ;;  %v16785_v37 = vld [vmem:[#allocation93_spill] sm:$0xff]  ;;  %v16787_v63 = vld [vmem:[#allocation80_spill] sm:$0xff] }
 0x3c3   : > { %5492 = vrot.lane.b32.xlu0 %v16780_v16, %s10137_s27  ;;  %v7311_v60 = vpack.c.bf16 %v7205_v48, %v7204_v39  ;;  %v14679_v9 = vpop.f32.mrb[136].mxu1  ;;  %v16786_v16 = vld [vmem:[#allocation64_spill] sm:$0xff] }
 0x3c4   : > { %5558 = vrot.lane.b32.xlu1 %v16781_v18, %s10139_s29  ;;  %v14683_v0 = vpop.f32.mrb[137].mxu1 }
 0x3c5   : > { %v5153_v51 = vpop.permute.xlu0 %5152  ;;  %9807 = vmatmul.mubr.msk.bf16.gmra.mrb[168].mxu1 %vm4438_vm8, %v7311_v60  ;;  %v14689_v53 = vpop.f32.mrb[138].mxu1 }
 0x3c6   : > { %v5317_v59 = vsel %vm4438_vm8, %v5282_v12, %v5153_v51  ;;  %v5224_v40 = vpop.permute.xlu1 %5223  ;;  %v6282_v22 = vpop.f32.mrb[88].mxu0  ;;  %v16788_v12 = vld [vmem:[#allocation159_spill] sm:$0xff] }
 0x3c7   : > { %5459 = vrot.lane.b32.xlu0 %v16784_v27, %s10138_s28  ;;  %v5361_v61 = vsel %vm4471_vm9, %v5317_v59, %v5185_v19  ;;  %v14694_v1 = vpop.f32.mrb[139].mxu1  ;;  %v6283_v49 = vadd.f32 %v14699_v43, %v6282_v22  ;;  %v6284_v50 = vpop.f32.mrb[89].mxu0  ;;  %v5403_v51 = vsel %vm4438_vm8, %v16788_v12, %v5224_v40  ;;  %v16789_v59 = vld [vmem:[#allocation32_spill] sm:$0xff]  ;;  %v16790_v22 = vld [vmem:[#allocation146_spill] sm:$0xff]  ;;  %v16791_v27 = vld [vmem:[#allocation29_spill] sm:$0xff] }
 0x3c8   : > { %6457 = vmatmul.mubr.bf16.gmra.mrb[176].mxu0 %v5361_v61  ;;  %5528 = vrot.lane.b32.xlu1 %v16785_v37, %s10138_s28  ;;  %v6285_v39 = vpop.f32.mrb[90].mxu0  ;;  %v16793_v12 = vld [vmem:[#allocation63_spill] sm:$0xff] }
 0x3c9   : > { %v5123_v48 = vpop.permute.xlu0 %5122  ;;  %6464 = vmatprep.mubr.bf16.mxu0 %v5432_v46  ;;  %v6828_v32 = vadd.f32 %v16786_v16, %v6283_v49  ;;  %v6286_v19 = vadd.f32 %v14699_v43, %v6285_v39  ;;  %v6287_v60 = vpop.f32.mrb[91].mxu0  ;;  %v5434_v39 = vsel %vm4471_vm9, %v5403_v51, %v14306_v47 }
 0x3ca   : > { %v5189_v18 = vpop.permute.xlu1 %5188  ;;  %v5285_v46 = vsel %vm4389_vm7, %v16791_v27, %v5123_v48  ;;  %v16792_v60 = vld [vmem:[#allocation36_spill] sm:$0xff] }
 0x3cb   : > { %5494 = vrot.lane.b32.xlu0 %v16787_v63, %s10137_s27  ;;  %v6831_v62 = vadd.f32 %v16789_v59, %v6286_v19  ;;  %v7206_v49 = vmax.f32 %v6828_v32, 0.0 }
 0x3cc   : > { %5560 = vrot.lane.b32.xlu1 %v16790_v22, %s10139_s29  ;;  %v16795_v22 = vld [vmem:[#allocation16_spill] sm:$0xff] }
 0x3cd   : > { %v5155_v61 = vpop.permute.xlu0 %5154  ;;  %v7207_v50 = vmax.f32 %v6831_v62, 0.0 }
 0x3ce   : > { %v5319_v37 = vsel %vm4438_vm8, %v5285_v46, %v5155_v61  ;;  %v5127_v16 = vpop.permute.xlu1 %5126 }
 0x3cf   : > { %5461 = vrot.lane.b32.xlu0 %v16792_v60, %s10138_s28  ;;  %v5364_v40 = vsel %vm4471_vm9, %v5319_v37, %v5187_v45  ;;  %v7312_v19 = vpack.c.bf16 %v7207_v50, %v7206_v49  ;;  %v16794_v45 = vld [vmem:[#allocation37_spill] sm:$0xff]  ;;  %v16796_v37 = vld [vmem:[#allocation42_spill] sm:$0xff]  ;;  %v16797_v60 = vld [vmem:[#allocation12_spill] sm:$0xff] }
 0x3d0   : > { %6465 = vmatmul.mubr.bf16.gmra.mrb[180].mxu0 %v5364_v40  ;;  %5530 = vrot.lane.b32.xlu1 %v13376_v35, %s10138_s28  ;;  %v16798_v40 = vld [vmem:[#allocation155_spill] sm:$0xff] }
 0x3d1   : > { %v5125_v48 = vpop.permute.xlu0 %5124  ;;  %6472 = vmatprep.mubr.bf16.mxu0 %v5434_v39  ;;  %9810 = vmatprep.mubr.msk.bf16.mxu1 %vm4438_vm8, %v7312_v19 }
 0x3d2   : > { %v5159_v32 = vpop.permute.xlu1 %5158  ;;  %v5288_v59 = vsel %vm4389_vm7, %v16794_v45, %v5125_v48 }
 0x3d3   : > { %v6290_v63 = vpop.f32.mrb[92].mxu0  ;;  %5496 = vrot.lane.b32.xlu0 %v16793_v12, %s10137_s27 }
 0x3d4   : > { %v6291_v47 = vadd.f32 %v14699_v43, %v6290_v63  ;;  %v6292_v51 = vpop.f32.mrb[93].mxu0  ;;  %5562 = vrot.lane.b32.xlu1 %v16692_v6, %s10139_s29 }
 0x3d5   : > { %v6293_v62 = vpop.f32.mrb[94].mxu0  ;;  %v5157_v35 = vpop.permute.xlu0 %5156 }
 0x3d6   : > { %v6836_v27 = vadd.f32 %v16795_v22, %v6291_v47  ;;  %v6294_v46 = vadd.f32 %v14699_v43, %v6293_v62  ;;  %v5321_v61 = vsel %vm4438_vm8, %v5288_v59, %v5157_v35  ;;  %v6295_v49 = vpop.f32.mrb[95].mxu0  ;;  %v5191_v50 = vpop.permute.xlu1 %5190  ;;  %v16799_v47 = vld [vmem:[#allocation138_spill] sm:$0xff]  ;;  %v16800_v59 = vld [vmem:[#allocation52_spill] sm:$0xff] }
 0x3d7   : > { %5463 = vrot.lane.b32.xlu0 %v16796_v37, %s10138_s28  ;;  %v5367_v39 = vsel %vm4471_vm9, %v5321_v61, %v5189_v18  ;;  %v5291_v62 = vsel %vm4389_vm7, %v16800_v59, %v5127_v16  ;;  %v16801_v22 = vld [vmem:[#allocation38_spill] sm:$0xff]  ;;  %v16806_v59 = vld [vmem:[#allocation3_spill] sm:$0xff] }
 0x3d8   : > { %v6839_v6 = vadd.f32 %v16797_v60, %v6294_v46  ;;  %6473 = vmatmul.mubr.bf16.gmra.mrb[184].mxu0 %v5367_v39  ;;  %5532 = vrot.lane.b32.xlu1 %v16798_v40, %s10138_s28  ;;  %v7208_v48 = vmax.f32 %v6836_v27, 0.0  ;;  %v16802_v27 = vld [vmem:[#allocation151_spill] sm:$0xff]  ;;  %v5323_v61 = vsel %vm4438_vm8, %v5291_v62, %v5159_v32 }
 0x3d9   : > { %v5193_v19 = vpop.permute.xlu0 %5192  ;;  %v5370_v16 = vsel %vm4471_vm9, %v5323_v61, %v5191_v50 }
 0x3da   : > { %v7209_v63 = vmax.f32 %v6839_v6, 0.0  ;;  %v5505_v12 = vpop.permute.xlu1 %5504  ;;  %v5373_v46 = vsel %vm4389_vm7, %v16802_v27, %v5193_v19  ;;  %v16803_v6 = vld [vmem:[#allocation74_spill] sm:$0xff] }
 0x3db   : > { %5498 = vrot.lane.b32.xlu0 %v16799_v47, %s10137_s27  ;;  %v16804_v47 = vld [vmem:[#allocation82_spill] sm:$0xff] }
 0x3dc   : > { %v7313_v51 = vpack.c.bf16 %v7209_v63, %v7208_v48  ;;  %5564 = vrot.lane.b32.xlu1 %v16703_v38, %s10139_s29 }
 0x3dd   : > { %v5226_v45 = vpop.permute.xlu0 %5225 }
 0x3de   : > { %9811 = vmatmul.mubr.msk.bf16.gmra.mrb[172].mxu1 %vm4438_vm8, %v7313_v51  ;;  %v5537_v18 = vpop.permute.xlu1 %5536  ;;  %v5405_v38 = vsel %vm4438_vm8, %v5373_v46, %v5226_v45  ;;  %v16807_v46 = vld [vmem:[#allocation19_spill] sm:$0xff] }
 0x3df   : > { %v6298_v35 = vpop.f32.mrb[96].mxu0  ;;  %5465 = vrot.lane.b32.xlu0 %v16801_v22, %s10138_s28 }
 0x3e0   : > { %v6299_v49 = vadd.f32 %v14699_v43, %v6298_v35  ;;  %v6300_v37 = vpop.f32.mrb[97].mxu0  ;;  %5534 = vrot.lane.b32.xlu1 %v16709_v7, %s10138_s28  ;;  %v16805_v7 = vld [vmem:[#allocation125_spill] sm:$0xff] }
 0x3e1   : > { %v6301_v39 = vpop.f32.mrb[98].mxu0  ;;  %v5228_v60 = vpop.permute.xlu0 %5227 }
 0x3e2   : > { %v6844_v40 = vadd.f32 %v16803_v6, %v6299_v49  ;;  %v6302_v48 = vadd.f32 %v14699_v43, %v6301_v39  ;;  %v6303_v63 = vpop.f32.mrb[99].mxu0  ;;  %v5437_v19 = vsel %vm4471_vm9, %v5405_v38, %v5228_v60  ;;  %v5507_v32 = vpop.permute.xlu1 %5506  ;;  %v16808_v38 = vld [vmem:[#allocation141_spill] sm:$0xff] }
 0x3e3   : > { %5500 = vrot.lane.b32.xlu0 %v16804_v47, %s10137_s27  ;;  %6480 = vmatprep.mubr.bf16.mxu0 %v5437_v19  ;;  %v14762_v51 = vpop.f32.mrb[140].mxu1  ;;  %v16810_v47 = vld [vmem:[#allocation139_spill] sm:$0xff] }
 0x3e4   : > { %v6847_v45 = vadd.f32 %v16805_v7, %v6302_v48  ;;  %6481 = vmatmul.mubr.bf16.gmra.mrb[188].mxu0 %v5370_v16  ;;  %5566 = vrot.lane.b32.xlu1 %v16806_v59, %s10139_s29  ;;  %v14767_v50 = vpop.f32.mrb[141].mxu1  ;;  %v7210_v22 = vmax.f32 %v6844_v40, 0.0  ;;  %v16809_v48 = vld [vmem:[#allocation116_spill] sm:$0xff]  ;;  %v16811_v7 = vld [vmem:[#allocation98_spill] sm:$0xff] }
 0x3e5   : > { %v5473_v62 = vpop.permute.xlu0 %5472  ;;  %v14769_v35 = vpop.f32.mrb[142].mxu1 }
 0x3e6   : > { %v7211_v27 = vmax.f32 %v6847_v45, 0.0  ;;  %v5634_v61 = vsel %vm4389_vm7, %v16807_v46, %v5473_v62  ;;  %v5539_v49 = vpop.permute.xlu1 %5538  ;;  %v14773_v37 = vpop.f32.mrb[143].mxu1 }
 0x3e7   : > { %5467 = vrot.lane.b32.xlu0 %v16808_v38, %s10138_s28  ;;  %v5681_v39 = vsel %vm4438_vm8, %v5634_v61, %v5505_v12  ;;  %v16813_v61 = vld [vmem:[#allocation23_spill] sm:$0xff] }
 0x3e8   : > { %v7314_v60 = vpack.c.bf16 %v7211_v27, %v7210_v22  ;;  %v5713_v16 = vsel %vm4471_vm9, %v5681_v39, %v5537_v18  ;;  %v16812_v22 = vld [vmem:[#allocation128_spill] sm:$0xff] }
 0x3e9   : > { %v5440_v6 = vpop.permute.xlu0 %5439  ;;  %6488 = vmatprep.mubr.bf16.mxu0 %v5713_v16  ;;  %v16814_v16 = vld [vmem:[#allocation35_spill] sm:$0xff] }
 0x3ea   : > { %v5569_v40 = vsel %vm4438_vm8, %v16809_v48, %v5440_v6  ;;  %9814 = vmatprep.mubr.msk.bf16.mxu1 %vm4438_vm8, %v7314_v60  ;;  %v5509_v63 = vpop.permute.xlu1 %5508  ;;  %v16815_v48 = vld [vmem:[#allocation41_spill] sm:$0xff] }
 0x3eb   : > { %v6306_v19 = vpop.f32.mrb[100].mxu0  ;;  %5502 = vrot.lane.b32.xlu0 %v16810_v47, %s10137_s27  ;;  %v5600_v45 = vsel %vm4471_vm9, %v5569_v40, %v16811_v7 }
 0x3ec   : > { %v6307_v12 = vadd.f32 %v14699_v43, %v6306_v19  ;;  %v6308_v59 = vpop.f32.mrb[101].mxu0  ;;  %6489 = vmatmul.mubr.bf16.gmra.mrb[192].mxu0 %v5600_v45 }
 0x3ed   : > { %v6309_v18 = vpop.f32.mrb[102].mxu0  ;;  %v5475_v62 = vpop.permute.xlu0 %5474 }
 0x3ee   : > { %v6852_v27 = vadd.f32 %v16812_v22, %v6307_v12  ;;  %v6310_v46 = vadd.f32 %v14699_v43, %v6309_v18  ;;  %v5637_v38 = vsel %vm4389_vm7, %v16813_v61, %v5475_v62  ;;  %v6311_v39 = vpop.f32.mrb[103].mxu0  ;;  %v5541_v60 = vpop.permute.xlu1 %5540  ;;  %v16816_v12 = vld [vmem:[#allocation122_spill] sm:$0xff]  ;;  %v16818_v22 = vld [vmem:[#allocation100_spill] sm:$0xff] }
 0x3ef   : > { %5469 = vrot.lane.b32.xlu0 %v16814_v16, %s10138_s28  ;;  %v5683_v6 = vsel %vm4438_vm8, %v5637_v38, %v5507_v32 }
 0x3f0   : > { %v6855_v40 = vadd.f32 %v16815_v48, %v6310_v46  ;;  %v5716_v19 = vsel %vm4471_vm9, %v5683_v6, %v5539_v49  ;;  %v7212_v7 = vmax.f32 %v6852_v27, 0.0  ;;  %v16822_v27 = vld [vmem:[#allocation31_spill] sm:$0xff] }
 0x3f1   : > { %v5442_v47 = vpop.permute.xlu0 %5441  ;;  %6496 = vmatprep.mubr.bf16.mxu0 %v5716_v19 }
 0x3f2   : > { %v7213_v45 = vmax.f32 %v6855_v40, 0.0  ;;  %v5571_v59 = vsel %vm4438_vm8, %v16816_v12, %v5442_v47  ;;  %v5511_v18 = vpop.permute.xlu1 %5510 }
 0x3f3   : > { %v14798_v62 = vpop.f32.mrb[144].mxu1  ;;  %v5602_v61 = vsel %vm4471_vm9, %v5571_v59, %v16818_v22  ;;  %v16823_v59 = vld [vmem:[#allocation49_spill] sm:$0xff] }
 0x3f4   : > { %16817 = vst [vmem:[#allocation30_spill] sm:$0xff] %v14798_v62  ;;  %v14802_v39 = vpop.f32.mrb[145].mxu1  ;;  %v7315_v32 = vpack.c.bf16 %v7213_v45, %v7212_v7  ;;  %6497 = vmatmul.mubr.bf16.gmra.mrb[196].mxu0 %v5602_v61 }
 0x3f5   : > { %16819 = vst [vmem:[#allocation147_spill] sm:$0xff] %v14802_v39  ;;  %v14804_v46 = vpop.f32.mrb[146].mxu1  ;;  %v5477_v49 = vpop.permute.xlu0 %5476  ;;  %v16825_v39 = vld [vmem:[#allocation103_spill] sm:$0xff] }
 0x3f6   : > { %16820 = vst [vmem:[#allocation72_spill] sm:$0xff] %v14804_v46  ;;  %v14806_v38 = vpop.f32.mrb[147].mxu1  ;;  %v5640_v16 = vsel %vm4389_vm7, %v16822_v27, %v5477_v49  ;;  %9815 = vmatmul.mubr.msk.bf16.gmra.mrb[176].mxu1 %vm4438_vm8, %v7315_v32  ;;  %v5543_v6 = vpop.permute.xlu1 %5542  ;;  %v16827_v46 = vld [vmem:[#allocation40_spill] sm:$0xff] }
 0x3f7   : > { %16821 = vst [vmem:[#allocation130_spill] sm:$0xff] %v14806_v38  ;;  %v6314_v48 = vpop.f32.mrb[104].mxu0  ;;  %v5685_v40 = vsel %vm4438_vm8, %v5640_v16, %v5509_v63  ;;  %v16824_v38 = vld [vmem:[#allocation58_spill] sm:$0xff]  ;;  %v16826_v16 = vld [vmem:[#allocation83_spill] sm:$0xff] }
 0x3f8   : > { %v6315_v19 = vadd.f32 %v14699_v43, %v6314_v48  ;;  %v6316_v47 = vpop.f32.mrb[105].mxu0  ;;  %v5719_v7 = vsel %vm4471_vm9, %v5685_v40, %v5541_v60 }
 0x3f9   : > { %v6317_v45 = vpop.f32.mrb[106].mxu0  ;;  %v5444_v12 = vpop.permute.xlu0 %5443  ;;  %6504 = vmatprep.mubr.bf16.mxu0 %v5719_v7 }
 0x3fa   : > { %v6860_v22 = vadd.f32 %v16823_v59, %v6315_v19  ;;  %v6318_v61 = vadd.f32 %v14699_v43, %v6317_v45  ;;  %v5573_v49 = vsel %vm4438_vm8, %v16824_v38, %v5444_v12  ;;  %v6319_v32 = vpop.f32.mrb[107].mxu0  ;;  %v5513_v27 = vpop.permute.xlu1 %5512 }
 0x3fb   : > { %v5604_v63 = vsel %vm4471_vm9, %v5573_v49, %v16825_v39  ;;  %v16828_v32 = vld [vmem:[#allocation140_spill] sm:$0xff] }
 0x3fc   : > { %v6863_v48 = vadd.f32 %v16826_v16, %v6318_v61  ;;  %6505 = vmatmul.mubr.bf16.gmra.mrb[200].mxu0 %v5604_v63  ;;  %v7214_v60 = vmax.f32 %v6860_v22, 0.0  ;;  %v16829_v22 = vld [vmem:[#allocation126_spill] sm:$0xff] }
 0x3fd   : > { %v5479_v47 = vpop.permute.xlu0 %5478 }
 0x3fe   : > { %v7215_v40 = vmax.f32 %v6863_v48, 0.0  ;;  %v5643_v7 = vsel %vm4389_vm7, %v16827_v46, %v5479_v47  ;;  %v5545_v19 = vpop.permute.xlu1 %5544  ;;  %v16831_v47 = vld [vmem:[#allocation94_spill] sm:$0xff] }
 0x3ff   : > { %v5687_v45 = vsel %vm4438_vm8, %v5643_v7, %v5511_v18  ;;  %v16832_v7 = vld [vmem:[#allocation48_spill] sm:$0xff] }
 0x400   : > { %v7316_v59 = vpack.c.bf16 %v7215_v40, %v7214_v60  ;;  %v5722_v38 = vsel %vm4471_vm9, %v5687_v45, %v5543_v6 }
 0x401   : > { %v5446_v12 = vpop.permute.xlu0 %5445  ;;  %6512 = vmatprep.mubr.bf16.mxu0 %v5722_v38 }
 0x402   : > { %v5575_v39 = vsel %vm4438_vm8, %v16828_v32, %v5446_v12  ;;  %9818 = vmatprep.mubr.msk.bf16.mxu1 %vm4438_vm8, %v7316_v59  ;;  %v5515_v61 = vpop.permute.xlu1 %5514 }
 0x403   : > { %v6322_v49 = vpop.f32.mrb[108].mxu0  ;;  %v5606_v63 = vsel %vm4471_vm9, %v5575_v39, %v16829_v22  ;;  %v16834_v39 = vld [vmem:[#allocation161_spill] sm:$0xff] }
 0x404   : > { %v6323_v46 = vadd.f32 %v14699_v43, %v6322_v49  ;;  %v6324_v16 = vpop.f32.mrb[109].mxu0  ;;  %6513 = vmatmul.mubr.bf16.gmra.mrb[204].mxu0 %v5606_v63  ;;  %v14831_v18 = vpop.f32.mrb[148].mxu1 }
 0x405   : > { %16830 = vst [vmem:[#allocation17_spill] sm:$0xff] %v14831_v18  ;;  %v6325_v48 = vpop.f32.mrb[110].mxu0  ;;  %v5481_v6 = vpop.permute.xlu0 %5480  ;;  %v16837_v18 = vld [vmem:[#allocation156_spill] sm:$0xff] }
 0x406   : > { %v6868_v60 = vadd.f32 %v16831_v47, %v6323_v46  ;;  %v6326_v40 = vadd.f32 %v14699_v43, %v6325_v48  ;;  %v5646_v45 = vsel %vm4389_vm7, %v16832_v7, %v5481_v6  ;;  %v6327_v59 = vpop.f32.mrb[111].mxu0  ;;  %v5547_v38 = vpop.permute.xlu1 %5546 }
 0x407   : > { %v5689_v12 = vsel %vm4438_vm8, %v5646_v45, %v5513_v27  ;;  %v14838_v32 = vpop.f32.mrb[149].mxu1  ;;  %v16838_v59 = vld [vmem:[#allocation131_spill] sm:$0xff] }
 0x408   : > { %16833 = vst [vmem:[#allocation13_spill] sm:$0xff] %v14838_v32  ;;  %v6871_v49 = vadd.f32 %v16834_v39, %v6326_v40  ;;  %v5725_v22 = vsel %vm4471_vm9, %v5689_v12, %v5545_v19  ;;  %v14842_v63 = vpop.f32.mrb[150].mxu1  ;;  %v7216_v48 = vmax.f32 %v6868_v60, 0.0  ;;  %v16839_v39 = vld [vmem:[#allocation57_spill] sm:$0xff] }
 0x409   : > { %16835 = vst [vmem:[#allocation153_spill] sm:$0xff] %v14842_v63  ;;  %v5448_v16 = vpop.permute.xlu0 %5447  ;;  %6520 = vmatprep.mubr.bf16.mxu0 %v5725_v22  ;;  %v14844_v46 = vpop.f32.mrb[151].mxu1 }
 0x40a   : > { %16836 = vst [vmem:[#allocation39_spill] sm:$0xff] %v14844_v46  ;;  %v7217_v47 = vmax.f32 %v6871_v49, 0.0  ;;  %v5577_v6 = vsel %vm4438_vm8, %v16837_v18, %v5448_v16  ;;  %v5517_v7 = vpop.permute.xlu1 %5516 }
 0x40b   : > { %v5608_v27 = vsel %vm4471_vm9, %v5577_v6, %v16838_v59  ;;  %v16841_v59 = vld [vmem:[#allocation160_spill] sm:$0xff] }
 0x40c   : > { %v7317_v45 = vpack.c.bf16 %v7217_v47, %v7216_v48  ;;  %6521 = vmatmul.mubr.bf16.gmra.mrb[208].mxu0 %v5608_v27  ;;  %v16840_v48 = vld [vmem:[#allocation59_spill] sm:$0xff] }
 0x40d   : > { %v5483_v40 = vpop.permute.xlu0 %5482 }
 0x40e   : > { %v5649_v19 = vsel %vm4389_vm7, %v16839_v39, %v5483_v40  ;;  %9819 = vmatmul.mubr.msk.bf16.gmra.mrb[180].mxu1 %vm4438_vm8, %v7317_v45  ;;  %v5549_v12 = vpop.permute.xlu1 %5548  ;;  %v16842_v39 = vld [vmem:[#allocation145_spill] sm:$0xff] }
 0x40f   : > { %v6330_v22 = vpop.f32.mrb[112].mxu0  ;;  %v5691_v60 = vsel %vm4438_vm8, %v5649_v19, %v5515_v61 }
 0x410   : > { %v6331_v49 = vadd.f32 %v14699_v43, %v6330_v22  ;;  %v6332_v46 = vpop.f32.mrb[113].mxu0  ;;  %v5728_v18 = vsel %vm4471_vm9, %v5691_v60, %v5547_v38 }
 0x411   : > { %v6333_v16 = vpop.f32.mrb[114].mxu0  ;;  %v5450_v32 = vpop.permute.xlu0 %5449  ;;  %6528 = vmatprep.mubr.bf16.mxu0 %v5728_v18  ;;  %v16844_v46 = vld [vmem:[#allocation164_spill] sm:$0xff] }
 0x412   : > { %v6876_v47 = vadd.f32 %v16840_v48, %v6331_v49  ;;  %v6334_v6 = vadd.f32 %v14699_v43, %v6333_v16  ;;  %v5579_v27 = vsel %vm4438_vm8, %v16841_v59, %v5450_v32  ;;  %v6335_v45 = vpop.f32.mrb[115].mxu0  ;;  %v5519_v40 = vpop.permute.xlu1 %5518  ;;  %v16847_v48 = vld [vmem:[#allocation67_spill] sm:$0xff] }
 0x413   : > { %v5610_v61 = vsel %vm4471_vm9, %v5579_v27, %v16842_v39  ;;  %v14862_v19 = vpop.f32.mrb[152].mxu1 }
 0x414   : > { %16843 = vst [vmem:[#allocation4_spill] sm:$0xff] %v14862_v19  ;;  %v6879_v22 = vadd.f32 %v16844_v46, %v6334_v6  ;;  %6529 = vmatmul.mubr.bf16.gmra.mrb[212].mxu0 %v5610_v61  ;;  %v14865_v38 = vpop.f32.mrb[153].mxu1  ;;  %v7218_v49 = vmax.f32 %v6876_v47, 0.0  ;;  %v16849_v61 = vld [vmem:[#allocation124_spill] sm:$0xff] }
 0x415   : > { %16845 = vst [vmem:[#allocation75_spill] sm:$0xff] %v14865_v38  ;;  %v5485_v60 = vpop.permute.xlu0 %5484  ;;  %v14867_v18 = vpop.f32.mrb[154].mxu1  ;;  %v16850_v38 = vld [vmem:[#allocation28_spill] sm:$0xff] }
 0x416   : > { %16846 = vst [vmem:[#allocation46_spill] sm:$0xff] %v14867_v18  ;;  %v7219_v16 = vmax.f32 %v6879_v22, 0.0  ;;  %v5652_v32 = vsel %vm4389_vm7, %v16847_v48, %v5485_v60  ;;  %v5551_v59 = vpop.permute.xlu1 %5550  ;;  %v14871_v45 = vpop.f32.mrb[155].mxu1  ;;  %v16853_v18 = vld [vmem:[#allocation163_spill] sm:$0xff] }
 0x417   : > { %16848 = vst [vmem:[#allocation54_spill] sm:$0xff] %v14871_v45  ;;  %v5693_v27 = vsel %vm4438_vm8, %v5652_v32, %v5517_v7  ;;  %v16852_v32 = vld [vmem:[#allocation77_spill] sm:$0xff] }
 0x418   : > { %v7318_v39 = vpack.c.bf16 %v7219_v16, %v7218_v49  ;;  %v5731_v19 = vsel %vm4471_vm9, %v5693_v27, %v5549_v12  ;;  %v16851_v16 = vld [vmem:[#allocation43_spill] sm:$0xff] }
 0x419   : > { %v5452_v6 = vpop.permute.xlu0 %5451  ;;  %6536 = vmatprep.mubr.bf16.mxu0 %v5731_v19 }
 0x41a   : > { %v5581_v46 = vsel %vm4438_vm8, %v16849_v61, %v5452_v6  ;;  %9822 = vmatprep.mubr.msk.bf16.mxu1 %vm4438_vm8, %v7318_v39  ;;  %v5521_v47 = vpop.permute.xlu1 %5520 }
 0x41b   : > { %v6338_v22 = vpop.f32.mrb[116].mxu0  ;;  %v5612_v60 = vsel %vm4471_vm9, %v5581_v46, %v16850_v38 }
 0x41c   : > { %v6339_v48 = vadd.f32 %v14699_v43, %v6338_v22  ;;  %v6340_v45 = vpop.f32.mrb[117].mxu0  ;;  %6537 = vmatmul.mubr.bf16.gmra.mrb[216].mxu0 %v5612_v60  ;;  %v16854_v60 = vld [vmem:[#allocation55_spill] sm:$0xff] }
 0x41d   : > { %v6341_v7 = vpop.f32.mrb[118].mxu0  ;;  %v5487_v49 = vpop.permute.xlu0 %5486 }
 0x41e   : > { %v6884_v12 = vadd.f32 %v16851_v16, %v6339_v48  ;;  %v6342_v19 = vadd.f32 %v14699_v43, %v6341_v7  ;;  %v5655_v27 = vsel %vm4389_vm7, %v16852_v32, %v5487_v49  ;;  %v6343_v6 = vpop.f32.mrb[119].mxu0  ;;  %v5553_v39 = vpop.permute.xlu1 %5552  ;;  %v16855_v7 = vld [vmem:[#allocation157_spill] sm:$0xff] }
 0x41f   : > { %v5695_v61 = vsel %vm4438_vm8, %v5655_v27, %v5519_v40  ;;  %v16856_v6 = vld [vmem:[#allocation88_spill] sm:$0xff] }
 0x420   : > { %v6887_v63 = vadd.f32 %v16853_v18, %v6342_v19  ;;  %v5734_v38 = vsel %vm4471_vm9, %v5695_v61, %v5551_v59  ;;  %v7220_v45 = vmax.f32 %v6884_v12, 0.0 }
 0x421   : > { %v5454_v46 = vpop.permute.xlu0 %5453  ;;  %6544 = vmatprep.mubr.bf16.mxu0 %v5734_v38 }
 0x422   : > { %v7221_v22 = vmax.f32 %v6887_v63, 0.0  ;;  %v5583_v48 = vsel %vm4438_vm8, %v16854_v60, %v5454_v46  ;;  %v5523_v16 = vpop.permute.xlu1 %5522  ;;  %v16857_v46 = vld [vmem:[#allocation99_spill] sm:$0xff] }
 0x423   : > { %v5614_v62 = vsel %vm4471_vm9, %v5583_v48, %v16855_v7 }
 0x424   : > { %v7319_v49 = vpack.c.bf16 %v7221_v22, %v7220_v45  ;;  %6545 = vmatmul.mubr.bf16.gmra.mrb[220].mxu0 %v5614_v62  ;;  %v16858_v22 = vld [vmem:[#allocation134_spill] sm:$0xff] }
 0x425   : > { %v5489_v32 = vpop.permute.xlu0 %5488 }
 0x426   : > { %v5658_v40 = vsel %vm4389_vm7, %v16856_v6, %v5489_v32  ;;  %9823 = vmatmul.mubr.msk.bf16.gmra.mrb[184].mxu1 %vm4438_vm8, %v7319_v49  ;;  %v5555_v18 = vpop.permute.xlu1 %5554  ;;  %v16859_v49 = vld [vmem:[#allocation110_spill] sm:$0xff]  ;;  %v16860_v32 = vld [vmem:[#allocation165_spill] sm:$0xff] }
 0x427   : > { %v6346_v59 = vpop.f32.mrb[120].mxu0  ;;  %v5697_v12 = vsel %vm4438_vm8, %v5658_v40, %v5521_v47 }
 0x428   : > { %v6347_v63 = vadd.f32 %v14699_v43, %v6346_v59  ;;  %v6348_v19 = vpop.f32.mrb[121].mxu0  ;;  %v5737_v27 = vsel %vm4471_vm9, %v5697_v12, %v5553_v39  ;;  %v16861_v12 = vld [vmem:[#allocation104_spill] sm:$0xff] }
 0x429   : > { %v6349_v61 = vpop.f32.mrb[122].mxu0  ;;  %v5456_v38 = vpop.permute.xlu0 %5455  ;;  %6552 = vmatprep.mubr.bf16.mxu0 %v5737_v27 }
 0x42a   : > { %v6892_v62 = vadd.f32 %v16857_v46, %v6347_v63  ;;  %v6350_v45 = vadd.f32 %v14699_v43, %v6349_v61  ;;  %v5585_v60 = vsel %vm4438_vm8, %v16858_v22, %v5456_v38  ;;  %v6351_v48 = vpop.f32.mrb[123].mxu0  ;;  %v5525_v7 = vpop.permute.xlu1 %5524  ;;  %v16862_v22 = vld [vmem:[#allocation123_spill] sm:$0xff] }
 0x42b   : > { %v5616_v47 = vsel %vm4471_vm9, %v5585_v60, %v16859_v49 }
 0x42c   : > { %v6895_v6 = vadd.f32 %v16860_v32, %v6350_v45  ;;  %6553 = vmatmul.mubr.bf16.gmra.mrb[224].mxu0 %v5616_v47  ;;  %v7222_v39 = vmax.f32 %v6892_v62, 0.0  ;;  %v16863_v62 = vld [vmem:[#allocation143_spill] sm:$0xff] }
 0x42d   : > { %v5491_v40 = vpop.permute.xlu0 %5490 }
 0x42e   : > { %v7223_v59 = vmax.f32 %v6895_v6, 0.0  ;;  %v5661_v19 = vsel %vm4389_vm7, %v16861_v12, %v5491_v40  ;;  %v5557_v63 = vpop.permute.xlu1 %5556  ;;  %v16864_v40 = vld [vmem:[#allocation142_spill] sm:$0xff] }
 0x42f   : > { %v5699_v27 = vsel %vm4438_vm8, %v5661_v19, %v5523_v16 }
 0x430   : > { %v7320_v61 = vpack.c.bf16 %v7223_v59, %v7222_v39  ;;  %v5740_v38 = vsel %vm4471_vm9, %v5699_v27, %v5555_v18  ;;  %v16865_v59 = vld [vmem:[#allocation119_spill] sm:$0xff] }
 0x431   : > { %v5458_v46 = vpop.permute.xlu0 %5457  ;;  %6560 = vmatprep.mubr.bf16.mxu0 %v5740_v38  ;;  %v16866_v38 = vld [vmem:[#allocation69_spill] sm:$0xff] }
 0x432   : > { %v5587_v60 = vsel %vm4438_vm8, %v16862_v22, %v5458_v46  ;;  %9826 = vmatprep.mubr.msk.bf16.mxu1 %vm4438_vm8, %v7320_v61  ;;  %v5527_v45 = vpop.permute.xlu1 %5526 }
 0x433   : > { %v6354_v48 = vpop.f32.mrb[124].mxu0  ;;  %v5618_v49 = vsel %vm4471_vm9, %v5587_v60, %v16863_v62 }
 0x434   : > { %v6355_v47 = vadd.f32 %v14699_v43, %v6354_v48  ;;  %v6356_v32 = vpop.f32.mrb[125].mxu0  ;;  %6561 = vmatmul.mubr.bf16.gmra.mrb[228].mxu0 %v5618_v49  ;;  %v16867_v49 = vld [vmem:[#allocation137_spill] sm:$0xff] }
 0x435   : > { %v6357_v16 = vpop.f32.mrb[126].mxu0  ;;  %v5493_v6 = vpop.permute.xlu0 %5492 }
 0x436   : > { %v6900_v18 = vadd.f32 %v16864_v40, %v6355_v47  ;;  %v6358_v39 = vadd.f32 %v14699_v43, %v6357_v16  ;;  %v5664_v12 = vsel %vm4389_vm7, %v16865_v59, %v5493_v6  ;;  %v6359_v19 = vpop.f32.mrb[127].mxu0  ;;  %v5559_v27 = vpop.permute.xlu1 %5558  ;;  %v16868_v40 = vld [vmem:[#allocation81_spill] sm:$0xff] }
 0x437   : > { %v5701_v61 = vsel %vm4438_vm8, %v5664_v12, %v5525_v7 }
 0x438   : > { %v6903_v46 = vadd.f32 %v16866_v38, %v6358_v39  ;;  %v5743_v22 = vsel %vm4471_vm9, %v5701_v61, %v5557_v63  ;;  %v7224_v48 = vmax.f32 %v6900_v18, 0.0  ;;  %v16869_v63 = vld [vmem:[#allocation78_spill] sm:$0xff]  ;;  %v16870_v38 = vld [vmem:[#allocation21_spill] sm:$0xff] }
 0x439   : > { %v5460_v60 = vpop.permute.xlu0 %5459  ;;  %6568 = vmatprep.mubr.bf16.mxu0 %v5743_v22 }
 0x43a   : > { %v7225_v62 = vmax.f32 %v6903_v46, 0.0  ;;  %v5589_v47 = vsel %vm4438_vm8, %v16867_v49, %v5460_v60  ;;  %v5529_v32 = vpop.permute.xlu1 %5528 }
 0x43b   : > { %v6362_v16 = vpop.f32.mrb[128].mxu0  ;;  %v5620_v6 = vsel %vm4471_vm9, %v5589_v47, %v16868_v40 }
 0x43c   : > { %v7321_v59 = vpack.c.bf16 %v7225_v62, %v7224_v48  ;;  %v6363_v19 = vadd.f32 %v14699_v43, %v6362_v16  ;;  %v6364_v7 = vpop.f32.mrb[129].mxu0  ;;  %6569 = vmatmul.mubr.bf16.gmra.mrb[232].mxu0 %v5620_v6  ;;  %v16871_v48 = vld [vmem:[#allocation114_spill] sm:$0xff] }
 0x43d   : > { %v6365_v39 = vpop.f32.mrb[130].mxu0  ;;  %v5495_v12 = vpop.permute.xlu0 %5494 }
 0x43e   : > { %v6908_v61 = vadd.f32 %v16869_v63, %v6363_v19  ;;  %v6366_v18 = vadd.f32 %v14699_v43, %v6365_v39  ;;  %v5667_v46 = vsel %vm4389_vm7, %v16870_v38, %v5495_v12  ;;  %v6367_v22 = vpop.f32.mrb[131].mxu0  ;;  %9827 = vmatmul.mubr.msk.bf16.gmra.mrb[188].mxu1 %vm4438_vm8, %v7321_v59  ;;  %v5561_v60 = vpop.permute.xlu1 %5560  ;;  %v16872_v19 = vld [vmem:[#allocation76_spill] sm:$0xff]  ;;  %v16873_v12 = vld [vmem:[#allocation66_spill] sm:$0xff] }
 0x43f   : > { %v5703_v49 = vsel %vm4438_vm8, %v5667_v46, %v5527_v45 }
 0x440   : > { %v6911_v62 = vadd.f32 %v16871_v48, %v6366_v18  ;;  %v5746_v47 = vsel %vm4471_vm9, %v5703_v49, %v5559_v27  ;;  %v7226_v40 = vmax.f32 %v6908_v61, 0.0  ;;  %v16874_v27 = vld [vmem:[#allocation132_spill] sm:$0xff]  ;;  %v16875_v48 = vld [vmem:[#allocation86_spill] sm:$0xff] }
 0x441   : > { %v5462_v16 = vpop.permute.xlu0 %5461  ;;  %6576 = vmatprep.mubr.bf16.mxu0 %v5746_v47 }
 0x442   : > { %v7227_v6 = vmax.f32 %v6911_v62, 0.0  ;;  %v5591_v7 = vsel %vm4438_vm8, %v16872_v19, %v5462_v16  ;;  %v5531_v39 = vpop.permute.xlu1 %5530 }
 0x443   : > { %v6370_v63 = vpop.f32.mrb[132].mxu0  ;;  %v5622_v38 = vsel %vm4471_vm9, %v5591_v7, %v16873_v12 }
 0x444   : > { %v7322_v59 = vpack.c.bf16 %v7227_v6, %v7226_v40  ;;  %v6371_v22 = vadd.f32 %v14699_v43, %v6370_v63  ;;  %v6372_v45 = vpop.f32.mrb[133].mxu0  ;;  %6577 = vmatmul.mubr.bf16.gmra.mrb[236].mxu0 %v5622_v38  ;;  %v16876_v40 = vld [vmem:[#allocation166_spill] sm:$0xff] }
 0x445   : > { %v6373_v18 = vpop.f32.mrb[134].mxu0  ;;  %v5497_v46 = vpop.permute.xlu0 %5496 }
 0x446   : > { %v6916_v49 = vadd.f32 %v16874_v27, %v6371_v22  ;;  %v6374_v61 = vadd.f32 %v14699_v43, %v6373_v18  ;;  %v5670_v62 = vsel %vm4389_vm7, %v16875_v48, %v5497_v46  ;;  %v6375_v47 = vpop.f32.mrb[135].mxu0  ;;  %9830 = vmatprep.mubr.msk.bf16.mxu1 %vm4438_vm8, %v7322_v59  ;;  %v5563_v16 = vpop.permute.xlu1 %5562  ;;  %v16877_v22 = vld [vmem:[#allocation87_spill] sm:$0xff]  ;;  %v16878_v46 = vld [vmem:[#allocation85_spill] sm:$0xff] }
 0x447   : > { %v5705_v19 = vsel %vm4438_vm8, %v5670_v62, %v5529_v32 }
 0x448   : > { %v6919_v6 = vadd.f32 %v16876_v40, %v6374_v61  ;;  %v5749_v7 = vsel %vm4471_vm9, %v5705_v19, %v5561_v60  ;;  %v7228_v12 = vmax.f32 %v6916_v49, 0.0  ;;  %v16879_v60 = vld [vmem:[#allocation89_spill] sm:$0xff]  ;;  %v16880_v40 = vld [vmem:[#allocation154_spill] sm:$0xff] }
 0x449   : > { %v5464_v63 = vpop.permute.xlu0 %5463  ;;  %6584 = vmatprep.mubr.bf16.mxu0 %v5749_v7 }
 0x44a   : > { %v7229_v38 = vmax.f32 %v6919_v6, 0.0  ;;  %v5593_v45 = vsel %vm4438_vm8, %v16877_v22, %v5464_v63  ;;  %v5533_v18 = vpop.permute.xlu1 %5532  ;;  %v16881_v22 = vld [vmem:[#allocation117_spill] sm:$0xff] }
 0x44b   : > { %v6378_v27 = vpop.f32.mrb[136].mxu0  ;;  %v5624_v48 = vsel %vm4471_vm9, %v5593_v45, %v16878_v46 }
 0x44c   : > { %v7323_v59 = vpack.c.bf16 %v7229_v38, %v7228_v12  ;;  %v6379_v47 = vadd.f32 %v14699_v43, %v6378_v27  ;;  %v6380_v32 = vpop.f32.mrb[137].mxu0  ;;  %6585 = vmatmul.mubr.bf16.gmra.mrb[240].mxu0 %v5624_v48 }
 0x44d   : > { %v6381_v61 = vpop.f32.mrb[138].mxu0  ;;  %v5499_v62 = vpop.permute.xlu0 %5498  ;;  %v16882_v32 = vld [vmem:[#allocation109_spill] sm:$0xff] }
 0x44e   : > { %v6924_v19 = vadd.f32 %v16879_v60, %v6379_v47  ;;  %v6382_v49 = vadd.f32 %v14699_v43, %v6381_v61  ;;  %v5673_v6 = vsel %vm4389_vm7, %v16880_v40, %v5499_v62  ;;  %v6383_v7 = vpop.f32.mrb[139].mxu0  ;;  %9831 = vmatmul.mubr.msk.bf16.gmra.mrb[192].mxu1 %vm4438_vm8, %v7323_v59  ;;  %v5565_v45 = vpop.permute.xlu1 %5564 }
 0x44f   : > { %v5707_v63 = vsel %vm4438_vm8, %v5673_v6, %v5531_v39  ;;  %v16885_v39 = vld [vmem:[#allocation101_spill] sm:$0xff] }
 0x450   : > { %v6927_v12 = vadd.f32 %v16881_v22, %v6382_v49  ;;  %v5752_v38 = vsel %vm4471_vm9, %v5707_v63, %v5563_v16  ;;  %v7230_v48 = vmax.f32 %v6924_v19, 0.0  ;;  %v16887_v22 = vld [vmem:[#allocation56_spill] sm:$0xff] }
 0x451   : > { %v14961_v27 = vpop.f32.mrb[156].mxu1  ;;  %v5466_v46 = vpop.permute.xlu0 %5465  ;;  %6592 = vmatprep.mubr.bf16.mxu0 %v5752_v38 }
 0x452   : > { %v7231_v47 = vmax.f32 %v6927_v12, 0.0  ;;  %v5595_v61 = vsel %vm4438_vm8, %v16882_v32, %v5466_v46  ;;  %v14965_v62 = vpop.f32.mrb[157].mxu1  ;;  %v16888_v46 = vld [vmem:[#allocation95_spill] sm:$0xff] }
 0x453   : > { %16883 = vst [vmem:[#allocation50_spill] sm:$0xff] %v14965_v62  ;;  %v6386_v60 = vpop.f32.mrb[140].mxu0  ;;  %v14967_v59 = vpop.f32.mrb[158].mxu1  ;;  %v5626_v49 = vsel %vm4471_vm9, %v5595_v61, %v16885_v39 }
 0x454   : > { %16884 = vst [vmem:[#allocation121_spill] sm:$0xff] %v14967_v59  ;;  %v7324_v40 = vpack.c.bf16 %v7231_v47, %v7230_v48  ;;  %v6387_v16 = vadd.f32 %v14699_v43, %v6386_v60  ;;  %v6388_v6 = vpop.f32.mrb[141].mxu0  ;;  %6593 = vmatmul.mubr.bf16.gmra.mrb[244].mxu0 %v5626_v49  ;;  %v14972_v7 = vpop.f32.mrb[159].mxu1  ;;  %v16889_v47 = vld [vmem:[#allocation167_spill] sm:$0xff] }
 0x455   : > { %16886 = vst [vmem:[#allocation112_spill] sm:$0xff] %v14972_v7  ;;  %v6389_v19 = vpop.f32.mrb[142].mxu0  ;;  %v5501_v63 = vpop.permute.xlu0 %5500  ;;  %v16891_v59 = vld [vmem:[#allocation111_spill] sm:$0xff] }
 0x456   : > { %v6932_v12 = vadd.f32 %v16887_v22, %v6387_v16  ;;  %v6390_v38 = vadd.f32 %v14699_v43, %v6389_v19  ;;  %v5676_v32 = vsel %vm4389_vm7, %v16888_v46, %v5501_v63  ;;  %v6391_v62 = vpop.f32.mrb[143].mxu0  ;;  %9834 = vmatprep.mubr.msk.bf16.mxu1 %vm4438_vm8, %v7324_v40  ;;  %v5535_v61 = vpop.permute.xlu1 %5534  ;;  %v16890_v16 = vld [vmem:[#allocation133_spill] sm:$0xff] }
 0x457   : > { %v5709_v48 = vsel %vm4438_vm8, %v5676_v32, %v5533_v18 }
 0x458   : > { %v6935_v60 = vadd.f32 %v16889_v47, %v6390_v38  ;;  %v5755_v39 = vsel %vm4471_vm9, %v5709_v48, %v5565_v45  ;;  %v7232_v6 = vmax.f32 %v6932_v12, 0.0  ;;  %v16892_v45 = vld [vmem:[#allocation169_spill] sm:$0xff] }
 0x459   : > { %v5468_v49 = vpop.permute.xlu0 %5467  ;;  %6600 = vmatprep.mubr.bf16.mxu0 %v5755_v39 }
 0x45a   : > { %v7233_v7 = vmax.f32 %v6935_v60, 0.0  ;;  %v5597_v19 = vsel %vm4438_vm8, %v16890_v16, %v5468_v49  ;;  %v5567_v18 = vpop.permute.xlu1 %5566 }
 0x45b   : > { %v6394_v22 = vpop.f32.mrb[144].mxu0  ;;  %v5628_v62 = vsel %vm4471_vm9, %v5597_v19, %v16891_v59 }
 0x45c   : > { %v7325_v63 = vpack.c.bf16 %v7233_v7, %v7232_v6  ;;  %v6395_v40 = vadd.f32 %v14699_v43, %v6394_v22  ;;  %v6396_v46 = vpop.f32.mrb[145].mxu0  ;;  %6601 = vmatmul.mubr.bf16.gmra.mrb[248].mxu0 %v5628_v62  ;;  %v16893_v7 = vld [vmem:[#allocation171_spill] sm:$0xff]  ;;  %v16894_v22 = vld [vmem:[#allocation149_spill] sm:$0xff] }
 0x45d   : > { %v6397_v38 = vpop.f32.mrb[146].mxu0  ;;  %v5503_v32 = vpop.permute.xlu0 %5502  ;;  %v16895_v46 = vld [vmem:[#allocation22_spill] sm:$0xff] }
 0x45e   : > { %v6940_v48 = vadd.f32 %v16892_v45, %v6395_v40  ;;  %v6398_v12 = vadd.f32 %v14699_v43, %v6397_v38  ;;  %v5679_v47 = vsel %vm4389_vm7, %v16581_v55, %v5503_v32  ;;  %v6399_v60 = vpop.f32.mrb[147].mxu0  ;;  %9835 = vmatmul.mubr.msk.bf16.gmra.mrb[196].mxu1 %vm4438_vm8, %v7325_v63  ;;  %v16896_v45 = vld [vmem:[#allocation106_spill] sm:$0xff] }
 0x45f   : > { %v5711_v59 = vsel %vm4438_vm8, %v5679_v47, %v5535_v61 }
 0x460   : > { %v6943_v39 = vadd.f32 %v16893_v7, %v6398_v12  ;;  %v5758_v49 = vsel %vm4471_vm9, %v5711_v59, %v5567_v18  ;;  %v7234_v16 = vmax.f32 %v6940_v48, 0.0  ;;  %v16897_v48 = vld [vmem:[#allocation170_spill] sm:$0xff] }
 0x461   : > { %v5470_v6 = vpop.permute.xlu0 %5469  ;;  %6608 = vmatprep.mubr.bf16.mxu0 %v5758_v49 }
 0x462   : > { %v7235_v19 = vmax.f32 %v6943_v39, 0.0  ;;  %v5599_v62 = vsel %vm4438_vm8, %v16894_v22, %v5470_v6  ;;  %v15007_v6 = vld [vmem:[%s15553_s4] ss:$0 sm:$0xff] }
 0x463   : > { %v6402_v40 = vpop.f32.mrb[148].mxu0  ;;  %v5630_v55 = vsel %vm4471_vm9, %v5599_v62, %v16895_v46 }
 0x464   : > { %v7326_v38 = vpack.c.bf16 %v7235_v19, %v7234_v16  ;;  %v6403_v63 = vadd.f32 %v14699_v43, %v6402_v40  ;;  %v6404_v32 = vpop.f32.mrb[149].mxu0  ;;  %6609 = vmatmul.mubr.bf16.gmra.mrb[252].mxu0 %v5630_v55 }
 0x465   : > { %v6405_v61 = vpop.f32.mrb[150].mxu0 }
 0x466   : > { %v6948_v12 = vadd.f32 %v16896_v45, %v6403_v63  ;;  %v6406_v18 = vadd.f32 %v14699_v43, %v6405_v61  ;;  %v6407_v47 = vpop.f32.mrb[151].mxu0  ;;  %9838 = vmatprep.mubr.msk.bf16.mxu1 %vm4438_vm8, %v7326_v38  ;;  %v16898_v45 = vld [vmem:[#allocation172_spill] sm:$0xff] }
 0x468   : > { %v6951_v60 = vadd.f32 %v16897_v48, %v6406_v18  ;;  %v7236_v7 = vmax.f32 %v6948_v12, 0.0 }
 0x469   : > { %v9800_v59 = vpop.f32.mrb[160].mxu1 }
 0x46a   : > { %v7237_v39 = vmax.f32 %v6951_v60, 0.0  ;;  %v7747_v49 = vpop.f32.mrb[161].mxu1  ;;  %v7756_v62 = vadd.f32 %v9800_v59, %v15007_v6  ;;  %v16899_v59 = vld [vmem:[#allocation174_spill] sm:$0xff] }
 0x46b   : > { %v6410_v16 = vpop.f32.mrb[152].mxu0  ;;  %v9801_v19 = vpop.f32.mrb[162].mxu1  ;;  %v7748_v63 = vadd.f32 %v15007_v6, %v7747_v49 }
 0x46c   : > { %v7327_v22 = vpack.c.bf16 %v7237_v39, %v7236_v7  ;;  %v6411_v40 = vadd.f32 %v14699_v43, %v6410_v16  ;;  %v7759_v46 = vadd.f32 %v9801_v19, %v15007_v6  ;;  %v6412_v55 = vpop.f32.mrb[153].mxu0  ;;  %v7750_v38 = vpop.f32.mrb[163].mxu1 }
 0x46d   : > { %v7751_v32 = vadd.f32 %v15007_v6, %v7750_v38  ;;  %v6413_v61 = vpop.f32.mrb[154].mxu0 }
 0x46e   : > { %v6956_v12 = vadd.f32 %v16898_v45, %v6411_v40  ;;  %v9925_v18 = vpack.i.bf16 %v7759_v46, %v7756_v62  ;;  %v6414_v47 = vadd.f32 %v14699_v43, %v6413_v61  ;;  %v6415_v48 = vpop.f32.mrb[155].mxu0  ;;  %9839 = vmatmul.mubr.msk.bf16.gmra.mrb[200].mxu1 %vm4438_vm8, %v7327_v22  ;;  %v16900_v46 = vld [vmem:[#allocation120_spill] sm:$0xff] }
 0x46f   : > { %v9930_v60 = vpack.i.bf16 %v7751_v32, %v7748_v63  ;;  %v16901_v63 = vld [vmem:[#allocation173_spill] sm:$0xff] }
 0x470   : > { %v6959_v7 = vadd.f32 %v16899_v59, %v6414_v47  ;;  %9926 = vrot.lane.b32.xlu1 %v9925_v18, %s10138_s28  ;;  %v7238_v39 = vmax.f32 %v6956_v12, 0.0 }
 0x471   : > { %9931 = vrot.lane.b32.xlu0 %v9930_v60, %s10138_s28 }
 0x472   : > { %v7239_v49 = vmax.f32 %v6959_v7, 0.0  ;;  %v16902_v7 = vld [vmem:[#allocation129_spill] sm:$0xff] }
 0x473   : > { %v6418_v16 = vpop.f32.mrb[156].mxu0 }
 0x474   : > { %v7328_v19 = vpack.c.bf16 %v7239_v49, %v7238_v39  ;;  %v6419_v55 = vadd.f32 %v14699_v43, %v6418_v16  ;;  %v6420_v40 = vpop.f32.mrb[157].mxu0 }
 0x475   : > { %v6421_v62 = vpop.f32.mrb[158].mxu0 }
 0x476   : > { %v6964_v38 = vadd.f32 %v16900_v46, %v6419_v55  ;;  %v6422_v61 = vadd.f32 %v14699_v43, %v6421_v62  ;;  %v6423_v22 = vpop.f32.mrb[159].mxu0  ;;  %9842 = vmatprep.mubr.msk.bf16.mxu1 %vm4438_vm8, %v7328_v19  ;;  %v16903_v55 = vld [vmem:[#allocation177_spill] sm:$0xff] }
 0x478   : > { %v6967_v32 = vadd.f32 %v16901_v63, %v6422_v61  ;;  %v7240_v45 = vmax.f32 %v6964_v38, 0.0 }
 0x47a   : > { %v7241_v18 = vmax.f32 %v6967_v32, 0.0 }
 0x47b   : > { %v6426_v47 = vpop.f32.mrb[160].mxu0 }
 0x47c   : > { %v7329_v12 = vpack.c.bf16 %v7241_v18, %v7240_v45  ;;  %v6427_v48 = vadd.f32 %v14699_v43, %v6426_v47  ;;  %v6428_v60 = vpop.f32.mrb[161].mxu0 }
 0x47d   : > { %v6429_v59 = vpop.f32.mrb[162].mxu0 }
 0x47e   : > { %v6972_v39 = vadd.f32 %v16902_v7, %v6427_v48  ;;  %v6430_v49 = vadd.f32 %v14699_v43, %v6429_v59  ;;  %v6431_v16 = vpop.f32.mrb[163].mxu0  ;;  %9843 = vmatmul.mubr.msk.bf16.gmra.mrb[204].mxu1 %vm4438_vm8, %v7329_v12  ;;  %v16904_v7 = vld [vmem:[#allocation113_spill] sm:$0xff] }
 0x480   : > { %v6975_v40 = vadd.f32 %v16903_v55, %v6430_v49  ;;  %v7242_v62 = vmax.f32 %v6972_v39, 0.0 }
 0x481   : > { %v9804_v19 = vpop.f32.mrb[164].mxu1 }
 0x482   : > { %v7243_v46 = vmax.f32 %v6975_v40, 0.0  ;;  %v7763_v38 = vpop.f32.mrb[165].mxu1  ;;  %v7772_v32 = vadd.f32 %v9804_v19, %v15007_v6  ;;  %v16905_v19 = vld [vmem:[#allocation176_spill] sm:$0xff] }
 0x483   : > { %v6434_v61 = vpop.f32.mrb[164].mxu0  ;;  %v9805_v22 = vpop.f32.mrb[166].mxu1  ;;  %v7764_v60 = vadd.f32 %v15007_v6, %v7763_v38 }
 0x484   : > { %v7330_v63 = vpack.c.bf16 %v7243_v46, %v7242_v62  ;;  %v6435_v45 = vadd.f32 %v14699_v43, %v6434_v61  ;;  %v7775_v18 = vadd.f32 %v9805_v22, %v15007_v6  ;;  %v6436_v47 = vpop.f32.mrb[165].mxu0  ;;  %v7766_v48 = vpop.f32.mrb[167].mxu1 }
 0x485   : > { %v7767_v12 = vadd.f32 %v15007_v6, %v7766_v48  ;;  %v6437_v59 = vpop.f32.mrb[166].mxu0 }
 0x486   : > { %v6980_v39 = vadd.f32 %v16904_v7, %v6435_v45  ;;  %v9935_v49 = vpack.i.bf16 %v7775_v18, %v7772_v32  ;;  %v6438_v16 = vadd.f32 %v14699_v43, %v6437_v59  ;;  %v6439_v55 = vpop.f32.mrb[167].mxu0  ;;  %9846 = vmatprep.mubr.msk.bf16.mxu1 %vm4438_vm8, %v7330_v63  ;;  %v16906_v18 = vld [vmem:[#allocation26_spill] sm:$0xff]  ;;  %v16907_v59 = vld [vmem:[#allocation179_spill] sm:$0xff] }
 0x487   : > { %v9940_v40 = vpack.i.bf16 %v7767_v12, %v7764_v60  ;;  %v15046_v63 = vld [vmem:[%s15551_s2] ss:$0 sm:$0xff] }
 0x488   : > { %v6983_v62 = vadd.f32 %v16905_v19, %v6438_v16  ;;  %9936 = vrot.lane.b32.xlu1 %v9935_v49, %s10138_s28  ;;  %v7244_v46 = vmax.f32 %v6980_v39, 0.0 }
 0x489   : > { %9941 = vrot.lane.b32.xlu0 %v9940_v40, %s10138_s28 }
 0x48a   : > { %v7245_v38 = vmax.f32 %v6983_v62, 0.0  ;;  %v16908_v62 = vld [vmem:[#allocation158_spill] sm:$0xff] }
 0x48b   : > { %v6442_v61 = vpop.f32.mrb[168].mxu0 }
 0x48c   : > { %v7331_v22 = vpack.c.bf16 %v7245_v38, %v7244_v46  ;;  %v6443_v47 = vadd.f32 %v14699_v43, %v6442_v61  ;;  %v6444_v45 = vpop.f32.mrb[169].mxu0 }
 0x48d   : > { %v6445_v32 = vpop.f32.mrb[170].mxu0 }
 0x48e   : > { %v6988_v48 = vadd.f32 %v16906_v18, %v6443_v47  ;;  %v6446_v60 = vadd.f32 %v15046_v63, %v6445_v32  ;;  %v6447_v12 = vpop.f32.mrb[171].mxu0  ;;  %9847 = vmatmul.mubr.msk.bf16.gmra.mrb[208].mxu1 %vm4438_vm8, %v7331_v22  ;;  %v16909_v47 = vld [vmem:[#allocation178_spill] sm:$0xff] }
 0x490   : > { %v6991_v7 = vadd.f32 %v16907_v59, %v6446_v60  ;;  %v7246_v39 = vmax.f32 %v6988_v48, 0.0 }
 0x492   : > { %v7247_v49 = vmax.f32 %v6991_v7, 0.0 }
 0x493   : > { %v6450_v16 = vpop.f32.mrb[172].mxu0 }
 0x494   : > { %v7332_v43 = vpack.c.bf16 %v7247_v49, %v7246_v39  ;;  %v6451_v55 = vadd.f32 %v15046_v63, %v6450_v16  ;;  %v6452_v40 = vpop.f32.mrb[173].mxu0 }
 0x495   : > { %v6453_v19 = vpop.f32.mrb[174].mxu0 }
 0x496   : > { %v6996_v46 = vadd.f32 %v16908_v62, %v6451_v55  ;;  %v6454_v38 = vadd.f32 %v15046_v63, %v6453_v19  ;;  %v6455_v61 = vpop.f32.mrb[175].mxu0  ;;  %9850 = vmatprep.mubr.msk.bf16.mxu1 %vm4438_vm8, %v7332_v43 }
 0x498   : > { %v6999_v45 = vadd.f32 %v16909_v47, %v6454_v38  ;;  %v9808_v22 = vpop.f32.mrb[168].mxu1  ;;  %v7248_v32 = vmax.f32 %v6996_v46, 0.0 }
 0x499   : > { %v7779_v48 = vpop.f32.mrb[169].mxu1  ;;  %v7788_v7 = vadd.f32 %v9808_v22, %v15007_v6 }
 0x49a   : > { %v7249_v18 = vmax.f32 %v6999_v45, 0.0  ;;  %v9809_v12 = vpop.f32.mrb[170].mxu1  ;;  %v7780_v40 = vadd.f32 %v15007_v6, %v7779_v48 }
 0x49b   : > { %v6458_v60 = vpop.f32.mrb[176].mxu0  ;;  %v7791_v49 = vadd.f32 %v9809_v12, %v15007_v6  ;;  %v7782_v55 = vpop.f32.mrb[171].mxu1 }
 0x49c   : > { %v7333_v59 = vpack.c.bf16 %v7249_v18, %v7248_v32  ;;  %v6459_v39 = vadd.f32 %v15046_v63, %v6458_v60  ;;  %v6460_v16 = vpop.f32.mrb[177].mxu0  ;;  %v7783_v43 = vadd.f32 %v15007_v6, %v7782_v55 }
 0x49d   : > { %v6461_v19 = vpop.f32.mrb[178].mxu0  ;;  %v9945_v46 = vpack.i.bf16 %v7791_v49, %v7788_v7  ;;  %v16910_v7 = vld [vmem:[#allocation45_spill] sm:$0xff] }
 0x49e   : > { %v7004_v62 = vadd.f32 %v14341_v52, %v6459_v39  ;;  %v6462_v38 = vadd.f32 %v15046_v63, %v6461_v19  ;;  %v6463_v61 = vpop.f32.mrb[179].mxu0  ;;  %9851 = vmatmul.mubr.msk.bf16.gmra.mrb[212].mxu1 %vm4438_vm8, %v7333_v59  ;;  %v9950_v47 = vpack.i.bf16 %v7783_v43, %v7780_v40 }
 0x49f   : > { %9946 = vrot.lane.b32.xlu1 %v9945_v46, %s10138_s28 }
 0x4a0   : > { %v7007_v45 = vadd.f32 %v14352_v10, %v6462_v38  ;;  %9951 = vrot.lane.b32.xlu0 %v9950_v47, %s10138_s28  ;;  %v7250_v22 = vmax.f32 %v7004_v62, 0.0 }
 0x4a2   : > { %v7251_v32 = vmax.f32 %v7007_v45, 0.0 }
 0x4a3   : > { %v6466_v18 = vpop.f32.mrb[180].mxu0 }
 0x4a4   : > { %v7334_v48 = vpack.c.bf16 %v7251_v32, %v7250_v22  ;;  %v6467_v60 = vadd.f32 %v15046_v63, %v6466_v18  ;;  %v6468_v52 = vpop.f32.mrb[181].mxu0 }
 0x4a5   : > { %v6469_v12 = vpop.f32.mrb[182].mxu0 }
 0x4a6   : > { %v7012_v39 = vadd.f32 %v16910_v7, %v6467_v60  ;;  %v6470_v49 = vadd.f32 %v15046_v63, %v6469_v12  ;;  %v6471_v59 = vpop.f32.mrb[183].mxu0  ;;  %9854 = vmatprep.mubr.msk.bf16.mxu1 %vm4438_vm8, %v7334_v48 }
 0x4a8   : > { %v7015_v10 = vadd.f32 %v14346_v29, %v6470_v49  ;;  %v7252_v16 = vmax.f32 %v7012_v39, 0.0 }
 0x4aa   : > { %v7253_v55 = vmax.f32 %v7015_v10, 0.0 }
 0x4ab   : > { %v6474_v40 = vpop.f32.mrb[184].mxu0 }
 0x4ac   : > { %v7335_v43 = vpack.c.bf16 %v7253_v55, %v7252_v16  ;;  %v6475_v19 = vadd.f32 %v15046_v63, %v6474_v40  ;;  %v6476_v62 = vpop.f32.mrb[185].mxu0 }
 0x4ad   : > { %v6477_v46 = vpop.f32.mrb[186].mxu0 }
 0x4ae   : > { %v7020_v38 = vadd.f32 %v14360_v56, %v6475_v19  ;;  %v6478_v61 = vadd.f32 %v15046_v63, %v6477_v46  ;;  %v6479_v47 = vpop.f32.mrb[187].mxu0  ;;  %9855 = vmatmul.mubr.msk.bf16.gmra.mrb[216].mxu1 %vm4438_vm8, %v7335_v43 }
 0x4b0   : > { %v7023_v45 = vadd.f32 %v14371_v36, %v6478_v61  ;;  %v7254_v32 = vmax.f32 %v7020_v38, 0.0 }
 0x4b1   : > { %v9812_v22 = vpop.f32.mrb[172].mxu1 }
 0x4b2   : > { %v7255_v29 = vmax.f32 %v7023_v45, 0.0  ;;  %v7795_v18 = vpop.f32.mrb[173].mxu1  ;;  %v7804_v52 = vadd.f32 %v9812_v22, %v15007_v6 }
 0x4b3   : > { %v9813_v48 = vpop.f32.mrb[174].mxu1  ;;  %v7796_v56 = vadd.f32 %v15007_v6, %v7795_v18 }
 0x4b4   : > { %v7336_v60 = vpack.c.bf16 %v7255_v29, %v7254_v32  ;;  %v7807_v12 = vadd.f32 %v9813_v48, %v15007_v6  ;;  %v7798_v7 = vpop.f32.mrb[175].mxu1 }
 0x4b5   : > { %v7799_v39 = vadd.f32 %v15007_v6, %v7798_v7 }
 0x4b6   : > { %v9955_v49 = vpack.i.bf16 %v7807_v12, %v7804_v52  ;;  %9858 = vmatprep.mubr.msk.bf16.mxu1 %vm4438_vm8, %v7336_v60 }
 0x4b7   : > { %v9960_v59 = vpack.i.bf16 %v7799_v39, %v7796_v56  ;;  %v6482_v36 = vpop.f32.mrb[188].mxu0 }
 0x4b8   : > { %v6483_v10 = vadd.f32 %v15046_v63, %v6482_v36  ;;  %9956 = vrot.lane.b32.xlu1 %v9955_v49, %s10138_s28  ;;  %v6484_v16 = vpop.f32.mrb[189].mxu0 }
 0x4b9   : > { %9961 = vrot.lane.b32.xlu0 %v9960_v59, %s10138_s28  ;;  %v6485_v55 = vpop.f32.mrb[190].mxu0 }
 0x4ba   : > { %v7028_v40 = vadd.f32 %v14358_v15, %v6483_v10  ;;  %v6486_v43 = vadd.f32 %v15046_v63, %v6485_v55  ;;  %v6487_v19 = vpop.f32.mrb[191].mxu0  ;;  %v16911_v55 = vld [vmem:[#allocation7_spill] sm:$0xff] }
 0x4bc   : > { %v7031_v62 = vadd.f32 %v14366_v11, %v6486_v43  ;;  %v7256_v46 = vmax.f32 %v7028_v40, 0.0 }
 0x4be   : > { %v7257_v38 = vmax.f32 %v7031_v62, 0.0 }
 0x4bf   : > { %v6490_v61 = vpop.f32.mrb[192].mxu0 }
 0x4c0   : > { %v7337_v47 = vpack.c.bf16 %v7257_v38, %v7256_v46  ;;  %v6491_v45 = vadd.f32 %v15046_v63, %v6490_v61  ;;  %v6492_v22 = vpop.f32.mrb[193].mxu0 }
 0x4c1   : > { %v6493_v32 = vpop.f32.mrb[194].mxu0 }
 0x4c2   : > { %v7036_v29 = vadd.f32 %v14385_v23, %v6491_v45  ;;  %v6494_v18 = vadd.f32 %v15046_v63, %v6493_v32  ;;  %v6495_v48 = vpop.f32.mrb[195].mxu0  ;;  %9859 = vmatmul.mubr.msk.bf16.gmra.mrb[220].mxu1 %vm4438_vm8, %v7337_v47 }
 0x4c3   : > { %v16912_v48 = vld [vmem:[#allocation47_spill] sm:$0xff] }
 0x4c4   : > { %v7039_v15 = vadd.f32 %v14395_v34, %v6494_v18  ;;  %v7258_v60 = vmax.f32 %v7036_v29, 0.0 }
 0x4c6   : > { %v7259_v52 = vmax.f32 %v7039_v15, 0.0 }
 0x4c7   : > { %v6498_v11 = vpop.f32.mrb[196].mxu0 }
 0x4c8   : > { %v7338_v12 = vpack.c.bf16 %v7259_v52, %v7258_v60  ;;  %v6499_v7 = vadd.f32 %v15046_v63, %v6498_v11  ;;  %v6500_v56 = vpop.f32.mrb[197].mxu0  ;;  %v16913_v11 = vld [vmem:[#allocation96_spill] sm:$0xff] }
 0x4c9   : > { %v6501_v39 = vpop.f32.mrb[198].mxu0  ;;  %v9816_v49 = vpop.f32.mrb[176].mxu1 }
 0x4ca   : > { %v7044_v59 = vadd.f32 %v14383_v24, %v6499_v7  ;;  %v6502_v23 = vadd.f32 %v15046_v63, %v6501_v39  ;;  %v6503_v36 = vpop.f32.mrb[199].mxu0  ;;  %v7811_v10 = vpop.f32.mrb[177].mxu1  ;;  %9862 = vmatprep.mubr.msk.bf16.mxu1 %vm4438_vm8, %v7338_v12  ;;  %v7820_v40 = vadd.f32 %v9816_v49, %v15007_v6 }
 0x4cb   : > { %v9817_v16 = vpop.f32.mrb[178].mxu1  ;;  %v7812_v62 = vadd.f32 %v15007_v6, %v7811_v10  ;;  %v16914_v10 = vld [vmem:[#allocation27_spill] sm:$0xff] }
 0x4cc   : > { %v7047_v34 = vadd.f32 %v16911_v55, %v6502_v23  ;;  %v7823_v43 = vadd.f32 %v9817_v16, %v15007_v6  ;;  %v7814_v19 = vpop.f32.mrb[179].mxu1  ;;  %v7260_v38 = vmax.f32 %v7044_v59, 0.0 }
 0x4cd   : > { %v7815_v46 = vadd.f32 %v15007_v6, %v7814_v19 }
 0x4ce   : > { %v7261_v24 = vmax.f32 %v7047_v34, 0.0  ;;  %v9965_v61 = vpack.i.bf16 %v7823_v43, %v7820_v40  ;;  %v16915_v40 = vld [vmem:[#allocation9_spill] sm:$0xff] }
 0x4cf   : > { %v9970_v47 = vpack.i.bf16 %v7815_v46, %v7812_v62  ;;  %v6506_v45 = vpop.f32.mrb[200].mxu0 }
 0x4d0   : > { %v7339_v22 = vpack.c.bf16 %v7261_v24, %v7260_v38  ;;  %v6507_v32 = vadd.f32 %v15046_v63, %v6506_v45  ;;  %9966 = vrot.lane.b32.xlu1 %v9965_v61, %s10138_s28  ;;  %v6508_v29 = vpop.f32.mrb[201].mxu0 }
 0x4d1   : > { %9971 = vrot.lane.b32.xlu0 %v9970_v47, %s10138_s28  ;;  %v6509_v18 = vpop.f32.mrb[202].mxu0  ;;  %v7628_v47 = vadd.f32 %v14599_v57, %v15007_v6  ;;  %v7631_v29 = vadd.f32 %v14607_v21, %v15007_v6  ;;  %v7623_v57 = vadd.f32 %v15007_v6, %v14611_v58 }
 0x4d2   : > { %v7052_v15 = vadd.f32 %v16912_v48, %v6507_v32  ;;  %v6510_v60 = vadd.f32 %v15046_v63, %v6509_v18  ;;  %v6511_v52 = vpop.f32.mrb[203].mxu0  ;;  %9863 = vmatmul.mubr.msk.bf16.gmra.mrb[224].mxu1 %vm4438_vm8, %v7339_v22  ;;  %v7620_v32 = vadd.f32 %v15007_v6, %v14601_v14 }
 0x4d4   : > { %v7055_v12 = vadd.f32 %v16913_v11, %v6510_v60  ;;  %v7262_v7 = vmax.f32 %v7052_v15, 0.0 }
 0x4d6   : > { %v7263_v56 = vmax.f32 %v7055_v12, 0.0 }
 0x4d7   : > { %v6514_v39 = vpop.f32.mrb[204].mxu0 }
 0x4d8   : > { %v7340_v49 = vpack.c.bf16 %v7263_v56, %v7262_v7  ;;  %v6515_v59 = vadd.f32 %v15046_v63, %v6514_v39  ;;  %v6516_v23 = vpop.f32.mrb[205].mxu0 }
 0x4d9   : > { %v6517_v36 = vpop.f32.mrb[206].mxu0 }
 0x4da   : > { %v7060_v16 = vadd.f32 %v16914_v10, %v6515_v59  ;;  %v6518_v55 = vadd.f32 %v15046_v63, %v6517_v36  ;;  %v6519_v34 = vpop.f32.mrb[207].mxu0  ;;  %9866 = vmatprep.mubr.msk.bf16.mxu1 %vm4438_vm8, %v7340_v49 }
 0x4dc   : > { %v7063_v43 = vadd.f32 %v16915_v40, %v6518_v55  ;;  %v7264_v19 = vmax.f32 %v7060_v16, 0.0 }
 0x4de   : > { %v7265_v62 = vmax.f32 %v7063_v43, 0.0 }
 0x4df   : > { %v6522_v46 = vpop.f32.mrb[208].mxu0 }
 0x4e0   : > { %v7341_v38 = vpack.c.bf16 %v7265_v62, %v7264_v19  ;;  %v6523_v24 = vadd.f32 %v15046_v63, %v6522_v46  ;;  %v6524_v61 = vpop.f32.mrb[209].mxu0 }
 0x4e1   : > { %v6525_v45 = vpop.f32.mrb[210].mxu0  ;;  %v9820_v22 = vpop.f32.mrb[180].mxu1 }
 0x4e2   : > { %v7068_v18 = vadd.f32 %v14437_v8, %v6523_v24  ;;  %v6526_v48 = vadd.f32 %v15046_v63, %v6525_v45  ;;  %v9927_v15 = vpop.permute.xlu1 %9926  ;;  %v6527_v60 = vpop.f32.mrb[211].mxu0  ;;  %9867 = vmatmul.mubr.msk.bf16.gmra.mrb[228].mxu1 %vm4438_vm8, %v7341_v38  ;;  %v7836_v52 = vadd.f32 %v9820_v22, %v15007_v6 }
 0x4e3   : > { %v9929_v11 = vunpack.i.h.bf16 %v9927_v15  ;;  %v9928_v12 = vunpack.i.l.bf16 %v9927_v15  ;;  %v7827_v14 = vpop.f32.mrb[181].mxu1  ;;  %v9932_v7 = vpop.permute.xlu0 %9931 }
 0x4e4   : > { %v7266_v56 = vmax.f32 %v7068_v18, 0.0  ;;  %v7071_v21 = vadd.f32 %v14447_v5, %v6526_v48  ;;  %v7828_v8 = vadd.f32 %v15007_v6, %v7827_v14  ;;  %v9821_v39 = vpop.f32.mrb[182].mxu1  ;;  %v9934_v49 = vunpack.i.h.bf16 %v9932_v7  ;;  %v16917_v14 = vld [vmem:[#allocation18_spill] sm:$0xff] }
 0x4e5   : > { %v8261_v58 = vsel %vm4438_vm8, %v7631_v29, %v9929_v11  ;;  %v8260_v59 = vsel %vm4438_vm8, %v7628_v47, %v9928_v12  ;;  %v7839_v23 = vadd.f32 %v9821_v39, %v15007_v6  ;;  %v9933_v36 = vunpack.i.l.bf16 %v9932_v7  ;;  %v7830_v10 = vpop.f32.mrb[183].mxu1 }
 0x4e6   : > { %v7267_v5 = vmax.f32 %v7071_v21, 0.0  ;;  %v9309_v16 = vpack.c.bf16 %v8261_v58, %v8260_v59  ;;  %v8259_v55 = vsel %vm4438_vm8, %v7623_v57, %v9934_v49  ;;  %v7831_v34 = vadd.f32 %v15007_v6, %v7830_v10 }
 0x4e7   : > { %v9975_v40 = vpack.i.bf16 %v7839_v23, %v7836_v52  ;;  %v8258_v43 = vsel %vm4438_vm8, %v7620_v32, %v9933_v36  ;;  %v6530_v19 = vpop.f32.mrb[212].mxu0  ;;  %v16916_v32 = vld [vmem:[#allocation2_spill] sm:$0xff]  ;;  %v7644_v36 = vadd.f32 %v14631_v4, %v15007_v6 }
 0x4e8   : > { %v7342_v62 = vpack.c.bf16 %v7267_v5, %v7266_v56  ;;  %9461 = vst [vmem:[%s15133_s7 + $0x10] sm:$0xff] %v9309_v16   ;;  %v9304_v46 = vpack.c.bf16 %v8259_v55, %v8258_v43  ;;  %v9980_v38 = vpack.i.bf16 %v7831_v34, %v7828_v8  ;;  %v6531_v24 = vadd.f32 %v15046_v63, %v6530_v19  ;;  %v6532_v61 = vpop.f32.mrb[213].mxu0  ;;  %v16918_v34 = vld [vmem:[#allocation68_spill] sm:$0xff] }
 0x4e9   : > { %9976 = vrot.lane.b32.xlu1 %v9975_v40, %s10138_s28  ;;  %v6533_v47 = vpop.f32.mrb[214].mxu0  ;;  %v7636_v16 = vadd.f32 %v15007_v6, %v14636_v25  ;;  %v7647_v55 = vadd.f32 %v14640_v28, %v15007_v6 }
 0x4ea   : > { %9305 = vst [vmem:[%s15133_s7] sm:$0xff] %v9304_v46   ;;  %v7076_v45 = vadd.f32 %v14435_v13, %v6531_v24  ;;  %9981 = vrot.lane.b32.xlu0 %v9980_v38, %s10138_s28  ;;  %v6534_v22 = vadd.f32 %v15046_v63, %v6533_v47  ;;  %v6535_v29 = vpop.f32.mrb[215].mxu0  ;;  %9870 = vmatprep.mubr.msk.bf16.mxu1 %vm4438_vm8, %v7342_v62 }
 0x4eb   : > { %v7639_v62 = vadd.f32 %v15007_v6, %v14645_v44 }
 0x4ec   : > { %v7079_v18 = vadd.f32 %v16916_v32, %v6534_v22  ;;  %v7268_v48 = vmax.f32 %v7076_v45, 0.0 }
 0x4ee   : > { %v7269_v15 = vmax.f32 %v7079_v18, 0.0 }
 0x4ef   : > { %v6538_v60 = vpop.f32.mrb[216].mxu0 }
 0x4f0   : > { %v7343_v57 = vpack.c.bf16 %v7269_v15, %v7268_v48  ;;  %v6539_v52 = vadd.f32 %v15046_v63, %v6538_v60  ;;  %v6540_v11 = vpop.f32.mrb[217].mxu0 }
 0x4f1   : > { %v6541_v12 = vpop.f32.mrb[218].mxu0 }
 0x4f2   : > { %v7084_v7 = vadd.f32 %v16917_v14, %v6539_v52  ;;  %v6542_v13 = vadd.f32 %v15046_v63, %v6541_v12  ;;  %v6543_v56 = vpop.f32.mrb[219].mxu0  ;;  %9871 = vmatmul.mubr.msk.bf16.gmra.mrb[232].mxu1 %vm4438_vm8, %v7343_v57 }
 0x4f4   : > { %v7087_v21 = vadd.f32 %v14481_v33, %v6542_v13  ;;  %v7270_v8 = vmax.f32 %v7084_v7, 0.0 }
 0x4f6   : > { %v7271_v39 = vmax.f32 %v7087_v21, 0.0 }
 0x4f7   : > { %v6546_v49 = vpop.f32.mrb[220].mxu0 }
 0x4f8   : > { %v7344_v58 = vpack.c.bf16 %v7271_v39, %v7270_v8  ;;  %v6547_v59 = vadd.f32 %v15046_v63, %v6546_v49  ;;  %v6548_v23 = vpop.f32.mrb[221].mxu0  ;;  %v16919_v39 = vld [vmem:[#allocation144_spill] sm:$0xff] }
 0x4f9   : > { %v6549_v10 = vpop.f32.mrb[222].mxu0  ;;  %v9824_v5 = vpop.f32.mrb[184].mxu1  ;;  %v16920_v23 = vld [vmem:[#allocation108_spill] sm:$0xff] }
 0x4fa   : > { %v7092_v33 = vadd.f32 %v16918_v34, %v6547_v59  ;;  %v6550_v40 = vadd.f32 %v15046_v63, %v6549_v10  ;;  %v9937_v43 = vpop.permute.xlu1 %9936  ;;  %v6551_v19 = vpop.f32.mrb[223].mxu0  ;;  %9874 = vmatprep.mubr.msk.bf16.mxu1 %vm4438_vm8, %v7344_v58  ;;  %v7852_v4 = vadd.f32 %v9824_v5, %v15007_v6 }
 0x4fb   : > { %v9939_v46 = vunpack.i.h.bf16 %v9937_v43  ;;  %v9938_v38 = vunpack.i.l.bf16 %v9937_v43  ;;  %v7843_v24 = vpop.f32.mrb[185].mxu1  ;;  %v9942_v25 = vpop.permute.xlu0 %9941  ;;  %v16921_v43 = vld [vmem:[#allocation90_spill] sm:$0xff] }
 0x4fc   : > { %v7272_v61 = vmax.f32 %v7092_v33, 0.0  ;;  %v7095_v28 = vadd.f32 %v14476_v2, %v6550_v40  ;;  %v7844_v47 = vadd.f32 %v15007_v6, %v7843_v24  ;;  %v9825_v45 = vpop.f32.mrb[186].mxu1  ;;  %v9944_v22 = vunpack.i.h.bf16 %v9942_v25 }
 0x4fd   : > { %v8265_v29 = vsel %vm4438_vm8, %v7647_v55, %v9939_v46  ;;  %v8264_v32 = vsel %vm4438_vm8, %v7644_v36, %v9938_v38  ;;  %v7855_v44 = vadd.f32 %v9825_v45, %v15007_v6  ;;  %v9943_v18 = vunpack.i.l.bf16 %v9942_v25  ;;  %v7846_v48 = vpop.f32.mrb[187].mxu1  ;;  %v16922_v46 = vld [vmem:[#allocation92_spill] sm:$0xff] }
 0x4fe   : > { %v7273_v15 = vmax.f32 %v7095_v28, 0.0  ;;  %v9319_v60 = vpack.c.bf16 %v8265_v29, %v8264_v32  ;;  %v8263_v57 = vsel %vm4438_vm8, %v7639_v62, %v9944_v22  ;;  %v7847_v2 = vadd.f32 %v15007_v6, %v7846_v48 }
 0x4ff   : > { %v9985_v52 = vpack.i.bf16 %v7855_v44, %v7852_v4  ;;  %v8262_v11 = vsel %vm4438_vm8, %v7636_v16, %v9943_v18  ;;  %v6554_v12 = vpop.f32.mrb[224].mxu0  ;;  %v7660_v22 = vadd.f32 %v14679_v9, %v15007_v6  ;;  %v7652_v44 = vadd.f32 %v15007_v6, %v14683_v0 }
 0x500   : > { %v7345_v14 = vpack.c.bf16 %v7273_v15, %v7272_v61  ;;  %9463 = vst [vmem:[%s15133_s7 + $0x30] sm:$0xff] %v9319_v60   ;;  %v9314_v7 = vpack.c.bf16 %v8263_v57, %v8262_v11  ;;  %v9990_v13 = vpack.i.bf16 %v7847_v2, %v7844_v47  ;;  %v6555_v56 = vadd.f32 %v15046_v63, %v6554_v12  ;;  %v6556_v21 = vpop.f32.mrb[225].mxu0 }
 0x501   : > { %9986 = vrot.lane.b32.xlu1 %v9985_v52, %s10138_s28  ;;  %v6557_v8 = vpop.f32.mrb[226].mxu0  ;;  %v7663_v18 = vadd.f32 %v14689_v53, %v15007_v6  ;;  %v7655_v2 = vadd.f32 %v15007_v6, %v14694_v1 }
 0x502   : > { %9462 = vst [vmem:[%s15133_s7 + $0x20] sm:$0xff] %v9314_v7   ;;  %v7100_v49 = vadd.f32 %v16919_v39, %v6555_v56  ;;  %9991 = vrot.lane.b32.xlu0 %v9990_v13, %s10138_s28  ;;  %v6558_v58 = vadd.f32 %v15046_v63, %v6557_v8  ;;  %v6559_v59 = vpop.f32.mrb[227].mxu0  ;;  %9875 = vmatmul.mubr.msk.bf16.gmra.mrb[236].mxu1 %vm4438_vm8, %v7345_v14 }
 0x504   : > { %v7103_v36 = vadd.f32 %v16920_v23, %v6558_v58  ;;  %v7274_v10 = vmax.f32 %v7100_v49, 0.0 }
 0x506   : > { %v7275_v5 = vmax.f32 %v7103_v36, 0.0 }
 0x507   : > { %v6562_v16 = vpop.f32.mrb[228].mxu0 }
 0x508   : > { %v7346_v55 = vpack.c.bf16 %v7275_v5, %v7274_v10  ;;  %v6563_v34 = vadd.f32 %v15046_v63, %v6562_v16  ;;  %v6564_v33 = vpop.f32.mrb[229].mxu0 }
 0x509   : > { %v6565_v40 = vpop.f32.mrb[230].mxu0 }
 0x50a   : > { %v7108_v19 = vadd.f32 %v16921_v43, %v6563_v34  ;;  %v6566_v62 = vadd.f32 %v15046_v63, %v6565_v40  ;;  %v6567_v4 = vpop.f32.mrb[231].mxu0  ;;  %9878 = vmatprep.mubr.msk.bf16.mxu1 %vm4438_vm8, %v7346_v55 }
 0x50c   : > { %v7111_v38 = vadd.f32 %v16922_v46, %v6566_v62  ;;  %v7276_v24 = vmax.f32 %v7108_v19, 0.0 }
 0x50e   : > { %v7277_v25 = vmax.f32 %v7111_v38, 0.0 }
 0x50f   : > { %v6570_v61 = vpop.f32.mrb[232].mxu0 }
 0x510   : > { %v7347_v28 = vpack.c.bf16 %v7277_v25, %v7276_v24  ;;  %v6571_v47 = vadd.f32 %v15046_v63, %v6570_v61  ;;  %v6572_v45 = vpop.f32.mrb[233].mxu0 }
 0x511   : > { %v6573_v29 = vpop.f32.mrb[234].mxu0  ;;  %v9828_v32 = vpop.f32.mrb[188].mxu1 }
 0x512   : > { %v7116_v48 = vadd.f32 %v14519_v54, %v6571_v47  ;;  %v6574_v15 = vadd.f32 %v15046_v63, %v6573_v29  ;;  %v9947_v60 = vpop.permute.xlu1 %9946  ;;  %v6575_v57 = vpop.f32.mrb[235].mxu0  ;;  %9879 = vmatmul.mubr.msk.bf16.gmra.mrb[240].mxu1 %vm4438_vm8, %v7347_v28  ;;  %v7868_v9 = vadd.f32 %v9828_v32, %v15007_v6 }
 0x513   : > { %v9949_v52 = vunpack.i.h.bf16 %v9947_v60  ;;  %v9948_v11 = vunpack.i.l.bf16 %v9947_v60  ;;  %v7859_v12 = vpop.f32.mrb[189].mxu1  ;;  %v9952_v0 = vpop.permute.xlu0 %9951 }
 0x514   : > { %v7278_v14 = vmax.f32 %v7116_v48, 0.0  ;;  %v7119_v53 = vadd.f32 %v14529_v20, %v6574_v15  ;;  %v7860_v54 = vadd.f32 %v15007_v6, %v7859_v12  ;;  %v9829_v7 = vpop.f32.mrb[190].mxu1  ;;  %v9954_v13 = vunpack.i.h.bf16 %v9952_v0 }
 0x515   : > { %v8269_v56 = vsel %vm4438_vm8, %v7663_v18, %v9949_v52  ;;  %v8268_v21 = vsel %vm4438_vm8, %v7660_v22, %v9948_v11  ;;  %v7871_v1 = vadd.f32 %v9829_v7, %v15007_v6  ;;  %v9953_v8 = vunpack.i.l.bf16 %v9952_v0  ;;  %v7862_v39 = vpop.f32.mrb[191].mxu1 }
 0x516   : > { %v7279_v49 = vmax.f32 %v7119_v53, 0.0  ;;  %v9329_v58 = vpack.c.bf16 %v8269_v56, %v8268_v21  ;;  %v8267_v59 = vsel %vm4438_vm8, %v7655_v2, %v9954_v13  ;;  %v7863_v20 = vadd.f32 %v15007_v6, %v7862_v39 }
 0x517   : > { %v9995_v23 = vpack.i.bf16 %v7871_v1, %v7868_v9  ;;  %v8266_v36 = vsel %vm4438_vm8, %v7652_v44, %v9953_v8  ;;  %v6578_v10 = vpop.f32.mrb[236].mxu0  ;;  %v7676_v52 = vadd.f32 %v14762_v51, %v15007_v6  ;;  %v7679_v53 = vadd.f32 %v14769_v35, %v15007_v6 }
 0x518   : > { %v7348_v5 = vpack.c.bf16 %v7279_v49, %v7278_v14  ;;  %9465 = vst [vmem:[%s15133_s7 + $0x50] sm:$0xff] %v9329_v58   ;;  %v9324_v16 = vpack.c.bf16 %v8267_v59, %v8266_v36  ;;  %v10000_v55 = vpack.i.bf16 %v7863_v20, %v7860_v54  ;;  %v6579_v34 = vadd.f32 %v15046_v63, %v6578_v10  ;;  %v6580_v33 = vpop.f32.mrb[237].mxu0 }
 0x519   : > { %9996 = vrot.lane.b32.xlu1 %v9995_v23, %s10138_s28  ;;  %v6581_v40 = vpop.f32.mrb[238].mxu0  ;;  %v7671_v51 = vadd.f32 %v15007_v6, %v14773_v37 }
 0x51a   : > { %9464 = vst [vmem:[%s15133_s7 + $0x40] sm:$0xff] %v9324_v16   ;;  %v7124_v43 = vadd.f32 %v14517_v42, %v6579_v34  ;;  %10001 = vrot.lane.b32.xlu0 %v10000_v55, %s10138_s28  ;;  %v6582_v19 = vadd.f32 %v15046_v63, %v6581_v40  ;;  %v6583_v62 = vpop.f32.mrb[239].mxu0  ;;  %9882 = vmatprep.mubr.msk.bf16.mxu1 %vm4438_vm8, %v7348_v5  ;;  %v16923_v40 = vld [vmem:[#allocation14_spill] sm:$0xff] }
 0x51c   : > { %v7127_v4 = vadd.f32 %v14525_v30, %v6582_v19  ;;  %v7280_v46 = vmax.f32 %v7124_v43, 0.0 }
 0x51e   : > { %v7281_v38 = vmax.f32 %v7127_v4, 0.0 }
 0x51f   : > { %v6586_v24 = vpop.f32.mrb[240].mxu0 }
 0x520   : > { %v7349_v25 = vpack.c.bf16 %v7281_v38, %v7280_v46  ;;  %v6587_v61 = vadd.f32 %v15046_v63, %v6586_v24  ;;  %v6588_v28 = vpop.f32.mrb[241].mxu0 }
 0x521   : > { %v6589_v47 = vpop.f32.mrb[242].mxu0  ;;  %v15221_v45 = vpop.f32.mrb[192].mxu1 }
 0x522   : > { %v7132_v42 = vadd.f32 %v14554_v3, %v6587_v61  ;;  %v6590_v22 = vadd.f32 %v15046_v63, %v6589_v47  ;;  %v6591_v29 = vpop.f32.mrb[243].mxu0  ;;  %v15225_v32 = vpop.f32.mrb[193].mxu1  ;;  %9883 = vmatmul.mubr.msk.bf16.gmra.mrb[244].mxu1 %vm4438_vm8, %v7349_v25  ;;  %v16924_v61 = vld [vmem:[#allocation20_spill] sm:$0xff] }
 0x523   : > { %v15228_v30 = vpop.f32.mrb[194].mxu1 }
 0x524   : > { %v7135_v44 = vadd.f32 %v14563_v17, %v6590_v22  ;;  %v15231_v18 = vpop.f32.mrb[195].mxu1  ;;  %v7282_v48 = vmax.f32 %v7132_v42, 0.0  ;;  %v7668_v17 = vadd.f32 %v15007_v6, %v14767_v50  ;;  %v16925_v22 = vld [vmem:[#allocation136_spill] sm:$0xff] }
 0x526   : > { %v7283_v15 = vmax.f32 %v7135_v44, 0.0 }
 0x527   : > { %v6594_v60 = vpop.f32.mrb[244].mxu0 }
 0x528   : > { %v7350_v57 = vpack.c.bf16 %v7283_v15, %v7282_v48  ;;  %v6595_v2 = vadd.f32 %v15046_v63, %v6594_v60  ;;  %v6596_v3 = vpop.f32.mrb[245].mxu0 }
 0x529   : > { %v6597_v9 = vpop.f32.mrb[246].mxu0  ;;  %v16926_v3 = vld [vmem:[#allocation30_spill] sm:$0xff] }
 0x52a   : > { %v7140_v11 = vadd.f32 %v14549_v41, %v6595_v2  ;;  %v6598_v12 = vadd.f32 %v15046_v63, %v6597_v9  ;;  %v9957_v0 = vpop.permute.xlu1 %9956  ;;  %v6599_v14 = vpop.f32.mrb[247].mxu0  ;;  %9886 = vmatprep.mubr.msk.bf16.mxu1 %vm4438_vm8, %v7350_v57  ;;  %v7692_v9 = vadd.f32 %v16926_v3, %v15007_v6 }
 0x52b   : > { %v9959_v54 = vunpack.i.h.bf16 %v9957_v0  ;;  %v9958_v7 = vunpack.i.l.bf16 %v9957_v0  ;;  %v9962_v13 = vpop.permute.xlu0 %9961 }
 0x52c   : > { %v7143_v41 = vadd.f32 %v14558_v26, %v6598_v12  ;;  %v9964_v56 = vunpack.i.h.bf16 %v9962_v13  ;;  %v9963_v21 = vunpack.i.l.bf16 %v9962_v13  ;;  %v7284_v1 = vmax.f32 %v7140_v11, 0.0 }
 0x52d   : > { %v8273_v8 = vsel %vm4438_vm8, %v7679_v53, %v9959_v54  ;;  %v8272_v50 = vsel %vm4438_vm8, %v7676_v52, %v9958_v7  ;;  %v16929_v54 = vld [vmem:[#allocation130_spill] sm:$0xff] }
 0x52e   : > { %v7285_v39 = vmax.f32 %v7143_v41, 0.0  ;;  %v9339_v49 = vpack.c.bf16 %v8273_v8, %v8272_v50  ;;  %v8271_v35 = vsel %vm4438_vm8, %v7671_v51, %v9964_v56  ;;  %v8270_v58 = vsel %vm4438_vm8, %v7668_v17, %v9963_v21  ;;  %v16928_v17 = vld [vmem:[#allocation147_spill] sm:$0xff] }
 0x52f   : > { %v9334_v59 = vpack.c.bf16 %v8271_v35, %v8270_v58  ;;  %v6602_v20 = vpop.f32.mrb[248].mxu0  ;;  %v7684_v53 = vadd.f32 %v15007_v6, %v16928_v17  ;;  %v7687_v7 = vadd.f32 %v15007_v6, %v16929_v54  ;;  %v16936_v54 = vld [vmem:[#allocation75_spill] sm:$0xff] }
 0x530   : > { %v7351_v23 = vpack.c.bf16 %v7285_v39, %v7284_v1  ;;  %9467 = vst [vmem:[%s15133_s7 + $0x70] sm:$0xff] %v9339_v49   ;;  %v6603_v26 = vadd.f32 %v15046_v63, %v6602_v20  ;;  %v6604_v37 = vpop.f32.mrb[249].mxu0  ;;  %v15304_v20 = vld [vmem:[%s15553_s4] ss:$0 sm:$0xff] }
 0x531   : > { %9466 = vst [vmem:[%s15133_s7 + $0x60] sm:$0xff] %v9334_v59   ;;  %v6605_v36 = vpop.f32.mrb[250].mxu0  ;;  %v15253_v10 = vpop.f32.mrb[196].mxu1  ;;  %v16931_v37 = vld [vmem:[#allocation153_spill] sm:$0xff] }
 0x532   : > { %v7148_v5 = vadd.f32 %v14573_v31, %v6603_v26  ;;  %v6606_v16 = vadd.f32 %v15046_v63, %v6605_v36  ;;  %v6607_v55 = vpop.f32.mrb[251].mxu0  ;;  %v15257_v34 = vpop.f32.mrb[197].mxu1  ;;  %9887 = vmatmul.mubr.msk.bf16.gmra.mrb[248].mxu1 %vm4438_vm8, %v7351_v23  ;;  %v16930_v23 = vld [vmem:[#allocation17_spill] sm:$0xff]  ;;  %v7711_v36 = vadd.f32 %v15304_v20, %v16931_v37 }
 0x533   : > { %v15260_v33 = vpop.f32.mrb[198].mxu1  ;;  %v7708_v26 = vadd.f32 %v15304_v20, %v16930_v23 }
 0x534   : > { %v7151_v43 = vadd.f32 %v16923_v40, %v6606_v16  ;;  %v15263_v19 = vpop.f32.mrb[199].mxu1  ;;  %v7286_v62 = vmax.f32 %v7148_v5, 0.0  ;;  %v16932_v40 = vld [vmem:[#allocation13_spill] sm:$0xff] }
 0x536   : > { %v7287_v4 = vmax.f32 %v7151_v43, 0.0  ;;  %v7700_v43 = vadd.f32 %v15304_v20, %v16932_v40  ;;  %v16938_v40 = vld [vmem:[#allocation121_spill] sm:$0xff] }
 0x537   : > { %v6610_v46 = vpop.f32.mrb[252].mxu0 }
 0x538   : > { %v7352_v38 = vpack.c.bf16 %v7287_v4, %v7286_v62  ;;  %v6611_v24 = vadd.f32 %v15046_v63, %v6610_v46  ;;  %v6612_v31 = vpop.f32.mrb[253].mxu0  ;;  %v16933_v62 = vld [vmem:[#allocation39_spill] sm:$0xff] }
 0x539   : > { %v6613_v25 = vpop.f32.mrb[254].mxu0  ;;  %v7703_v4 = vadd.f32 %v15304_v20, %v16933_v62 }
 0x53a   : > { %v7156_v28 = vadd.f32 %v16924_v61, %v6611_v24  ;;  %v6614_v47 = vadd.f32 %v15046_v63, %v6613_v25  ;;  %v6615_v42 = vpop.f32.mrb[255].mxu0  ;;  %9890 = vmatprep.mubr.msk.bf16.mxu1 %vm4438_vm8, %v7352_v38  ;;  %v16927_v63 = vld [vmem:[#allocation72_spill] sm:$0xff] }
 0x53b   : > { %v7695_v52 = vadd.f32 %v16927_v63, %v15007_v6 }
 0x53c   : > { %v7159_v29 = vadd.f32 %v16925_v22, %v6614_v47  ;;  %v7288_v44 = vmax.f32 %v7156_v28, 0.0 }
 0x53e   : > { %v7289_v48 = vmax.f32 %v7159_v29, 0.0 }
 0x540   : > { %v7353_v15 = vpack.c.bf16 %v7289_v48, %v7288_v44 }
 0x541   : > { %v15270_v60 = vpop.f32.mrb[200].mxu1 }
 0x542   : > { %v9967_v57 = vpop.permute.xlu1 %9966  ;;  %v15272_v2 = vpop.f32.mrb[201].mxu1  ;;  %9891 = vmatmul.mubr.msk.bf16.gmra.mrb[252].mxu1 %vm4438_vm8, %v7353_v15 }
 0x543   : > { %v9969_v11 = vunpack.i.h.bf16 %v9967_v57  ;;  %v9968_v12 = vunpack.i.l.bf16 %v9967_v57  ;;  %v15279_v0 = vpop.f32.mrb[202].mxu1  ;;  %v9972_v14 = vpop.permute.xlu0 %9971 }
 0x544   : > { %v9974_v13 = vunpack.i.h.bf16 %v9972_v14  ;;  %v9973_v51 = vunpack.i.l.bf16 %v9972_v14  ;;  %v15285_v41 = vpop.f32.mrb[203].mxu1 }
 0x545   : > { %v8277_v56 = vsel %vm4438_vm8, %v7695_v52, %v9969_v11  ;;  %v8276_v21 = vsel %vm4438_vm8, %v7692_v9, %v9968_v12  ;;  %v16934_v9 = vld [vmem:[#allocation4_spill] sm:$0xff]  ;;  %v16935_v52 = vld [vmem:[#allocation46_spill] sm:$0xff] }
 0x546   : > { %v9349_v1 = vpack.c.bf16 %v8277_v56, %v8276_v21  ;;  %v8275_v8 = vsel %vm4438_vm8, %v7687_v7, %v9974_v13  ;;  %v8274_v50 = vsel %vm4438_vm8, %v7684_v53, %v9973_v51  ;;  %v7724_v63 = vadd.f32 %v15304_v20, %v16934_v9  ;;  %v16937_v13 = vld [vmem:[#allocation54_spill] sm:$0xff] }
 0x547   : > { %v9344_v39 = vpack.c.bf16 %v8275_v8, %v8274_v50  ;;  %v7727_v11 = vadd.f32 %v15304_v20, %v16935_v52  ;;  %v7716_v7 = vadd.f32 %v15304_v20, %v16936_v54  ;;  %v7719_v51 = vadd.f32 %v15304_v20, %v16937_v13 }
 0x548   : > { %9469 = vst [vmem:[%s15133_s7 + $0x90] sm:$0xff] %v9349_v1  }
 0x549   : > { %9468 = vst [vmem:[%s15133_s7 + $0x80] sm:$0xff] %v9344_v39  }
 0x551   : > { %v15293_v49 = vpop.f32.mrb[204].mxu1 }
 0x552   : > { %v15295_v35 = vpop.f32.mrb[205].mxu1 }
 0x553   : > { %v15297_v6 = vpop.f32.mrb[206].mxu1 }
 0x554   : > { %v15299_v58 = vpop.f32.mrb[207].mxu1 }
 0x55b   : > { %v9977_v59 = vpop.permute.xlu1 %9976 }
 0x55c   : > { %v9979_v5 = vunpack.i.h.bf16 %v9977_v59  ;;  %v9978_v16 = vunpack.i.l.bf16 %v9977_v59  ;;  %v9982_v55 = vpop.permute.xlu0 %9981 }
 0x55d   : > { %v9984_v46 = vunpack.i.h.bf16 %v9982_v55  ;;  %v9983_v38 = vunpack.i.l.bf16 %v9982_v55  ;;  %v7740_v55 = vadd.f32 %v15304_v20, %v14961_v27 }
 0x55e   : > { %v8281_v24 = vsel %vm4438_vm8, %v7711_v36, %v9979_v5  ;;  %v8280_v31 = vsel %vm4438_vm8, %v7708_v26, %v9978_v16 }
 0x55f   : > { %v9359_v25 = vpack.c.bf16 %v8281_v24, %v8280_v31  ;;  %v8279_v61 = vsel %vm4438_vm8, %v7703_v4, %v9984_v46  ;;  %v8278_v28 = vsel %vm4438_vm8, %v7700_v43, %v9983_v38  ;;  %v7743_v43 = vadd.f32 %v15304_v20, %v16938_v40  ;;  %v16939_v38 = vld [vmem:[#allocation50_spill] sm:$0xff]  ;;  %v16940_v31 = vld [vmem:[#allocation112_spill] sm:$0xff] }
 0x560   : > { %v9354_v47 = vpack.c.bf16 %v8279_v61, %v8278_v28  ;;  %v7732_v24 = vadd.f32 %v15304_v20, %v16939_v38 }
 0x561   : > { %9471 = vst [vmem:[%s15133_s7 + $0xb0] sm:$0xff] %v9359_v25   ;;  %v15319_v42 = vpop.f32.mrb[208].mxu1  ;;  %v7735_v25 = vadd.f32 %v15304_v20, %v16940_v31 }
 0x562   : > { %9470 = vst [vmem:[%s15133_s7 + $0xa0] sm:$0xff] %v9354_v47   ;;  %v15322_v22 = vpop.f32.mrb[209].mxu1 }
 0x563   : > { %v15324_v29 = vpop.f32.mrb[210].mxu1 }
 0x564   : > { %v15326_v44 = vpop.f32.mrb[211].mxu1 }
 0x571   : > { %v15328_v48 = vpop.f32.mrb[212].mxu1 }
 0x572   : > { %v15330_v15 = vpop.f32.mrb[213].mxu1 }
 0x573   : > { %v9987_v57 = vpop.permute.xlu1 %9986  ;;  %v15332_v3 = vpop.f32.mrb[214].mxu1 }
 0x574   : > { %v9989_v12 = vunpack.i.h.bf16 %v9987_v57  ;;  %v9988_v14 = vunpack.i.l.bf16 %v9987_v57  ;;  %v9992_v17 = vpop.permute.xlu0 %9991  ;;  %v15338_v53 = vpop.f32.mrb[215].mxu1 }
 0x575   : > { %v9994_v56 = vunpack.i.h.bf16 %v9992_v17  ;;  %v9993_v21 = vunpack.i.l.bf16 %v9992_v17 }
 0x576   : > { %v8285_v1 = vsel %vm4438_vm8, %v7727_v11, %v9989_v12  ;;  %v8284_v8 = vsel %vm4438_vm8, %v7724_v63, %v9988_v14 }
 0x577   : > { %v9369_v50 = vpack.c.bf16 %v8285_v1, %v8284_v8  ;;  %v8283_v39 = vsel %vm4438_vm8, %v7719_v51, %v9994_v56  ;;  %v8282_v59 = vsel %vm4438_vm8, %v7716_v7, %v9993_v21 }
 0x578   : > { %v9364_v23 = vpack.c.bf16 %v8283_v39, %v8282_v59 }
 0x579   : > { %9473 = vst [vmem:[%s15133_s7 + $0xd0] sm:$0xff] %v9369_v50  }
 0x57a   : > { %9472 = vst [vmem:[%s15133_s7 + $0xc0] sm:$0xff] %v9364_v23  }
 0x581   : > { %v15350_v26 = vpop.f32.mrb[216].mxu1 }
 0x582   : > { %v15352_v37 = vpop.f32.mrb[217].mxu1 }
 0x583   : > { %v15354_v36 = vpop.f32.mrb[218].mxu1 }
 0x584   : > { %v15356_v5 = vpop.f32.mrb[219].mxu1 }
 0x58b   : > { %v9997_v16 = vpop.permute.xlu1 %9996 }
 0x58c   : > { %v9999_v62 = vunpack.i.h.bf16 %v9997_v16  ;;  %v9998_v4 = vunpack.i.l.bf16 %v9997_v16  ;;  %v10002_v46 = vpop.permute.xlu0 %10001 }
 0x58d   : > { %v10004_v61 = vunpack.i.h.bf16 %v10002_v46  ;;  %v10003_v28 = vunpack.i.l.bf16 %v10002_v46 }
 0x58e   : > { %v8289_v47 = vsel %vm4438_vm8, %v7743_v43, %v9999_v62  ;;  %v8288_v57 = vsel %vm4438_vm8, %v7740_v55, %v9998_v4 }
 0x58f   : > { %v9379_v27 = vpack.c.bf16 %v8289_v47, %v8288_v57  ;;  %v8287_v9 = vsel %vm4438_vm8, %v7735_v25, %v10004_v61  ;;  %v8286_v63 = vsel %vm4438_vm8, %v7732_v24, %v10003_v28 }
 0x590   : > { %v9374_v52 = vpack.c.bf16 %v8287_v9, %v8286_v63 }
 0x591   : > { %9475 = vst [vmem:[%s15133_s7 + $0xf0] sm:$0xff] %v9379_v27  }
 0x592   : > { %9474 = vst [vmem:[%s15133_s7 + $0xe0] sm:$0xff] %v9374_v52  }
 0x595   : > { %v15372_v11 = vpop.f32.mrb[220].mxu1 }
 0x596   : > { %v15374_v12 = vpop.f32.mrb[221].mxu1 }
 0x597   : > { %v15376_v14 = vpop.f32.mrb[222].mxu1 }
 0x598   : > { %v15378_v17 = vpop.f32.mrb[223].mxu1 }
 0x5a5   : > { %v9864_v54 = vpop.f32.mrb[224].mxu1 }
 0x5a6   : > { %v8003_v7 = vpop.f32.mrb[225].mxu1  ;;  %v8012_v51 = vadd.f32 %v15304_v20, %v9864_v54 }
 0x5a7   : > { %v9865_v13 = vpop.f32.mrb[226].mxu1  ;;  %v8004_v1 = vadd.f32 %v15304_v20, %v8003_v7 }
 0x5a8   : > { %v8015_v56 = vadd.f32 %v15304_v20, %v9865_v13  ;;  %v8006_v21 = vpop.f32.mrb[227].mxu1 }
 0x5a9   : > { %v8007_v8 = vadd.f32 %v15304_v20, %v8006_v21 }
 0x5aa   : > { %v10005_v50 = vpack.i.bf16 %v8015_v56, %v8012_v51 }
 0x5ab   : > { %v10010_v39 = vpack.i.bf16 %v8007_v8, %v8004_v1 }
 0x5ac   : > { %10006 = vrot.lane.b32.xlu1 %v10005_v50, %s10138_s28 }
 0x5ad   : > { %10011 = vrot.lane.b32.xlu0 %v10010_v39, %s10138_s28 }
 0x5b5   : > { %v9868_v59 = vpop.f32.mrb[228].mxu1 }
 0x5b6   : > { %v8019_v23 = vpop.f32.mrb[229].mxu1  ;;  %v8028_v55 = vadd.f32 %v15304_v20, %v9868_v59 }
 0x5b7   : > { %v9869_v16 = vpop.f32.mrb[230].mxu1  ;;  %v8020_v62 = vadd.f32 %v15304_v20, %v8019_v23 }
 0x5b8   : > { %v8031_v40 = vadd.f32 %v15304_v20, %v9869_v16  ;;  %v8022_v43 = vpop.f32.mrb[231].mxu1 }
 0x5b9   : > { %v8023_v4 = vadd.f32 %v15304_v20, %v8022_v43 }
 0x5ba   : > { %v10015_v46 = vpack.i.bf16 %v8031_v40, %v8028_v55 }
 0x5bb   : > { %v10020_v38 = vpack.i.bf16 %v8023_v4, %v8020_v62 }
 0x5bc   : > { %10016 = vrot.lane.b32.xlu1 %v10015_v46, %s10138_s28 }
 0x5bd   : > { %10021 = vrot.lane.b32.xlu0 %v10020_v38, %s10138_s28 }
 0x5c5   : > { %v9872_v24 = vpop.f32.mrb[232].mxu1 }
 0x5c6   : > { %v8035_v31 = vpop.f32.mrb[233].mxu1  ;;  %v8044_v61 = vadd.f32 %v15304_v20, %v9872_v24 }
 0x5c7   : > { %v9873_v25 = vpop.f32.mrb[234].mxu1  ;;  %v8036_v57 = vadd.f32 %v15304_v20, %v8035_v31 }
 0x5c8   : > { %v8047_v28 = vadd.f32 %v15304_v20, %v9873_v25  ;;  %v8038_v47 = vpop.f32.mrb[235].mxu1 }
 0x5c9   : > { %v8039_v27 = vadd.f32 %v15304_v20, %v8038_v47 }
 0x5ca   : > { %v10025_v9 = vpack.i.bf16 %v8047_v28, %v8044_v61 }
 0x5cb   : > { %v10030_v63 = vpack.i.bf16 %v8039_v27, %v8036_v57 }
 0x5cc   : > { %10026 = vrot.lane.b32.xlu1 %v10025_v9, %s10138_s28 }
 0x5cd   : > { %10031 = vrot.lane.b32.xlu0 %v10030_v63, %s10138_s28 }
 0x5d5   : > { %v9876_v52 = vpop.f32.mrb[236].mxu1 }
 0x5d6   : > { %v8051_v54 = vpop.f32.mrb[237].mxu1  ;;  %v8060_v13 = vadd.f32 %v15304_v20, %v9876_v52 }
 0x5d7   : > { %v9877_v7 = vpop.f32.mrb[238].mxu1  ;;  %v8052_v21 = vadd.f32 %v15304_v20, %v8051_v54 }
 0x5d8   : > { %v8063_v51 = vadd.f32 %v15304_v20, %v9877_v7  ;;  %v8054_v56 = vpop.f32.mrb[239].mxu1 }
 0x5d9   : > { %v8055_v1 = vadd.f32 %v15304_v20, %v8054_v56 }
 0x5da   : > { %v10035_v8 = vpack.i.bf16 %v8063_v51, %v8060_v13 }
 0x5db   : > { %v10040_v50 = vpack.i.bf16 %v8055_v1, %v8052_v21 }
 0x5dc   : > { %10036 = vrot.lane.b32.xlu1 %v10035_v8, %s10138_s28 }
 0x5dd   : > { %10041 = vrot.lane.b32.xlu0 %v10040_v50, %s10138_s28 }
 0x5e5   : > { %v9880_v39 = vpop.f32.mrb[240].mxu1 }
 0x5e6   : > { %v8067_v59 = vpop.f32.mrb[241].mxu1  ;;  %v8076_v16 = vadd.f32 %v15304_v20, %v9880_v39 }
 0x5e7   : > { %v9881_v23 = vpop.f32.mrb[242].mxu1  ;;  %v8068_v43 = vadd.f32 %v15304_v20, %v8067_v59 }
 0x5e8   : > { %v8079_v55 = vadd.f32 %v15304_v20, %v9881_v23  ;;  %v8070_v40 = vpop.f32.mrb[243].mxu1 }
 0x5e9   : > { %v8071_v62 = vadd.f32 %v15304_v20, %v8070_v40 }
 0x5ea   : > { %v10045_v4 = vpack.i.bf16 %v8079_v55, %v8076_v16 }
 0x5eb   : > { %v10050_v46 = vpack.i.bf16 %v8071_v62, %v8068_v43 }
 0x5ec   : > { %10046 = vrot.lane.b32.xlu1 %v10045_v4, %s10138_s28 }
 0x5ed   : > { %10051 = vrot.lane.b32.xlu0 %v10050_v46, %s10138_s28 }
 0x5f5   : > { %v9884_v38 = vpop.f32.mrb[244].mxu1 }
 0x5f6   : > { %v8083_v24 = vpop.f32.mrb[245].mxu1  ;;  %v8092_v25 = vadd.f32 %v15304_v20, %v9884_v38  ;;  %v7884_v38 = vadd.f32 %v15304_v20, %v15221_v45 }
 0x5f7   : > { %v9885_v31 = vpop.f32.mrb[246].mxu1  ;;  %v8084_v47 = vadd.f32 %v15304_v20, %v8083_v24  ;;  %v7887_v24 = vadd.f32 %v15304_v20, %v15228_v30 }
 0x5f8   : > { %v8095_v61 = vadd.f32 %v15304_v20, %v9885_v31  ;;  %v8086_v28 = vpop.f32.mrb[247].mxu1 }
 0x5f9   : > { %v8087_v57 = vadd.f32 %v15304_v20, %v8086_v28  ;;  %v7876_v28 = vadd.f32 %v15304_v20, %v15225_v32  ;;  %v7900_v32 = vadd.f32 %v15304_v20, %v15253_v10 }
 0x5fa   : > { %v10055_v27 = vpack.i.bf16 %v8095_v61, %v8092_v25 }
 0x5fb   : > { %v10060_v9 = vpack.i.bf16 %v8087_v57, %v8084_v47  ;;  %v7879_v47 = vadd.f32 %v15304_v20, %v15231_v18  ;;  %v7903_v18 = vadd.f32 %v15304_v20, %v15260_v33 }
 0x5fc   : > { %10056 = vrot.lane.b32.xlu1 %v10055_v27, %s10138_s28 }
 0x5fd   : > { %10061 = vrot.lane.b32.xlu0 %v10060_v9, %s10138_s28 }
 0x605   : > { %v9888_v63 = vpop.f32.mrb[248].mxu1 }
 0x606   : > { %v8099_v52 = vpop.f32.mrb[249].mxu1  ;;  %v8108_v7 = vadd.f32 %v15304_v20, %v9888_v63 }
 0x607   : > { %v9889_v54 = vpop.f32.mrb[250].mxu1  ;;  %v8100_v56 = vadd.f32 %v15304_v20, %v8099_v52 }
 0x608   : > { %v8111_v13 = vadd.f32 %v15304_v20, %v9889_v54  ;;  %v8102_v51 = vpop.f32.mrb[251].mxu1 }
 0x609   : > { %v8103_v21 = vadd.f32 %v15304_v20, %v8102_v51 }
 0x60a   : > { %v10065_v1 = vpack.i.bf16 %v8111_v13, %v8108_v7 }
 0x60b   : > { %v10070_v8 = vpack.i.bf16 %v8103_v21, %v8100_v56  ;;  %v7892_v21 = vadd.f32 %v15304_v20, %v15257_v34  ;;  %v7916_v34 = vadd.f32 %v15304_v20, %v15270_v60 }
 0x60c   : > { %10066 = vrot.lane.b32.xlu1 %v10065_v1, %s10138_s28  ;;  %v7895_v1 = vadd.f32 %v15304_v20, %v15263_v19  ;;  %v7919_v19 = vadd.f32 %v15304_v20, %v15279_v0 }
 0x60d   : > { %10071 = vrot.lane.b32.xlu0 %v10070_v8, %s10138_s28 }
 0x615   : > { %v9892_v50 = vpop.f32.mrb[252].mxu1 }
 0x616   : > { %v8115_v39 = vpop.f32.mrb[253].mxu1  ;;  %v8124_v23 = vadd.f32 %v15304_v20, %v9892_v50 }
 0x617   : > { %v9893_v59 = vpop.f32.mrb[254].mxu1  ;;  %v8116_v40 = vadd.f32 %v15304_v20, %v8115_v39 }
 0x618   : > { %v8127_v16 = vadd.f32 %v15304_v20, %v9893_v59  ;;  %v8118_v55 = vpop.f32.mrb[255].mxu1 }
 0x619   : > { %v8119_v43 = vadd.f32 %v15304_v20, %v8118_v55 }
 0x61a   : > { %v10080_v62 = vpack.i.bf16 %v8127_v16, %v8124_v23 }
 0x61b   : > { %v10075_v4 = vpack.i.bf16 %v8119_v43, %v8116_v40 }
 0x61c   : > { %10081 = vrot.lane.b32.xlu1 %v10080_v62, %s10138_s28 }
 0x61d   : > { %10076 = vrot.lane.b32.xlu0 %v10075_v4, %s10138_s28  ;;  %v7908_v4 = vadd.f32 %v15304_v20, %v15272_v2  ;;  %v7932_v2 = vadd.f32 %v15304_v20, %v15293_v49 }
 0x61e   : > { %v10007_v46 = vpop.permute.xlu1 %10006 }
 0x61f   : > { %v10009_v31 = vunpack.i.h.bf16 %v10007_v46  ;;  %v10008_v25 = vunpack.i.l.bf16 %v10007_v46  ;;  %v10012_v61 = vpop.permute.xlu0 %10011  ;;  %v7911_v46 = vadd.f32 %v15304_v20, %v15285_v41  ;;  %v7935_v41 = vadd.f32 %v15304_v20, %v15297_v6 }
 0x620   : > { %v10014_v57 = vunpack.i.h.bf16 %v10012_v61  ;;  %v10013_v27 = vunpack.i.l.bf16 %v10012_v61 }
 0x621   : > { %v8581_v9 = vsel %vm4438_vm8, %v7887_v24, %v10009_v31  ;;  %v8580_v63 = vsel %vm4438_vm8, %v7884_v38, %v10008_v25 }
 0x622   : > { %v9389_v45 = vpack.c.bf16 %v8581_v9, %v8580_v63  ;;  %v8579_v52 = vsel %vm4438_vm8, %v7879_v47, %v10014_v57  ;;  %v8578_v30 = vsel %vm4438_vm8, %v7876_v28, %v10013_v27  ;;  %v7924_v63 = vadd.f32 %v15304_v20, %v15295_v35 }
 0x623   : > { %v9384_v54 = vpack.c.bf16 %v8579_v52, %v8578_v30  ;;  %v7948_v35 = vadd.f32 %v15304_v20, %v15319_v42 }
 0x624   : > { %9477 = vst [vmem:[%s15133_s7 + $0x18] sm:$0xff] %v9389_v45   ;;  %v7927_v45 = vadd.f32 %v15304_v20, %v15299_v58  ;;  %v7951_v58 = vadd.f32 %v15304_v20, %v15324_v29 }
 0x625   : > { %9476 = vst [vmem:[%s15133_s7 + $0x8] sm:$0xff] %v9384_v54  }
 0x62e   : > { %v10017_v7 = vpop.permute.xlu1 %10016 }
 0x62f   : > { %v10019_v13 = vunpack.i.h.bf16 %v10017_v7  ;;  %v10018_v51 = vunpack.i.l.bf16 %v10017_v7  ;;  %v10022_v56 = vpop.permute.xlu0 %10021 }
 0x630   : > { %v10024_v8 = vunpack.i.h.bf16 %v10022_v56  ;;  %v10023_v50 = vunpack.i.l.bf16 %v10022_v56 }
 0x631   : > { %v8585_v39 = vsel %vm4438_vm8, %v7903_v18, %v10019_v13  ;;  %v8584_v59 = vsel %vm4438_vm8, %v7900_v32, %v10018_v51 }
 0x632   : > { %v9399_v10 = vpack.c.bf16 %v8585_v39, %v8584_v59  ;;  %v8583_v23 = vsel %vm4438_vm8, %v7895_v1, %v10024_v8  ;;  %v8582_v33 = vsel %vm4438_vm8, %v7892_v21, %v10023_v50  ;;  %v7940_v1 = vadd.f32 %v15304_v20, %v15322_v22 }
 0x633   : > { %v9394_v16 = vpack.c.bf16 %v8583_v23, %v8582_v33  ;;  %v7943_v8 = vadd.f32 %v15304_v20, %v15326_v44  ;;  %v7964_v22 = vadd.f32 %v15304_v20, %v15328_v48  ;;  %v7967_v44 = vadd.f32 %v15304_v20, %v15332_v3 }
 0x634   : > { %9479 = vst [vmem:[%s15133_s7 + $0x38] sm:$0xff] %v9399_v10  }
 0x635   : > { %9478 = vst [vmem:[%s15133_s7 + $0x28] sm:$0xff] %v9394_v16  }
 0x63e   : > { %v10027_v55 = vpop.permute.xlu1 %10026 }
 0x63f   : > { %v10029_v40 = vunpack.i.h.bf16 %v10027_v55  ;;  %v10028_v43 = vunpack.i.l.bf16 %v10027_v55  ;;  %v10032_v62 = vpop.permute.xlu0 %10031 }
 0x640   : > { %v10034_v38 = vunpack.i.h.bf16 %v10032_v62  ;;  %v10033_v24 = vunpack.i.l.bf16 %v10032_v62 }
 0x641   : > { %v8589_v31 = vsel %vm4438_vm8, %v7919_v19, %v10029_v40  ;;  %v8588_v25 = vsel %vm4438_vm8, %v7916_v34, %v10028_v43  ;;  %v7956_v40 = vadd.f32 %v15304_v20, %v15330_v15  ;;  %v7959_v43 = vadd.f32 %v15304_v20, %v15338_v53 }
 0x642   : > { %v9409_v60 = vpack.c.bf16 %v8589_v31, %v8588_v25  ;;  %v8587_v61 = vsel %vm4438_vm8, %v7911_v46, %v10034_v38  ;;  %v8586_v0 = vsel %vm4438_vm8, %v7908_v4, %v10033_v24  ;;  %v7980_v15 = vadd.f32 %v15304_v20, %v15350_v26 }
 0x643   : > { %v9404_v28 = vpack.c.bf16 %v8587_v61, %v8586_v0  ;;  %v7983_v53 = vadd.f32 %v15304_v20, %v15354_v36 }
 0x644   : > { %9481 = vst [vmem:[%s15133_s7 + $0x58] sm:$0xff] %v9409_v60  }
 0x645   : > { %9480 = vst [vmem:[%s15133_s7 + $0x48] sm:$0xff] %v9404_v28   ;;  %v7972_v28 = vadd.f32 %v15304_v20, %v15352_v37  ;;  %v7996_v37 = vadd.f32 %v15304_v20, %v15372_v11 }
 0x64e   : > { %v10037_v47 = vpop.permute.xlu1 %10036 }
 0x64f   : > { %v10039_v57 = vunpack.i.h.bf16 %v10037_v47  ;;  %v10038_v27 = vunpack.i.l.bf16 %v10037_v47  ;;  %v10042_v9 = vpop.permute.xlu0 %10041  ;;  %v7975_v47 = vadd.f32 %v15304_v20, %v15356_v5  ;;  %v7999_v5 = vadd.f32 %v15304_v20, %v15376_v14 }
 0x650   : > { %v10044_v52 = vunpack.i.h.bf16 %v10042_v9  ;;  %v10043_v30 = vunpack.i.l.bf16 %v10042_v9 }
 0x651   : > { %v8593_v54 = vsel %vm4438_vm8, %v7935_v41, %v10039_v57  ;;  %v8592_v7 = vsel %vm4438_vm8, %v7932_v2, %v10038_v27 }
 0x652   : > { %v9419_v49 = vpack.c.bf16 %v8593_v54, %v8592_v7  ;;  %v8591_v32 = vsel %vm4438_vm8, %v7927_v45, %v10044_v52  ;;  %v8590_v6 = vsel %vm4438_vm8, %v7924_v63, %v10043_v30  ;;  %v7988_v7 = vadd.f32 %v15304_v20, %v15374_v12 }
 0x653   : > { %v9414_v18 = vpack.c.bf16 %v8591_v32, %v8590_v6 }
 0x654   : > { %9483 = vst [vmem:[%s15133_s7 + $0x78] sm:$0xff] %v9419_v49   ;;  %v7991_v49 = vadd.f32 %v15304_v20, %v15378_v17 }
 0x655   : > { %9482 = vst [vmem:[%s15133_s7 + $0x68] sm:$0xff] %v9414_v18  }
 0x65e   : > { %v10047_v13 = vpop.permute.xlu1 %10046 }
 0x65f   : > { %v10049_v51 = vunpack.i.h.bf16 %v10047_v13  ;;  %v10048_v56 = vunpack.i.l.bf16 %v10047_v13  ;;  %v10052_v21 = vpop.permute.xlu0 %10051 }
 0x660   : > { %v10054_v50 = vunpack.i.h.bf16 %v10052_v21  ;;  %v10053_v39 = vunpack.i.l.bf16 %v10052_v21 }
 0x661   : > { %v8597_v59 = vsel %vm4438_vm8, %v7951_v58, %v10049_v51  ;;  %v8596_v10 = vsel %vm4438_vm8, %v7948_v35, %v10048_v56 }
 0x662   : > { %v9429_v42 = vpack.c.bf16 %v8597_v59, %v8596_v10  ;;  %v8595_v23 = vsel %vm4438_vm8, %v7943_v8, %v10054_v50  ;;  %v8594_v29 = vsel %vm4438_vm8, %v7940_v1, %v10053_v39 }
 0x663   : > { %v9424_v33 = vpack.c.bf16 %v8595_v23, %v8594_v29 }
 0x664   : > { %9485 = vst [vmem:[%s15133_s7 + $0x98] sm:$0xff] %v9429_v42  }
 0x665   : > { %9484 = vst [vmem:[%s15133_s7 + $0x88] sm:$0xff] %v9424_v33  }
 0x66e   : > { %v10057_v16 = vpop.permute.xlu1 %10056 }
 0x66f   : > { %v10059_v55 = vunpack.i.h.bf16 %v10057_v16  ;;  %v10058_v34 = vunpack.i.l.bf16 %v10057_v16  ;;  %v10062_v19 = vpop.permute.xlu0 %10061 }
 0x670   : > { %v10064_v62 = vunpack.i.h.bf16 %v10062_v19  ;;  %v10063_v4 = vunpack.i.l.bf16 %v10062_v19 }
 0x671   : > { %v8601_v46 = vsel %vm4438_vm8, %v7967_v44, %v10059_v55  ;;  %v8600_v38 = vsel %vm4438_vm8, %v7964_v22, %v10058_v34 }
 0x672   : > { %v9439_v48 = vpack.c.bf16 %v8601_v46, %v8600_v38  ;;  %v8599_v24 = vsel %vm4438_vm8, %v7959_v43, %v10064_v62  ;;  %v8598_v3 = vsel %vm4438_vm8, %v7956_v40, %v10063_v4 }
 0x673   : > { %v9434_v31 = vpack.c.bf16 %v8599_v24, %v8598_v3 }
 0x674   : > { %9487 = vst [vmem:[%s15133_s7 + $0xb8] sm:$0xff] %v9439_v48  }
 0x675   : > { %9486 = vst [vmem:[%s15133_s7 + $0xa8] sm:$0xff] %v9434_v31  }
 0x67e   : > { %v10067_v25 = vpop.permute.xlu1 %10066 }
 0x67f   : > { %v10069_v60 = vunpack.i.h.bf16 %v10067_v25  ;;  %v10068_v61 = vunpack.i.l.bf16 %v10067_v25  ;;  %v10072_v0 = vpop.permute.xlu0 %10071 }
 0x680   : > { %v10074_v2 = vunpack.i.h.bf16 %v10072_v0  ;;  %v10073_v41 = vunpack.i.l.bf16 %v10072_v0 }
 0x681   : > { %v8605_v57 = vsel %vm4438_vm8, %v7983_v53, %v10069_v60  ;;  %v8604_v27 = vsel %vm4438_vm8, %v7980_v15, %v10068_v61 }
 0x682   : > { %v9449_v26 = vpack.c.bf16 %v8605_v57, %v8604_v27  ;;  %v8603_v9 = vsel %vm4438_vm8, %v7975_v47, %v10074_v2  ;;  %v8602_v36 = vsel %vm4438_vm8, %v7972_v28, %v10073_v41 }
 0x683   : > { %v9444_v63 = vpack.c.bf16 %v8603_v9, %v8602_v36 }
 0x684   : > { %9489 = vst [vmem:[%s15133_s7 + $0xd8] sm:$0xff] %v9449_v26  }
 0x685   : > { %9488 = vst [vmem:[%s15133_s7 + $0xc8] sm:$0xff] %v9444_v63  }
 0x68e   : > { %v10082_v45 = vpop.permute.xlu1 %10081 }
 0x68f   : > { %v10084_v52 = vunpack.i.h.bf16 %v10082_v45  ;;  %v10083_v30 = vunpack.i.l.bf16 %v10082_v45  ;;  %v10077_v54 = vpop.permute.xlu0 %10076 }
 0x690   : > { %v10079_v32 = vunpack.i.h.bf16 %v10077_v54  ;;  %v10078_v6 = vunpack.i.l.bf16 %v10077_v54 }
 0x691   : > { %v8609_v18 = vsel %vm4438_vm8, %v7999_v5, %v10084_v52  ;;  %v8608_v13 = vsel %vm4438_vm8, %v7996_v37, %v10083_v30 }
 0x692   : > { %v9459_v11 = vpack.c.bf16 %v8609_v18, %v8608_v13  ;;  %v8607_v35 = vsel %vm4438_vm8, %v7991_v49, %v10079_v32  ;;  %v8606_v14 = vsel %vm4438_vm8, %v7988_v7, %v10078_v6 }
 0x693   : > { %v9454_v58 = vpack.c.bf16 %v8607_v35, %v8606_v14 }
 0x694   : > { %9491 = vst [vmem:[%s15133_s7 + $0xf8] sm:$0xff] %v9459_v11  }
 0x695   : > { %9490 = vst [vmem:[%s15133_s7 + $0xe8] sm:$0xff] %v9454_v58  }
 0x696 PF: > { %s15_s20 = sadd.s32 1, %s10133_s20   ;;  %s16941_s18 = smov %s10129_s19 }
 0x697   : > { %p12_p6 = scmp.ge.s32.totalorder %s15_s20, 4   ;;  %s16942_s19 = smov %s16944_s21 }
 0x699   :  { %14 = sbr.rel (!%p12_p6) target bundleno = 2 (0x2), region = 71 }

</bundles_post_ra>
